<compile_context>
chip_gen: v7x
topology: tpu7x:2x2x1
jax: 0.10.0
libtpu: 0.0.40
codegen_flags: <defaults>
</compile_context>

<pallas_src>
import jax
import jax.numpy as jnp
from jax.experimental import pallas as pl
from jax.experimental.pallas import tpu as pltpu

PATCH = 16
EMBED = 2048          # resnet50.fc.in_features
E_CHUNK = EMBED // 2  # EMBED split into two chunks -> even megacore split on v7x
NUM_CLASSES = 40      # self.m3.fc = Linear(2048, 40); m1 also outputs 40
NC_PAD = 128          # pad head output to a full lane width (unmasked stores)


# ----------------------------------------------------------------------------
# Fused kernel: one grid step = B images of one branch x one EMBED chunk.
#   patch-embed matmul (bf16 MXU, f32 acc) -> bias+ReLU (f32 VPU)
#   -> GAP as bf16 MXU matmul (exact 0/1 pool) -> bf16 Linear(EC, NC_PAD) head.
# ----------------------------------------------------------------------------
def _fused_kernel(sel_ref, patches_ref, w_ref, b_ref, pool_ref, wfc_ref, out_ref):
    del sel_ref  # only used by the BlockSpec index_maps
    # patches_ref: (GP, Dp) bf16   w_ref: (Dp, EC) bf16   b_ref: (1, EC) f32
    # pool_ref:    (G, GP) bf16    wfc_ref: (EC, NC_PAD) bf16 (1/P and 1/V folded)
    h = jnp.dot(patches_ref[...], w_ref[...],
                preferred_element_type=jnp.float32)                 # (GP, EC) f32 acc
    h = jnp.maximum(h + b_ref[...], 0.0).astype(jnp.bfloat16)        # f32 epilogue -> bf16
    # Global average pool on the MXU (exact block-diagonal 0/1 pooling matrix).
    feat = jnp.dot(pool_ref[...], h,
                   preferred_element_type=jnp.float32)               # (G, EC) f32
    # Linear chunk of the 2048->40 head (lane-padded to 128).
    out_ref[...] = jnp.dot(feat.astype(jnp.bfloat16), wfc_ref[...],
                           preferred_element_type=jnp.float32)       # (G, NC_PAD)


def fused_backbone_fc(sel, patches, w_embed, b_embed, pool, w_fc,
                      *, num_steps, G, P, Dp):
    GP = G * P
    total_steps = num_steps * 2
    flops = total_steps * (2 * GP * Dp * E_CHUNK       # patch-embed matmuls
                           + 2 * G * GP * E_CHUNK      # MXU pooling
                           + 2 * G * E_CHUNK * NC_PAD)  # fc head
    bytes_accessed = (2 * patches.size * patches.dtype.itemsize   # re-read per EMBED chunk
                      + w_embed.size * w_embed.dtype.itemsize
                      + b_embed.size * b_embed.dtype.itemsize
                      + 2 * pool.size * pool.dtype.itemsize
                      + w_fc.size * w_fc.dtype.itemsize
                      + total_steps * G * NC_PAD * 4)
    return pl.pallas_call(
        _fused_kernel,
        out_shape=jax.ShapeDtypeStruct((num_steps, 2, G, NC_PAD), jnp.float32),
        grid_spec=pltpu.PrefetchScalarGridSpec(
            num_scalar_prefetch=1,            # `sel` lands in SMEM, feeds the index_maps
            grid=(num_steps, 2),
            in_specs=[
                pl.BlockSpec((GP, Dp), lambda g, e, sel: (g, 0)),
                pl.BlockSpec((None, Dp, E_CHUNK), lambda g, e, sel: (sel[g], 0, e)),
                pl.BlockSpec((None, 1, E_CHUNK), lambda g, e, sel: (sel[g], 0, e)),
                pl.BlockSpec((G, GP), lambda g, e, sel: (0, 0)),
                pl.BlockSpec((None, E_CHUNK, NC_PAD), lambda g, e, sel: (sel[g], e, 0)),
            ],
            out_specs=pl.BlockSpec((None, None, G, NC_PAD),
                                   lambda g, e, sel: (g, e, 0, 0)),
        ),
        compiler_params=pltpu.CompilerParams(
            # 2*R independent, equal-weight steps -> both TCs busy on v7x.
            dimension_semantics=("parallel", "parallel"),
            # Explicit VMEM budget: ~8 MB double-buffered working set; give
            # headroom without exceeding any generation's physical VMEM.
            vmem_limit_bytes=32 * 1024 * 1024,
        ),
        cost_estimate=pl.CostEstimate(
            flops=flops, transcendentals=0, bytes_accessed=bytes_accessed),
    )(sel, patches, w_embed, b_embed, pool, w_fc)


# ----------------------------------------------------------------------------
# Glue (plain JAX): im2col patch extraction and parameter setup.
# ----------------------------------------------------------------------------
def patchify(imgs):
    """(N, C, H, W) NCHW -> (N, num_patches, C*PATCH*PATCH) im2col."""
    N, C, H, W = imgs.shape
    ph, pw = H // PATCH, W // PATCH
    x = imgs.reshape(N, C, ph, PATCH, pw, PATCH)
    x = x.transpose(0, 2, 4, 1, 3, 5)            # (N, ph, pw, C, PATCH, PATCH)
    return x.reshape(N, ph * pw, C * PATCH * PATCH)


def make_params(key, patch_dim):
    ks = jax.random.split(key, 8)
    s = 0.02
    return dict(
        # m3 stand-in backbone (bf16 embed weights halve the weight DMA)
        # + exact replacement fc Linear(2048, 40)
        w3_embed=(jax.random.normal(ks[0], (patch_dim, EMBED), jnp.float32) * s
                  ).astype(jnp.bfloat16),
        b3_embed=jax.random.normal(ks[1], (1, EMBED), jnp.float32) * s,
        w3_fc=jax.random.normal(ks[2], (EMBED, NUM_CLASSES), jnp.float32) * s,
        b3_fc=jax.random.normal(ks[3], (1, NUM_CLASSES), jnp.float32) * s,
        # m1 (multi_resolution_cnn) stand-in backbone + 40-way head
        w1_embed=(jax.random.normal(ks[4], (patch_dim, EMBED), jnp.float32) * s
                  ).astype(jnp.bfloat16),
        b1_embed=jax.random.normal(ks[5], (1, EMBED), jnp.float32) * s,
        w1_fc=jax.random.normal(ks[6], (EMBED, NUM_CLASSES), jnp.float32) * s,
        b1_fc=jax.random.normal(ks[7], (1, NUM_CLASSES), jnp.float32) * s,
    )


def fusion_forward(inp, params):
    """inp: (R, B, C, 224, 224).  Returns (B, 40) = m3(inp[-1]) + m1(inp[:-1])."""
    newin = inp[-1]                               # (B, C, 224, 224)
    assert newin.shape[-1] == 224                 # mirrors the PyTorch assert

    R, B = inp.shape[0], inp.shape[1]
    V = R - 1
    views = inp[:-1]                              # (V, B, C, H, W)

    # im2col for every image: m3 batch first, then each m1 view batch.
    # Patches are the dominant streaming input -> cast to bf16 in the wrapper
    # (halves HBM traffic and the in-kernel double-buffer, removes VPU casts).
    p3 = patchify(newin)                                              # (B, P, Dp)
    pv = patchify(views.reshape((V * B,) + views.shape[2:]))          # (V*B, P, Dp)
    P, Dp = p3.shape[1], p3.shape[2]
    patches_flat = (jnp.concatenate([p3, pv], axis=0)
                    .reshape(R * B * P, Dp)
                    .astype(jnp.bfloat16))

    # Branch selector per grid step: step 0 -> m3 weights, steps 1..V -> m1.
    sel = jnp.array([0] + [1] * V, dtype=jnp.int32)

    # Stacked per-branch weights (indexed by the scalar-prefetch selector).
    w_embed = jnp.stack([params["w3_embed"], params["w1_embed"]])     # (2, Dp, EMBED) bf16
    b_embed = jnp.stack([params["b3_embed"], params["b1_embed"]])     # (2, 1, EMBED) f32
    pad = ((0, 0), (0, NC_PAD - NUM_CLASSES))
    # Fold both the 1/P GAP mean and the 1/V view-mean (m1) into the fc weights,
    # then cast to bf16 -> pooling stays exact, fc weight DMA halves.
    w_fc = jnp.stack([jnp.pad(params["w3_fc"] / P, pad),
                      jnp.pad(params["w1_fc"] / (P * V), pad)]
                     ).astype(jnp.bfloat16)                           # (2, EMBED, NC_PAD)

    # Exact 0/1 block-diagonal pooling matrix (bf16-safe): row b sums image b's
    # patch rows; the 1/P mean scale lives in w_fc.
    pool = jnp.repeat(jnp.eye(B, dtype=jnp.float32), P, axis=1).astype(jnp.bfloat16)

    partial = fused_backbone_fc(sel, patches_flat, w_embed, b_embed, pool, w_fc,
                                num_steps=R, G=B, P=P, Dp=Dp)   # (R, 2, B, NC_PAD)

    # out3 + out1 fusion: sum over branch steps and EMBED chunks (view-mean and
    # GAP scale already folded into w_fc) plus both fc biases.  Tiny; left to
    # XLA instead of another kernel launch.
    return (partial.sum(axis=(0, 1))[:, :NUM_CLASSES]
            + params["b3_fc"] + params["b1_fc"])


if __name__ == "__main__":
    key = jax.random.PRNGKey(0)
    k_in, k_par = jax.random.split(key)

    R, B, C, H, W = 3, 2, 3, 224, 224             # input[-1] must be 224x224
    inp = jax.random.normal(k_in, (R, B, C, H, W), jnp.float32)
    params = make_params(k_par, C * PATCH * PATCH)

    out = jax.jit(fusion_forward)(inp, params)
    out = jax.block_until_ready(out)
    assert out.shape == (B, NUM_CLASSES) and out.dtype == jnp.float32
    print("KERNEL_OK")
</pallas_src>

<mosaic_0001>
module attributes {stable_mosaic.version = 11 : i64} {
  func.func @_fused_kernel(%arg0: i32, %arg1: i32, %arg2: memref<3xi32, #tpu.memory_space<smem>>, %arg3: memref<392x768xbf16, #tpu.memory_space<vmem>>, %arg4: memref<1x768x1024xbf16, #tpu.memory_space<vmem>>, %arg5: memref<1x1x1024xf32, #tpu.memory_space<vmem>>, %arg6: memref<2x392xbf16, #tpu.memory_space<vmem>>, %arg7: memref<1x1024x128xbf16, #tpu.memory_space<vmem>>, %arg8: memref<1x1x2x128xf32, #tpu.memory_space<vmem>>) attributes {dimension_semantics = [#tpu.dimension_semantics<parallel>, #tpu.dimension_semantics<parallel>], iteration_bounds = array<i64: 3, 2>, scalar_prefetch = 1 : i64, scratch_operands = 0 : i64, tpu.core_type = #tpu.core_type<tc>, window_params = [{transform_indices = @transform_0, window_bounds = array<i64: 392, 768>}, {transform_indices = @transform_1, window_bounds = array<i64: 1, 768, 1024>}, {transform_indices = @transform_2, window_bounds = array<i64: 1, 1, 1024>}, {pipeline_mode = #tpu.pipeline_mode<synchronous>, transform_indices = @transform_3, window_bounds = array<i64: 2, 392>}, {transform_indices = @transform_4, window_bounds = array<i64: 1, 1024, 128>}, {transform_indices = @transform_5, window_bounds = array<i64: 1, 1, 2, 128>}]} {
    %c0 = arith.constant 0 : index
    %c0_0 = arith.constant 0 : index
    %0 = vector.load %arg3[%c0, %c0_0] : memref<392x768xbf16, #tpu.memory_space<vmem>>, vector<392x768xbf16>
    %c0_1 = arith.constant 0 : index
    %c0_2 = arith.constant 0 : index
    %c0_3 = arith.constant 0 : index
    %1 = vector.load %arg4[%c0_1, %c0_2, %c0_3] : memref<1x768x1024xbf16, #tpu.memory_space<vmem>>, vector<1x768x1024xbf16>
    %2 = vector.shape_cast %1 : vector<1x768x1024xbf16> to vector<768x1024xbf16>
    %cst = arith.constant dense<0.000000e+00> : vector<392x1024xf32>
    %3 = tpu.matmul %0, %2, %cst {dimension_numbers = #tpu.dot_dimension_numbers<[1], [0], [0], [1], [0, 0, 1, 1], [], []>} : vector<392x768xbf16>, vector<768x1024xbf16>, vector<392x1024xf32> -> vector<392x1024xf32>
    %c0_4 = arith.constant 0 : index
    %c0_5 = arith.constant 0 : index
    %c0_6 = arith.constant 0 : index
    %4 = vector.load %arg5[%c0_4, %c0_5, %c0_6] : memref<1x1x1024xf32, #tpu.memory_space<vmem>>, vector<1x1x1024xf32>
    %5 = vector.shape_cast %4 : vector<1x1x1024xf32> to vector<1x1024xf32>
    %6 = vector.broadcast %5 : vector<1x1024xf32> to vector<392x1024xf32>
    %7 = arith.addf %3, %6 : vector<392x1024xf32>
    %cst_7 = arith.constant 0.000000e+00 : f32
    %8 = vector.broadcast %cst_7 : f32 to vector<392x1024xf32>
    %9 = arith.maximumf %7, %8 : vector<392x1024xf32>
    %10 = arith.truncf %9 : vector<392x1024xf32> to vector<392x1024xbf16>
    %c0_8 = arith.constant 0 : index
    %c0_9 = arith.constant 0 : index
    %11 = vector.load %arg6[%c0_8, %c0_9] : memref<2x392xbf16, #tpu.memory_space<vmem>>, vector<2x392xbf16>
    %cst_10 = arith.constant dense<0.000000e+00> : vector<2x1024xf32>
    %12 = tpu.matmul %11, %10, %cst_10 {dimension_numbers = #tpu.dot_dimension_numbers<[1], [0], [0], [1], [0, 0, 1, 1], [], []>} : vector<2x392xbf16>, vector<392x1024xbf16>, vector<2x1024xf32> -> vector<2x1024xf32>
    %13 = arith.truncf %12 : vector<2x1024xf32> to vector<2x1024xbf16>
    %c0_11 = arith.constant 0 : index
    %c0_12 = arith.constant 0 : index
    %c0_13 = arith.constant 0 : index
    %14 = vector.load %arg7[%c0_11, %c0_12, %c0_13] : memref<1x1024x128xbf16, #tpu.memory_space<vmem>>, vector<1x1024x128xbf16>
    %15 = vector.shape_cast %14 : vector<1x1024x128xbf16> to vector<1024x128xbf16>
    %cst_14 = arith.constant dense<0.000000e+00> : vector<2x128xf32>
    %16 = tpu.matmul %13, %15, %cst_14 {dimension_numbers = #tpu.dot_dimension_numbers<[1], [0], [0], [1], [0, 0, 1, 1], [], []>} : vector<2x1024xbf16>, vector<1024x128xbf16>, vector<2x128xf32> -> vector<2x128xf32>
    %c0_15 = arith.constant 0 : index
    %c0_16 = arith.constant 0 : index
    %c0_17 = arith.constant 0 : index
    %c0_18 = arith.constant 0 : index
    %17 = vector.load %arg8[%c0_15, %c0_16, %c0_17, %c0_18] : memref<1x1x2x128xf32, #tpu.memory_space<vmem>>, vector<1x1x2x128xf32>
    %18 = vector.shape_cast %17 : vector<1x1x2x128xf32> to vector<2x128xf32>
    %19 = vector.shape_cast %16 : vector<2x128xf32> to vector<1x1x2x128xf32>
    tpu.vector_store %arg8[%c0_15, %c0_16, %c0_17, %c0_18], %19 {strides = array<i32>} : memref<1x1x2x128xf32, #tpu.memory_space<vmem>>, vector<1x1x2x128xf32>,
    return
  }
  func.func @transform_0(%arg0: i32, %arg1: i32, %arg2: memref<3xi32, #tpu.memory_space<smem>>) -> (i32, i32) {
    %c0_i32 = arith.constant 0 : i32
    %c0_i32_0 = arith.constant 0 : i32
    return %arg0, %c0_i32 : i32, i32
  }
  func.func @transform_1(%arg0: i32, %arg1: i32, %arg2: memref<3xi32, #tpu.memory_space<smem>>) -> (i32, i32, i32) {
    %0 = arith.index_cast %arg0 : i32 to index
    %1 = memref.load %arg2[%0] : memref<3xi32, #tpu.memory_space<smem>>
    %c0_i32 = arith.constant 0 : i32
    %c0_i32_0 = arith.constant 0 : i32
    return %1, %c0_i32, %arg1 : i32, i32, i32
  }
  func.func @transform_2(%arg0: i32, %arg1: i32, %arg2: memref<3xi32, #tpu.memory_space<smem>>) -> (i32, i32, i32) {
    %0 = arith.index_cast %arg0 : i32 to index
    %1 = memref.load %arg2[%0] : memref<3xi32, #tpu.memory_space<smem>>
    %c0_i32 = arith.constant 0 : i32
    %c0_i32_0 = arith.constant 0 : i32
    return %1, %c0_i32, %arg1 : i32, i32, i32
  }
  func.func @transform_3(%arg0: i32, %arg1: i32, %arg2: memref<3xi32, #tpu.memory_space<smem>>) -> (i32, i32) {
    %c0_i32 = arith.constant 0 : i32
    %c0_i32_0 = arith.constant 0 : i32
    %c0_i32_1 = arith.constant 0 : i32
    return %c0_i32, %c0_i32_0 : i32, i32
  }
  func.func @transform_4(%arg0: i32, %arg1: i32, %arg2: memref<3xi32, #tpu.memory_space<smem>>) -> (i32, i32, i32) {
    %0 = arith.index_cast %arg0 : i32 to index
    %1 = memref.load %arg2[%0] : memref<3xi32, #tpu.memory_space<smem>>
    %c0_i32 = arith.constant 0 : i32
    %c0_i32_0 = arith.constant 0 : i32
    return %1, %arg1, %c0_i32 : i32, i32, i32
  }
  func.func @transform_5(%arg0: i32, %arg1: i32, %arg2: memref<3xi32, #tpu.memory_space<smem>>) -> (i32, i32, i32, i32) {
    %c0_i32 = arith.constant 0 : i32
    %c0_i32_0 = arith.constant 0 : i32
    %c0_i32_1 = arith.constant 0 : i32
    return %arg0, %arg1, %c0_i32, %c0_i32_0 : i32, i32, i32, i32
  }
}

</mosaic_0001>

<bundles_post_ra>
// kernel: squeeze.0
= control target key start
LH: loop header
LB: loop body
LE: loop exit
PB: predicated region body
PF: predicated region fallthrough
CT: control target
= control target key end

     0   :  { %s16947_s6 = smov 0   ;;  %s21029_s0 = inlined_call_operand.vmem [shape: bf16[1,2,3,224,224], index: 0, kind: input, shape index: {}]   ;;  %s21030_s1 = inlined_call_operand.vmem [shape: bf16[2,3,14,16,14,16], index: 1, kind: output, shape index: {}]  }
   0x1 LB: > { %s12663_s7 = sadd.s32 4294967295, %s16928_s6   ;;  %p12666_p0 = scmp.ge.s32.totalorder %s16928_s6, 1  ;;  %s16928_s6 = sphi %s16947_s6, %s7_s6  }
   0x2   : > { %p28_p1 = scmp.lt.s32.totalorder %s16928_s6, 5 }
   0x4   : > { %p29_p2 = pnand %p12666_p0, %p28_p1 }
   0x6   : > { %32 = sbr.rel (%p29_p2) target bundleno = 1254 (0x4e6), region = 20 }
   0xd   : > { %s47_s8 = smul.u32 336, %s12663_s7  ;;  %s16930_s12 = smov 112   ;;  %vm1398_vm0 = vcmask 130048  }
   0xe   : > { %s16931_s13 = smov 96   ;;  %s16932_s14 = smov 80  }
   0xf   : > { %p48_p3 = scmp.lt.s32.totalorder %s47_s8, 1343  ;;  %s16933_s15 = smov 64  }
  0x10   : > { %s16934_s16 = smov 48   ;;  %s16935_s17 = smov 32  }
  0x11   : > { %s21036_s8 = smov (!%p48_p3, %s47_s8), 1343  ;;  %s16936_s18 = smov 16  }
  0x12   : > { %s16960_s11 = scalar_lea.vmem %s21029_s0, %s21036_s8  ;;  %s19331_s19 = smul.u32 2688, %s12663_s7 }
  0x13   : > { %v13588_v0 = vld [vmem:[%s16960_s11] sm:$0xff]   ;;  %v15310_v1 = vld [vmem:[%s16960_s11 + $0x10] sm:$0xff]   ;;  %v15311_v2 = vld [vmem:[%s16960_s11 + $0x8] sm:$0xff]  }
  0x14   : > { %v13589_v3 = vunpack.c.l.bf16 %v13588_v0  ;;  %v13590_v4 = vunpack.c.h.bf16 %v13588_v0  ;;  %v13581_v5 = vunpack.c.l.bf16 %v15310_v1  ;;  %v13582_v6 = vunpack.c.h.bf16 %v15310_v1  ;;  %v15309_v7 = vld [vmem:[%s16960_s11 + $0x18] sm:$0xff]   ;;  %v15308_v8 = vld [vmem:[%s16960_s11 + $0x20] sm:$0xff]   ;;  %v15307_v9 = vld [vmem:[%s16960_s11 + $0x28] sm:$0xff]   ;;  %p43_p4 = scmp.lt.s32.totalorder %s19331_s19, 10751 }
  0x15   : > { %v13585_v10 = vunpack.c.l.bf16 %v15311_v2  ;;  %v13586_v11 = vunpack.c.h.bf16 %v15311_v2  ;;  %v13577_v12 = vunpack.c.l.bf16 %v15309_v7  ;;  %v13578_v13 = vunpack.c.h.bf16 %v15309_v7  ;;  %v15306_v14 = vld [vmem:[%s16960_s11 + $0x30] sm:$0xff]   ;;  %v15305_v15 = vld [vmem:[%s16960_s11 + $0x38] sm:$0xff]   ;;  %v15304_v16 = vld [vmem:[%s16960_s11 + $0x40] sm:$0xff]  }
  0x16   : > { %1381 = vst [vmem:[#allocation1 + $0x8] sm:$0xff] %v13590_v4  ;;  %1394 = vst [vmem:[#allocation1] sm:$0xff] %v13589_v3  ;;  %v13573_v17 = vunpack.c.l.bf16 %v15308_v8  ;;  %v13574_v18 = vunpack.c.h.bf16 %v15308_v8  ;;  %v13569_v19 = vunpack.c.l.bf16 %v15307_v9  ;;  %v13570_v20 = vunpack.c.h.bf16 %v15307_v9  ;;  %v15303_v21 = vld [vmem:[%s16960_s11 + $0x48] sm:$0xff]   ;;  %v15302_v22 = vld [vmem:[%s16960_s11 + $0x50] sm:$0xff]   ;;  %s21038_s19 = smov (!%p43_p4, %s19331_s19), 10751 }
  0x17   : > { %1318 = vst [vmem:[#allocation1 + $0x28] sm:$0xff] %v13582_v6  ;;  %1334 = vst [vmem:[#allocation1 + $0x20] sm:$0xff] %v13581_v5  ;;  %v15301_v23 = vld [vmem:[%s16960_s11 + $0x58] sm:$0xff]   ;;  %v13565_v24 = vunpack.c.l.bf16 %v15306_v14  ;;  %v13566_v25 = vunpack.c.h.bf16 %v15306_v14  ;;  %v13561_v26 = vunpack.c.l.bf16 %v15305_v15  ;;  %v13562_v27 = vunpack.c.h.bf16 %v15305_v15  ;;  %v15300_v28 = vld [vmem:[%s16960_s11 + $0x60] sm:$0xff]   ;;  %s19409_s22 = scalar_lea.vmem %s21030_s1, %s21038_s19 }
  0x18   : > { %1350 = vst [vmem:[#allocation1 + $0x18] sm:$0xff] %v13586_v11  ;;  %1366 = vst [vmem:[#allocation1 + $0x10] sm:$0xff] %v13585_v10  ;;  %v15299_v29 = vld [vmem:[%s16960_s11 + $0x68] sm:$0xff]   ;;  %v13557_v30 = vunpack.c.l.bf16 %v15304_v16  ;;  %v13558_v31 = vunpack.c.h.bf16 %v15304_v16  ;;  %v13553_v32 = vunpack.c.l.bf16 %v15303_v21  ;;  %v13554_v33 = vunpack.c.h.bf16 %v15303_v21  ;;  %v15298_v34 = vld [vmem:[%s16960_s11 + $0x70] sm:$0xff]  }
  0x19   : > { %1286 = vst [vmem:[#allocation1 + $0x38] sm:$0xff] %v13578_v13  ;;  %1302 = vst [vmem:[#allocation1 + $0x30] sm:$0xff] %v13577_v12  ;;  %v15297_v35 = vld [vmem:[%s16960_s11 + $0x78] sm:$0xff]   ;;  %v13549_v36 = vunpack.c.l.bf16 %v15302_v22  ;;  %v13550_v37 = vunpack.c.h.bf16 %v15302_v22  ;;  %v13545_v38 = vunpack.c.l.bf16 %v15301_v23  ;;  %v13546_v39 = vunpack.c.h.bf16 %v15301_v23  ;;  %v15296_v40 = vld [vmem:[%s16960_s11 + $0x80] sm:$0xff]  }
  0x1a   : > { %1254 = vst [vmem:[#allocation1 + $0x48] sm:$0xff] %v13574_v18  ;;  %1270 = vst [vmem:[#allocation1 + $0x40] sm:$0xff] %v13573_v17  ;;  %v15295_v41 = vld [vmem:[%s16960_s11 + $0x88] sm:$0xff]   ;;  %v13541_v42 = vunpack.c.l.bf16 %v15300_v28  ;;  %v13542_v43 = vunpack.c.h.bf16 %v15300_v28  ;;  %v13537_v44 = vunpack.c.l.bf16 %v15299_v29  ;;  %v13538_v45 = vunpack.c.h.bf16 %v15299_v29  ;;  %v15294_v46 = vld [vmem:[%s16960_s11 + $0x90] sm:$0xff]  }
  0x1b   : > { %1222 = vst [vmem:[#allocation1 + $0x58] sm:$0xff] %v13570_v20  ;;  %1238 = vst [vmem:[#allocation1 + $0x50] sm:$0xff] %v13569_v19  ;;  %v15293_v47 = vld [vmem:[%s16960_s11 + $0x98] sm:$0xff]   ;;  %v13533_v48 = vunpack.c.l.bf16 %v15298_v34  ;;  %v13534_v49 = vunpack.c.h.bf16 %v15298_v34  ;;  %v13529_v50 = vunpack.c.l.bf16 %v15297_v35  ;;  %v13530_v51 = vunpack.c.h.bf16 %v15297_v35  ;;  %v15292_v52 = vld [vmem:[%s16960_s11 + $0xa0] sm:$0xff]  }
  0x1c   : > { %1190 = vst [vmem:[#allocation1 + $0x68] sm:$0xff] %v13566_v25  ;;  %1206 = vst [vmem:[#allocation1 + $0x60] sm:$0xff] %v13565_v24  ;;  %v15291_v53 = vld [vmem:[%s16960_s11 + $0xa8] sm:$0xff]   ;;  %v16985_v54 = vld [vmem:[%s16960_s11 + $0xb0] sm:$0xff]   ;;  %v13525_v55 = vunpack.c.l.bf16 %v15296_v40  ;;  %v13526_v56 = vunpack.c.h.bf16 %v15296_v40  ;;  %v13521_v57 = vunpack.c.l.bf16 %v15295_v41  ;;  %v13522_v58 = vunpack.c.h.bf16 %v15295_v41 }
  0x1d   : > { %1158 = vst [vmem:[#allocation1 + $0x78] sm:$0xff] %v13562_v27  ;;  %1174 = vst [vmem:[#allocation1 + $0x70] sm:$0xff] %v13561_v26  ;;  %v15289_v59 = vld [vmem:[%s16960_s11 + $0xb8] sm:$0xff]   ;;  %v16989_v60 = vld [vmem:[%s16960_s11 + $0xc0] sm:$0xff]   ;;  %v13517_v0 = vunpack.c.l.bf16 %v15294_v46  ;;  %v13518_v1 = vunpack.c.h.bf16 %v15294_v46  ;;  %v13513_v2 = vunpack.c.l.bf16 %v15293_v47  ;;  %v13514_v3 = vunpack.c.h.bf16 %v15293_v47 }
  0x1e   : > { %1126 = vst [vmem:[#allocation1 + $0x88] sm:$0xff] %v13558_v31  ;;  %1142 = vst [vmem:[#allocation1 + $0x80] sm:$0xff] %v13557_v30  ;;  %v16992_v61 = vld [vmem:[%s16960_s11 + $0xc8] sm:$0xff]   ;;  %v15286_v4 = vld [vmem:[%s16960_s11 + $0xd0] sm:$0xff]   ;;  %v13509_v9 = vunpack.c.l.bf16 %v15292_v52  ;;  %v13510_v10 = vunpack.c.h.bf16 %v15292_v52  ;;  %v13505_v11 = vunpack.c.l.bf16 %v15291_v53  ;;  %v13506_v16 = vunpack.c.h.bf16 %v15291_v53 }
  0x1f   : > { %1094 = vst [vmem:[#allocation1 + $0x98] sm:$0xff] %v13554_v33  ;;  %1110 = vst [vmem:[#allocation1 + $0x90] sm:$0xff] %v13553_v32  ;;  %v2316_v62 = vld.sshfl [vmem:[#allocation1] sm:$0xff pattern:$0xb3a29180]   ;;  %v16996_v5 = vld [vmem:[%s16960_s11 + $0xd8] sm:$0xff]   ;;  %v13501_v17 = vunpack.c.l.bf16 %v16985_v54  ;;  %v13502_v18 = vunpack.c.h.bf16 %v16985_v54  ;;  %v13497_v23 = vunpack.c.l.bf16 %v15289_v59  ;;  %v13498_v24 = vunpack.c.h.bf16 %v15289_v59 }
  0x20   : > { %1062 = vst [vmem:[#allocation1 + $0xa8] sm:$0xff] %v13550_v37  ;;  %1078 = vst [vmem:[#allocation1 + $0xa0] sm:$0xff] %v13549_v36  ;;  %v2325_v63 = vld.sshfl [vmem:[#allocation1 + $0x4] sm:$0xff pattern:$0xb3a29180]   ;;  %v13493_v25 = vunpack.c.l.bf16 %v16989_v60  ;;  %v13494_v29 = vunpack.c.h.bf16 %v16989_v60  ;;  %v13489_v30 = vunpack.c.l.bf16 %v16992_v61  ;;  %v13490_v31 = vunpack.c.h.bf16 %v16992_v61 }
  0x21   : > { %1030 = vst [vmem:[#allocation1 + $0xb8] sm:$0xff] %v13546_v39  ;;  %1046 = vst [vmem:[#allocation1 + $0xb0] sm:$0xff] %v13545_v38  ;;  %v16998_v6 = vpack.i.bf16 %v2325_v63, %v2316_v62  ;;  %v2352_v7 = vld.sshfl [vmem:[#allocation1 + $0x20] sm:$0xff pattern:$0xb3a29180]   ;;  %v13485_v34 = vunpack.c.l.bf16 %v15286_v4  ;;  %v13486_v35 = vunpack.c.h.bf16 %v15286_v4  ;;  %v13481_v36 = vunpack.c.l.bf16 %v16996_v5 }
  0x22   : > { %998 = vst [vmem:[#allocation1 + $0xc8] sm:$0xff] %v13542_v43  ;;  %1014 = vst [vmem:[#allocation1 + $0xc0] sm:$0xff] %v13541_v42  ;;  %v2361_v8 = vld.sshfl [vmem:[#allocation1 + $0x24] sm:$0xff pattern:$0xb3a29180]   ;;  %v13482_v37 = vunpack.c.h.bf16 %v16996_v5 }
  0x23   : > { %966 = vst [vmem:[#allocation1 + $0xd8] sm:$0xff] %v13538_v45  ;;  %982 = vst [vmem:[#allocation1 + $0xd0] sm:$0xff] %v13537_v44  ;;  %v15284_v12 = vld [vmem:[%s16960_s11 + $0xe0] sm:$0xff]   ;;  %v17001_v13 = vpack.i.bf16 %v2361_v8, %v2352_v7  ;;  %v2334_v14 = vld.sshfl [vmem:[#allocation1 + $0x10] sm:$0xff pattern:$0xb3a29180]   ;;  %15663 = vrot.lane.b32.xlu0 %v16998_v6, %s16930_s12 }
  0x24   : > { %934 = vst [vmem:[#allocation1 + $0xe8] sm:$0xff] %v13534_v49  ;;  %950 = vst [vmem:[#allocation1 + $0xe0] sm:$0xff] %v13533_v48  ;;  %v2343_v15 = vld.sshfl [vmem:[#allocation1 + $0x14] sm:$0xff pattern:$0xb3a29180]   ;;  %v15283_v19 = vld [vmem:[%s16960_s11 + $0xe8] sm:$0xff]   ;;  %v13477_v38 = vunpack.c.l.bf16 %v15284_v12  ;;  %v13478_v39 = vunpack.c.h.bf16 %v15284_v12 }
  0x25   : > { %902 = vst [vmem:[#allocation1 + $0xf8] sm:$0xff] %v13530_v51  ;;  %918 = vst [vmem:[#allocation1 + $0xf0] sm:$0xff] %v13529_v50  ;;  %v17008_v20 = vpack.i.bf16 %v2343_v15, %v2334_v14  ;;  %v2370_v21 = vld.sshfl [vmem:[#allocation1 + $0x30] sm:$0xff pattern:$0xb3a29180]   ;;  %15673 = vrot.lane.b32.xlu1 %v17001_v13, %s16930_s12  ;;  %v13473_v41 = vunpack.c.l.bf16 %v15283_v19  ;;  %v13474_v42 = vunpack.c.h.bf16 %v15283_v19 }
  0x26   : > { %870 = vst [vmem:[#allocation1 + $0x108] sm:$0xff] %v13526_v56  ;;  %886 = vst [vmem:[#allocation1 + $0x100] sm:$0xff] %v13525_v55  ;;  %v2379_v22 = vld.sshfl [vmem:[#allocation1 + $0x34] sm:$0xff pattern:$0xb3a29180]  }
  0x27   : > { %838 = vst [vmem:[#allocation1 + $0x118] sm:$0xff] %v13522_v58  ;;  %854 = vst [vmem:[#allocation1 + $0x110] sm:$0xff] %v13521_v57  ;;  %v17013_v26 = vpack.i.bf16 %v2379_v22, %v2370_v21  ;;  %v2388_v27 = vld.sshfl [vmem:[#allocation1 + $0x40] sm:$0xff pattern:$0xb3a29180]   ;;  %15668 = vrot.lane.b32.xlu0 %v17008_v20, %s16930_s12 }
  0x28   : > { %806 = vst [vmem:[#allocation1 + $0x128] sm:$0xff] %v13518_v1  ;;  %822 = vst [vmem:[#allocation1 + $0x120] sm:$0xff] %v13517_v0  ;;  %v2397_v28 = vld.sshfl [vmem:[#allocation1 + $0x44] sm:$0xff pattern:$0xb3a29180]  }
  0x29   : > { %774 = vst [vmem:[#allocation1 + $0x138] sm:$0xff] %v13514_v3  ;;  %790 = vst [vmem:[#allocation1 + $0x130] sm:$0xff] %v13513_v2  ;;  %v2406_v32 = vld.sshfl [vmem:[#allocation1 + $0x50] sm:$0xff pattern:$0xb3a29180]   ;;  %v17022_v40 = vpack.i.bf16 %v2397_v28, %v2388_v27  ;;  %15678 = vrot.lane.b32.xlu1 %v17013_v26, %s16930_s12  ;;  %v15280_v28 = vld [vmem:[%s16960_s11 + $0x100] sm:$0xff]  }
  0x2a   : > { %742 = vst [vmem:[#allocation1 + $0x148] sm:$0xff] %v13510_v10  ;;  %758 = vst [vmem:[#allocation1 + $0x140] sm:$0xff] %v13509_v9  ;;  %v2415_v33 = vld.sshfl [vmem:[#allocation1 + $0x54] sm:$0xff pattern:$0xb3a29180]  }
  0x2b   : > { %726 = vst [vmem:[#allocation1 + $0x150] sm:$0xff] %v13505_v11  ;;  %710 = vst [vmem:[#allocation1 + $0x158] sm:$0xff] %v13506_v16  ;;  %v17026_v43 = vpack.i.bf16 %v2415_v33, %v2406_v32  ;;  %v2424_v44 = vld.sshfl [vmem:[#allocation1 + $0x60] sm:$0xff pattern:$0xb3a29180]   ;;  %15683 = vrot.lane.b32.xlu0 %v17022_v40, %s16930_s12  ;;  %v15281_v27 = vld [vmem:[%s16960_s11 + $0xf8] sm:$0xff]  }
  0x2c   : > { %678 = vst [vmem:[#allocation1 + $0x168] sm:$0xff] %v13502_v18  ;;  %694 = vst [vmem:[#allocation1 + $0x160] sm:$0xff] %v13501_v17  ;;  %v2433_v45 = vld.sshfl [vmem:[#allocation1 + $0x64] sm:$0xff pattern:$0xb3a29180]   ;;  %v13466_v32 = vunpack.c.h.bf16 %v15281_v27 }
  0x2d   : > { %646 = vst [vmem:[#allocation1 + $0x178] sm:$0xff] %v13498_v24  ;;  %662 = vst [vmem:[#allocation1 + $0x170] sm:$0xff] %v13497_v23  ;;  %v2442_v46 = vld.sshfl [vmem:[#allocation1 + $0x70] sm:$0xff pattern:$0xb3a29180]   ;;  %v17030_v48 = vpack.i.bf16 %v2433_v45, %v2424_v44  ;;  %15688 = vrot.lane.b32.xlu1 %v17026_v43, %s16930_s12  ;;  %v15279_v33 = vld [vmem:[%s16960_s11 + $0x108] sm:$0xff]  }
  0x2e   : > { %630 = vst [vmem:[#allocation1 + $0x180] sm:$0xff] %v13493_v25  ;;  %614 = vst [vmem:[#allocation1 + $0x188] sm:$0xff] %v13494_v29  ;;  %v2451_v47 = vld.sshfl [vmem:[#allocation1 + $0x74] sm:$0xff pattern:$0xb3a29180]  }
  0x2f   : > { %582 = vst [vmem:[#allocation1 + $0x198] sm:$0xff] %v13490_v31  ;;  %598 = vst [vmem:[#allocation1 + $0x190] sm:$0xff] %v13489_v30  ;;  %v17034_v49 = vpack.i.bf16 %v2451_v47, %v2442_v46  ;;  %v2460_v50 = vld.sshfl [vmem:[#allocation1 + $0x80] sm:$0xff pattern:$0xb3a29180]   ;;  %15693 = vrot.lane.b32.xlu0 %v17030_v48, %s16930_s12  ;;  %v15282_v25 = vld [vmem:[%s16960_s11 + $0xf0] sm:$0xff]   ;;  %v13465_v31 = vunpack.c.l.bf16 %v15281_v27 }
  0x30   : > { %550 = vst [vmem:[#allocation1 + $0x1a8] sm:$0xff] %v13486_v35  ;;  %566 = vst [vmem:[#allocation1 + $0x1a0] sm:$0xff] %v13485_v34  ;;  %v2469_v51 = vld.sshfl [vmem:[#allocation1 + $0x84] sm:$0xff pattern:$0xb3a29180]   ;;  %v13469_v29 = vunpack.c.l.bf16 %v15282_v25  ;;  %v13470_v30 = vunpack.c.h.bf16 %v15282_v25  ;;  %v15278_v34 = vld [vmem:[%s16960_s11 + $0x110] sm:$0xff]  }
  0x31   : > { %534 = vst [vmem:[#allocation1 + $0x1b0] sm:$0xff] %v13481_v36  ;;  %518 = vst [vmem:[#allocation1 + $0x1b8] sm:$0xff] %v13482_v37  ;;  %v2478_v52 = vld.sshfl [vmem:[#allocation1 + $0x90] sm:$0xff pattern:$0xb3a29180]   ;;  %v17038_v54 = vpack.i.bf16 %v2469_v51, %v2460_v50  ;;  %15698 = vrot.lane.b32.xlu1 %v17034_v49, %s16930_s12  ;;  %v13461_v36 = vunpack.c.l.bf16 %v15280_v28  ;;  %v13462_v37 = vunpack.c.h.bf16 %v15280_v28  ;;  %v13453_v45 = vunpack.c.l.bf16 %v15278_v34 }
  0x32   : > { %486 = vst [vmem:[#allocation1 + $0x1c8] sm:$0xff] %v13478_v39  ;;  %502 = vst [vmem:[#allocation1 + $0x1c0] sm:$0xff] %v13477_v38  ;;  %v2487_v53 = vld.sshfl [vmem:[#allocation1 + $0x94] sm:$0xff pattern:$0xb3a29180]   ;;  %v13457_v38 = vunpack.c.l.bf16 %v15279_v33  ;;  %v13458_v39 = vunpack.c.h.bf16 %v15279_v33  ;;  %v13454_v46 = vunpack.c.h.bf16 %v15278_v34 }
  0x33   : > { %454 = vst [vmem:[#allocation1 + $0x1d8] sm:$0xff] %v13474_v42  ;;  %470 = vst [vmem:[#allocation1 + $0x1d0] sm:$0xff] %v13473_v41  ;;  %v17042_v55 = vpack.i.bf16 %v2487_v53, %v2478_v52  ;;  %v2496_v56 = vld.sshfl [vmem:[#allocation1 + $0xa0] sm:$0xff pattern:$0xb3a29180]   ;;  %15703 = vrot.lane.b32.xlu0 %v17038_v54, %s16930_s12  ;;  %v15277_v35 = vld [vmem:[%s16960_s11 + $0x118] sm:$0xff]  }
  0x34   : > { %v2505_v57 = vld.sshfl [vmem:[#allocation1 + $0xa4] sm:$0xff pattern:$0xb3a29180]   ;;  %v2514_v58 = vld.sshfl [vmem:[#allocation1 + $0xb0] sm:$0xff pattern:$0xb3a29180]   ;;  %v13449_v47 = vunpack.c.l.bf16 %v15277_v35  ;;  %v13450_v50 = vunpack.c.h.bf16 %v15277_v35 }
  0x35   : > { %v2523_v59 = vld.sshfl [vmem:[#allocation1 + $0xb4] sm:$0xff pattern:$0xb3a29180]   ;;  %v17046_v60 = vpack.i.bf16 %v2505_v57, %v2496_v56  ;;  %15708 = vrot.lane.b32.xlu1 %v17042_v55, %s16930_s12  ;;  %v2532_v62 = vld.sshfl [vmem:[#allocation1 + $0xc0] sm:$0xff pattern:$0xb3a29180]  }
  0x36   : > { %v17050_v61 = vpack.i.bf16 %v2523_v59, %v2514_v58  ;;  %v2541_v63 = vld.sshfl [vmem:[#allocation1 + $0xc4] sm:$0xff pattern:$0xb3a29180]   ;;  %v2550_v0 = vld.sshfl [vmem:[#allocation1 + $0xd0] sm:$0xff pattern:$0xb3a29180]  }
  0x37   : > { %v2559_v1 = vld.sshfl [vmem:[#allocation1 + $0xd4] sm:$0xff pattern:$0xb3a29180]   ;;  %15713 = vrot.lane.b32.xlu0 %v17046_v60, %s16930_s12  ;;  %v17054_v2 = vpack.i.bf16 %v2541_v63, %v2532_v62  ;;  %v2568_v3 = vld.sshfl [vmem:[#allocation1 + $0xe0] sm:$0xff pattern:$0xb3a29180]  }
  0x38   : > { %v2577_v4 = vld.sshfl [vmem:[#allocation1 + $0xe4] sm:$0xff pattern:$0xb3a29180]   ;;  %v17058_v5 = vpack.i.bf16 %v2559_v1, %v2550_v0  ;;  %v2586_v7 = vld.sshfl [vmem:[#allocation1 + $0xf0] sm:$0xff pattern:$0xb3a29180]  }
  0x39   : > { %15718 = vrot.lane.b32.xlu1 %v17050_v61, %s16930_s12  ;;  %v2595_v8 = vld.sshfl [vmem:[#allocation1 + $0xf4] sm:$0xff pattern:$0xb3a29180]   ;;  %v2604_v9 = vld.sshfl [vmem:[#allocation1 + $0x100] sm:$0xff pattern:$0xb3a29180]   ;;  %v17062_v16 = vpack.i.bf16 %v2577_v4, %v2568_v3 }
  0x3a   : > { %v2613_v10 = vld.sshfl [vmem:[#allocation1 + $0x104] sm:$0xff pattern:$0xb3a29180]   ;;  %v2622_v11 = vld.sshfl [vmem:[#allocation1 + $0x110] sm:$0xff pattern:$0xb3a29180]   ;;  %v17066_v19 = vpack.i.bf16 %v2595_v8, %v2586_v7 }
  0x3b   : > { %v2631_v12 = vld.sshfl [vmem:[#allocation1 + $0x114] sm:$0xff pattern:$0xb3a29180]   ;;  %v2640_v14 = vld.sshfl [vmem:[#allocation1 + $0x120] sm:$0xff pattern:$0xb3a29180]   ;;  %15723 = vrot.lane.b32.xlu0 %v17054_v2, %s16930_s12  ;;  %v17068_v21 = vpack.i.bf16 %v2613_v10, %v2604_v9 }
  0x3c   : > { %v2649_v15 = vld.sshfl [vmem:[#allocation1 + $0x124] sm:$0xff pattern:$0xb3a29180]   ;;  %v2658_v17 = vld.sshfl [vmem:[#allocation1 + $0x130] sm:$0xff pattern:$0xb3a29180]   ;;  %v17070_v22 = vpack.i.bf16 %v2631_v12, %v2622_v11 }
  0x3d   : > { %v2667_v18 = vld.sshfl [vmem:[#allocation1 + $0x134] sm:$0xff pattern:$0xb3a29180]   ;;  %15728 = vrot.lane.b32.xlu1 %v17058_v5, %s16930_s12  ;;  %v17072_v23 = vpack.i.bf16 %v2649_v15, %v2640_v14  ;;  %v15276_v41 = vld [vmem:[%s16960_s11 + $0x120] sm:$0xff]   ;;  %v15275_v42 = vld [vmem:[%s16960_s11 + $0x128] sm:$0xff]   ;;  %422 = vst [vmem:[#allocation1 + $0x1e8] sm:$0xff] %v13470_v30 }
  0x3e   : > { %v17074_v24 = vpack.i.bf16 %v2667_v18, %v2658_v17  ;;  %v15274_v44 = vld [vmem:[%s16960_s11 + $0x130] sm:$0xff]   ;;  %438 = vst [vmem:[#allocation1 + $0x1e0] sm:$0xff] %v13469_v29  ;;  %390 = vst [vmem:[#allocation1 + $0x1f8] sm:$0xff] %v13466_v32  ;;  %v15273_v51 = vld [vmem:[%s16960_s11 + $0x138] sm:$0xff]   ;;  %v13445_v56 = vunpack.c.l.bf16 %v15276_v41  ;;  %v13446_v57 = vunpack.c.h.bf16 %v15276_v41  ;;  %v13441_v58 = vunpack.c.l.bf16 %v15275_v42 }
  0x3f   : > { %15733 = vrot.lane.b32.xlu0 %v17062_v16, %s16930_s12  ;;  %406 = vst [vmem:[#allocation1 + $0x1f0] sm:$0xff] %v13465_v31  ;;  %v15272_v52 = vld [vmem:[%s16960_s11 + $0x140] sm:$0xff]   ;;  %v15271_v53 = vld [vmem:[%s16960_s11 + $0x148] sm:$0xff]   ;;  %358 = vst [vmem:[#allocation1 + $0x208] sm:$0xff] %v13462_v37  ;;  %v13442_v59 = vunpack.c.h.bf16 %v15275_v42  ;;  %v13437_v62 = vunpack.c.l.bf16 %v15274_v44  ;;  %v13438_v63 = vunpack.c.h.bf16 %v15274_v44  ;;  %v13433_v0 = vunpack.c.l.bf16 %v15273_v51 }
  0x40   : > { %374 = vst [vmem:[#allocation1 + $0x200] sm:$0xff] %v13461_v36  ;;  %326 = vst [vmem:[#allocation1 + $0x218] sm:$0xff] %v13458_v39  ;;  %v13434_v1 = vunpack.c.h.bf16 %v15273_v51  ;;  %v2676_v3 = vld.sshfl [vmem:[#allocation1 + $0x140] sm:$0xff pattern:$0xb3a29180]   ;;  %v13429_v7 = vunpack.c.l.bf16 %v15272_v52  ;;  %v13430_v8 = vunpack.c.h.bf16 %v15272_v52  ;;  %v13425_v9 = vunpack.c.l.bf16 %v15271_v53 }
  0x41   : > { %15738 = vrot.lane.b32.xlu1 %v17066_v19, %s16930_s12  ;;  %342 = vst [vmem:[#allocation1 + $0x210] sm:$0xff] %v13457_v38  ;;  %294 = vst [vmem:[#allocation1 + $0x228] sm:$0xff] %v13454_v46  ;;  %v2685_v4 = vld.sshfl [vmem:[#allocation1 + $0x144] sm:$0xff pattern:$0xb3a29180]   ;;  %v13426_v10 = vunpack.c.h.bf16 %v15271_v53 }
  0x42   : > { %310 = vst [vmem:[#allocation1 + $0x220] sm:$0xff] %v13453_v45  ;;  %262 = vst [vmem:[#allocation1 + $0x238] sm:$0xff] %v13450_v50  ;;  %v2694_v11 = vld.sshfl [vmem:[#allocation1 + $0x150] sm:$0xff pattern:$0xb3a29180]   ;;  %v17098_v14 = vpack.i.bf16 %v2685_v4, %v2676_v3 }
  0x43   : > { %15743 = vrot.lane.b32.xlu0 %v17068_v21, %s16930_s12  ;;  %278 = vst [vmem:[#allocation1 + $0x230] sm:$0xff] %v13449_v47  ;;  %230 = vst [vmem:[#allocation1 + $0x248] sm:$0xff] %v13446_v57  ;;  %v2703_v12 = vld.sshfl [vmem:[#allocation1 + $0x154] sm:$0xff pattern:$0xb3a29180]  }
  0x44   : > { %246 = vst [vmem:[#allocation1 + $0x240] sm:$0xff] %v13445_v56  ;;  %198 = vst [vmem:[#allocation1 + $0x258] sm:$0xff] %v13442_v59  ;;  %v17102_v15 = vpack.i.bf16 %v2703_v12, %v2694_v11  ;;  %v2712_v17 = vld.sshfl [vmem:[#allocation1 + $0x160] sm:$0xff pattern:$0xb3a29180]  }
  0x45   : > { %15748 = vrot.lane.b32.xlu1 %v17070_v22, %s16930_s12  ;;  %214 = vst [vmem:[#allocation1 + $0x250] sm:$0xff] %v13441_v58  ;;  %166 = vst [vmem:[#allocation1 + $0x268] sm:$0xff] %v13438_v63  ;;  %v2721_v18 = vld.sshfl [vmem:[#allocation1 + $0x164] sm:$0xff pattern:$0xb3a29180]  }
  0x46   : > { %182 = vst [vmem:[#allocation1 + $0x260] sm:$0xff] %v13437_v62  ;;  %134 = vst [vmem:[#allocation1 + $0x278] sm:$0xff] %v13434_v1  ;;  %v2730_v25 = vld.sshfl [vmem:[#allocation1 + $0x170] sm:$0xff pattern:$0xb3a29180]   ;;  %v17106_v28 = vpack.i.bf16 %v2721_v18, %v2712_v17 }
  0x47   : > { %150 = vst [vmem:[#allocation1 + $0x270] sm:$0xff] %v13433_v0  ;;  %102 = vst [vmem:[#allocation1 + $0x288] sm:$0xff] %v13430_v8  ;;  %15753 = vrot.lane.b32.xlu0 %v17072_v23, %s16930_s12  ;;  %v2739_v27 = vld.sshfl [vmem:[#allocation1 + $0x174] sm:$0xff pattern:$0xb3a29180]  }
  0x48   : > { %118 = vst [vmem:[#allocation1 + $0x280] sm:$0xff] %v13429_v7  ;;  %70 = vst [vmem:[#allocation1 + $0x298] sm:$0xff] %v13426_v10  ;;  %v17110_v29 = vpack.i.bf16 %v2739_v27, %v2730_v25  ;;  %v2748_v30 = vld.sshfl [vmem:[#allocation1 + $0x180] sm:$0xff pattern:$0xb3a29180]  }
  0x49   : > { %86 = vst [vmem:[#allocation1 + $0x290] sm:$0xff] %v13425_v9  ;;  %15758 = vrot.lane.b32.xlu1 %v17074_v24, %s16930_s12  ;;  %v2757_v31 = vld.sshfl [vmem:[#allocation1 + $0x184] sm:$0xff pattern:$0xb3a29180]  }
  0x4a   : > { %v2766_v32 = vld.sshfl [vmem:[#allocation1 + $0x190] sm:$0xff pattern:$0xb3a29180]   ;;  %v2775_v33 = vld.sshfl [vmem:[#allocation1 + $0x194] sm:$0xff pattern:$0xb3a29180]   ;;  %v17114_v34 = vpack.i.bf16 %v2757_v31, %v2748_v30 }
  0x4b   : > { %15763 = vrot.lane.b32.xlu0 %v17098_v14, %s16930_s12  ;;  %v17118_v35 = vpack.i.bf16 %v2775_v33, %v2766_v32  ;;  %v2784_v36 = vld.sshfl [vmem:[#allocation1 + $0x1a0] sm:$0xff pattern:$0xb3a29180]   ;;  %v2793_v37 = vld.sshfl [vmem:[#allocation1 + $0x1a4] sm:$0xff pattern:$0xb3a29180]  }
  0x4c   : > { %v2802_v38 = vld.sshfl [vmem:[#allocation1 + $0x1b0] sm:$0xff pattern:$0xb3a29180]   ;;  %v2811_v39 = vld.sshfl [vmem:[#allocation1 + $0x1b4] sm:$0xff pattern:$0xb3a29180]   ;;  %v17122_v41 = vpack.i.bf16 %v2793_v37, %v2784_v36 }
  0x4d   : > { %15768 = vrot.lane.b32.xlu1 %v17102_v15, %s16930_s12  ;;  %v17126_v42 = vpack.i.bf16 %v2811_v39, %v2802_v38  ;;  %v2820_v44 = vld.sshfl [vmem:[#allocation1 + $0x1c0] sm:$0xff pattern:$0xb3a29180]   ;;  %v2829_v45 = vld.sshfl [vmem:[#allocation1 + $0x1c4] sm:$0xff pattern:$0xb3a29180]  }
  0x4e   : > { %v2838_v46 = vld.sshfl [vmem:[#allocation1 + $0x1d0] sm:$0xff pattern:$0xb3a29180]   ;;  %v2847_v47 = vld.sshfl [vmem:[#allocation1 + $0x1d4] sm:$0xff pattern:$0xb3a29180]   ;;  %v17130_v50 = vpack.i.bf16 %v2829_v45, %v2820_v44 }
  0x4f   : > { %15773 = vrot.lane.b32.xlu0 %v17106_v28, %s16930_s12  ;;  %v17134_v51 = vpack.i.bf16 %v2847_v47, %v2838_v46  ;;  %v2856_v52 = vld.sshfl [vmem:[#allocation1 + $0x1e0] sm:$0xff pattern:$0xb3a29180]   ;;  %v2865_v53 = vld.sshfl [vmem:[#allocation1 + $0x1e4] sm:$0xff pattern:$0xb3a29180]  }
  0x50   : > { %v2874_v56 = vld.sshfl [vmem:[#allocation1 + $0x1f0] sm:$0xff pattern:$0xb3a29180]   ;;  %v2883_v57 = vld.sshfl [vmem:[#allocation1 + $0x1f4] sm:$0xff pattern:$0xb3a29180]   ;;  %v17138_v58 = vpack.i.bf16 %v2865_v53, %v2856_v52 }
  0x51   : > { %15778 = vrot.lane.b32.xlu1 %v17110_v29, %s16930_s12  ;;  %v17142_v59 = vpack.i.bf16 %v2883_v57, %v2874_v56  ;;  %v2892_v62 = vld.sshfl [vmem:[#allocation1 + $0x200] sm:$0xff pattern:$0xb3a29180]   ;;  %v2901_v63 = vld.sshfl [vmem:[#allocation1 + $0x204] sm:$0xff pattern:$0xb3a29180]  }
  0x52   : > { %v2910_v0 = vld.sshfl [vmem:[#allocation1 + $0x210] sm:$0xff pattern:$0xb3a29180]   ;;  %v2919_v1 = vld.sshfl [vmem:[#allocation1 + $0x214] sm:$0xff pattern:$0xb3a29180]   ;;  %v17146_v3 = vpack.i.bf16 %v2901_v63, %v2892_v62 }
  0x53   : > { %15783 = vrot.lane.b32.xlu0 %v17114_v34, %s16930_s12  ;;  %v17150_v4 = vpack.i.bf16 %v2919_v1, %v2910_v0  ;;  %v2928_v7 = vld.sshfl [vmem:[#allocation1 + $0x220] sm:$0xff pattern:$0xb3a29180]   ;;  %v2937_v8 = vld.sshfl [vmem:[#allocation1 + $0x224] sm:$0xff pattern:$0xb3a29180]  }
  0x54   : > { %v2946_v9 = vld.sshfl [vmem:[#allocation1 + $0x230] sm:$0xff pattern:$0xb3a29180]   ;;  %v2955_v10 = vld.sshfl [vmem:[#allocation1 + $0x234] sm:$0xff pattern:$0xb3a29180]   ;;  %v17154_v11 = vpack.i.bf16 %v2937_v8, %v2928_v7 }
  0x55   : > { %15788 = vrot.lane.b32.xlu1 %v17118_v35, %s16930_s12  ;;  %v17158_v12 = vpack.i.bf16 %v2955_v10, %v2946_v9  ;;  %v2964_v17 = vld.sshfl [vmem:[#allocation1 + $0x240] sm:$0xff pattern:$0xb3a29180]   ;;  %v2973_v18 = vld.sshfl [vmem:[#allocation1 + $0x244] sm:$0xff pattern:$0xb3a29180]  }
  0x56   : > { %v2982_v25 = vld.sshfl [vmem:[#allocation1 + $0x250] sm:$0xff pattern:$0xb3a29180]   ;;  %v2991_v27 = vld.sshfl [vmem:[#allocation1 + $0x254] sm:$0xff pattern:$0xb3a29180]   ;;  %v17162_v30 = vpack.i.bf16 %v2973_v18, %v2964_v17 }
  0x57   : > { %15793 = vrot.lane.b32.xlu0 %v17122_v41, %s16930_s12  ;;  %v17166_v31 = vpack.i.bf16 %v2991_v27, %v2982_v25  ;;  %v3000_v32 = vld.sshfl [vmem:[#allocation1 + $0x260] sm:$0xff pattern:$0xb3a29180]   ;;  %v3009_v33 = vld.sshfl [vmem:[#allocation1 + $0x264] sm:$0xff pattern:$0xb3a29180]  }
  0x58   : > { %v3018_v36 = vld.sshfl [vmem:[#allocation1 + $0x270] sm:$0xff pattern:$0xb3a29180]   ;;  %v3027_v37 = vld.sshfl [vmem:[#allocation1 + $0x274] sm:$0xff pattern:$0xb3a29180]   ;;  %v17170_v38 = vpack.i.bf16 %v3009_v33, %v3000_v32 }
  0x59   : > { %15798 = vrot.lane.b32.xlu1 %v17126_v42, %s16930_s12  ;;  %v17174_v39 = vpack.i.bf16 %v3027_v37, %v3018_v36  ;;  %v3036_v44 = vld.sshfl [vmem:[#allocation1 + $0x280] sm:$0xff pattern:$0xb3a29180]   ;;  %v3045_v45 = vld.sshfl [vmem:[#allocation1 + $0x284] sm:$0xff pattern:$0xb3a29180]  }
  0x5a   : > { %v3054_v46 = vld.sshfl [vmem:[#allocation1 + $0x290] sm:$0xff pattern:$0xb3a29180]   ;;  %v3063_v47 = vld.sshfl [vmem:[#allocation1 + $0x294] sm:$0xff pattern:$0xb3a29180]   ;;  %v17178_v52 = vpack.i.bf16 %v3045_v45, %v3036_v44 }
  0x5b   : > { %15803 = vrot.lane.b32.xlu0 %v17130_v50, %s16930_s12  ;;  %v17182_v53 = vpack.i.bf16 %v3063_v47, %v3054_v46 }
  0x5d   : > { %15808 = vrot.lane.b32.xlu1 %v17134_v51, %s16930_s12 }
  0x5f   : > { %15813 = vrot.lane.b32.xlu0 %v17138_v58, %s16930_s12 }
  0x61   : > { %15818 = vrot.lane.b32.xlu1 %v17142_v59, %s16930_s12 }
  0x63   : > { %15823 = vrot.lane.b32.xlu0 %v17146_v3, %s16930_s12 }
  0x65   : > { %15828 = vrot.lane.b32.xlu1 %v17150_v4, %s16930_s12 }
  0x67   : > { %15833 = vrot.lane.b32.xlu0 %v17154_v11, %s16930_s12 }
  0x69   : > { %15838 = vrot.lane.b32.xlu1 %v17158_v12, %s16930_s12 }
  0x6b   : > { %15843 = vrot.lane.b32.xlu0 %v17162_v30, %s16930_s12 }
  0x6d   : > { %15848 = vrot.lane.b32.xlu1 %v17166_v31, %s16930_s12 }
  0x6f   : > { %15853 = vrot.lane.b32.xlu0 %v17170_v38, %s16930_s12 }
  0x71   : > { %15858 = vrot.lane.b32.xlu1 %v17174_v39, %s16930_s12 }
  0x73   : > { %15863 = vrot.lane.b32.xlu0 %v17178_v52, %s16930_s12 }
  0x75   : > { %15868 = vrot.lane.b32.xlu1 %v17182_v53, %s16930_s12 }
  0x77   : > { %15873 = vrot.lane.b32.xlu0 %v16998_v6, %s16931_s13 }
  0x79   : > { %15878 = vrot.lane.b32.xlu1 %v17008_v20, %s16931_s13 }
  0x7b   : > { %15883 = vrot.lane.b32.xlu0 %v17001_v13, %s16931_s13 }
  0x7d   : > { %15888 = vrot.lane.b32.xlu1 %v17013_v26, %s16931_s13 }
  0x7f   : > { %15893 = vrot.lane.b32.xlu0 %v17022_v40, %s16931_s13 }
  0x81   : > { %15898 = vrot.lane.b32.xlu1 %v17026_v43, %s16931_s13 }
  0x83   : > { %15903 = vrot.lane.b32.xlu0 %v17030_v48, %s16931_s13 }
  0x85   : > { %15908 = vrot.lane.b32.xlu1 %v17034_v49, %s16931_s13 }
  0x87   : > { %15913 = vrot.lane.b32.xlu0 %v17038_v54, %s16931_s13 }
  0x89   : > { %15918 = vrot.lane.b32.xlu1 %v17042_v55, %s16931_s13 }
  0x8b   : > { %15923 = vrot.lane.b32.xlu0 %v17046_v60, %s16931_s13 }
  0x8d   : > { %15928 = vrot.lane.b32.xlu1 %v17050_v61, %s16931_s13 }
  0x8f   : > { %15933 = vrot.lane.b32.xlu0 %v17054_v2, %s16931_s13 }
  0x91   : > { %15938 = vrot.lane.b32.xlu1 %v17058_v5, %s16931_s13 }
  0x93   : > { %15943 = vrot.lane.b32.xlu0 %v17062_v16, %s16931_s13 }
  0x95   : > { %15948 = vrot.lane.b32.xlu1 %v17066_v19, %s16931_s13  ;;  %v15664_v6 = vpop.permute.xlu0 %15663 }
  0x96   : > { %v15666_v13 = vunpack.i.h.bf16 %v15664_v6  ;;  %v15665_v20 = vunpack.i.l.bf16 %v15664_v6 }
  0x97   : > { %v15674_v26 = vpop.permute.xlu1 %15673  ;;  %15953 = vrot.lane.b32.xlu0 %v17068_v21, %s16931_s13 }
  0x98   : > { %v15676_v40 = vunpack.i.h.bf16 %v15674_v26  ;;  %v15675_v43 = vunpack.i.l.bf16 %v15674_v26  ;;  %2330 = vst.msk [vmem:[#allocation0 + $0x41] ss:$8 sm:$0xf] %vm1398_vm0, %v15666_v13   ;;  %2332 = vst.msk [vmem:[#allocation0 + $0x41] ss:$8 sm:$0xf0] %vm1398_vm0, %v15666_v13  }
  0x99   : > { %2321 = vst.msk [vmem:[#allocation0 + $0x1] ss:$8 sm:$0xf] %vm1398_vm0, %v15665_v20   ;;  %2323 = vst.msk [vmem:[#allocation0 + $0x1] ss:$8 sm:$0xf0] %vm1398_vm0, %v15665_v20   ;;  %15958 = vrot.lane.b32.xlu1 %v17070_v22, %s16931_s13  ;;  %v15669_v48 = vpop.permute.xlu0 %15668 }
  0x9a   : > { %2366 = vst.msk [vmem:[#allocation0 + $0x141] ss:$8 sm:$0xf] %vm1398_vm0, %v15676_v40   ;;  %2368 = vst.msk [vmem:[#allocation0 + $0x141] ss:$8 sm:$0xf0] %vm1398_vm0, %v15676_v40   ;;  %v15671_v49 = vunpack.i.h.bf16 %v15669_v48  ;;  %v15670_v54 = vunpack.i.l.bf16 %v15669_v48 }
  0x9b   : > { %2357 = vst.msk [vmem:[#allocation0 + $0x101] ss:$8 sm:$0xf] %vm1398_vm0, %v15675_v43   ;;  %2359 = vst.msk [vmem:[#allocation0 + $0x101] ss:$8 sm:$0xf0] %vm1398_vm0, %v15675_v43   ;;  %v15679_v55 = vpop.permute.xlu1 %15678  ;;  %15963 = vrot.lane.b32.xlu0 %v17072_v23, %s16931_s13 }
  0x9c   : > { %v15681_v60 = vunpack.i.h.bf16 %v15679_v55  ;;  %v15680_v61 = vunpack.i.l.bf16 %v15679_v55  ;;  %2348 = vst.msk [vmem:[#allocation0 + $0xc1] ss:$8 sm:$0xf] %vm1398_vm0, %v15671_v49   ;;  %2350 = vst.msk [vmem:[#allocation0 + $0xc1] ss:$8 sm:$0xf0] %vm1398_vm0, %v15671_v49  }
  0x9d   : > { %2339 = vst.msk [vmem:[#allocation0 + $0x81] ss:$8 sm:$0xf] %vm1398_vm0, %v15670_v54   ;;  %2341 = vst.msk [vmem:[#allocation0 + $0x81] ss:$8 sm:$0xf0] %vm1398_vm0, %v15670_v54   ;;  %15968 = vrot.lane.b32.xlu1 %v17074_v24, %s16931_s13  ;;  %v15684_v2 = vpop.permute.xlu0 %15683 }
  0x9e   : > { %2384 = vst.msk [vmem:[#allocation0 + $0x1c1] ss:$8 sm:$0xf] %vm1398_vm0, %v15681_v60   ;;  %2386 = vst.msk [vmem:[#allocation0 + $0x1c1] ss:$8 sm:$0xf0] %vm1398_vm0, %v15681_v60   ;;  %v15686_v5 = vunpack.i.h.bf16 %v15684_v2  ;;  %v15685_v16 = vunpack.i.l.bf16 %v15684_v2 }
  0x9f   : > { %2375 = vst.msk [vmem:[#allocation0 + $0x181] ss:$8 sm:$0xf] %vm1398_vm0, %v15680_v61   ;;  %2377 = vst.msk [vmem:[#allocation0 + $0x181] ss:$8 sm:$0xf0] %vm1398_vm0, %v15680_v61   ;;  %v15689_v19 = vpop.permute.xlu1 %15688  ;;  %15973 = vrot.lane.b32.xlu0 %v17098_v14, %s16931_s13 }
  0xa0   : > { %v15691_v21 = vunpack.i.h.bf16 %v15689_v19  ;;  %v15690_v22 = vunpack.i.l.bf16 %v15689_v19  ;;  %2402 = vst.msk [vmem:[#allocation0 + $0x241] ss:$8 sm:$0xf] %vm1398_vm0, %v15686_v5   ;;  %2404 = vst.msk [vmem:[#allocation0 + $0x241] ss:$8 sm:$0xf0] %vm1398_vm0, %v15686_v5  }
  0xa1   : > { %2393 = vst.msk [vmem:[#allocation0 + $0x201] ss:$8 sm:$0xf] %vm1398_vm0, %v15685_v16   ;;  %2395 = vst.msk [vmem:[#allocation0 + $0x201] ss:$8 sm:$0xf0] %vm1398_vm0, %v15685_v16   ;;  %15978 = vrot.lane.b32.xlu1 %v17102_v15, %s16931_s13  ;;  %v15694_v23 = vpop.permute.xlu0 %15693 }
  0xa2   : > { %2420 = vst.msk [vmem:[#allocation0 + $0x2c1] ss:$8 sm:$0xf] %vm1398_vm0, %v15691_v21   ;;  %2422 = vst.msk [vmem:[#allocation0 + $0x2c1] ss:$8 sm:$0xf0] %vm1398_vm0, %v15691_v21   ;;  %v15696_v24 = vunpack.i.h.bf16 %v15694_v23  ;;  %v15695_v14 = vunpack.i.l.bf16 %v15694_v23 }
  0xa3   : > { %2411 = vst.msk [vmem:[#allocation0 + $0x281] ss:$8 sm:$0xf] %vm1398_vm0, %v15690_v22   ;;  %2413 = vst.msk [vmem:[#allocation0 + $0x281] ss:$8 sm:$0xf0] %vm1398_vm0, %v15690_v22   ;;  %v15699_v15 = vpop.permute.xlu1 %15698  ;;  %15983 = vrot.lane.b32.xlu0 %v17106_v28, %s16931_s13 }
  0xa4   : > { %v15701_v56 = vunpack.i.h.bf16 %v15699_v15  ;;  %v15700_v57 = vunpack.i.l.bf16 %v15699_v15  ;;  %2438 = vst.msk [vmem:[#allocation0 + $0x341] ss:$8 sm:$0xf] %vm1398_vm0, %v15696_v24   ;;  %2440 = vst.msk [vmem:[#allocation0 + $0x341] ss:$8 sm:$0xf0] %vm1398_vm0, %v15696_v24  }
  0xa5   : > { %2429 = vst.msk [vmem:[#allocation0 + $0x301] ss:$8 sm:$0xf] %vm1398_vm0, %v15695_v14   ;;  %2431 = vst.msk [vmem:[#allocation0 + $0x301] ss:$8 sm:$0xf0] %vm1398_vm0, %v15695_v14   ;;  %15988 = vrot.lane.b32.xlu1 %v17110_v29, %s16931_s13  ;;  %v15704_v28 = vpop.permute.xlu0 %15703 }
  0xa6   : > { %2456 = vst.msk [vmem:[#allocation0 + $0x3c1] ss:$8 sm:$0xf] %vm1398_vm0, %v15701_v56   ;;  %2458 = vst.msk [vmem:[#allocation0 + $0x3c1] ss:$8 sm:$0xf0] %vm1398_vm0, %v15701_v56   ;;  %v15706_v29 = vunpack.i.h.bf16 %v15704_v28  ;;  %v15705_v62 = vunpack.i.l.bf16 %v15704_v28 }
  0xa7   : > { %2447 = vst.msk [vmem:[#allocation0 + $0x381] ss:$8 sm:$0xf] %vm1398_vm0, %v15700_v57   ;;  %2449 = vst.msk [vmem:[#allocation0 + $0x381] ss:$8 sm:$0xf0] %vm1398_vm0, %v15700_v57   ;;  %v15709_v63 = vpop.permute.xlu1 %15708  ;;  %15993 = vrot.lane.b32.xlu0 %v17114_v34, %s16931_s13 }
  0xa8   : > { %v15711_v0 = vunpack.i.h.bf16 %v15709_v63  ;;  %v15710_v1 = vunpack.i.l.bf16 %v15709_v63  ;;  %2474 = vst.msk [vmem:[#allocation0 + $0x441] ss:$8 sm:$0xf] %vm1398_vm0, %v15706_v29   ;;  %2476 = vst.msk [vmem:[#allocation0 + $0x441] ss:$8 sm:$0xf0] %vm1398_vm0, %v15706_v29  }
  0xa9   : > { %2465 = vst.msk [vmem:[#allocation0 + $0x401] ss:$8 sm:$0xf] %vm1398_vm0, %v15705_v62   ;;  %2467 = vst.msk [vmem:[#allocation0 + $0x401] ss:$8 sm:$0xf0] %vm1398_vm0, %v15705_v62   ;;  %15998 = vrot.lane.b32.xlu1 %v17118_v35, %s16931_s13  ;;  %v15714_v34 = vpop.permute.xlu0 %15713 }
  0xaa   : > { %2492 = vst.msk [vmem:[#allocation0 + $0x4c1] ss:$8 sm:$0xf] %vm1398_vm0, %v15711_v0   ;;  %2494 = vst.msk [vmem:[#allocation0 + $0x4c1] ss:$8 sm:$0xf0] %vm1398_vm0, %v15711_v0   ;;  %v15716_v35 = vunpack.i.h.bf16 %v15714_v34  ;;  %v15715_v7 = vunpack.i.l.bf16 %v15714_v34 }
  0xab   : > { %2483 = vst.msk [vmem:[#allocation0 + $0x481] ss:$8 sm:$0xf] %vm1398_vm0, %v15710_v1   ;;  %2485 = vst.msk [vmem:[#allocation0 + $0x481] ss:$8 sm:$0xf0] %vm1398_vm0, %v15710_v1   ;;  %v15719_v8 = vpop.permute.xlu1 %15718  ;;  %16003 = vrot.lane.b32.xlu0 %v17122_v41, %s16931_s13 }
  0xac   : > { %v15721_v9 = vunpack.i.h.bf16 %v15719_v8  ;;  %v15720_v10 = vunpack.i.l.bf16 %v15719_v8  ;;  %2510 = vst.msk [vmem:[#allocation0 + $0x541] ss:$8 sm:$0xf] %vm1398_vm0, %v15716_v35   ;;  %2512 = vst.msk [vmem:[#allocation0 + $0x541] ss:$8 sm:$0xf0] %vm1398_vm0, %v15716_v35  }
  0xad   : > { %2501 = vst.msk [vmem:[#allocation0 + $0x501] ss:$8 sm:$0xf] %vm1398_vm0, %v15715_v7   ;;  %2503 = vst.msk [vmem:[#allocation0 + $0x501] ss:$8 sm:$0xf0] %vm1398_vm0, %v15715_v7   ;;  %16008 = vrot.lane.b32.xlu1 %v17126_v42, %s16931_s13  ;;  %v15724_v41 = vpop.permute.xlu0 %15723 }
  0xae   : > { %2528 = vst.msk [vmem:[#allocation0 + $0x5c1] ss:$8 sm:$0xf] %vm1398_vm0, %v15721_v9   ;;  %2530 = vst.msk [vmem:[#allocation0 + $0x5c1] ss:$8 sm:$0xf0] %vm1398_vm0, %v15721_v9   ;;  %v15726_v42 = vunpack.i.h.bf16 %v15724_v41  ;;  %v15725_v17 = vunpack.i.l.bf16 %v15724_v41 }
  0xaf   : > { %2519 = vst.msk [vmem:[#allocation0 + $0x581] ss:$8 sm:$0xf] %vm1398_vm0, %v15720_v10   ;;  %2521 = vst.msk [vmem:[#allocation0 + $0x581] ss:$8 sm:$0xf0] %vm1398_vm0, %v15720_v10   ;;  %v15729_v18 = vpop.permute.xlu1 %15728  ;;  %16013 = vrot.lane.b32.xlu0 %v17130_v50, %s16931_s13 }
  0xb0   : > { %v15731_v25 = vunpack.i.h.bf16 %v15729_v18  ;;  %v15730_v27 = vunpack.i.l.bf16 %v15729_v18  ;;  %2546 = vst.msk [vmem:[#allocation0 + $0x641] ss:$8 sm:$0xf] %vm1398_vm0, %v15726_v42   ;;  %2548 = vst.msk [vmem:[#allocation0 + $0x641] ss:$8 sm:$0xf0] %vm1398_vm0, %v15726_v42  }
  0xb1   : > { %2537 = vst.msk [vmem:[#allocation0 + $0x601] ss:$8 sm:$0xf] %vm1398_vm0, %v15725_v17   ;;  %2539 = vst.msk [vmem:[#allocation0 + $0x601] ss:$8 sm:$0xf0] %vm1398_vm0, %v15725_v17   ;;  %16018 = vrot.lane.b32.xlu1 %v17134_v51, %s16931_s13  ;;  %v15734_v50 = vpop.permute.xlu0 %15733 }
  0xb2   : > { %2564 = vst.msk [vmem:[#allocation0 + $0x6c1] ss:$8 sm:$0xf] %vm1398_vm0, %v15731_v25   ;;  %2566 = vst.msk [vmem:[#allocation0 + $0x6c1] ss:$8 sm:$0xf0] %vm1398_vm0, %v15731_v25   ;;  %v15736_v51 = vunpack.i.h.bf16 %v15734_v50  ;;  %v15735_v32 = vunpack.i.l.bf16 %v15734_v50 }
  0xb3   : > { %2555 = vst.msk [vmem:[#allocation0 + $0x681] ss:$8 sm:$0xf] %vm1398_vm0, %v15730_v27   ;;  %2557 = vst.msk [vmem:[#allocation0 + $0x681] ss:$8 sm:$0xf0] %vm1398_vm0, %v15730_v27   ;;  %v15739_v33 = vpop.permute.xlu1 %15738  ;;  %16023 = vrot.lane.b32.xlu0 %v17138_v58, %s16931_s13 }
  0xb4   : > { %v15741_v36 = vunpack.i.h.bf16 %v15739_v33  ;;  %v15740_v37 = vunpack.i.l.bf16 %v15739_v33  ;;  %2582 = vst.msk [vmem:[#allocation0 + $0x741] ss:$8 sm:$0xf] %vm1398_vm0, %v15736_v51   ;;  %2584 = vst.msk [vmem:[#allocation0 + $0x741] ss:$8 sm:$0xf0] %vm1398_vm0, %v15736_v51  }
  0xb5   : > { %2573 = vst.msk [vmem:[#allocation0 + $0x701] ss:$8 sm:$0xf] %vm1398_vm0, %v15735_v32   ;;  %2575 = vst.msk [vmem:[#allocation0 + $0x701] ss:$8 sm:$0xf0] %vm1398_vm0, %v15735_v32   ;;  %16028 = vrot.lane.b32.xlu1 %v17142_v59, %s16931_s13  ;;  %v15744_v58 = vpop.permute.xlu0 %15743 }
  0xb6   : > { %2600 = vst.msk [vmem:[#allocation0 + $0x7c1] ss:$8 sm:$0xf] %vm1398_vm0, %v15741_v36   ;;  %2602 = vst.msk [vmem:[#allocation0 + $0x7c1] ss:$8 sm:$0xf0] %vm1398_vm0, %v15741_v36   ;;  %v15746_v59 = vunpack.i.h.bf16 %v15744_v58  ;;  %v15745_v44 = vunpack.i.l.bf16 %v15744_v58 }
  0xb7   : > { %2591 = vst.msk [vmem:[#allocation0 + $0x781] ss:$8 sm:$0xf] %vm1398_vm0, %v15740_v37   ;;  %2593 = vst.msk [vmem:[#allocation0 + $0x781] ss:$8 sm:$0xf0] %vm1398_vm0, %v15740_v37   ;;  %v15749_v45 = vpop.permute.xlu1 %15748  ;;  %16033 = vrot.lane.b32.xlu0 %v17146_v3, %s16931_s13 }
  0xb8   : > { %v15751_v46 = vunpack.i.h.bf16 %v15749_v45  ;;  %v15750_v47 = vunpack.i.l.bf16 %v15749_v45  ;;  %2618 = vst.msk [vmem:[#allocation0 + $0x841] ss:$8 sm:$0xf] %vm1398_vm0, %v15746_v59   ;;  %2620 = vst.msk [vmem:[#allocation0 + $0x841] ss:$8 sm:$0xf0] %vm1398_vm0, %v15746_v59  }
  0xb9   : > { %2609 = vst.msk [vmem:[#allocation0 + $0x801] ss:$8 sm:$0xf] %vm1398_vm0, %v15745_v44   ;;  %2611 = vst.msk [vmem:[#allocation0 + $0x801] ss:$8 sm:$0xf0] %vm1398_vm0, %v15745_v44   ;;  %16038 = vrot.lane.b32.xlu1 %v17150_v4, %s16931_s13  ;;  %v15754_v3 = vpop.permute.xlu0 %15753 }
  0xba   : > { %2636 = vst.msk [vmem:[#allocation0 + $0x8c1] ss:$8 sm:$0xf] %vm1398_vm0, %v15751_v46   ;;  %2638 = vst.msk [vmem:[#allocation0 + $0x8c1] ss:$8 sm:$0xf0] %vm1398_vm0, %v15751_v46   ;;  %v15756_v4 = vunpack.i.h.bf16 %v15754_v3  ;;  %v15755_v6 = vunpack.i.l.bf16 %v15754_v3 }
  0xbb   : > { %2627 = vst.msk [vmem:[#allocation0 + $0x881] ss:$8 sm:$0xf] %vm1398_vm0, %v15750_v47   ;;  %2629 = vst.msk [vmem:[#allocation0 + $0x881] ss:$8 sm:$0xf0] %vm1398_vm0, %v15750_v47   ;;  %v15759_v13 = vpop.permute.xlu1 %15758  ;;  %16043 = vrot.lane.b32.xlu0 %v17154_v11, %s16931_s13 }
  0xbc   : > { %v15761_v20 = vunpack.i.h.bf16 %v15759_v13  ;;  %v15760_v26 = vunpack.i.l.bf16 %v15759_v13  ;;  %2654 = vst.msk [vmem:[#allocation0 + $0x941] ss:$8 sm:$0xf] %vm1398_vm0, %v15756_v4   ;;  %2656 = vst.msk [vmem:[#allocation0 + $0x941] ss:$8 sm:$0xf0] %vm1398_vm0, %v15756_v4  }
  0xbd   : > { %2645 = vst.msk [vmem:[#allocation0 + $0x901] ss:$8 sm:$0xf] %vm1398_vm0, %v15755_v6   ;;  %2647 = vst.msk [vmem:[#allocation0 + $0x901] ss:$8 sm:$0xf0] %vm1398_vm0, %v15755_v6   ;;  %16048 = vrot.lane.b32.xlu1 %v17158_v12, %s16931_s13  ;;  %v15764_v11 = vpop.permute.xlu0 %15763 }
  0xbe   : > { %2672 = vst.msk [vmem:[#allocation0 + $0x9c1] ss:$8 sm:$0xf] %vm1398_vm0, %v15761_v20   ;;  %2674 = vst.msk [vmem:[#allocation0 + $0x9c1] ss:$8 sm:$0xf0] %vm1398_vm0, %v15761_v20   ;;  %v15766_v12 = vunpack.i.h.bf16 %v15764_v11  ;;  %v15765_v40 = vunpack.i.l.bf16 %v15764_v11 }
  0xbf   : > { %2663 = vst.msk [vmem:[#allocation0 + $0x981] ss:$8 sm:$0xf] %vm1398_vm0, %v15760_v26   ;;  %2665 = vst.msk [vmem:[#allocation0 + $0x981] ss:$8 sm:$0xf0] %vm1398_vm0, %v15760_v26   ;;  %v15769_v43 = vpop.permute.xlu1 %15768  ;;  %16053 = vrot.lane.b32.xlu0 %v17162_v30, %s16931_s13 }
  0xc0   : > { %v15771_v48 = vunpack.i.h.bf16 %v15769_v43  ;;  %v15770_v49 = vunpack.i.l.bf16 %v15769_v43  ;;  %2690 = vst.msk [vmem:[#allocation0 + $0xa41] ss:$8 sm:$0xf] %vm1398_vm0, %v15766_v12   ;;  %2692 = vst.msk [vmem:[#allocation0 + $0xa41] ss:$8 sm:$0xf0] %vm1398_vm0, %v15766_v12  }
  0xc1   : > { %2681 = vst.msk [vmem:[#allocation0 + $0xa01] ss:$8 sm:$0xf] %vm1398_vm0, %v15765_v40   ;;  %2683 = vst.msk [vmem:[#allocation0 + $0xa01] ss:$8 sm:$0xf0] %vm1398_vm0, %v15765_v40   ;;  %16058 = vrot.lane.b32.xlu1 %v17166_v31, %s16931_s13  ;;  %v15774_v30 = vpop.permute.xlu0 %15773 }
  0xc2   : > { %2708 = vst.msk [vmem:[#allocation0 + $0xac1] ss:$8 sm:$0xf] %vm1398_vm0, %v15771_v48   ;;  %2710 = vst.msk [vmem:[#allocation0 + $0xac1] ss:$8 sm:$0xf0] %vm1398_vm0, %v15771_v48   ;;  %v15776_v31 = vunpack.i.h.bf16 %v15774_v30  ;;  %v15775_v54 = vunpack.i.l.bf16 %v15774_v30 }
  0xc3   : > { %2699 = vst.msk [vmem:[#allocation0 + $0xa81] ss:$8 sm:$0xf] %vm1398_vm0, %v15770_v49   ;;  %2701 = vst.msk [vmem:[#allocation0 + $0xa81] ss:$8 sm:$0xf0] %vm1398_vm0, %v15770_v49   ;;  %v15779_v55 = vpop.permute.xlu1 %15778  ;;  %16063 = vrot.lane.b32.xlu0 %v17170_v38, %s16931_s13 }
  0xc4   : > { %v15781_v60 = vunpack.i.h.bf16 %v15779_v55  ;;  %v15780_v61 = vunpack.i.l.bf16 %v15779_v55  ;;  %2726 = vst.msk [vmem:[#allocation0 + $0xb41] ss:$8 sm:$0xf] %vm1398_vm0, %v15776_v31   ;;  %2728 = vst.msk [vmem:[#allocation0 + $0xb41] ss:$8 sm:$0xf0] %vm1398_vm0, %v15776_v31  }
  0xc5   : > { %2717 = vst.msk [vmem:[#allocation0 + $0xb01] ss:$8 sm:$0xf] %vm1398_vm0, %v15775_v54   ;;  %2719 = vst.msk [vmem:[#allocation0 + $0xb01] ss:$8 sm:$0xf0] %vm1398_vm0, %v15775_v54   ;;  %16068 = vrot.lane.b32.xlu1 %v17174_v39, %s16931_s13  ;;  %v15784_v2 = vpop.permute.xlu0 %15783 }
  0xc6   : > { %v3826_v38 = vld.sshfl [vmem:[#allocation1] sm:$0xff pattern:$0xb3a29180]   ;;  %v3835_v39 = vld.sshfl [vmem:[#allocation1 + $0x4] sm:$0xff pattern:$0xb3a29180]   ;;  %v15786_v19 = vunpack.i.h.bf16 %v15784_v2  ;;  %v15785_v21 = vunpack.i.l.bf16 %v15784_v2 }
  0xc7   : > { %2744 = vst.msk [vmem:[#allocation0 + $0xbc1] ss:$8 sm:$0xf] %vm1398_vm0, %v15781_v60   ;;  %2746 = vst.msk [vmem:[#allocation0 + $0xbc1] ss:$8 sm:$0xf0] %vm1398_vm0, %v15781_v60   ;;  %v15789_v22 = vpop.permute.xlu1 %15788  ;;  %16073 = vrot.lane.b32.xlu0 %v17178_v52, %s16931_s13  ;;  %v17366_v52 = vpack.i.bf16 %v3835_v39, %v3826_v38 }
  0xc8   : > { %2735 = vst.msk [vmem:[#allocation0 + $0xb81] ss:$8 sm:$0xf] %vm1398_vm0, %v15780_v61   ;;  %2737 = vst.msk [vmem:[#allocation0 + $0xb81] ss:$8 sm:$0xf0] %vm1398_vm0, %v15780_v61   ;;  %v15791_v23 = vunpack.i.h.bf16 %v15789_v22  ;;  %v15790_v24 = vunpack.i.l.bf16 %v15789_v22 }
  0xc9   : > { %v3844_v5 = vld.sshfl [vmem:[#allocation1 + $0x10] sm:$0xff pattern:$0xb3a29180]   ;;  %v3853_v16 = vld.sshfl [vmem:[#allocation1 + $0x14] sm:$0xff pattern:$0xb3a29180]   ;;  %16078 = vrot.lane.b32.xlu1 %v17182_v53, %s16931_s13  ;;  %v15794_v56 = vpop.permute.xlu0 %15793 }
  0xca   : > { %2762 = vst.msk [vmem:[#allocation0 + $0xc41] ss:$8 sm:$0xf] %vm1398_vm0, %v15786_v19   ;;  %2764 = vst.msk [vmem:[#allocation0 + $0xc41] ss:$8 sm:$0xf0] %vm1398_vm0, %v15786_v19   ;;  %v17374_v53 = vpack.i.bf16 %v3853_v16, %v3844_v5  ;;  %v15796_v29 = vunpack.i.h.bf16 %v15794_v56  ;;  %v15795_v62 = vunpack.i.l.bf16 %v15794_v56 }
  0xcb   : > { %2753 = vst.msk [vmem:[#allocation0 + $0xc01] ss:$8 sm:$0xf] %vm1398_vm0, %v15785_v21   ;;  %2755 = vst.msk [vmem:[#allocation0 + $0xc01] ss:$8 sm:$0xf0] %vm1398_vm0, %v15785_v21   ;;  %v15799_v63 = vpop.permute.xlu1 %15798  ;;  %16083 = vrot.lane.b32.xlu0 %v17366_v52, %s16932_s14 }
  0xcc   : > { %v3862_v14 = vld.sshfl [vmem:[#allocation1 + $0x20] sm:$0xff pattern:$0xb3a29180]   ;;  %v3871_v15 = vld.sshfl [vmem:[#allocation1 + $0x24] sm:$0xff pattern:$0xb3a29180]   ;;  %v15801_v0 = vunpack.i.h.bf16 %v15799_v63  ;;  %v15800_v1 = vunpack.i.l.bf16 %v15799_v63 }
  0xcd   : > { %2780 = vst.msk [vmem:[#allocation0 + $0xcc1] ss:$8 sm:$0xf] %vm1398_vm0, %v15791_v23   ;;  %2782 = vst.msk [vmem:[#allocation0 + $0xcc1] ss:$8 sm:$0xf0] %vm1398_vm0, %v15791_v23   ;;  %v17382_v34 = vpack.i.bf16 %v3871_v15, %v3862_v14  ;;  %16088 = vrot.lane.b32.xlu1 %v17374_v53, %s16932_s14  ;;  %v15804_v9 = vpop.permute.xlu0 %15803 }
  0xce   : > { %2771 = vst.msk [vmem:[#allocation0 + $0xc81] ss:$8 sm:$0xf] %vm1398_vm0, %v15790_v24   ;;  %2773 = vst.msk [vmem:[#allocation0 + $0xc81] ss:$8 sm:$0xf0] %vm1398_vm0, %v15790_v24   ;;  %v15806_v42 = vunpack.i.h.bf16 %v15804_v9  ;;  %v15805_v17 = vunpack.i.l.bf16 %v15804_v9 }
  0xcf   : > { %v3880_v57 = vld.sshfl [vmem:[#allocation1 + $0x30] sm:$0xff pattern:$0xb3a29180]   ;;  %v3889_v28 = vld.sshfl [vmem:[#allocation1 + $0x34] sm:$0xff pattern:$0xb3a29180]   ;;  %v15809_v18 = vpop.permute.xlu1 %15808  ;;  %16093 = vrot.lane.b32.xlu0 %v17382_v34, %s16932_s14 }
  0xd0   : > { %2798 = vst.msk [vmem:[#allocation0 + $0xd41] ss:$8 sm:$0xf] %vm1398_vm0, %v15796_v29   ;;  %2800 = vst.msk [vmem:[#allocation0 + $0xd41] ss:$8 sm:$0xf0] %vm1398_vm0, %v15796_v29   ;;  %v17390_v35 = vpack.i.bf16 %v3889_v28, %v3880_v57  ;;  %v15811_v25 = vunpack.i.h.bf16 %v15809_v18  ;;  %v15810_v27 = vunpack.i.l.bf16 %v15809_v18 }
  0xd1   : > { %2789 = vst.msk [vmem:[#allocation0 + $0xd01] ss:$8 sm:$0xf] %vm1398_vm0, %v15795_v62   ;;  %2791 = vst.msk [vmem:[#allocation0 + $0xd01] ss:$8 sm:$0xf0] %vm1398_vm0, %v15795_v62   ;;  %v15814_v36 = vpop.permute.xlu0 %15813 }
  0xd2   : > { %v3898_v7 = vld.sshfl [vmem:[#allocation1 + $0x40] sm:$0xff pattern:$0xb3a29180]   ;;  %v3907_v8 = vld.sshfl [vmem:[#allocation1 + $0x44] sm:$0xff pattern:$0xb3a29180]   ;;  %16098 = vrot.lane.b32.xlu1 %v17390_v35, %s16932_s14  ;;  %v15816_v59 = vunpack.i.h.bf16 %v15814_v36  ;;  %v15815_v44 = vunpack.i.l.bf16 %v15814_v36 }
  0xd3   : > { %2816 = vst.msk [vmem:[#allocation0 + $0xdc1] ss:$8 sm:$0xf] %vm1398_vm0, %v15801_v0   ;;  %2818 = vst.msk [vmem:[#allocation0 + $0xdc1] ss:$8 sm:$0xf0] %vm1398_vm0, %v15801_v0   ;;  %v17398_v50 = vpack.i.bf16 %v3907_v8, %v3898_v7  ;;  %v15819_v45 = vpop.permute.xlu1 %15818 }
  0xd4   : > { %2807 = vst.msk [vmem:[#allocation0 + $0xd81] ss:$8 sm:$0xf] %vm1398_vm0, %v15800_v1   ;;  %2809 = vst.msk [vmem:[#allocation0 + $0xd81] ss:$8 sm:$0xf0] %vm1398_vm0, %v15800_v1   ;;  %v15821_v46 = vunpack.i.h.bf16 %v15819_v45  ;;  %v15820_v47 = vunpack.i.l.bf16 %v15819_v45 }
  0xd5   : > { %v3916_v10 = vld.sshfl [vmem:[#allocation1 + $0x50] sm:$0xff pattern:$0xb3a29180]   ;;  %v3925_v41 = vld.sshfl [vmem:[#allocation1 + $0x54] sm:$0xff pattern:$0xb3a29180]   ;;  %16103 = vrot.lane.b32.xlu0 %v17398_v50, %s16932_s14  ;;  %v15824_v20 = vpop.permute.xlu0 %15823 }
  0xd6   : > { %2834 = vst.msk [vmem:[#allocation0 + $0xe41] ss:$8 sm:$0xf] %vm1398_vm0, %v15806_v42   ;;  %2836 = vst.msk [vmem:[#allocation0 + $0xe41] ss:$8 sm:$0xf0] %vm1398_vm0, %v15806_v42   ;;  %v17406_v51 = vpack.i.bf16 %v3925_v41, %v3916_v10  ;;  %v15826_v12 = vunpack.i.h.bf16 %v15824_v20  ;;  %v15825_v40 = vunpack.i.l.bf16 %v15824_v20 }
  0xd7   : > { %2825 = vst.msk [vmem:[#allocation0 + $0xe01] ss:$8 sm:$0xf] %vm1398_vm0, %v15805_v17   ;;  %2827 = vst.msk [vmem:[#allocation0 + $0xe01] ss:$8 sm:$0xf0] %vm1398_vm0, %v15805_v17   ;;  %v15829_v43 = vpop.permute.xlu1 %15828 }
  0xd8   : > { %v3934_v32 = vld.sshfl [vmem:[#allocation1 + $0x60] sm:$0xff pattern:$0xb3a29180]   ;;  %v3943_v33 = vld.sshfl [vmem:[#allocation1 + $0x64] sm:$0xff pattern:$0xb3a29180]   ;;  %16108 = vrot.lane.b32.xlu1 %v17406_v51, %s16932_s14  ;;  %v15831_v48 = vunpack.i.h.bf16 %v15829_v43  ;;  %v15830_v49 = vunpack.i.l.bf16 %v15829_v43 }
  0xd9   : > { %2852 = vst.msk [vmem:[#allocation0 + $0xec1] ss:$8 sm:$0xf] %vm1398_vm0, %v15811_v25   ;;  %2854 = vst.msk [vmem:[#allocation0 + $0xec1] ss:$8 sm:$0xf0] %vm1398_vm0, %v15811_v25   ;;  %v17414_v3 = vpack.i.bf16 %v3943_v33, %v3934_v32  ;;  %v15834_v60 = vpop.permute.xlu0 %15833 }
  0xda   : > { %2843 = vst.msk [vmem:[#allocation0 + $0xe81] ss:$8 sm:$0xf] %vm1398_vm0, %v15810_v27   ;;  %2845 = vst.msk [vmem:[#allocation0 + $0xe81] ss:$8 sm:$0xf0] %vm1398_vm0, %v15810_v27   ;;  %v15836_v39 = vunpack.i.h.bf16 %v15834_v60  ;;  %v15835_v2 = vunpack.i.l.bf16 %v15834_v60 }
  0xdb   : > { %v3952_v37 = vld.sshfl [vmem:[#allocation1 + $0x70] sm:$0xff pattern:$0xb3a29180]   ;;  %v3961_v58 = vld.sshfl [vmem:[#allocation1 + $0x74] sm:$0xff pattern:$0xb3a29180]   ;;  %16113 = vrot.lane.b32.xlu0 %v17414_v3, %s16932_s14  ;;  %v15839_v5 = vpop.permute.xlu1 %15838 }
  0xdc   : > { %2870 = vst.msk [vmem:[#allocation0 + $0xf41] ss:$8 sm:$0xf] %vm1398_vm0, %v15816_v59   ;;  %2872 = vst.msk [vmem:[#allocation0 + $0xf41] ss:$8 sm:$0xf0] %vm1398_vm0, %v15816_v59   ;;  %v17422_v4 = vpack.i.bf16 %v3961_v58, %v3952_v37  ;;  %v15841_v16 = vunpack.i.h.bf16 %v15839_v5  ;;  %v15840_v19 = vunpack.i.l.bf16 %v15839_v5 }
  0xdd   : > { %2861 = vst.msk [vmem:[#allocation0 + $0xf01] ss:$8 sm:$0xf] %vm1398_vm0, %v15815_v44   ;;  %2863 = vst.msk [vmem:[#allocation0 + $0xf01] ss:$8 sm:$0xf0] %vm1398_vm0, %v15815_v44   ;;  %v15844_v14 = vpop.permute.xlu0 %15843 }
  0xde   : > { %v3970_v6 = vld.sshfl [vmem:[#allocation1 + $0x80] sm:$0xff pattern:$0xb3a29180]   ;;  %v3979_v13 = vld.sshfl [vmem:[#allocation1 + $0x84] sm:$0xff pattern:$0xb3a29180]   ;;  %16118 = vrot.lane.b32.xlu1 %v17422_v4, %s16932_s14  ;;  %v15846_v57 = vunpack.i.h.bf16 %v15844_v14  ;;  %v15845_v28 = vunpack.i.l.bf16 %v15844_v14 }
  0xdf   : > { %2888 = vst.msk [vmem:[#allocation0 + $0xfc1] ss:$8 sm:$0xf] %vm1398_vm0, %v15821_v46   ;;  %2890 = vst.msk [vmem:[#allocation0 + $0xfc1] ss:$8 sm:$0xf0] %vm1398_vm0, %v15821_v46   ;;  %v17430_v30 = vpack.i.bf16 %v3979_v13, %v3970_v6  ;;  %v15849_v29 = vpop.permute.xlu1 %15848 }
  0xe0   : > { %2879 = vst.msk [vmem:[#allocation0 + $0xf81] ss:$8 sm:$0xf] %vm1398_vm0, %v15820_v47   ;;  %2881 = vst.msk [vmem:[#allocation0 + $0xf81] ss:$8 sm:$0xf0] %vm1398_vm0, %v15820_v47   ;;  %v15851_v62 = vunpack.i.h.bf16 %v15849_v29  ;;  %v15850_v63 = vunpack.i.l.bf16 %v15849_v29 }
  0xe1   : > { %v3988_v26 = vld.sshfl [vmem:[#allocation1 + $0x90] sm:$0xff pattern:$0xb3a29180]   ;;  %v3997_v11 = vld.sshfl [vmem:[#allocation1 + $0x94] sm:$0xff pattern:$0xb3a29180]   ;;  %16123 = vrot.lane.b32.xlu0 %v17430_v30, %s16932_s14  ;;  %v15854_v9 = vpop.permute.xlu0 %15853 }
  0xe2   : > { %2906 = vst.msk [vmem:[#allocation0 + $0x1041] ss:$8 sm:$0xf] %vm1398_vm0, %v15826_v12   ;;  %2908 = vst.msk [vmem:[#allocation0 + $0x1041] ss:$8 sm:$0xf0] %vm1398_vm0, %v15826_v12   ;;  %v17438_v31 = vpack.i.bf16 %v3997_v11, %v3988_v26  ;;  %v15856_v42 = vunpack.i.h.bf16 %v15854_v9  ;;  %v15855_v17 = vunpack.i.l.bf16 %v15854_v9 }
  0xe3   : > { %2897 = vst.msk [vmem:[#allocation0 + $0x1001] ss:$8 sm:$0xf] %vm1398_vm0, %v15825_v40   ;;  %2899 = vst.msk [vmem:[#allocation0 + $0x1001] ss:$8 sm:$0xf0] %vm1398_vm0, %v15825_v40   ;;  %v15859_v18 = vpop.permute.xlu1 %15858 }
  0xe4   : > { %v4006_v54 = vld.sshfl [vmem:[#allocation1 + $0xa0] sm:$0xff pattern:$0xb3a29180]   ;;  %v4015_v55 = vld.sshfl [vmem:[#allocation1 + $0xa4] sm:$0xff pattern:$0xb3a29180]   ;;  %16128 = vrot.lane.b32.xlu1 %v17438_v31, %s16932_s14  ;;  %v15861_v25 = vunpack.i.h.bf16 %v15859_v18  ;;  %v15860_v27 = vunpack.i.l.bf16 %v15859_v18 }
  0xe5   : > { %2924 = vst.msk [vmem:[#allocation0 + $0x10c1] ss:$8 sm:$0xf] %vm1398_vm0, %v15831_v48   ;;  %2926 = vst.msk [vmem:[#allocation0 + $0x10c1] ss:$8 sm:$0xf0] %vm1398_vm0, %v15831_v48   ;;  %v17446_v21 = vpack.i.bf16 %v4015_v55, %v4006_v54  ;;  %v15864_v58 = vpop.permute.xlu0 %15863 }
  0xe6   : > { %2915 = vst.msk [vmem:[#allocation0 + $0x1081] ss:$8 sm:$0xf] %vm1398_vm0, %v15830_v49   ;;  %2917 = vst.msk [vmem:[#allocation0 + $0x1081] ss:$8 sm:$0xf0] %vm1398_vm0, %v15830_v49   ;;  %v15866_v45 = vunpack.i.h.bf16 %v15864_v58  ;;  %v15865_v46 = vunpack.i.l.bf16 %v15864_v58 }
  0xe7   : > { %v4024_v61 = vld.sshfl [vmem:[#allocation1 + $0xb0] sm:$0xff pattern:$0xb3a29180]   ;;  %v4033_v38 = vld.sshfl [vmem:[#allocation1 + $0xb4] sm:$0xff pattern:$0xb3a29180]   ;;  %16133 = vrot.lane.b32.xlu0 %v17446_v21, %s16932_s14  ;;  %v15869_v47 = vpop.permute.xlu1 %15868 }
  0xe8   : > { %2942 = vst.msk [vmem:[#allocation0 + $0x1141] ss:$8 sm:$0xf] %vm1398_vm0, %v15836_v39   ;;  %2944 = vst.msk [vmem:[#allocation0 + $0x1141] ss:$8 sm:$0xf0] %vm1398_vm0, %v15836_v39   ;;  %v17454_v22 = vpack.i.bf16 %v4033_v38, %v4024_v61  ;;  %v15871_v6 = vunpack.i.h.bf16 %v15869_v47  ;;  %v15870_v13 = vunpack.i.l.bf16 %v15869_v47 }
  0xe9   : > { %2933 = vst.msk [vmem:[#allocation0 + $0x1101] ss:$8 sm:$0xf] %vm1398_vm0, %v15835_v2   ;;  %2935 = vst.msk [vmem:[#allocation0 + $0x1101] ss:$8 sm:$0xf0] %vm1398_vm0, %v15835_v2   ;;  %v15874_v40 = vpop.permute.xlu0 %15873 }
  0xea   : > { %v4042_v23 = vld.sshfl [vmem:[#allocation1 + $0xc0] sm:$0xff pattern:$0xb3a29180]   ;;  %v4051_v24 = vld.sshfl [vmem:[#allocation1 + $0xc4] sm:$0xff pattern:$0xb3a29180]   ;;  %16138 = vrot.lane.b32.xlu1 %v17454_v22, %s16932_s14  ;;  %v15876_v49 = vunpack.i.h.bf16 %v15874_v40  ;;  %v15875_v54 = vunpack.i.l.bf16 %v15874_v40 }
  0xeb   : > { %2960 = vst.msk [vmem:[#allocation0 + $0x11c1] ss:$8 sm:$0xf] %vm1398_vm0, %v15841_v16   ;;  %2962 = vst.msk [vmem:[#allocation0 + $0x11c1] ss:$8 sm:$0xf0] %vm1398_vm0, %v15841_v16   ;;  %v17462_v0 = vpack.i.bf16 %v4051_v24, %v4042_v23  ;;  %v15879_v55 = vpop.permute.xlu1 %15878 }
  0xec   : > { %2951 = vst.msk [vmem:[#allocation0 + $0x1181] ss:$8 sm:$0xf] %vm1398_vm0, %v15840_v19   ;;  %2953 = vst.msk [vmem:[#allocation0 + $0x1181] ss:$8 sm:$0xf0] %vm1398_vm0, %v15840_v19   ;;  %v15881_v60 = vunpack.i.h.bf16 %v15879_v55  ;;  %v15880_v61 = vunpack.i.l.bf16 %v15879_v55 }
  0xed   : > { %v4060_v15 = vld.sshfl [vmem:[#allocation1 + $0xd0] sm:$0xff pattern:$0xb3a29180]   ;;  %v4069_v56 = vld.sshfl [vmem:[#allocation1 + $0xd4] sm:$0xff pattern:$0xb3a29180]   ;;  %16143 = vrot.lane.b32.xlu0 %v17462_v0, %s16932_s14  ;;  %v15884_v16 = vpop.permute.xlu0 %15883 }
  0xee   : > { %2978 = vst.msk [vmem:[#allocation0 + $0x1241] ss:$8 sm:$0xf] %vm1398_vm0, %v15846_v57   ;;  %2980 = vst.msk [vmem:[#allocation0 + $0x1241] ss:$8 sm:$0xf0] %vm1398_vm0, %v15846_v57   ;;  %v17470_v1 = vpack.i.bf16 %v4069_v56, %v4060_v15  ;;  %v15886_v24 = vunpack.i.h.bf16 %v15884_v16  ;;  %v15885_v14 = vunpack.i.l.bf16 %v15884_v16 }
  0xef   : > { %2969 = vst.msk [vmem:[#allocation0 + $0x1201] ss:$8 sm:$0xf] %vm1398_vm0, %v15845_v28   ;;  %2971 = vst.msk [vmem:[#allocation0 + $0x1201] ss:$8 sm:$0xf0] %vm1398_vm0, %v15845_v28   ;;  %v15889_v15 = vpop.permute.xlu1 %15888 }
  0xf0   : > { %v4078_v7 = vld.sshfl [vmem:[#allocation1 + $0xe0] sm:$0xff pattern:$0xb3a29180]   ;;  %v4087_v8 = vld.sshfl [vmem:[#allocation1 + $0xe4] sm:$0xff pattern:$0xb3a29180]   ;;  %16148 = vrot.lane.b32.xlu1 %v17470_v1, %s16932_s14  ;;  %v15891_v56 = vunpack.i.h.bf16 %v15889_v15  ;;  %v15890_v57 = vunpack.i.l.bf16 %v15889_v15 }
  0xf1   : > { %2996 = vst.msk [vmem:[#allocation0 + $0x12c1] ss:$8 sm:$0xf] %vm1398_vm0, %v15851_v62   ;;  %2998 = vst.msk [vmem:[#allocation0 + $0x12c1] ss:$8 sm:$0xf0] %vm1398_vm0, %v15851_v62   ;;  %v17478_v32 = vpack.i.bf16 %v4087_v8, %v4078_v7  ;;  %v15894_v7 = vpop.permute.xlu0 %15893 }
  0xf2   : > { %2987 = vst.msk [vmem:[#allocation0 + $0x1281] ss:$8 sm:$0xf] %vm1398_vm0, %v15850_v63   ;;  %2989 = vst.msk [vmem:[#allocation0 + $0x1281] ss:$8 sm:$0xf0] %vm1398_vm0, %v15850_v63  }
  0xf3   : > { %v4096_v10 = vld.sshfl [vmem:[#allocation1 + $0xf0] sm:$0xff pattern:$0xb3a29180]   ;;  %v4105_v41 = vld.sshfl [vmem:[#allocation1 + $0xf4] sm:$0xff pattern:$0xb3a29180]   ;;  %16153 = vrot.lane.b32.xlu0 %v17478_v32, %s16932_s14 }
  0xf4   : > { %3014 = vst.msk [vmem:[#allocation0 + $0x1341] ss:$8 sm:$0xf] %vm1398_vm0, %v15856_v42   ;;  %3016 = vst.msk [vmem:[#allocation0 + $0x1341] ss:$8 sm:$0xf0] %vm1398_vm0, %v15856_v42   ;;  %v17486_v33 = vpack.i.bf16 %v4105_v41, %v4096_v10  ;;  %v15896_v10 = vunpack.i.h.bf16 %v15894_v7  ;;  %v15895_v41 = vunpack.i.l.bf16 %v15894_v7  ;;  %v15899_v42 = vpop.permute.xlu1 %15898 }
  0xf5   : > { %3005 = vst.msk [vmem:[#allocation0 + $0x1301] ss:$8 sm:$0xf] %vm1398_vm0, %v15855_v17   ;;  %3007 = vst.msk [vmem:[#allocation0 + $0x1301] ss:$8 sm:$0xf0] %vm1398_vm0, %v15855_v17   ;;  %v15901_v17 = vunpack.i.h.bf16 %v15899_v42  ;;  %v15900_v18 = vunpack.i.l.bf16 %v15899_v42  ;;  %v15904_v58 = vpop.permute.xlu0 %15903 }
  0xf6   : > { %v4114_v36 = vld.sshfl [vmem:[#allocation1 + $0x100] sm:$0xff pattern:$0xb3a29180]   ;;  %v4123_v37 = vld.sshfl [vmem:[#allocation1 + $0x104] sm:$0xff pattern:$0xb3a29180]   ;;  %16158 = vrot.lane.b32.xlu1 %v17486_v33, %s16932_s14 }
  0xf7   : > { %3032 = vst.msk [vmem:[#allocation0 + $0x13c1] ss:$8 sm:$0xf] %vm1398_vm0, %v15861_v25   ;;  %3034 = vst.msk [vmem:[#allocation0 + $0x13c1] ss:$8 sm:$0xf0] %vm1398_vm0, %v15861_v25   ;;  %v17494_v20 = vpack.i.bf16 %v4123_v37, %v4114_v36 }
  0xf8   : > { %3023 = vst.msk [vmem:[#allocation0 + $0x1381] ss:$8 sm:$0xf] %vm1398_vm0, %v15860_v27   ;;  %3025 = vst.msk [vmem:[#allocation0 + $0x1381] ss:$8 sm:$0xf0] %vm1398_vm0, %v15860_v27   ;;  %v15909_v47 = vpop.permute.xlu1 %15908 }
  0xf9   : > { %v4132_v59 = vld.sshfl [vmem:[#allocation1 + $0x110] sm:$0xff pattern:$0xb3a29180]   ;;  %v4141_v44 = vld.sshfl [vmem:[#allocation1 + $0x114] sm:$0xff pattern:$0xb3a29180]   ;;  %16163 = vrot.lane.b32.xlu0 %v17494_v20, %s16932_s14 }
  0xfa   : > { %3050 = vst.msk [vmem:[#allocation0 + $0x1441] ss:$8 sm:$0xf] %vm1398_vm0, %v15866_v45   ;;  %3052 = vst.msk [vmem:[#allocation0 + $0x1441] ss:$8 sm:$0xf0] %vm1398_vm0, %v15866_v45   ;;  %v17502_v26 = vpack.i.bf16 %v4141_v44, %v4132_v59  ;;  %v15906_v45 = vunpack.i.h.bf16 %v15904_v58 }
  0xfb   : > { %3041 = vst.msk [vmem:[#allocation0 + $0x1401] ss:$8 sm:$0xf] %vm1398_vm0, %v15865_v46   ;;  %3043 = vst.msk [vmem:[#allocation0 + $0x1401] ss:$8 sm:$0xf0] %vm1398_vm0, %v15865_v46   ;;  %v15905_v46 = vunpack.i.l.bf16 %v15904_v58 }
  0xfc   : > { %v4150_v11 = vld.sshfl [vmem:[#allocation1 + $0x120] sm:$0xff pattern:$0xb3a29180]   ;;  %v4159_v12 = vld.sshfl [vmem:[#allocation1 + $0x124] sm:$0xff pattern:$0xb3a29180]   ;;  %16168 = vrot.lane.b32.xlu1 %v17502_v26, %s16932_s14 }
  0xfd   : > { %3068 = vst.msk [vmem:[#allocation0 + $0x14c1] ss:$8 sm:$0xf] %vm1398_vm0, %v15871_v6   ;;  %3070 = vst.msk [vmem:[#allocation0 + $0x14c1] ss:$8 sm:$0xf0] %vm1398_vm0, %v15871_v6   ;;  %v17510_v38 = vpack.i.bf16 %v4159_v12, %v4150_v11  ;;  %v15911_v6 = vunpack.i.h.bf16 %v15909_v47 }
  0xfe   : > { %3059 = vst.msk [vmem:[#allocation0 + $0x1481] ss:$8 sm:$0xf] %vm1398_vm0, %v15870_v13   ;;  %3061 = vst.msk [vmem:[#allocation0 + $0x1481] ss:$8 sm:$0xf0] %vm1398_vm0, %v15870_v13   ;;  %v15910_v13 = vunpack.i.l.bf16 %v15909_v47 }
  0xff   : > { %v4168_v43 = vld.sshfl [vmem:[#allocation1 + $0x130] sm:$0xff pattern:$0xb3a29180]   ;;  %v4177_v48 = vld.sshfl [vmem:[#allocation1 + $0x134] sm:$0xff pattern:$0xb3a29180]   ;;  %16173 = vrot.lane.b32.xlu0 %v17510_v38, %s16932_s14 }
 0x100   : > { %3085 = vst.msk [vmem:[#allocation0 + $0x42] ss:$8 sm:$0xf] %vm1398_vm0, %v15876_v49   ;;  %3087 = vst.msk [vmem:[#allocation0 + $0x42] ss:$8 sm:$0xf0] %vm1398_vm0, %v15876_v49   ;;  %v17518_v39 = vpack.i.bf16 %v4177_v48, %v4168_v43  ;;  %v15914_v48 = vpop.permute.xlu0 %15913 }
 0x101   : > { %3076 = vst.msk [vmem:[#allocation0 + $0x2] ss:$8 sm:$0xf] %vm1398_vm0, %v15875_v54   ;;  %3078 = vst.msk [vmem:[#allocation0 + $0x2] ss:$8 sm:$0xf0] %vm1398_vm0, %v15875_v54   ;;  %v15916_v55 = vunpack.i.h.bf16 %v15914_v48 }
 0x102   : > { %v4186_v2 = vld.sshfl [vmem:[#allocation1 + $0x140] sm:$0xff pattern:$0xb3a29180]   ;;  %v4195_v5 = vld.sshfl [vmem:[#allocation1 + $0x144] sm:$0xff pattern:$0xb3a29180]   ;;  %16178 = vrot.lane.b32.xlu1 %v17518_v39, %s16932_s14 }
 0x103   : > { %3103 = vst.msk [vmem:[#allocation0 + $0xc2] ss:$8 sm:$0xf] %vm1398_vm0, %v15881_v60   ;;  %3105 = vst.msk [vmem:[#allocation0 + $0xc2] ss:$8 sm:$0xf0] %vm1398_vm0, %v15881_v60   ;;  %v17526_v28 = vpack.i.bf16 %v4195_v5, %v4186_v2  ;;  %v15915_v60 = vunpack.i.l.bf16 %v15914_v48 }
 0x104   : > { %3094 = vst.msk [vmem:[#allocation0 + $0x82] ss:$8 sm:$0xf] %vm1398_vm0, %v15880_v61   ;;  %3096 = vst.msk [vmem:[#allocation0 + $0x82] ss:$8 sm:$0xf0] %vm1398_vm0, %v15880_v61   ;;  %v15919_v61 = vpop.permute.xlu1 %15918 }
 0x105   : > { %v4204_v19 = vld.sshfl [vmem:[#allocation1 + $0x150] sm:$0xff pattern:$0xb3a29180]   ;;  %v4213_v23 = vld.sshfl [vmem:[#allocation1 + $0x154] sm:$0xff pattern:$0xb3a29180]   ;;  %16183 = vrot.lane.b32.xlu0 %v17526_v28, %s16932_s14  ;;  %v15921_v2 = vunpack.i.h.bf16 %v15919_v61  ;;  %v15920_v5 = vunpack.i.l.bf16 %v15919_v61 }
 0x106   : > { %3121 = vst.msk [vmem:[#allocation0 + $0x142] ss:$8 sm:$0xf] %vm1398_vm0, %v15886_v24   ;;  %3123 = vst.msk [vmem:[#allocation0 + $0x142] ss:$8 sm:$0xf0] %vm1398_vm0, %v15886_v24   ;;  %v17534_v29 = vpack.i.bf16 %v4213_v23, %v4204_v19 }
 0x107   : > { %3112 = vst.msk [vmem:[#allocation0 + $0x102] ss:$8 sm:$0xf] %vm1398_vm0, %v15885_v14   ;;  %3114 = vst.msk [vmem:[#allocation0 + $0x102] ss:$8 sm:$0xf0] %vm1398_vm0, %v15885_v14   ;;  %v15924_v14 = vpop.permute.xlu0 %15923 }
 0x108   : > { %v4222_v62 = vld.sshfl [vmem:[#allocation1 + $0x160] sm:$0xff pattern:$0xb3a29180]   ;;  %v4231_v63 = vld.sshfl [vmem:[#allocation1 + $0x164] sm:$0xff pattern:$0xb3a29180]   ;;  %16188 = vrot.lane.b32.xlu1 %v17534_v29, %s16932_s14 }
 0x109   : > { %3139 = vst.msk [vmem:[#allocation0 + $0x1c2] ss:$8 sm:$0xf] %vm1398_vm0, %v15891_v56   ;;  %3141 = vst.msk [vmem:[#allocation0 + $0x1c2] ss:$8 sm:$0xf0] %vm1398_vm0, %v15891_v56   ;;  %v17542_v25 = vpack.i.bf16 %v4231_v63, %v4222_v62  ;;  %v15925_v62 = vunpack.i.l.bf16 %v15924_v14  ;;  %v15929_v63 = vpop.permute.xlu1 %15928 }
 0x10a   : > { %3130 = vst.msk [vmem:[#allocation0 + $0x182] ss:$8 sm:$0xf] %vm1398_vm0, %v15890_v57   ;;  %3132 = vst.msk [vmem:[#allocation0 + $0x182] ss:$8 sm:$0xf0] %vm1398_vm0, %v15890_v57   ;;  %v15926_v57 = vunpack.i.h.bf16 %v15924_v14  ;;  %v15931_v7 = vunpack.i.h.bf16 %v15929_v63 }
 0x10b   : > { %v4240_v8 = vld.sshfl [vmem:[#allocation1 + $0x170] sm:$0xff pattern:$0xb3a29180]   ;;  %v4249_v9 = vld.sshfl [vmem:[#allocation1 + $0x174] sm:$0xff pattern:$0xb3a29180]   ;;  %16193 = vrot.lane.b32.xlu0 %v17542_v25, %s16932_s14 }
 0x10c   : > { %3157 = vst.msk [vmem:[#allocation0 + $0x242] ss:$8 sm:$0xf] %vm1398_vm0, %v15896_v10   ;;  %3159 = vst.msk [vmem:[#allocation0 + $0x242] ss:$8 sm:$0xf0] %vm1398_vm0, %v15896_v10   ;;  %v17550_v27 = vpack.i.bf16 %v4249_v9, %v4240_v8  ;;  %v15930_v8 = vunpack.i.l.bf16 %v15929_v63 }
 0x10d   : > { %3148 = vst.msk [vmem:[#allocation0 + $0x202] ss:$8 sm:$0xf] %vm1398_vm0, %v15895_v41   ;;  %3150 = vst.msk [vmem:[#allocation0 + $0x202] ss:$8 sm:$0xf0] %vm1398_vm0, %v15895_v41  }
 0x10e   : > { %v4258_v36 = vld.sshfl [vmem:[#allocation1 + $0x180] sm:$0xff pattern:$0xb3a29180]   ;;  %v4267_v37 = vld.sshfl [vmem:[#allocation1 + $0x184] sm:$0xff pattern:$0xb3a29180]   ;;  %16198 = vrot.lane.b32.xlu1 %v17550_v27, %s16932_s14 }
 0x10f   : > { %3175 = vst.msk [vmem:[#allocation0 + $0x2c2] ss:$8 sm:$0xf] %vm1398_vm0, %v15901_v17   ;;  %3177 = vst.msk [vmem:[#allocation0 + $0x2c2] ss:$8 sm:$0xf0] %vm1398_vm0, %v15901_v17   ;;  %v17558_v11 = vpack.i.bf16 %v4267_v37, %v4258_v36  ;;  %v15934_v17 = vpop.permute.xlu0 %15933 }
 0x110   : > { %3166 = vst.msk [vmem:[#allocation0 + $0x282] ss:$8 sm:$0xf] %vm1398_vm0, %v15900_v18   ;;  %3168 = vst.msk [vmem:[#allocation0 + $0x282] ss:$8 sm:$0xf0] %vm1398_vm0, %v15900_v18   ;;  %v15936_v37 = vunpack.i.h.bf16 %v15934_v17  ;;  %v15935_v58 = vunpack.i.l.bf16 %v15934_v17 }
 0x111   : > { %v4276_v59 = vld.sshfl [vmem:[#allocation1 + $0x190] sm:$0xff pattern:$0xb3a29180]   ;;  %v4285_v44 = vld.sshfl [vmem:[#allocation1 + $0x194] sm:$0xff pattern:$0xb3a29180]   ;;  %16203 = vrot.lane.b32.xlu0 %v17558_v11, %s16932_s14 }
 0x112   : > { %3193 = vst.msk [vmem:[#allocation0 + $0x342] ss:$8 sm:$0xf] %vm1398_vm0, %v15906_v45   ;;  %3195 = vst.msk [vmem:[#allocation0 + $0x342] ss:$8 sm:$0xf0] %vm1398_vm0, %v15906_v45   ;;  %v17566_v12 = vpack.i.bf16 %v4285_v44, %v4276_v59  ;;  %v15939_v59 = vpop.permute.xlu1 %15938 }
 0x113   : > { %3184 = vst.msk [vmem:[#allocation0 + $0x302] ss:$8 sm:$0xf] %vm1398_vm0, %v15905_v46   ;;  %3186 = vst.msk [vmem:[#allocation0 + $0x302] ss:$8 sm:$0xf0] %vm1398_vm0, %v15905_v46   ;;  %v15941_v44 = vunpack.i.h.bf16 %v15939_v59  ;;  %v15940_v45 = vunpack.i.l.bf16 %v15939_v59 }
 0x114   : > { %v4294_v40 = vld.sshfl [vmem:[#allocation1 + $0x1a0] sm:$0xff pattern:$0xb3a29180]   ;;  %v4303_v43 = vld.sshfl [vmem:[#allocation1 + $0x1a4] sm:$0xff pattern:$0xb3a29180]   ;;  %16208 = vrot.lane.b32.xlu1 %v17566_v12, %s16932_s14 }
 0x115   : > { %3211 = vst.msk [vmem:[#allocation0 + $0x3c2] ss:$8 sm:$0xf] %vm1398_vm0, %v15911_v6   ;;  %3213 = vst.msk [vmem:[#allocation0 + $0x3c2] ss:$8 sm:$0xf0] %vm1398_vm0, %v15911_v6   ;;  %v17574_v16 = vpack.i.bf16 %v4303_v43, %v4294_v40  ;;  %v15944_v40 = vpop.permute.xlu0 %15943 }
 0x116   : > { %3202 = vst.msk [vmem:[#allocation0 + $0x382] ss:$8 sm:$0xf] %vm1398_vm0, %v15910_v13   ;;  %3204 = vst.msk [vmem:[#allocation0 + $0x382] ss:$8 sm:$0xf0] %vm1398_vm0, %v15910_v13  }
 0x117   : > { %v4312_v49 = vld.sshfl [vmem:[#allocation1 + $0x1b0] sm:$0xff pattern:$0xb3a29180]   ;;  %v4321_v54 = vld.sshfl [vmem:[#allocation1 + $0x1b4] sm:$0xff pattern:$0xb3a29180]   ;;  %16213 = vrot.lane.b32.xlu0 %v17574_v16, %s16932_s14 }
 0x118   : > { %3229 = vst.msk [vmem:[#allocation0 + $0x442] ss:$8 sm:$0xf] %vm1398_vm0, %v15916_v55   ;;  %3231 = vst.msk [vmem:[#allocation0 + $0x442] ss:$8 sm:$0xf0] %vm1398_vm0, %v15916_v55   ;;  %v17582_v19 = vpack.i.bf16 %v4321_v54, %v4312_v49  ;;  %v15946_v49 = vunpack.i.h.bf16 %v15944_v40  ;;  %v15945_v54 = vunpack.i.l.bf16 %v15944_v40  ;;  %v15949_v55 = vpop.permute.xlu1 %15948 }
 0x119   : > { %3220 = vst.msk [vmem:[#allocation0 + $0x402] ss:$8 sm:$0xf] %vm1398_vm0, %v15915_v60   ;;  %3222 = vst.msk [vmem:[#allocation0 + $0x402] ss:$8 sm:$0xf0] %vm1398_vm0, %v15915_v60   ;;  %v15951_v60 = vunpack.i.h.bf16 %v15949_v55  ;;  %v15950_v61 = vunpack.i.l.bf16 %v15949_v55  ;;  %v15954_v14 = vpop.permute.xlu0 %15953 }
 0x11a   : > { %v4330_v23 = vld.sshfl [vmem:[#allocation1 + $0x1c0] sm:$0xff pattern:$0xb3a29180]   ;;  %v4339_v24 = vld.sshfl [vmem:[#allocation1 + $0x1c4] sm:$0xff pattern:$0xb3a29180]   ;;  %16218 = vrot.lane.b32.xlu1 %v17582_v19, %s16932_s14 }
 0x11b   : > { %3247 = vst.msk [vmem:[#allocation0 + $0x4c2] ss:$8 sm:$0xf] %vm1398_vm0, %v15921_v2   ;;  %3249 = vst.msk [vmem:[#allocation0 + $0x4c2] ss:$8 sm:$0xf0] %vm1398_vm0, %v15921_v2   ;;  %v17590_v9 = vpack.i.bf16 %v4339_v24, %v4330_v23 }
 0x11c   : > { %3238 = vst.msk [vmem:[#allocation0 + $0x482] ss:$8 sm:$0xf] %vm1398_vm0, %v15920_v5   ;;  %3240 = vst.msk [vmem:[#allocation0 + $0x482] ss:$8 sm:$0xf0] %vm1398_vm0, %v15920_v5   ;;  %v15959_v63 = vpop.permute.xlu1 %15958 }
 0x11d   : > { %v4348_v15 = vld.sshfl [vmem:[#allocation1 + $0x1d0] sm:$0xff pattern:$0xb3a29180]   ;;  %v4357_v56 = vld.sshfl [vmem:[#allocation1 + $0x1d4] sm:$0xff pattern:$0xb3a29180]   ;;  %16223 = vrot.lane.b32.xlu0 %v17590_v9, %s16932_s14 }
 0x11e   : > { %3265 = vst.msk [vmem:[#allocation0 + $0x542] ss:$8 sm:$0xf] %vm1398_vm0, %v15926_v57   ;;  %3267 = vst.msk [vmem:[#allocation0 + $0x542] ss:$8 sm:$0xf0] %vm1398_vm0, %v15926_v57   ;;  %v17598_v10 = vpack.i.bf16 %v4357_v56, %v4348_v15  ;;  %v15956_v57 = vunpack.i.h.bf16 %v15954_v14 }
 0x11f   : > { %3256 = vst.msk [vmem:[#allocation0 + $0x502] ss:$8 sm:$0xf] %vm1398_vm0, %v15925_v62   ;;  %3258 = vst.msk [vmem:[#allocation0 + $0x502] ss:$8 sm:$0xf0] %vm1398_vm0, %v15925_v62   ;;  %v15955_v62 = vunpack.i.l.bf16 %v15954_v14 }
 0x120   : > { %v4366_v41 = vld.sshfl [vmem:[#allocation1 + $0x1e0] sm:$0xff pattern:$0xb3a29180]   ;;  %v4375_v42 = vld.sshfl [vmem:[#allocation1 + $0x1e4] sm:$0xff pattern:$0xb3a29180]   ;;  %16228 = vrot.lane.b32.xlu1 %v17598_v10, %s16932_s14 }
 0x121   : > { %3283 = vst.msk [vmem:[#allocation0 + $0x5c2] ss:$8 sm:$0xf] %vm1398_vm0, %v15931_v7   ;;  %3285 = vst.msk [vmem:[#allocation0 + $0x5c2] ss:$8 sm:$0xf0] %vm1398_vm0, %v15931_v7   ;;  %v17606_v46 = vpack.i.bf16 %v4375_v42, %v4366_v41  ;;  %v15961_v7 = vunpack.i.h.bf16 %v15959_v63 }
 0x122   : > { %3274 = vst.msk [vmem:[#allocation0 + $0x582] ss:$8 sm:$0xf] %vm1398_vm0, %v15930_v8   ;;  %3276 = vst.msk [vmem:[#allocation0 + $0x582] ss:$8 sm:$0xf0] %vm1398_vm0, %v15930_v8   ;;  %v15960_v8 = vunpack.i.l.bf16 %v15959_v63 }
 0x123   : > { %v4384_v18 = vld.sshfl [vmem:[#allocation1 + $0x1f0] sm:$0xff pattern:$0xb3a29180]   ;;  %v4393_v36 = vld.sshfl [vmem:[#allocation1 + $0x1f4] sm:$0xff pattern:$0xb3a29180]   ;;  %16233 = vrot.lane.b32.xlu0 %v17606_v46, %s16932_s14 }
 0x124   : > { %3301 = vst.msk [vmem:[#allocation0 + $0x642] ss:$8 sm:$0xf] %vm1398_vm0, %v15936_v37   ;;  %3303 = vst.msk [vmem:[#allocation0 + $0x642] ss:$8 sm:$0xf0] %vm1398_vm0, %v15936_v37   ;;  %v17614_v47 = vpack.i.bf16 %v4393_v36, %v4384_v18  ;;  %v15964_v36 = vpop.permute.xlu0 %15963 }
 0x125   : > { %3292 = vst.msk [vmem:[#allocation0 + $0x602] ss:$8 sm:$0xf] %vm1398_vm0, %v15935_v58   ;;  %3294 = vst.msk [vmem:[#allocation0 + $0x602] ss:$8 sm:$0xf0] %vm1398_vm0, %v15935_v58   ;;  %v15966_v59 = vunpack.i.h.bf16 %v15964_v36 }
 0x126   : > { %v4402_v6 = vld.sshfl [vmem:[#allocation1 + $0x200] sm:$0xff pattern:$0xb3a29180]   ;;  %v4411_v13 = vld.sshfl [vmem:[#allocation1 + $0x204] sm:$0xff pattern:$0xb3a29180]   ;;  %16238 = vrot.lane.b32.xlu1 %v17614_v47, %s16932_s14 }
 0x127   : > { %3319 = vst.msk [vmem:[#allocation0 + $0x6c2] ss:$8 sm:$0xf] %vm1398_vm0, %v15941_v44   ;;  %3321 = vst.msk [vmem:[#allocation0 + $0x6c2] ss:$8 sm:$0xf0] %vm1398_vm0, %v15941_v44   ;;  %v17622_v2 = vpack.i.bf16 %v4411_v13, %v4402_v6  ;;  %v15965_v44 = vunpack.i.l.bf16 %v15964_v36 }
 0x128   : > { %3310 = vst.msk [vmem:[#allocation0 + $0x682] ss:$8 sm:$0xf] %vm1398_vm0, %v15940_v45   ;;  %3312 = vst.msk [vmem:[#allocation0 + $0x682] ss:$8 sm:$0xf0] %vm1398_vm0, %v15940_v45   ;;  %v15969_v45 = vpop.permute.xlu1 %15968 }
 0x129   : > { %v4420_v43 = vld.sshfl [vmem:[#allocation1 + $0x210] sm:$0xff pattern:$0xb3a29180]   ;;  %v4429_v48 = vld.sshfl [vmem:[#allocation1 + $0x214] sm:$0xff pattern:$0xb3a29180]   ;;  %16243 = vrot.lane.b32.xlu0 %v17622_v2, %s16932_s14  ;;  %v15971_v6 = vunpack.i.h.bf16 %v15969_v45  ;;  %v15970_v13 = vunpack.i.l.bf16 %v15969_v45 }
 0x12a   : > { %3337 = vst.msk [vmem:[#allocation0 + $0x742] ss:$8 sm:$0xf] %vm1398_vm0, %v15946_v49   ;;  %3339 = vst.msk [vmem:[#allocation0 + $0x742] ss:$8 sm:$0xf0] %vm1398_vm0, %v15946_v49   ;;  %v17630_v5 = vpack.i.bf16 %v4429_v48, %v4420_v43 }
 0x12b   : > { %3328 = vst.msk [vmem:[#allocation0 + $0x702] ss:$8 sm:$0xf] %vm1398_vm0, %v15945_v54   ;;  %3330 = vst.msk [vmem:[#allocation0 + $0x702] ss:$8 sm:$0xf0] %vm1398_vm0, %v15945_v54   ;;  %v15974_v54 = vpop.permute.xlu0 %15973 }
 0x12c   : > { %v4438_v23 = vld.sshfl [vmem:[#allocation1 + $0x220] sm:$0xff pattern:$0xb3a29180]   ;;  %v4447_v24 = vld.sshfl [vmem:[#allocation1 + $0x224] sm:$0xff pattern:$0xb3a29180]   ;;  %16248 = vrot.lane.b32.xlu1 %v17630_v5, %s16932_s14 }
 0x12d   : > { %3355 = vst.msk [vmem:[#allocation0 + $0x7c2] ss:$8 sm:$0xf] %vm1398_vm0, %v15951_v60   ;;  %3357 = vst.msk [vmem:[#allocation0 + $0x7c2] ss:$8 sm:$0xf0] %vm1398_vm0, %v15951_v60   ;;  %v17638_v41 = vpack.i.bf16 %v4447_v24, %v4438_v23  ;;  %v15975_v23 = vunpack.i.l.bf16 %v15974_v54  ;;  %v15979_v24 = vpop.permute.xlu1 %15978 }
 0x12e   : > { %3346 = vst.msk [vmem:[#allocation0 + $0x782] ss:$8 sm:$0xf] %vm1398_vm0, %v15950_v61   ;;  %3348 = vst.msk [vmem:[#allocation0 + $0x782] ss:$8 sm:$0xf0] %vm1398_vm0, %v15950_v61   ;;  %v15976_v61 = vunpack.i.h.bf16 %v15974_v54  ;;  %v15981_v14 = vunpack.i.h.bf16 %v15979_v24 }
 0x12f   : > { %v4456_v15 = vld.sshfl [vmem:[#allocation1 + $0x230] sm:$0xff pattern:$0xb3a29180]   ;;  %v4465_v56 = vld.sshfl [vmem:[#allocation1 + $0x234] sm:$0xff pattern:$0xb3a29180]   ;;  %16253 = vrot.lane.b32.xlu0 %v17638_v41, %s16932_s14 }
 0x130   : > { %3373 = vst.msk [vmem:[#allocation0 + $0x842] ss:$8 sm:$0xf] %vm1398_vm0, %v15956_v57   ;;  %3375 = vst.msk [vmem:[#allocation0 + $0x842] ss:$8 sm:$0xf0] %vm1398_vm0, %v15956_v57   ;;  %v17646_v42 = vpack.i.bf16 %v4465_v56, %v4456_v15  ;;  %v15980_v15 = vunpack.i.l.bf16 %v15979_v24 }
 0x131   : > { %3364 = vst.msk [vmem:[#allocation0 + $0x802] ss:$8 sm:$0xf] %vm1398_vm0, %v15955_v62   ;;  %3366 = vst.msk [vmem:[#allocation0 + $0x802] ss:$8 sm:$0xf0] %vm1398_vm0, %v15955_v62  }
 0x132   : > { %v4474_v17 = vld.sshfl [vmem:[#allocation1 + $0x240] sm:$0xff pattern:$0xb3a29180]   ;;  %v4483_v18 = vld.sshfl [vmem:[#allocation1 + $0x244] sm:$0xff pattern:$0xb3a29180]   ;;  %16258 = vrot.lane.b32.xlu1 %v17646_v42, %s16932_s14 }
 0x133   : > { %3391 = vst.msk [vmem:[#allocation0 + $0x8c2] ss:$8 sm:$0xf] %vm1398_vm0, %v15961_v7   ;;  %3393 = vst.msk [vmem:[#allocation0 + $0x8c2] ss:$8 sm:$0xf0] %vm1398_vm0, %v15961_v7   ;;  %v17654_v40 = vpack.i.bf16 %v4483_v18, %v4474_v17  ;;  %v15984_v7 = vpop.permute.xlu0 %15983 }
 0x134   : > { %3382 = vst.msk [vmem:[#allocation0 + $0x882] ss:$8 sm:$0xf] %vm1398_vm0, %v15960_v8   ;;  %3384 = vst.msk [vmem:[#allocation0 + $0x882] ss:$8 sm:$0xf0] %vm1398_vm0, %v15960_v8   ;;  %v15986_v18 = vunpack.i.h.bf16 %v15984_v7  ;;  %v15985_v36 = vunpack.i.l.bf16 %v15984_v7 }
 0x135   : > { %v4492_v37 = vld.sshfl [vmem:[#allocation1 + $0x250] sm:$0xff pattern:$0xb3a29180]   ;;  %v4501_v58 = vld.sshfl [vmem:[#allocation1 + $0x254] sm:$0xff pattern:$0xb3a29180]   ;;  %16263 = vrot.lane.b32.xlu0 %v17654_v40, %s16932_s14 }
 0x136   : > { %3409 = vst.msk [vmem:[#allocation0 + $0x942] ss:$8 sm:$0xf] %vm1398_vm0, %v15966_v59   ;;  %3411 = vst.msk [vmem:[#allocation0 + $0x942] ss:$8 sm:$0xf0] %vm1398_vm0, %v15966_v59   ;;  %v17662_v43 = vpack.i.bf16 %v4501_v58, %v4492_v37  ;;  %v15989_v37 = vpop.permute.xlu1 %15988 }
 0x137   : > { %3400 = vst.msk [vmem:[#allocation0 + $0x902] ss:$8 sm:$0xf] %vm1398_vm0, %v15965_v44   ;;  %3402 = vst.msk [vmem:[#allocation0 + $0x902] ss:$8 sm:$0xf0] %vm1398_vm0, %v15965_v44   ;;  %v15991_v58 = vunpack.i.h.bf16 %v15989_v37  ;;  %v15990_v59 = vunpack.i.l.bf16 %v15989_v37 }
 0x138   : > { %v4510_v48 = vld.sshfl [vmem:[#allocation1 + $0x260] sm:$0xff pattern:$0xb3a29180]   ;;  %v4519_v49 = vld.sshfl [vmem:[#allocation1 + $0x264] sm:$0xff pattern:$0xb3a29180]   ;;  %16268 = vrot.lane.b32.xlu1 %v17662_v43, %s16932_s14 }
 0x139   : > { %3427 = vst.msk [vmem:[#allocation0 + $0x9c2] ss:$8 sm:$0xf] %vm1398_vm0, %v15971_v6   ;;  %3429 = vst.msk [vmem:[#allocation0 + $0x9c2] ss:$8 sm:$0xf0] %vm1398_vm0, %v15971_v6   ;;  %v17670_v56 = vpack.i.bf16 %v4519_v49, %v4510_v48  ;;  %v15994_v6 = vpop.permute.xlu0 %15993 }
 0x13a   : > { %3418 = vst.msk [vmem:[#allocation0 + $0x982] ss:$8 sm:$0xf] %vm1398_vm0, %v15970_v13   ;;  %3420 = vst.msk [vmem:[#allocation0 + $0x982] ss:$8 sm:$0xf0] %vm1398_vm0, %v15970_v13   ;;  %v15996_v13 = vunpack.i.h.bf16 %v15994_v6  ;;  %v15995_v48 = vunpack.i.l.bf16 %v15994_v6  ;;  %v15999_v49 = vpop.permute.xlu1 %15998 }
 0x13b   : > { %v4528_v55 = vld.sshfl [vmem:[#allocation1 + $0x270] sm:$0xff pattern:$0xb3a29180]   ;;  %v4537_v60 = vld.sshfl [vmem:[#allocation1 + $0x274] sm:$0xff pattern:$0xb3a29180]   ;;  %16273 = vrot.lane.b32.xlu0 %v17670_v56, %s16932_s14  ;;  %v16001_v54 = vunpack.i.h.bf16 %v15999_v49 }
 0x13c   : > { %3445 = vst.msk [vmem:[#allocation0 + $0xa42] ss:$8 sm:$0xf] %vm1398_vm0, %v15976_v61   ;;  %3447 = vst.msk [vmem:[#allocation0 + $0xa42] ss:$8 sm:$0xf0] %vm1398_vm0, %v15976_v61   ;;  %v17678_v57 = vpack.i.bf16 %v4537_v60, %v4528_v55  ;;  %v16000_v55 = vunpack.i.l.bf16 %v15999_v49 }
 0x13d   : > { %3436 = vst.msk [vmem:[#allocation0 + $0xa02] ss:$8 sm:$0xf] %vm1398_vm0, %v15975_v23   ;;  %3438 = vst.msk [vmem:[#allocation0 + $0xa02] ss:$8 sm:$0xf0] %vm1398_vm0, %v15975_v23   ;;  %v16004_v60 = vpop.permute.xlu0 %16003 }
 0x13e   : > { %v4546_v62 = vld.sshfl [vmem:[#allocation1 + $0x280] sm:$0xff pattern:$0xb3a29180]   ;;  %v4555_v63 = vld.sshfl [vmem:[#allocation1 + $0x284] sm:$0xff pattern:$0xb3a29180]   ;;  %16278 = vrot.lane.b32.xlu1 %v17678_v57, %s16932_s14  ;;  %v16006_v61 = vunpack.i.h.bf16 %v16004_v60  ;;  %v16005_v23 = vunpack.i.l.bf16 %v16004_v60  ;;  %v16009_v24 = vpop.permute.xlu1 %16008 }
 0x13f   : > { %3463 = vst.msk [vmem:[#allocation0 + $0xac2] ss:$8 sm:$0xf] %vm1398_vm0, %v15981_v14   ;;  %3465 = vst.msk [vmem:[#allocation0 + $0xac2] ss:$8 sm:$0xf0] %vm1398_vm0, %v15981_v14   ;;  %v17686_v44 = vpack.i.bf16 %v4555_v63, %v4546_v62  ;;  %v16011_v14 = vunpack.i.h.bf16 %v16009_v24 }
 0x140   : > { %3454 = vst.msk [vmem:[#allocation0 + $0xa82] ss:$8 sm:$0xf] %vm1398_vm0, %v15980_v15   ;;  %3456 = vst.msk [vmem:[#allocation0 + $0xa82] ss:$8 sm:$0xf0] %vm1398_vm0, %v15980_v15   ;;  %v16010_v15 = vunpack.i.l.bf16 %v16009_v24 }
 0x141   : > { %v4564_v8 = vld.sshfl [vmem:[#allocation1 + $0x290] sm:$0xff pattern:$0xb3a29180]   ;;  %v4573_v17 = vld.sshfl [vmem:[#allocation1 + $0x294] sm:$0xff pattern:$0xb3a29180]   ;;  %16283 = vrot.lane.b32.xlu0 %v17686_v44, %s16932_s14 }
 0x142   : > { %3481 = vst.msk [vmem:[#allocation0 + $0xb42] ss:$8 sm:$0xf] %vm1398_vm0, %v15986_v18   ;;  %3483 = vst.msk [vmem:[#allocation0 + $0xb42] ss:$8 sm:$0xf0] %vm1398_vm0, %v15986_v18   ;;  %v17694_v45 = vpack.i.bf16 %v4573_v17, %v4564_v8  ;;  %v16019_v63 = vpop.permute.xlu1 %16018 }
 0x143   : > { %3472 = vst.msk [vmem:[#allocation0 + $0xb02] ss:$8 sm:$0xf] %vm1398_vm0, %v15985_v36   ;;  %3474 = vst.msk [vmem:[#allocation0 + $0xb02] ss:$8 sm:$0xf0] %vm1398_vm0, %v15985_v36   ;;  %v16021_v7 = vunpack.i.h.bf16 %v16019_v63  ;;  %v16020_v8 = vunpack.i.l.bf16 %v16019_v63 }
 0x144   : > { %3499 = vst.msk [vmem:[#allocation0 + $0xbc2] ss:$8 sm:$0xf] %vm1398_vm0, %v15991_v58   ;;  %3501 = vst.msk [vmem:[#allocation0 + $0xbc2] ss:$8 sm:$0xf0] %vm1398_vm0, %v15991_v58   ;;  %16288 = vrot.lane.b32.xlu1 %v17694_v45, %s16932_s14 }
 0x145   : > { %3490 = vst.msk [vmem:[#allocation0 + $0xb82] ss:$8 sm:$0xf] %vm1398_vm0, %v15990_v59   ;;  %3492 = vst.msk [vmem:[#allocation0 + $0xb82] ss:$8 sm:$0xf0] %vm1398_vm0, %v15990_v59   ;;  %16293 = vrot.lane.b32.xlu0 %v17366_v52, %s16933_s15  ;;  %v16014_v52 = vpop.permute.xlu0 %16013 }
 0x146   : > { %3517 = vst.msk [vmem:[#allocation0 + $0xc42] ss:$8 sm:$0xf] %vm1398_vm0, %v15996_v13   ;;  %3519 = vst.msk [vmem:[#allocation0 + $0xc42] ss:$8 sm:$0xf0] %vm1398_vm0, %v15996_v13   ;;  %v16015_v62 = vunpack.i.l.bf16 %v16014_v52  ;;  %v16029_v18 = vpop.permute.xlu1 %16028 }
 0x147   : > { %3508 = vst.msk [vmem:[#allocation0 + $0xc02] ss:$8 sm:$0xf] %vm1398_vm0, %v15995_v48   ;;  %3510 = vst.msk [vmem:[#allocation0 + $0xc02] ss:$8 sm:$0xf0] %vm1398_vm0, %v15995_v48   ;;  %v16031_v36 = vunpack.i.h.bf16 %v16029_v18  ;;  %v16030_v37 = vunpack.i.l.bf16 %v16029_v18 }
 0x148   : > { %3535 = vst.msk [vmem:[#allocation0 + $0xcc2] ss:$8 sm:$0xf] %vm1398_vm0, %v16001_v54   ;;  %3537 = vst.msk [vmem:[#allocation0 + $0xcc2] ss:$8 sm:$0xf0] %vm1398_vm0, %v16001_v54   ;;  %16298 = vrot.lane.b32.xlu1 %v17374_v53, %s16933_s15  ;;  %v16016_v53 = vunpack.i.h.bf16 %v16014_v52 }
 0x149   : > { %3526 = vst.msk [vmem:[#allocation0 + $0xc82] ss:$8 sm:$0xf] %vm1398_vm0, %v16000_v55   ;;  %3528 = vst.msk [vmem:[#allocation0 + $0xc82] ss:$8 sm:$0xf0] %vm1398_vm0, %v16000_v55   ;;  %16303 = vrot.lane.b32.xlu0 %v17382_v34, %s16933_s15  ;;  %v16024_v34 = vpop.permute.xlu0 %16023 }
 0x14a   : > { %3553 = vst.msk [vmem:[#allocation0 + $0xd42] ss:$8 sm:$0xf] %vm1398_vm0, %v16006_v61   ;;  %3555 = vst.msk [vmem:[#allocation0 + $0xd42] ss:$8 sm:$0xf0] %vm1398_vm0, %v16006_v61   ;;  %v16025_v17 = vunpack.i.l.bf16 %v16024_v34  ;;  %v16039_v59 = vpop.permute.xlu1 %16038 }
 0x14b   : > { %3544 = vst.msk [vmem:[#allocation0 + $0xd02] ss:$8 sm:$0xf] %vm1398_vm0, %v16005_v23   ;;  %3546 = vst.msk [vmem:[#allocation0 + $0xd02] ss:$8 sm:$0xf0] %vm1398_vm0, %v16005_v23   ;;  %v16041_v6 = vunpack.i.h.bf16 %v16039_v59  ;;  %v16040_v13 = vunpack.i.l.bf16 %v16039_v59 }
 0x14c   : > { %3571 = vst.msk [vmem:[#allocation0 + $0xdc2] ss:$8 sm:$0xf] %vm1398_vm0, %v16011_v14   ;;  %3573 = vst.msk [vmem:[#allocation0 + $0xdc2] ss:$8 sm:$0xf0] %vm1398_vm0, %v16011_v14   ;;  %16308 = vrot.lane.b32.xlu1 %v17390_v35, %s16933_s15  ;;  %v16026_v35 = vunpack.i.h.bf16 %v16024_v34 }
 0x14d   : > { %3562 = vst.msk [vmem:[#allocation0 + $0xd82] ss:$8 sm:$0xf] %vm1398_vm0, %v16010_v15   ;;  %3564 = vst.msk [vmem:[#allocation0 + $0xd82] ss:$8 sm:$0xf0] %vm1398_vm0, %v16010_v15   ;;  %16313 = vrot.lane.b32.xlu0 %v17398_v50, %s16933_s15  ;;  %v16034_v50 = vpop.permute.xlu0 %16033 }
 0x14e   : > { %3589 = vst.msk [vmem:[#allocation0 + $0xe42] ss:$8 sm:$0xf] %vm1398_vm0, %v16016_v53   ;;  %3591 = vst.msk [vmem:[#allocation0 + $0xe42] ss:$8 sm:$0xf0] %vm1398_vm0, %v16016_v53   ;;  %v16035_v58 = vunpack.i.l.bf16 %v16034_v50  ;;  %v16049_v49 = vpop.permute.xlu1 %16048 }
 0x14f   : > { %3580 = vst.msk [vmem:[#allocation0 + $0xe02] ss:$8 sm:$0xf] %vm1398_vm0, %v16015_v62   ;;  %3582 = vst.msk [vmem:[#allocation0 + $0xe02] ss:$8 sm:$0xf0] %vm1398_vm0, %v16015_v62   ;;  %v16051_v54 = vunpack.i.h.bf16 %v16049_v49  ;;  %v16050_v55 = vunpack.i.l.bf16 %v16049_v49 }
 0x150   : > { %3607 = vst.msk [vmem:[#allocation0 + $0xec2] ss:$8 sm:$0xf] %vm1398_vm0, %v16021_v7   ;;  %3609 = vst.msk [vmem:[#allocation0 + $0xec2] ss:$8 sm:$0xf0] %vm1398_vm0, %v16021_v7   ;;  %16318 = vrot.lane.b32.xlu1 %v17406_v51, %s16933_s15  ;;  %v16036_v51 = vunpack.i.h.bf16 %v16034_v50 }
 0x151   : > { %3598 = vst.msk [vmem:[#allocation0 + $0xe82] ss:$8 sm:$0xf] %vm1398_vm0, %v16020_v8   ;;  %3600 = vst.msk [vmem:[#allocation0 + $0xe82] ss:$8 sm:$0xf0] %vm1398_vm0, %v16020_v8   ;;  %16323 = vrot.lane.b32.xlu0 %v17414_v3, %s16933_s15  ;;  %v16044_v3 = vpop.permute.xlu0 %16043 }
 0x152   : > { %3625 = vst.msk [vmem:[#allocation0 + $0xf42] ss:$8 sm:$0xf] %vm1398_vm0, %v16026_v35   ;;  %3627 = vst.msk [vmem:[#allocation0 + $0xf42] ss:$8 sm:$0xf0] %vm1398_vm0, %v16026_v35   ;;  %v16045_v48 = vunpack.i.l.bf16 %v16044_v3  ;;  %v16059_v61 = vpop.permute.xlu1 %16058 }
 0x153   : > { %3616 = vst.msk [vmem:[#allocation0 + $0xf02] ss:$8 sm:$0xf] %vm1398_vm0, %v16025_v17   ;;  %3618 = vst.msk [vmem:[#allocation0 + $0xf02] ss:$8 sm:$0xf0] %vm1398_vm0, %v16025_v17   ;;  %v16061_v23 = vunpack.i.h.bf16 %v16059_v61  ;;  %v16060_v24 = vunpack.i.l.bf16 %v16059_v61 }
 0x154   : > { %3643 = vst.msk [vmem:[#allocation0 + $0xfc2] ss:$8 sm:$0xf] %vm1398_vm0, %v16031_v36   ;;  %3645 = vst.msk [vmem:[#allocation0 + $0xfc2] ss:$8 sm:$0xf0] %vm1398_vm0, %v16031_v36   ;;  %16328 = vrot.lane.b32.xlu1 %v17422_v4, %s16933_s15  ;;  %v16046_v4 = vunpack.i.h.bf16 %v16044_v3 }
 0x155   : > { %3634 = vst.msk [vmem:[#allocation0 + $0xf82] ss:$8 sm:$0xf] %vm1398_vm0, %v16030_v37   ;;  %3636 = vst.msk [vmem:[#allocation0 + $0xf82] ss:$8 sm:$0xf0] %vm1398_vm0, %v16030_v37   ;;  %16333 = vrot.lane.b32.xlu0 %v17430_v30, %s16933_s15  ;;  %v16054_v30 = vpop.permute.xlu0 %16053 }
 0x156   : > { %3661 = vst.msk [vmem:[#allocation0 + $0x1042] ss:$8 sm:$0xf] %vm1398_vm0, %v16036_v51   ;;  %3663 = vst.msk [vmem:[#allocation0 + $0x1042] ss:$8 sm:$0xf0] %vm1398_vm0, %v16036_v51   ;;  %v16055_v60 = vunpack.i.l.bf16 %v16054_v30  ;;  %v16069_v15 = vpop.permute.xlu1 %16068 }
 0x157   : > { %3652 = vst.msk [vmem:[#allocation0 + $0x1002] ss:$8 sm:$0xf] %vm1398_vm0, %v16035_v58   ;;  %3654 = vst.msk [vmem:[#allocation0 + $0x1002] ss:$8 sm:$0xf0] %vm1398_vm0, %v16035_v58   ;;  %v16071_v52 = vunpack.i.h.bf16 %v16069_v15  ;;  %v16070_v53 = vunpack.i.l.bf16 %v16069_v15 }
 0x158   : > { %3679 = vst.msk [vmem:[#allocation0 + $0x10c2] ss:$8 sm:$0xf] %vm1398_vm0, %v16041_v6   ;;  %3681 = vst.msk [vmem:[#allocation0 + $0x10c2] ss:$8 sm:$0xf0] %vm1398_vm0, %v16041_v6   ;;  %16338 = vrot.lane.b32.xlu1 %v17438_v31, %s16933_s15  ;;  %v16056_v31 = vunpack.i.h.bf16 %v16054_v30 }
 0x159   : > { %3670 = vst.msk [vmem:[#allocation0 + $0x1082] ss:$8 sm:$0xf] %vm1398_vm0, %v16040_v13   ;;  %3672 = vst.msk [vmem:[#allocation0 + $0x1082] ss:$8 sm:$0xf0] %vm1398_vm0, %v16040_v13   ;;  %16343 = vrot.lane.b32.xlu0 %v17446_v21, %s16933_s15  ;;  %v16064_v21 = vpop.permute.xlu0 %16063 }
 0x15a   : > { %3697 = vst.msk [vmem:[#allocation0 + $0x1142] ss:$8 sm:$0xf] %vm1398_vm0, %v16046_v4   ;;  %3699 = vst.msk [vmem:[#allocation0 + $0x1142] ss:$8 sm:$0xf0] %vm1398_vm0, %v16046_v4   ;;  %v16065_v14 = vunpack.i.l.bf16 %v16064_v21  ;;  %v16079_v63 = vpop.permute.xlu1 %16078 }
 0x15b   : > { %3688 = vst.msk [vmem:[#allocation0 + $0x1102] ss:$8 sm:$0xf] %vm1398_vm0, %v16045_v48   ;;  %3690 = vst.msk [vmem:[#allocation0 + $0x1102] ss:$8 sm:$0xf0] %vm1398_vm0, %v16045_v48   ;;  %v16081_v7 = vunpack.i.h.bf16 %v16079_v63  ;;  %v16080_v8 = vunpack.i.l.bf16 %v16079_v63 }
 0x15c   : > { %3715 = vst.msk [vmem:[#allocation0 + $0x11c2] ss:$8 sm:$0xf] %vm1398_vm0, %v16051_v54   ;;  %3717 = vst.msk [vmem:[#allocation0 + $0x11c2] ss:$8 sm:$0xf0] %vm1398_vm0, %v16051_v54   ;;  %16348 = vrot.lane.b32.xlu1 %v17454_v22, %s16933_s15  ;;  %v16066_v22 = vunpack.i.h.bf16 %v16064_v21 }
 0x15d   : > { %3706 = vst.msk [vmem:[#allocation0 + $0x1182] ss:$8 sm:$0xf] %vm1398_vm0, %v16050_v55   ;;  %3708 = vst.msk [vmem:[#allocation0 + $0x1182] ss:$8 sm:$0xf0] %vm1398_vm0, %v16050_v55   ;;  %16353 = vrot.lane.b32.xlu0 %v17462_v0, %s16933_s15  ;;  %v16074_v0 = vpop.permute.xlu0 %16073 }
 0x15e   : > { %3733 = vst.msk [vmem:[#allocation0 + $0x1242] ss:$8 sm:$0xf] %vm1398_vm0, %v16056_v31   ;;  %3735 = vst.msk [vmem:[#allocation0 + $0x1242] ss:$8 sm:$0xf0] %vm1398_vm0, %v16056_v31   ;;  %v16075_v62 = vunpack.i.l.bf16 %v16074_v0  ;;  %v16089_v35 = vpop.permute.xlu1 %16088 }
 0x15f   : > { %3724 = vst.msk [vmem:[#allocation0 + $0x1202] ss:$8 sm:$0xf] %vm1398_vm0, %v16055_v60   ;;  %3726 = vst.msk [vmem:[#allocation0 + $0x1202] ss:$8 sm:$0xf0] %vm1398_vm0, %v16055_v60   ;;  %v16091_v17 = vunpack.i.h.bf16 %v16089_v35  ;;  %v16090_v18 = vunpack.i.l.bf16 %v16089_v35 }
 0x160   : > { %3751 = vst.msk [vmem:[#allocation0 + $0x12c2] ss:$8 sm:$0xf] %vm1398_vm0, %v16061_v23   ;;  %3753 = vst.msk [vmem:[#allocation0 + $0x12c2] ss:$8 sm:$0xf0] %vm1398_vm0, %v16061_v23   ;;  %16358 = vrot.lane.b32.xlu1 %v17470_v1, %s16933_s15  ;;  %v16076_v1 = vunpack.i.h.bf16 %v16074_v0 }
 0x161   : > { %3742 = vst.msk [vmem:[#allocation0 + $0x1282] ss:$8 sm:$0xf] %vm1398_vm0, %v16060_v24   ;;  %3744 = vst.msk [vmem:[#allocation0 + $0x1282] ss:$8 sm:$0xf0] %vm1398_vm0, %v16060_v24   ;;  %16363 = vrot.lane.b32.xlu0 %v17478_v32, %s16933_s15  ;;  %v16084_v32 = vpop.permute.xlu0 %16083 }
 0x162   : > { %3769 = vst.msk [vmem:[#allocation0 + $0x1342] ss:$8 sm:$0xf] %vm1398_vm0, %v16066_v22   ;;  %3771 = vst.msk [vmem:[#allocation0 + $0x1342] ss:$8 sm:$0xf0] %vm1398_vm0, %v16066_v22   ;;  %v16085_v34 = vunpack.i.l.bf16 %v16084_v32  ;;  %v16099_v37 = vpop.permute.xlu1 %16098 }
 0x163   : > { %3760 = vst.msk [vmem:[#allocation0 + $0x1302] ss:$8 sm:$0xf] %vm1398_vm0, %v16065_v14   ;;  %3762 = vst.msk [vmem:[#allocation0 + $0x1302] ss:$8 sm:$0xf0] %vm1398_vm0, %v16065_v14   ;;  %v16101_v50 = vunpack.i.h.bf16 %v16099_v37  ;;  %v16100_v51 = vunpack.i.l.bf16 %v16099_v37 }
 0x164   : > { %3787 = vst.msk [vmem:[#allocation0 + $0x13c2] ss:$8 sm:$0xf] %vm1398_vm0, %v16071_v52   ;;  %3789 = vst.msk [vmem:[#allocation0 + $0x13c2] ss:$8 sm:$0xf0] %vm1398_vm0, %v16071_v52   ;;  %16368 = vrot.lane.b32.xlu1 %v17486_v33, %s16933_s15  ;;  %v16086_v33 = vunpack.i.h.bf16 %v16084_v32 }
 0x165   : > { %3778 = vst.msk [vmem:[#allocation0 + $0x1382] ss:$8 sm:$0xf] %vm1398_vm0, %v16070_v53   ;;  %3780 = vst.msk [vmem:[#allocation0 + $0x1382] ss:$8 sm:$0xf0] %vm1398_vm0, %v16070_v53   ;;  %16373 = vrot.lane.b32.xlu0 %v17494_v20, %s16933_s15  ;;  %v16094_v20 = vpop.permute.xlu0 %16093 }
 0x166   : > { %3805 = vst.msk [vmem:[#allocation0 + $0x1442] ss:$8 sm:$0xf] %vm1398_vm0, %v16076_v1   ;;  %3807 = vst.msk [vmem:[#allocation0 + $0x1442] ss:$8 sm:$0xf0] %vm1398_vm0, %v16076_v1   ;;  %v16095_v36 = vunpack.i.l.bf16 %v16094_v20  ;;  %v16109_v3 = vpop.permute.xlu1 %16108 }
 0x167   : > { %3796 = vst.msk [vmem:[#allocation0 + $0x1402] ss:$8 sm:$0xf] %vm1398_vm0, %v16075_v62   ;;  %3798 = vst.msk [vmem:[#allocation0 + $0x1402] ss:$8 sm:$0xf0] %vm1398_vm0, %v16075_v62   ;;  %v16111_v49 = vunpack.i.h.bf16 %v16109_v3  ;;  %v16110_v54 = vunpack.i.l.bf16 %v16109_v3 }
 0x168   : > { %3823 = vst.msk [vmem:[#allocation0 + $0x14c2] ss:$8 sm:$0xf] %vm1398_vm0, %v16081_v7   ;;  %3825 = vst.msk [vmem:[#allocation0 + $0x14c2] ss:$8 sm:$0xf0] %vm1398_vm0, %v16081_v7   ;;  %16378 = vrot.lane.b32.xlu1 %v17502_v26, %s16933_s15  ;;  %v16096_v26 = vunpack.i.h.bf16 %v16094_v20 }
 0x169   : > { %3814 = vst.msk [vmem:[#allocation0 + $0x1482] ss:$8 sm:$0xf] %vm1398_vm0, %v16080_v8   ;;  %3816 = vst.msk [vmem:[#allocation0 + $0x1482] ss:$8 sm:$0xf0] %vm1398_vm0, %v16080_v8   ;;  %16383 = vrot.lane.b32.xlu0 %v17510_v38, %s16933_s15  ;;  %v16104_v38 = vpop.permute.xlu0 %16103 }
 0x16a   : > { %3840 = vst.msk [vmem:[#allocation0 + $0x43] ss:$8 sm:$0xf] %vm1398_vm0, %v16086_v33   ;;  %3842 = vst.msk [vmem:[#allocation0 + $0x43] ss:$8 sm:$0xf0] %vm1398_vm0, %v16086_v33   ;;  %v16106_v6 = vunpack.i.h.bf16 %v16104_v38  ;;  %v16105_v13 = vunpack.i.l.bf16 %v16104_v38  ;;  %v16119_v23 = vpop.permute.xlu1 %16118 }
 0x16b   : > { %3831 = vst.msk [vmem:[#allocation0 + $0x3] ss:$8 sm:$0xf] %vm1398_vm0, %v16085_v34   ;;  %3833 = vst.msk [vmem:[#allocation0 + $0x3] ss:$8 sm:$0xf0] %vm1398_vm0, %v16085_v34   ;;  %v16121_v14 = vunpack.i.h.bf16 %v16119_v23  ;;  %v16120_v15 = vunpack.i.l.bf16 %v16119_v23 }
 0x16c   : > { %3858 = vst.msk [vmem:[#allocation0 + $0xc3] ss:$8 sm:$0xf] %vm1398_vm0, %v16091_v17   ;;  %3860 = vst.msk [vmem:[#allocation0 + $0xc3] ss:$8 sm:$0xf0] %vm1398_vm0, %v16091_v17   ;;  %16388 = vrot.lane.b32.xlu1 %v17518_v39, %s16933_s15 }
 0x16d   : > { %3849 = vst.msk [vmem:[#allocation0 + $0x83] ss:$8 sm:$0xf] %vm1398_vm0, %v16090_v18   ;;  %3851 = vst.msk [vmem:[#allocation0 + $0x83] ss:$8 sm:$0xf0] %vm1398_vm0, %v16090_v18   ;;  %16393 = vrot.lane.b32.xlu0 %v17526_v28, %s16933_s15 }
 0x16e   : > { %3876 = vst.msk [vmem:[#allocation0 + $0x143] ss:$8 sm:$0xf] %vm1398_vm0, %v16096_v26   ;;  %3878 = vst.msk [vmem:[#allocation0 + $0x143] ss:$8 sm:$0xf0] %vm1398_vm0, %v16096_v26   ;;  %v16129_v32 = vpop.permute.xlu1 %16128 }
 0x16f   : > { %3867 = vst.msk [vmem:[#allocation0 + $0x103] ss:$8 sm:$0xf] %vm1398_vm0, %v16095_v36   ;;  %3869 = vst.msk [vmem:[#allocation0 + $0x103] ss:$8 sm:$0xf0] %vm1398_vm0, %v16095_v36   ;;  %v16131_v35 = vunpack.i.h.bf16 %v16129_v32  ;;  %v16130_v17 = vunpack.i.l.bf16 %v16129_v32 }
 0x170   : > { %3894 = vst.msk [vmem:[#allocation0 + $0x1c3] ss:$8 sm:$0xf] %vm1398_vm0, %v16101_v50   ;;  %3896 = vst.msk [vmem:[#allocation0 + $0x1c3] ss:$8 sm:$0xf0] %vm1398_vm0, %v16101_v50   ;;  %16398 = vrot.lane.b32.xlu1 %v17534_v29, %s16933_s15  ;;  %v16114_v29 = vpop.permute.xlu0 %16113 }
 0x171   : > { %3885 = vst.msk [vmem:[#allocation0 + $0x183] ss:$8 sm:$0xf] %vm1398_vm0, %v16100_v51   ;;  %3887 = vst.msk [vmem:[#allocation0 + $0x183] ss:$8 sm:$0xf0] %vm1398_vm0, %v16100_v51   ;;  %v16116_v60 = vunpack.i.h.bf16 %v16114_v29  ;;  %v16115_v61 = vunpack.i.l.bf16 %v16114_v29  ;;  %16403 = vrot.lane.b32.xlu0 %v17542_v25, %s16933_s15 }
 0x172   : > { %v6091_v39 = vld [vmem:[#allocation1] sm:$0xff]   ;;  %v6104_v58 = vld [vmem:[#allocation1 + $0x10] sm:$0xff]   ;;  %3912 = vst.msk [vmem:[#allocation0 + $0x243] ss:$8 sm:$0xf] %vm1398_vm0, %v16106_v6   ;;  %v2020_v30 = vld [vmem:[#allocation1 + $0x1c8] sm:$0xff]   ;;  %v16139_v51 = vpop.permute.xlu1 %16138 }
 0x173   : > { %v17832_v59 = vld [vmem:[#allocation1 + $0x20] sm:$0xff]   ;;  %v17834_v4 = vpack.i.bf16 %v6104_v58, %v6091_v39  ;;  %v17836_v48 = vld [vmem:[#allocation1 + $0x30] sm:$0xff]   ;;  %1399 = vst.msk [vmem:[#allocation0] ss:$16 sm:$0x3] %vm1398_vm0, %v6091_v39   ;;  %v2042_v53 = vld [vmem:[#allocation1 + $0x1d8] sm:$0xff]   ;;  %v16141_v38 = vunpack.i.h.bf16 %v16139_v51 }
 0x174   : > { %1400 = vst.msk [vmem:[#allocation0] ss:$16 sm:$0xc] %vm1398_vm0, %v6091_v39   ;;  %1401 = vst.msk [vmem:[#allocation0] ss:$16 sm:$0x30] %vm1398_vm0, %v6091_v39   ;;  %v16717_v28 = vpack.i.bf16 %v17836_v48, %v17832_v59  ;;  %16408 = vrot.lane.b32.xlu1 %v17550_v27, %s16933_s15  ;;  %v16124_v0 = vpop.permute.xlu0 %16123 }
 0x175   : > { %1402 = vst.msk [vmem:[#allocation0] ss:$16 sm:$0xc0] %vm1398_vm0, %v6091_v39   ;;  %1418 = vst.msk [vmem:[#allocation0 + $0x80] ss:$16 sm:$0x3] %vm1398_vm0, %v6104_v58   ;;  %v16126_v7 = vunpack.i.h.bf16 %v16124_v0  ;;  %v16125_v8 = vunpack.i.l.bf16 %v16124_v0  ;;  %16413 = vrot.lane.b32.xlu0 %v17558_v11, %s16933_s15  ;;  %v16140_v39 = vunpack.i.l.bf16 %v16139_v51 }
 0x176   : > { %1420 = vst.msk [vmem:[#allocation0 + $0x80] ss:$16 sm:$0xc] %vm1398_vm0, %v6104_v58   ;;  %1422 = vst.msk [vmem:[#allocation0 + $0x80] ss:$16 sm:$0x30] %vm1398_vm0, %v6104_v58  }
 0x177   : > { %1424 = vst.msk [vmem:[#allocation0 + $0x80] ss:$16 sm:$0xc0] %vm1398_vm0, %v6104_v58   ;;  %1440 = vst.msk [vmem:[#allocation0 + $0x100] ss:$16 sm:$0x3] %vm1398_vm0, %v17832_v59  }
 0x178   : > { %1442 = vst.msk [vmem:[#allocation0 + $0x100] ss:$16 sm:$0xc] %vm1398_vm0, %v17832_v59   ;;  %1444 = vst.msk [vmem:[#allocation0 + $0x100] ss:$16 sm:$0x30] %vm1398_vm0, %v17832_v59   ;;  %16418 = vrot.lane.b32.xlu1 %v17566_v12, %s16933_s15  ;;  %v16134_v20 = vpop.permute.xlu0 %16133 }
 0x179   : > { %1446 = vst.msk [vmem:[#allocation0 + $0x100] ss:$16 sm:$0xc0] %vm1398_vm0, %v17832_v59   ;;  %1462 = vst.msk [vmem:[#allocation0 + $0x180] ss:$16 sm:$0x3] %vm1398_vm0, %v17836_v48   ;;  %v16136_v37 = vunpack.i.h.bf16 %v16134_v20  ;;  %v16135_v50 = vunpack.i.l.bf16 %v16134_v20  ;;  %16423 = vrot.lane.b32.xlu0 %v17574_v16, %s16933_s15 }
 0x17a   : > { %1464 = vst.msk [vmem:[#allocation0 + $0x180] ss:$16 sm:$0xc] %vm1398_vm0, %v17836_v48   ;;  %1466 = vst.msk [vmem:[#allocation0 + $0x180] ss:$16 sm:$0x30] %vm1398_vm0, %v17836_v48  }
 0x17b   : > { %1468 = vst.msk [vmem:[#allocation0 + $0x180] ss:$16 sm:$0xc0] %vm1398_vm0, %v17836_v48   ;;  %3914 = vst.msk [vmem:[#allocation0 + $0x243] ss:$8 sm:$0xf0] %vm1398_vm0, %v16106_v6  }
 0x17c   : > { %3903 = vst.msk [vmem:[#allocation0 + $0x203] ss:$8 sm:$0xf] %vm1398_vm0, %v16105_v13   ;;  %3905 = vst.msk [vmem:[#allocation0 + $0x203] ss:$8 sm:$0xf0] %vm1398_vm0, %v16105_v13   ;;  %16428 = vrot.lane.b32.xlu1 %v17582_v19, %s16933_s15  ;;  %v16144_v58 = vpop.permute.xlu0 %16143 }
 0x17d   : > { %3930 = vst.msk [vmem:[#allocation0 + $0x2c3] ss:$8 sm:$0xf] %vm1398_vm0, %v16111_v49   ;;  %3932 = vst.msk [vmem:[#allocation0 + $0x2c3] ss:$8 sm:$0xf0] %vm1398_vm0, %v16111_v49   ;;  %v16146_v3 = vunpack.i.h.bf16 %v16144_v58  ;;  %v16145_v49 = vunpack.i.l.bf16 %v16144_v58  ;;  %16433 = vrot.lane.b32.xlu0 %v17590_v9, %s16933_s15 }
 0x17e   : > { %3921 = vst.msk [vmem:[#allocation0 + $0x283] ss:$8 sm:$0xf] %vm1398_vm0, %v16110_v54   ;;  %3923 = vst.msk [vmem:[#allocation0 + $0x283] ss:$8 sm:$0xf0] %vm1398_vm0, %v16110_v54   ;;  %v16149_v54 = vpop.permute.xlu1 %16148 }
 0x17f   : > { %v17876_v55 = vld [vmem:[#allocation1 + $0x1c0] sm:$0xff]   ;;  %2023 = vst.msk [vmem:[#allocation0 + $0xe08] ss:$16 sm:$0x3] %vm1398_vm0, %v2020_v30   ;;  %v6156_v24 = vld [vmem:[#allocation1 + $0x50] sm:$0xff]   ;;  %v2064_v62 = vld [vmem:[#allocation1 + $0x1e8] sm:$0xff]   ;;  %v16151_v29 = vunpack.i.h.bf16 %v16149_v54 }
 0x180   : > { %v6143_v31 = vld [vmem:[#allocation1 + $0x40] sm:$0xff]   ;;  %2012 = vst.msk [vmem:[#allocation0 + $0xe00] ss:$16 sm:$0x3] %vm1398_vm0, %v17876_v55   ;;  %v17892_v22 = vld [vmem:[#allocation1 + $0x70] sm:$0xff]   ;;  %v2086_v18 = vld [vmem:[#allocation1 + $0x1f8] sm:$0xff]   ;;  %16438 = vrot.lane.b32.xlu1 %v17598_v10, %s16933_s15 }
 0x181   : > { %2014 = vst.msk [vmem:[#allocation0 + $0xe00] ss:$16 sm:$0xc] %vm1398_vm0, %v17876_v55   ;;  %2018 = vst.msk [vmem:[#allocation0 + $0xe00] ss:$16 sm:$0xc0] %vm1398_vm0, %v17876_v55   ;;  %v17900_v25 = vpack.i.bf16 %v6156_v24, %v6143_v31  ;;  %16443 = vrot.lane.b32.xlu0 %v17606_v46, %s16933_s15 }
 0x182   : > { %2025 = vst.msk [vmem:[#allocation0 + $0xe08] ss:$16 sm:$0xc] %vm1398_vm0, %v2020_v30   ;;  %2029 = vst.msk [vmem:[#allocation0 + $0xe08] ss:$16 sm:$0xc0] %vm1398_vm0, %v2020_v30  }
 0x183   : > { %2016 = vst.msk [vmem:[#allocation0 + $0xe00] ss:$16 sm:$0x30] %vm1398_vm0, %v17876_v55   ;;  %2027 = vst.msk [vmem:[#allocation0 + $0xe08] ss:$16 sm:$0x30] %vm1398_vm0, %v2020_v30   ;;  %v16150_v30 = vunpack.i.l.bf16 %v16149_v54 }
 0x184   : > { %v17890_v21 = vld [vmem:[#allocation1 + $0x60] sm:$0xff]   ;;  %1484 = vst.msk [vmem:[#allocation0 + $0x200] ss:$16 sm:$0x3] %vm1398_vm0, %v6143_v31   ;;  %v17930_v27 = vld [vmem:[#allocation1 + $0x1d0] sm:$0xff]   ;;  %v2108_v36 = vld [vmem:[#allocation1 + $0x208] sm:$0xff]   ;;  %16448 = vrot.lane.b32.xlu1 %v17614_v47, %s16933_s15 }
 0x185   : > { %1486 = vst.msk [vmem:[#allocation0 + $0x200] ss:$16 sm:$0xc] %vm1398_vm0, %v6143_v31   ;;  %1488 = vst.msk [vmem:[#allocation0 + $0x200] ss:$16 sm:$0x30] %vm1398_vm0, %v6143_v31   ;;  %v16727_v52 = vpack.i.bf16 %v17892_v22, %v17890_v21  ;;  %16453 = vrot.lane.b32.xlu0 %v17622_v2, %s16933_s15 }
 0x186   : > { %1490 = vst.msk [vmem:[#allocation0 + $0x200] ss:$16 sm:$0xc0] %vm1398_vm0, %v6143_v31   ;;  %1506 = vst.msk [vmem:[#allocation0 + $0x280] ss:$16 sm:$0x3] %vm1398_vm0, %v6156_v24   ;;  %v16154_v31 = vpop.permute.xlu0 %16153 }
 0x187   : > { %1508 = vst.msk [vmem:[#allocation0 + $0x280] ss:$16 sm:$0xc] %vm1398_vm0, %v6156_v24   ;;  %1510 = vst.msk [vmem:[#allocation0 + $0x280] ss:$16 sm:$0x30] %vm1398_vm0, %v6156_v24   ;;  %v16156_v23 = vunpack.i.h.bf16 %v16154_v31 }
 0x188   : > { %1512 = vst.msk [vmem:[#allocation0 + $0x280] ss:$16 sm:$0xc0] %vm1398_vm0, %v6156_v24   ;;  %1528 = vst.msk [vmem:[#allocation0 + $0x300] ss:$16 sm:$0x3] %vm1398_vm0, %v17890_v21   ;;  %v16155_v24 = vunpack.i.l.bf16 %v16154_v31  ;;  %16458 = vrot.lane.b32.xlu1 %v17630_v5, %s16933_s15 }
 0x189   : > { %1530 = vst.msk [vmem:[#allocation0 + $0x300] ss:$16 sm:$0xc] %vm1398_vm0, %v17890_v21   ;;  %1532 = vst.msk [vmem:[#allocation0 + $0x300] ss:$16 sm:$0x30] %vm1398_vm0, %v17890_v21   ;;  %16463 = vrot.lane.b32.xlu0 %v17638_v41, %s16933_s15 }
 0x18a   : > { %1534 = vst.msk [vmem:[#allocation0 + $0x300] ss:$16 sm:$0xc0] %vm1398_vm0, %v17890_v21   ;;  %1550 = vst.msk [vmem:[#allocation0 + $0x380] ss:$16 sm:$0x3] %vm1398_vm0, %v17892_v22   ;;  %v16164_v0 = vpop.permute.xlu0 %16163 }
 0x18b   : > { %1552 = vst.msk [vmem:[#allocation0 + $0x380] ss:$16 sm:$0xc] %vm1398_vm0, %v17892_v22   ;;  %1554 = vst.msk [vmem:[#allocation0 + $0x380] ss:$16 sm:$0x30] %vm1398_vm0, %v17892_v22  }
 0x18c   : > { %1556 = vst.msk [vmem:[#allocation0 + $0x380] ss:$16 sm:$0xc0] %vm1398_vm0, %v17892_v22   ;;  %3948 = vst.msk [vmem:[#allocation0 + $0x343] ss:$8 sm:$0xf] %vm1398_vm0, %v16116_v60   ;;  %16468 = vrot.lane.b32.xlu1 %v17646_v42, %s16933_s15 }
 0x18d   : > { %3950 = vst.msk [vmem:[#allocation0 + $0x343] ss:$8 sm:$0xf0] %vm1398_vm0, %v16116_v60   ;;  %3939 = vst.msk [vmem:[#allocation0 + $0x303] ss:$8 sm:$0xf] %vm1398_vm0, %v16115_v61   ;;  %16473 = vrot.lane.b32.xlu0 %v17654_v40, %s16933_s15 }
 0x18e   : > { %3941 = vst.msk [vmem:[#allocation0 + $0x303] ss:$8 sm:$0xf0] %vm1398_vm0, %v16115_v61   ;;  %3966 = vst.msk [vmem:[#allocation0 + $0x3c3] ss:$8 sm:$0xf] %vm1398_vm0, %v16121_v14  }
 0x18f   : > { %3968 = vst.msk [vmem:[#allocation0 + $0x3c3] ss:$8 sm:$0xf0] %vm1398_vm0, %v16121_v14   ;;  %3957 = vst.msk [vmem:[#allocation0 + $0x383] ss:$8 sm:$0xf] %vm1398_vm0, %v16120_v15   ;;  %v16159_v14 = vpop.permute.xlu1 %16158 }
 0x190   : > { %3959 = vst.msk [vmem:[#allocation0 + $0x383] ss:$8 sm:$0xf0] %vm1398_vm0, %v16120_v15   ;;  %2034 = vst.msk [vmem:[#allocation0 + $0xe80] ss:$16 sm:$0x3] %vm1398_vm0, %v17930_v27   ;;  %v16161_v15 = vunpack.i.h.bf16 %v16159_v14  ;;  %16478 = vrot.lane.b32.xlu1 %v17662_v43, %s16933_s15 }
 0x191   : > { %2036 = vst.msk [vmem:[#allocation0 + $0xe80] ss:$16 sm:$0xc] %vm1398_vm0, %v17930_v27   ;;  %2038 = vst.msk [vmem:[#allocation0 + $0xe80] ss:$16 sm:$0x30] %vm1398_vm0, %v17930_v27   ;;  %16483 = vrot.lane.b32.xlu0 %v17670_v56, %s16933_s15 }
 0x192   : > { %2040 = vst.msk [vmem:[#allocation0 + $0xe80] ss:$16 sm:$0xc0] %vm1398_vm0, %v17930_v27   ;;  %2045 = vst.msk [vmem:[#allocation0 + $0xe88] ss:$16 sm:$0x3] %vm1398_vm0, %v2042_v53  }
 0x193   : > { %2047 = vst.msk [vmem:[#allocation0 + $0xe88] ss:$16 sm:$0xc] %vm1398_vm0, %v2042_v53   ;;  %2049 = vst.msk [vmem:[#allocation0 + $0xe88] ss:$16 sm:$0x30] %vm1398_vm0, %v2042_v53   ;;  %v16169_v32 = vpop.permute.xlu1 %16168 }
 0x194   : > { %2051 = vst.msk [vmem:[#allocation0 + $0xe88] ss:$16 sm:$0xc0] %vm1398_vm0, %v2042_v53   ;;  %v17948_v1 = vld [vmem:[#allocation1 + $0x1e0] sm:$0xff]   ;;  %v6208_v33 = vld [vmem:[#allocation1 + $0x90] sm:$0xff]   ;;  %v2130_v19 = vld [vmem:[#allocation1 + $0x218] sm:$0xff]   ;;  %v16160_v53 = vunpack.i.l.bf16 %v16159_v14  ;;  %16488 = vrot.lane.b32.xlu1 %v17678_v57, %s16933_s15 }
 0x195   : > { %v6195_v63 = vld [vmem:[#allocation1 + $0x80] sm:$0xff]   ;;  %2056 = vst.msk [vmem:[#allocation0 + $0xf00] ss:$16 sm:$0x3] %vm1398_vm0, %v17948_v1   ;;  %v17990_v12 = vld [vmem:[#allocation1 + $0x1f0] sm:$0xff]   ;;  %v2152_v13 = vld [vmem:[#allocation1 + $0x228] sm:$0xff]   ;;  %16493 = vrot.lane.b32.xlu0 %v17686_v44, %s16933_s15 }
 0x196   : > { %2060 = vst.msk [vmem:[#allocation0 + $0xf00] ss:$16 sm:$0x30] %vm1398_vm0, %v17948_v1   ;;  %2062 = vst.msk [vmem:[#allocation0 + $0xf00] ss:$16 sm:$0xc0] %vm1398_vm0, %v17948_v1   ;;  %v17970_v11 = vpack.i.bf16 %v6208_v33, %v6195_v63  ;;  %v16787_v51 = vpack.i.bf16 %v17990_v12, %v17948_v1 }
 0x197   : > { %2067 = vst.msk [vmem:[#allocation0 + $0xf08] ss:$16 sm:$0x3] %vm1398_vm0, %v2064_v62   ;;  %2071 = vst.msk [vmem:[#allocation0 + $0xf08] ss:$16 sm:$0x30] %vm1398_vm0, %v2064_v62  }
 0x198   : > { %2073 = vst.msk [vmem:[#allocation0 + $0xf08] ss:$16 sm:$0xc0] %vm1398_vm0, %v2064_v62   ;;  %2058 = vst.msk [vmem:[#allocation0 + $0xf00] ss:$16 sm:$0xc] %vm1398_vm0, %v17948_v1   ;;  %16498 = vrot.lane.b32.xlu1 %v17694_v45, %s16933_s15 }
 0x199   : > { %2069 = vst.msk [vmem:[#allocation0 + $0xf08] ss:$16 sm:$0xc] %vm1398_vm0, %v2064_v62   ;;  %v17962_v34 = vld [vmem:[#allocation1 + $0xa0] sm:$0xff]   ;;  %v18030_v16 = vld [vmem:[#allocation1 + $0x210] sm:$0xff]   ;;  %v2174_v10 = vld [vmem:[#allocation1 + $0x238] sm:$0xff]  }
 0x19a   : > { %1572 = vst.msk [vmem:[#allocation0 + $0x400] ss:$16 sm:$0x3] %vm1398_vm0, %v6195_v63   ;;  %1574 = vst.msk [vmem:[#allocation0 + $0x400] ss:$16 sm:$0xc] %vm1398_vm0, %v6195_v63  }
 0x19b   : > { %1576 = vst.msk [vmem:[#allocation0 + $0x400] ss:$16 sm:$0x30] %vm1398_vm0, %v6195_v63   ;;  %1578 = vst.msk [vmem:[#allocation0 + $0x400] ss:$16 sm:$0xc0] %vm1398_vm0, %v6195_v63  }
 0x19c   : > { %1594 = vst.msk [vmem:[#allocation0 + $0x480] ss:$16 sm:$0x3] %vm1398_vm0, %v6208_v33   ;;  %1596 = vst.msk [vmem:[#allocation0 + $0x480] ss:$16 sm:$0xc] %vm1398_vm0, %v6208_v33  }
 0x19d   : > { %1598 = vst.msk [vmem:[#allocation0 + $0x480] ss:$16 sm:$0x30] %vm1398_vm0, %v6208_v33   ;;  %1600 = vst.msk [vmem:[#allocation0 + $0x480] ss:$16 sm:$0xc0] %vm1398_vm0, %v6208_v33   ;;  %v16171_v33 = vunpack.i.h.bf16 %v16169_v32 }
 0x19e   : > { %1616 = vst.msk [vmem:[#allocation0 + $0x500] ss:$16 sm:$0x3] %vm1398_vm0, %v17962_v34   ;;  %1618 = vst.msk [vmem:[#allocation0 + $0x500] ss:$16 sm:$0xc] %vm1398_vm0, %v17962_v34  }
 0x19f   : > { %1620 = vst.msk [vmem:[#allocation0 + $0x500] ss:$16 sm:$0x30] %vm1398_vm0, %v17962_v34   ;;  %1622 = vst.msk [vmem:[#allocation0 + $0x500] ss:$16 sm:$0xc0] %vm1398_vm0, %v17962_v34  }
 0x1a0   : > { %3984 = vst.msk [vmem:[#allocation0 + $0x443] ss:$8 sm:$0xf] %vm1398_vm0, %v16126_v7   ;;  %3986 = vst.msk [vmem:[#allocation0 + $0x443] ss:$8 sm:$0xf0] %vm1398_vm0, %v16126_v7   ;;  %v16166_v7 = vunpack.i.h.bf16 %v16164_v0 }
 0x1a1   : > { %3975 = vst.msk [vmem:[#allocation0 + $0x403] ss:$8 sm:$0xf] %vm1398_vm0, %v16125_v8   ;;  %3977 = vst.msk [vmem:[#allocation0 + $0x403] ss:$8 sm:$0xf0] %vm1398_vm0, %v16125_v8   ;;  %v16165_v8 = vunpack.i.l.bf16 %v16164_v0 }
 0x1a2   : > { %4002 = vst.msk [vmem:[#allocation0 + $0x4c3] ss:$8 sm:$0xf] %vm1398_vm0, %v16131_v35   ;;  %4004 = vst.msk [vmem:[#allocation0 + $0x4c3] ss:$8 sm:$0xf0] %vm1398_vm0, %v16131_v35   ;;  %v16170_v35 = vunpack.i.l.bf16 %v16169_v32 }
 0x1a3   : > { %3993 = vst.msk [vmem:[#allocation0 + $0x483] ss:$8 sm:$0xf] %vm1398_vm0, %v16130_v17   ;;  %3995 = vst.msk [vmem:[#allocation0 + $0x483] ss:$8 sm:$0xf0] %vm1398_vm0, %v16130_v17   ;;  %v16174_v17 = vpop.permute.xlu0 %16173 }
 0x1a4   : > { %2078 = vst.msk [vmem:[#allocation0 + $0xf80] ss:$16 sm:$0x3] %vm1398_vm0, %v17990_v12   ;;  %2080 = vst.msk [vmem:[#allocation0 + $0xf80] ss:$16 sm:$0xc] %vm1398_vm0, %v17990_v12   ;;  %v16176_v20 = vunpack.i.h.bf16 %v16174_v17 }
 0x1a5   : > { %2082 = vst.msk [vmem:[#allocation0 + $0xf80] ss:$16 sm:$0x30] %vm1398_vm0, %v17990_v12   ;;  %2084 = vst.msk [vmem:[#allocation0 + $0xf80] ss:$16 sm:$0xc0] %vm1398_vm0, %v17990_v12  }
 0x1a6   : > { %2089 = vst.msk [vmem:[#allocation0 + $0xf88] ss:$16 sm:$0x3] %vm1398_vm0, %v2086_v18   ;;  %2091 = vst.msk [vmem:[#allocation0 + $0xf88] ss:$16 sm:$0xc] %vm1398_vm0, %v2086_v18  }
 0x1a7   : > { %2093 = vst.msk [vmem:[#allocation0 + $0xf88] ss:$16 sm:$0x30] %vm1398_vm0, %v2086_v18   ;;  %2095 = vst.msk [vmem:[#allocation0 + $0xf88] ss:$16 sm:$0xc0] %vm1398_vm0, %v2086_v18  }
 0x1a8   : > { %v18008_v26 = vld [vmem:[#allocation1 + $0x200] sm:$0xff]   ;;  %2111 = vst.msk [vmem:[#allocation0 + $0x1008] ss:$16 sm:$0x3] %vm1398_vm0, %v2108_v36   ;;  %v18070_v9 = vld [vmem:[#allocation1 + $0x230] sm:$0xff]   ;;  %v2196_v61 = vld [vmem:[#allocation1 + $0x248] sm:$0xff]  }
 0x1a9   : > { %2100 = vst.msk [vmem:[#allocation0 + $0x1000] ss:$16 sm:$0x3] %vm1398_vm0, %v18008_v26   ;;  %2102 = vst.msk [vmem:[#allocation0 + $0x1000] ss:$16 sm:$0xc] %vm1398_vm0, %v18008_v26  }
 0x1aa   : > { %2113 = vst.msk [vmem:[#allocation0 + $0x1008] ss:$16 sm:$0xc] %vm1398_vm0, %v2108_v36   ;;  %2104 = vst.msk [vmem:[#allocation0 + $0x1000] ss:$16 sm:$0x30] %vm1398_vm0, %v18008_v26  }
 0x1ab   : > { %2106 = vst.msk [vmem:[#allocation0 + $0x1000] ss:$16 sm:$0xc0] %vm1398_vm0, %v18008_v26   ;;  %2115 = vst.msk [vmem:[#allocation0 + $0x1008] ss:$16 sm:$0x30] %vm1398_vm0, %v2108_v36  }
 0x1ac   : > { %2117 = vst.msk [vmem:[#allocation0 + $0x1008] ss:$16 sm:$0xc0] %vm1398_vm0, %v2108_v36   ;;  %4020 = vst.msk [vmem:[#allocation0 + $0x543] ss:$8 sm:$0xf] %vm1398_vm0, %v16136_v37   ;;  %v16175_v36 = vunpack.i.l.bf16 %v16174_v17 }
 0x1ad   : > { %4022 = vst.msk [vmem:[#allocation0 + $0x543] ss:$8 sm:$0xf0] %vm1398_vm0, %v16136_v37   ;;  %4011 = vst.msk [vmem:[#allocation0 + $0x503] ss:$8 sm:$0xf] %vm1398_vm0, %v16135_v50   ;;  %v16179_v37 = vpop.permute.xlu1 %16178 }
 0x1ae   : > { %4013 = vst.msk [vmem:[#allocation0 + $0x503] ss:$8 sm:$0xf0] %vm1398_vm0, %v16135_v50   ;;  %4038 = vst.msk [vmem:[#allocation0 + $0x5c3] ss:$8 sm:$0xf] %vm1398_vm0, %v16141_v38   ;;  %v16782_v50 = vpack.i.bf16 %v17930_v27, %v17876_v55 }
 0x1af   : > { %4040 = vst.msk [vmem:[#allocation0 + $0x5c3] ss:$8 sm:$0xf0] %vm1398_vm0, %v16141_v38   ;;  %4029 = vst.msk [vmem:[#allocation0 + $0x583] ss:$8 sm:$0xf] %vm1398_vm0, %v16140_v39   ;;  %v16181_v38 = vunpack.i.h.bf16 %v16179_v37 }
 0x1b0   : > { %4031 = vst.msk [vmem:[#allocation0 + $0x583] ss:$8 sm:$0xf0] %vm1398_vm0, %v16140_v39   ;;  %2122 = vst.msk [vmem:[#allocation0 + $0x1080] ss:$16 sm:$0x3] %vm1398_vm0, %v18030_v16   ;;  %v16180_v39 = vunpack.i.l.bf16 %v16179_v37 }
 0x1b1   : > { %2124 = vst.msk [vmem:[#allocation0 + $0x1080] ss:$16 sm:$0xc] %vm1398_vm0, %v18030_v16   ;;  %2126 = vst.msk [vmem:[#allocation0 + $0x1080] ss:$16 sm:$0x30] %vm1398_vm0, %v18030_v16   ;;  %v16189_v54 = vpop.permute.xlu1 %16188 }
 0x1b2   : > { %2133 = vst.msk [vmem:[#allocation0 + $0x1088] ss:$16 sm:$0x3] %vm1398_vm0, %v2130_v19   ;;  %2135 = vst.msk [vmem:[#allocation0 + $0x1088] ss:$16 sm:$0xc] %vm1398_vm0, %v2130_v19  }
 0x1b3   : > { %2137 = vst.msk [vmem:[#allocation0 + $0x1088] ss:$16 sm:$0x30] %vm1398_vm0, %v2130_v19   ;;  %2128 = vst.msk [vmem:[#allocation0 + $0x1080] ss:$16 sm:$0xc0] %vm1398_vm0, %v18030_v16  }
 0x1b4   : > { %2139 = vst.msk [vmem:[#allocation0 + $0x1088] ss:$16 sm:$0xc0] %vm1398_vm0, %v2130_v19   ;;  %v18048_v6 = vld [vmem:[#allocation1 + $0x220] sm:$0xff]   ;;  %v18110_v46 = vld [vmem:[#allocation1 + $0x250] sm:$0xff]   ;;  %v2218_v47 = vld [vmem:[#allocation1 + $0x258] sm:$0xff]   ;;  %v16184_v19 = vpop.permute.xlu0 %16183 }
 0x1b5   : > { %2144 = vst.msk [vmem:[#allocation0 + $0x1100] ss:$16 sm:$0x3] %vm1398_vm0, %v18048_v6   ;;  %2146 = vst.msk [vmem:[#allocation0 + $0x1100] ss:$16 sm:$0xc] %vm1398_vm0, %v18048_v6  }
 0x1b6   : > { %2148 = vst.msk [vmem:[#allocation0 + $0x1100] ss:$16 sm:$0x30] %vm1398_vm0, %v18048_v6   ;;  %2155 = vst.msk [vmem:[#allocation0 + $0x1108] ss:$16 sm:$0x3] %vm1398_vm0, %v2152_v13  }
 0x1b7   : > { %2157 = vst.msk [vmem:[#allocation0 + $0x1108] ss:$16 sm:$0xc] %vm1398_vm0, %v2152_v13   ;;  %2159 = vst.msk [vmem:[#allocation0 + $0x1108] ss:$16 sm:$0x30] %vm1398_vm0, %v2152_v13  }
 0x1b8   : > { %2150 = vst.msk [vmem:[#allocation0 + $0x1100] ss:$16 sm:$0xc0] %vm1398_vm0, %v18048_v6   ;;  %2161 = vst.msk [vmem:[#allocation0 + $0x1108] ss:$16 sm:$0xc0] %vm1398_vm0, %v2152_v13   ;;  %v16194_v40 = vpop.permute.xlu0 %16193 }
 0x1b9   : > { %4056 = vst.msk [vmem:[#allocation0 + $0x643] ss:$8 sm:$0xf] %vm1398_vm0, %v16146_v3   ;;  %4058 = vst.msk [vmem:[#allocation0 + $0x643] ss:$8 sm:$0xf0] %vm1398_vm0, %v16146_v3   ;;  %v16186_v3 = vunpack.i.h.bf16 %v16184_v19  ;;  %v16195_v31 = vunpack.i.l.bf16 %v16194_v40 }
 0x1ba   : > { %4047 = vst.msk [vmem:[#allocation0 + $0x603] ss:$8 sm:$0xf] %vm1398_vm0, %v16145_v49   ;;  %4049 = vst.msk [vmem:[#allocation0 + $0x603] ss:$8 sm:$0xf0] %vm1398_vm0, %v16145_v49   ;;  %v16185_v49 = vunpack.i.l.bf16 %v16184_v19 }
 0x1bb   : > { %4074 = vst.msk [vmem:[#allocation0 + $0x6c3] ss:$8 sm:$0xf] %vm1398_vm0, %v16151_v29   ;;  %4076 = vst.msk [vmem:[#allocation0 + $0x6c3] ss:$8 sm:$0xf0] %vm1398_vm0, %v16151_v29   ;;  %v16191_v29 = vunpack.i.h.bf16 %v16189_v54 }
 0x1bc   : > { %4065 = vst.msk [vmem:[#allocation0 + $0x683] ss:$8 sm:$0xf] %vm1398_vm0, %v16150_v30   ;;  %4067 = vst.msk [vmem:[#allocation0 + $0x683] ss:$8 sm:$0xf0] %vm1398_vm0, %v16150_v30   ;;  %v16190_v30 = vunpack.i.l.bf16 %v16189_v54  ;;  %v16204_v57 = vpop.permute.xlu0 %16203 }
 0x1bd   : > { %2166 = vst.msk [vmem:[#allocation0 + $0x1180] ss:$16 sm:$0x3] %vm1398_vm0, %v18070_v9   ;;  %2168 = vst.msk [vmem:[#allocation0 + $0x1180] ss:$16 sm:$0xc] %vm1398_vm0, %v18070_v9  }
 0x1be   : > { %2170 = vst.msk [vmem:[#allocation0 + $0x1180] ss:$16 sm:$0x30] %vm1398_vm0, %v18070_v9   ;;  %2172 = vst.msk [vmem:[#allocation0 + $0x1180] ss:$16 sm:$0xc0] %vm1398_vm0, %v18070_v9  }
 0x1bf   : > { %2177 = vst.msk [vmem:[#allocation0 + $0x1188] ss:$16 sm:$0x3] %vm1398_vm0, %v2174_v10   ;;  %2179 = vst.msk [vmem:[#allocation0 + $0x1188] ss:$16 sm:$0xc] %vm1398_vm0, %v2174_v10  }
 0x1c0   : > { %2181 = vst.msk [vmem:[#allocation0 + $0x1188] ss:$16 sm:$0x30] %vm1398_vm0, %v2174_v10   ;;  %2183 = vst.msk [vmem:[#allocation0 + $0x1188] ss:$16 sm:$0xc0] %vm1398_vm0, %v2174_v10   ;;  %v16196_v10 = vunpack.i.h.bf16 %v16194_v40  ;;  %v16214_v37 = vpop.permute.xlu0 %16213 }
 0x1c1   : > { %v18088_v60 = vld [vmem:[#allocation1 + $0x240] sm:$0xff]   ;;  %2199 = vst.msk [vmem:[#allocation0 + $0x1208] ss:$16 sm:$0x3] %vm1398_vm0, %v2196_v61   ;;  %v2240_v63 = vld [vmem:[#allocation1 + $0x268] sm:$0xff]   ;;  %v18150_v2 = vld [vmem:[#allocation1 + $0x270] sm:$0xff]   ;;  %v16215_v19 = vunpack.i.l.bf16 %v16214_v37 }
 0x1c2   : > { %2188 = vst.msk [vmem:[#allocation0 + $0x1200] ss:$16 sm:$0x3] %vm1398_vm0, %v18088_v60   ;;  %2192 = vst.msk [vmem:[#allocation0 + $0x1200] ss:$16 sm:$0x30] %vm1398_vm0, %v18088_v60  }
 0x1c3   : > { %2194 = vst.msk [vmem:[#allocation0 + $0x1200] ss:$16 sm:$0xc0] %vm1398_vm0, %v18088_v60   ;;  %2203 = vst.msk [vmem:[#allocation0 + $0x1208] ss:$16 sm:$0x30] %vm1398_vm0, %v2196_v61  }
 0x1c4   : > { %2205 = vst.msk [vmem:[#allocation0 + $0x1208] ss:$16 sm:$0xc0] %vm1398_vm0, %v2196_v61   ;;  %2190 = vst.msk [vmem:[#allocation0 + $0x1200] ss:$16 sm:$0xc] %vm1398_vm0, %v18088_v60  }
 0x1c5   : > { %2201 = vst.msk [vmem:[#allocation0 + $0x1208] ss:$16 sm:$0xc] %vm1398_vm0, %v2196_v61   ;;  %4092 = vst.msk [vmem:[#allocation0 + $0x743] ss:$8 sm:$0xf] %vm1398_vm0, %v16156_v23   ;;  %v16199_v61 = vpop.permute.xlu1 %16198 }
 0x1c6   : > { %4094 = vst.msk [vmem:[#allocation0 + $0x743] ss:$8 sm:$0xf0] %vm1398_vm0, %v16156_v23   ;;  %4083 = vst.msk [vmem:[#allocation0 + $0x703] ss:$8 sm:$0xf] %vm1398_vm0, %v16155_v24   ;;  %v16792_v23 = vpack.i.bf16 %v18030_v16, %v18008_v26  ;;  %v16201_v14 = vunpack.i.h.bf16 %v16199_v61 }
 0x1c7   : > { %4085 = vst.msk [vmem:[#allocation0 + $0x703] ss:$8 sm:$0xf0] %vm1398_vm0, %v16155_v24   ;;  %4110 = vst.msk [vmem:[#allocation0 + $0x7c3] ss:$8 sm:$0xf] %vm1398_vm0, %v16161_v15   ;;  %v16797_v24 = vpack.i.bf16 %v18070_v9, %v18048_v6 }
 0x1c8   : > { %4112 = vst.msk [vmem:[#allocation0 + $0x7c3] ss:$8 sm:$0xf0] %vm1398_vm0, %v16161_v15   ;;  %4101 = vst.msk [vmem:[#allocation0 + $0x783] ss:$8 sm:$0xf] %vm1398_vm0, %v16160_v53   ;;  %v16200_v15 = vunpack.i.l.bf16 %v16199_v61 }
 0x1c9   : > { %4103 = vst.msk [vmem:[#allocation0 + $0x783] ss:$8 sm:$0xf0] %vm1398_vm0, %v16160_v53   ;;  %2210 = vst.msk [vmem:[#allocation0 + $0x1280] ss:$16 sm:$0x3] %vm1398_vm0, %v18110_v46  }
 0x1ca   : > { %2214 = vst.msk [vmem:[#allocation0 + $0x1280] ss:$16 sm:$0x30] %vm1398_vm0, %v18110_v46   ;;  %2216 = vst.msk [vmem:[#allocation0 + $0x1280] ss:$16 sm:$0xc0] %vm1398_vm0, %v18110_v46  }
 0x1cb   : > { %2221 = vst.msk [vmem:[#allocation0 + $0x1288] ss:$16 sm:$0x3] %vm1398_vm0, %v2218_v47   ;;  %2225 = vst.msk [vmem:[#allocation0 + $0x1288] ss:$16 sm:$0x30] %vm1398_vm0, %v2218_v47  }
 0x1cc   : > { %2227 = vst.msk [vmem:[#allocation0 + $0x1288] ss:$16 sm:$0xc0] %vm1398_vm0, %v2218_v47   ;;  %2212 = vst.msk [vmem:[#allocation0 + $0x1280] ss:$16 sm:$0xc] %vm1398_vm0, %v18110_v46  }
 0x1cd   : > { %2223 = vst.msk [vmem:[#allocation0 + $0x1288] ss:$16 sm:$0xc] %vm1398_vm0, %v2218_v47   ;;  %v18128_v62 = vld [vmem:[#allocation1 + $0x260] sm:$0xff]   ;;  %v2262_v5 = vld [vmem:[#allocation1 + $0x278] sm:$0xff]   ;;  %v2284_v18 = vld [vmem:[#allocation1 + $0x288] sm:$0xff]  }
 0x1ce   : > { %2232 = vst.msk [vmem:[#allocation0 + $0x1300] ss:$16 sm:$0x3] %vm1398_vm0, %v18128_v62   ;;  %2234 = vst.msk [vmem:[#allocation0 + $0x1300] ss:$16 sm:$0xc] %vm1398_vm0, %v18128_v62   ;;  %v16807_v17 = vpack.i.bf16 %v18150_v2, %v18128_v62 }
 0x1cf   : > { %2238 = vst.msk [vmem:[#allocation0 + $0x1300] ss:$16 sm:$0xc0] %vm1398_vm0, %v18128_v62   ;;  %2243 = vst.msk [vmem:[#allocation0 + $0x1308] ss:$16 sm:$0x3] %vm1398_vm0, %v2240_v63  }
 0x1d0   : > { %2245 = vst.msk [vmem:[#allocation0 + $0x1308] ss:$16 sm:$0xc] %vm1398_vm0, %v2240_v63   ;;  %2249 = vst.msk [vmem:[#allocation0 + $0x1308] ss:$16 sm:$0xc0] %vm1398_vm0, %v2240_v63  }
 0x1d1   : > { %2236 = vst.msk [vmem:[#allocation0 + $0x1300] ss:$16 sm:$0x30] %vm1398_vm0, %v18128_v62   ;;  %2247 = vst.msk [vmem:[#allocation0 + $0x1308] ss:$16 sm:$0x30] %vm1398_vm0, %v2240_v63   ;;  %v16206_v63 = vunpack.i.h.bf16 %v16204_v57 }
 0x1d2   : > { %4128 = vst.msk [vmem:[#allocation0 + $0x843] ss:$8 sm:$0xf] %vm1398_vm0, %v16166_v7   ;;  %4130 = vst.msk [vmem:[#allocation0 + $0x843] ss:$8 sm:$0xf0] %vm1398_vm0, %v16166_v7   ;;  %v16205_v7 = vunpack.i.l.bf16 %v16204_v57 }
 0x1d3   : > { %4119 = vst.msk [vmem:[#allocation0 + $0x803] ss:$8 sm:$0xf] %vm1398_vm0, %v16165_v8   ;;  %4121 = vst.msk [vmem:[#allocation0 + $0x803] ss:$8 sm:$0xf0] %vm1398_vm0, %v16165_v8   ;;  %v16209_v8 = vpop.permute.xlu1 %16208 }
 0x1d4   : > { %4146 = vst.msk [vmem:[#allocation0 + $0x8c3] ss:$8 sm:$0xf] %vm1398_vm0, %v16171_v33   ;;  %4148 = vst.msk [vmem:[#allocation0 + $0x8c3] ss:$8 sm:$0xf0] %vm1398_vm0, %v16171_v33   ;;  %v16211_v33 = vunpack.i.h.bf16 %v16209_v8 }
 0x1d5   : > { %4137 = vst.msk [vmem:[#allocation0 + $0x883] ss:$8 sm:$0xf] %vm1398_vm0, %v16170_v35   ;;  %4139 = vst.msk [vmem:[#allocation0 + $0x883] ss:$8 sm:$0xf0] %vm1398_vm0, %v16170_v35   ;;  %v16210_v35 = vunpack.i.l.bf16 %v16209_v8 }
 0x1d6   : > { %2254 = vst.msk [vmem:[#allocation0 + $0x1380] ss:$16 sm:$0x3] %vm1398_vm0, %v18150_v2   ;;  %2256 = vst.msk [vmem:[#allocation0 + $0x1380] ss:$16 sm:$0xc] %vm1398_vm0, %v18150_v2  }
 0x1d7   : > { %2258 = vst.msk [vmem:[#allocation0 + $0x1380] ss:$16 sm:$0x30] %vm1398_vm0, %v18150_v2   ;;  %2260 = vst.msk [vmem:[#allocation0 + $0x1380] ss:$16 sm:$0xc0] %vm1398_vm0, %v18150_v2  }
 0x1d8   : > { %2265 = vst.msk [vmem:[#allocation0 + $0x1388] ss:$16 sm:$0x3] %vm1398_vm0, %v2262_v5   ;;  %2267 = vst.msk [vmem:[#allocation0 + $0x1388] ss:$16 sm:$0xc] %vm1398_vm0, %v2262_v5  }
 0x1d9   : > { %2269 = vst.msk [vmem:[#allocation0 + $0x1388] ss:$16 sm:$0x30] %vm1398_vm0, %v2262_v5   ;;  %2271 = vst.msk [vmem:[#allocation0 + $0x1388] ss:$16 sm:$0xc0] %vm1398_vm0, %v2262_v5   ;;  %v16802_v5 = vpack.i.bf16 %v18110_v46, %v18088_v60 }
 0x1da   : > { %2287 = vst.msk [vmem:[#allocation0 + $0x1408] ss:$16 sm:$0x3] %vm1398_vm0, %v2284_v18   ;;  %2289 = vst.msk [vmem:[#allocation0 + $0x1408] ss:$16 sm:$0xc] %vm1398_vm0, %v2284_v18  }
 0x1db   : > { %2291 = vst.msk [vmem:[#allocation0 + $0x1408] ss:$16 sm:$0x30] %vm1398_vm0, %v2284_v18   ;;  %2293 = vst.msk [vmem:[#allocation0 + $0x1408] ss:$16 sm:$0xc0] %vm1398_vm0, %v2284_v18  }
 0x1dc   : > { %4164 = vst.msk [vmem:[#allocation0 + $0x943] ss:$8 sm:$0xf] %vm1398_vm0, %v16176_v20   ;;  %4166 = vst.msk [vmem:[#allocation0 + $0x943] ss:$8 sm:$0xf0] %vm1398_vm0, %v16176_v20  }
 0x1dd   : > { %4155 = vst.msk [vmem:[#allocation0 + $0x903] ss:$8 sm:$0xf] %vm1398_vm0, %v16175_v36   ;;  %4157 = vst.msk [vmem:[#allocation0 + $0x903] ss:$8 sm:$0xf0] %vm1398_vm0, %v16175_v36  }
 0x1de   : > { %v18184_v41 = vld [vmem:[#allocation1 + $0x280] sm:$0xff]   ;;  %v2306_v42 = vld [vmem:[#allocation1 + $0x298] sm:$0xff]   ;;  %4182 = vst.msk [vmem:[#allocation0 + $0x9c3] ss:$8 sm:$0xf] %vm1398_vm0, %v16181_v38   ;;  %v18201_v58 = vld [vmem:[#allocation1 + $0x290] sm:$0xff]  }
 0x1df   : > { %4184 = vst.msk [vmem:[#allocation0 + $0x9c3] ss:$8 sm:$0xf0] %vm1398_vm0, %v16181_v38   ;;  %4173 = vst.msk [vmem:[#allocation0 + $0x983] ss:$8 sm:$0xf] %vm1398_vm0, %v16180_v39  }
 0x1e0   : > { %4175 = vst.msk [vmem:[#allocation0 + $0x983] ss:$8 sm:$0xf0] %vm1398_vm0, %v16180_v39   ;;  %2276 = vst.msk [vmem:[#allocation0 + $0x1400] ss:$16 sm:$0x3] %vm1398_vm0, %v18184_v41  }
 0x1e1   : > { %2278 = vst.msk [vmem:[#allocation0 + $0x1400] ss:$16 sm:$0xc] %vm1398_vm0, %v18184_v41   ;;  %2280 = vst.msk [vmem:[#allocation0 + $0x1400] ss:$16 sm:$0x30] %vm1398_vm0, %v18184_v41  }
 0x1e2   : > { %2282 = vst.msk [vmem:[#allocation0 + $0x1400] ss:$16 sm:$0xc0] %vm1398_vm0, %v18184_v41   ;;  %2309 = vst.msk [vmem:[#allocation0 + $0x1488] ss:$16 sm:$0x3] %vm1398_vm0, %v2306_v42  }
 0x1e3   : > { %2311 = vst.msk [vmem:[#allocation0 + $0x1488] ss:$16 sm:$0xc] %vm1398_vm0, %v2306_v42   ;;  %2315 = vst.msk [vmem:[#allocation0 + $0x1488] ss:$16 sm:$0xc0] %vm1398_vm0, %v2306_v42  }
 0x1e4   : > { %2313 = vst.msk [vmem:[#allocation0 + $0x1488] ss:$16 sm:$0x30] %vm1398_vm0, %v2306_v42   ;;  %v1404_v13 = vld [vmem:[#allocation1 + $0x8] sm:$0xff]   ;;  %v1426_v43 = vld [vmem:[#allocation1 + $0x18] sm:$0xff]   ;;  %v16216_v42 = vunpack.i.h.bf16 %v16214_v37  ;;  %v6234_v48 = vld [vmem:[#allocation1 + $0xb0] sm:$0xff]  }
 0x1e5   : > { %2298 = vst.msk [vmem:[#allocation0 + $0x1480] ss:$16 sm:$0x3] %vm1398_vm0, %v18201_v58   ;;  %2300 = vst.msk [vmem:[#allocation0 + $0x1480] ss:$16 sm:$0xc] %vm1398_vm0, %v18201_v58   ;;  %v16737_v21 = vpack.i.bf16 %v6234_v48, %v17962_v34 }
 0x1e6   : > { %2304 = vst.msk [vmem:[#allocation0 + $0x1480] ss:$16 sm:$0xc0] %vm1398_vm0, %v18201_v58   ;;  %2302 = vst.msk [vmem:[#allocation0 + $0x1480] ss:$16 sm:$0x30] %vm1398_vm0, %v18201_v58  }
 0x1e7   : > { %1407 = vst.msk [vmem:[#allocation0 + $0x8] ss:$16 sm:$0x3] %vm1398_vm0, %v1404_v13   ;;  %1409 = vst.msk [vmem:[#allocation0 + $0x8] ss:$16 sm:$0xc] %vm1398_vm0, %v1404_v13  }
 0x1e8   : > { %1411 = vst.msk [vmem:[#allocation0 + $0x8] ss:$16 sm:$0x30] %vm1398_vm0, %v1404_v13   ;;  %1413 = vst.msk [vmem:[#allocation0 + $0x8] ss:$16 sm:$0xc0] %vm1398_vm0, %v1404_v13   ;;  %v16219_v13 = vpop.permute.xlu1 %16218 }
 0x1e9   : > { %4200 = vst.msk [vmem:[#allocation0 + $0xa43] ss:$8 sm:$0xf] %vm1398_vm0, %v16186_v3   ;;  %4202 = vst.msk [vmem:[#allocation0 + $0xa43] ss:$8 sm:$0xf0] %vm1398_vm0, %v16186_v3   ;;  %v16221_v3 = vunpack.i.h.bf16 %v16219_v13 }
 0x1ea   : > { %4191 = vst.msk [vmem:[#allocation0 + $0xa03] ss:$8 sm:$0xf] %vm1398_vm0, %v16185_v49   ;;  %4193 = vst.msk [vmem:[#allocation0 + $0xa03] ss:$8 sm:$0xf0] %vm1398_vm0, %v16185_v49   ;;  %v16220_v49 = vunpack.i.l.bf16 %v16219_v13 }
 0x1eb   : > { %4218 = vst.msk [vmem:[#allocation0 + $0xac3] ss:$8 sm:$0xf] %vm1398_vm0, %v16191_v29   ;;  %4220 = vst.msk [vmem:[#allocation0 + $0xac3] ss:$8 sm:$0xf0] %vm1398_vm0, %v16191_v29  }
 0x1ec   : > { %4209 = vst.msk [vmem:[#allocation0 + $0xa83] ss:$8 sm:$0xf] %vm1398_vm0, %v16190_v30   ;;  %4211 = vst.msk [vmem:[#allocation0 + $0xa83] ss:$8 sm:$0xf0] %vm1398_vm0, %v16190_v30   ;;  %v16229_v57 = vpop.permute.xlu1 %16228 }
 0x1ed   : > { %1429 = vst.msk [vmem:[#allocation0 + $0x88] ss:$16 sm:$0x3] %vm1398_vm0, %v1426_v43   ;;  %1431 = vst.msk [vmem:[#allocation0 + $0x88] ss:$16 sm:$0xc] %vm1398_vm0, %v1426_v43  }
 0x1ee   : > { %1433 = vst.msk [vmem:[#allocation0 + $0x88] ss:$16 sm:$0x30] %vm1398_vm0, %v1426_v43   ;;  %1435 = vst.msk [vmem:[#allocation0 + $0x88] ss:$16 sm:$0xc0] %vm1398_vm0, %v1426_v43  }
 0x1ef   : > { %v5336_v56 = vld.sshfl [vmem:[#allocation1] sm:$0xff pattern:$0xb3a29180]   ;;  %v5345_v53 = vld.sshfl [vmem:[#allocation1 + $0x4] sm:$0xff pattern:$0xb3a29180]  }
 0x1f0   : > { %4236 = vst.msk [vmem:[#allocation0 + $0xb43] ss:$8 sm:$0xf] %vm1398_vm0, %v16196_v10   ;;  %4238 = vst.msk [vmem:[#allocation0 + $0xb43] ss:$8 sm:$0xf0] %vm1398_vm0, %v16196_v10   ;;  %v16502_v32 = vpack.i.bf16 %v5345_v53, %v5336_v56  ;;  %v16812_v10 = vpack.i.bf16 %v18201_v58, %v18184_v41 }
 0x1f1   : > { %4227 = vst.msk [vmem:[#allocation0 + $0xb03] ss:$8 sm:$0xf] %vm1398_vm0, %v16195_v31   ;;  %4229 = vst.msk [vmem:[#allocation0 + $0xb03] ss:$8 sm:$0xf0] %vm1398_vm0, %v16195_v31   ;;  %v16224_v31 = vpop.permute.xlu0 %16223 }
 0x1f2   : > { %4254 = vst.msk [vmem:[#allocation0 + $0xbc3] ss:$8 sm:$0xf] %vm1398_vm0, %v16201_v14   ;;  %4256 = vst.msk [vmem:[#allocation0 + $0xbc3] ss:$8 sm:$0xf0] %vm1398_vm0, %v16201_v14   ;;  %16503 = vrot.lane.b32.xlu0 %v16502_v32, %s16934_s16  ;;  %v16226_v56 = vunpack.i.h.bf16 %v16224_v31  ;;  %v16225_v53 = vunpack.i.l.bf16 %v16224_v31 }
 0x1f3   : > { %4245 = vst.msk [vmem:[#allocation0 + $0xb83] ss:$8 sm:$0xf] %vm1398_vm0, %v16200_v15   ;;  %4247 = vst.msk [vmem:[#allocation0 + $0xb83] ss:$8 sm:$0xf0] %vm1398_vm0, %v16200_v15  }
 0x1f4   : > { %v5354_v47 = vld.sshfl [vmem:[#allocation1 + $0x10] sm:$0xff pattern:$0xb3a29180]   ;;  %v5363_v0 = vld.sshfl [vmem:[#allocation1 + $0x14] sm:$0xff pattern:$0xb3a29180]  }
 0x1f5   : > { %v18250_v44 = vld.sshfl [vmem:[#allocation1 + $0x20] sm:$0xff pattern:$0xb3a29180]   ;;  %4272 = vst.msk [vmem:[#allocation0 + $0xc43] ss:$8 sm:$0xf] %vm1398_vm0, %v16206_v63   ;;  %v16507_v45 = vpack.i.bf16 %v5363_v0, %v5354_v47  ;;  %v16231_v47 = vunpack.i.h.bf16 %v16229_v57  ;;  %v16230_v0 = vunpack.i.l.bf16 %v16229_v57 }
 0x1f6   : > { %4274 = vst.msk [vmem:[#allocation0 + $0xc43] ss:$8 sm:$0xf0] %vm1398_vm0, %v16206_v63   ;;  %4263 = vst.msk [vmem:[#allocation0 + $0xc03] ss:$8 sm:$0xf] %vm1398_vm0, %v16205_v7  }
 0x1f7   : > { %4265 = vst.msk [vmem:[#allocation0 + $0xc03] ss:$8 sm:$0xf0] %vm1398_vm0, %v16205_v7   ;;  %v5381_v18 = vld.sshfl [vmem:[#allocation1 + $0x24] sm:$0xff pattern:$0xb3a29180]   ;;  %16508 = vrot.lane.b32.xlu1 %v16507_v45, %s16934_s16 }
 0x1f8   : > { %v1448_v20 = vld [vmem:[#allocation1 + $0x28] sm:$0xff]   ;;  %v1470_v36 = vld [vmem:[#allocation1 + $0x38] sm:$0xff]   ;;  %4290 = vst.msk [vmem:[#allocation0 + $0xcc3] ss:$8 sm:$0xf] %vm1398_vm0, %v16211_v33   ;;  %v16512_v54 = vpack.i.bf16 %v5381_v18, %v18250_v44  ;;  %v6247_v22 = vld [vmem:[#allocation1 + $0xc0] sm:$0xff]  }
 0x1f9   : > { %4292 = vst.msk [vmem:[#allocation0 + $0xcc3] ss:$8 sm:$0xf0] %vm1398_vm0, %v16211_v33   ;;  %4281 = vst.msk [vmem:[#allocation0 + $0xc83] ss:$8 sm:$0xf] %vm1398_vm0, %v16210_v35   ;;  %v16234_v33 = vpop.permute.xlu0 %16233 }
 0x1fa   : > { %4283 = vst.msk [vmem:[#allocation0 + $0xc83] ss:$8 sm:$0xf0] %vm1398_vm0, %v16210_v35   ;;  %v5390_v38 = vld.sshfl [vmem:[#allocation1 + $0x30] sm:$0xff pattern:$0xb3a29180]   ;;  %16513 = vrot.lane.b32.xlu0 %v16512_v54, %s16934_s16  ;;  %v16236_v45 = vunpack.i.h.bf16 %v16234_v33  ;;  %v16235_v18 = vunpack.i.l.bf16 %v16234_v33 }
 0x1fb   : > { %v5399_v39 = vld.sshfl [vmem:[#allocation1 + $0x34] sm:$0xff pattern:$0xb3a29180]   ;;  %1451 = vst.msk [vmem:[#allocation0 + $0x108] ss:$16 sm:$0x3] %vm1398_vm0, %v1448_v20  }
 0x1fc   : > { %1453 = vst.msk [vmem:[#allocation0 + $0x108] ss:$16 sm:$0xc] %vm1398_vm0, %v1448_v20   ;;  %1455 = vst.msk [vmem:[#allocation0 + $0x108] ss:$16 sm:$0x30] %vm1398_vm0, %v1448_v20   ;;  %v16517_v30 = vpack.i.bf16 %v5399_v39, %v5390_v38 }
 0x1fd   : > { %1457 = vst.msk [vmem:[#allocation0 + $0x108] ss:$16 sm:$0xc0] %vm1398_vm0, %v1448_v20   ;;  %1473 = vst.msk [vmem:[#allocation0 + $0x188] ss:$16 sm:$0x3] %vm1398_vm0, %v1470_v36   ;;  %v16239_v20 = vpop.permute.xlu1 %16238 }
 0x1fe   : > { %1475 = vst.msk [vmem:[#allocation0 + $0x188] ss:$16 sm:$0xc] %vm1398_vm0, %v1470_v36   ;;  %1477 = vst.msk [vmem:[#allocation0 + $0x188] ss:$16 sm:$0x30] %vm1398_vm0, %v1470_v36   ;;  %16518 = vrot.lane.b32.xlu1 %v16517_v30, %s16934_s16  ;;  %v16241_v38 = vunpack.i.h.bf16 %v16239_v20  ;;  %v16240_v39 = vunpack.i.l.bf16 %v16239_v20 }
 0x1ff   : > { %1479 = vst.msk [vmem:[#allocation0 + $0x188] ss:$16 sm:$0xc0] %vm1398_vm0, %v1470_v36   ;;  %v5408_v29 = vld.sshfl [vmem:[#allocation1 + $0x40] sm:$0xff pattern:$0xb3a29180]  }
 0x200   : > { %4308 = vst.msk [vmem:[#allocation0 + $0xd43] ss:$8 sm:$0xf] %vm1398_vm0, %v16216_v42   ;;  %4310 = vst.msk [vmem:[#allocation0 + $0xd43] ss:$8 sm:$0xf0] %vm1398_vm0, %v16216_v42  }
 0x201   : > { %4299 = vst.msk [vmem:[#allocation0 + $0xd03] ss:$8 sm:$0xf] %vm1398_vm0, %v16215_v19   ;;  %4301 = vst.msk [vmem:[#allocation0 + $0xd03] ss:$8 sm:$0xf0] %vm1398_vm0, %v16215_v19  }
 0x202   : > { %v5417_v40 = vld.sshfl [vmem:[#allocation1 + $0x44] sm:$0xff pattern:$0xb3a29180]   ;;  %v5426_v43 = vld.sshfl [vmem:[#allocation1 + $0x50] sm:$0xff pattern:$0xb3a29180]  }
 0x203   : > { %4326 = vst.msk [vmem:[#allocation0 + $0xdc3] ss:$8 sm:$0xf] %vm1398_vm0, %v16221_v3   ;;  %4328 = vst.msk [vmem:[#allocation0 + $0xdc3] ss:$8 sm:$0xf0] %vm1398_vm0, %v16221_v3   ;;  %v16522_v63 = vpack.i.bf16 %v5417_v40, %v5408_v29 }
 0x204   : > { %4317 = vst.msk [vmem:[#allocation0 + $0xd83] ss:$8 sm:$0xf] %vm1398_vm0, %v16220_v49   ;;  %4319 = vst.msk [vmem:[#allocation0 + $0xd83] ss:$8 sm:$0xf0] %vm1398_vm0, %v16220_v49   ;;  %v16244_v49 = vpop.permute.xlu0 %16243 }
 0x205   : > { %v5435_v61 = vld.sshfl [vmem:[#allocation1 + $0x54] sm:$0xff pattern:$0xb3a29180]   ;;  %v1492_v14 = vld [vmem:[#allocation1 + $0x48] sm:$0xff]   ;;  %16523 = vrot.lane.b32.xlu0 %v16522_v63, %s16934_s16  ;;  %v16246_v30 = vunpack.i.h.bf16 %v16244_v49  ;;  %v16245_v40 = vunpack.i.l.bf16 %v16244_v49  ;;  %v6299_v48 = vld [vmem:[#allocation1 + $0x100] sm:$0xff]  }
 0x206   : > { %v1514_v15 = vld [vmem:[#allocation1 + $0x58] sm:$0xff]   ;;  %1495 = vst.msk [vmem:[#allocation0 + $0x208] ss:$16 sm:$0x3] %vm1398_vm0, %v1492_v14   ;;  %v16527_v7 = vpack.i.bf16 %v5435_v61, %v5426_v43  ;;  %v1536_v36 = vld [vmem:[#allocation1 + $0x68] sm:$0xff]   ;;  %v16249_v43 = vpop.permute.xlu1 %16248  ;;  %v6662_v60 = vld [vmem:[#allocation1 + $0x20] sm:$0xff]  }
 0x207   : > { %1497 = vst.msk [vmem:[#allocation0 + $0x208] ss:$16 sm:$0xc] %vm1398_vm0, %v1492_v14   ;;  %1499 = vst.msk [vmem:[#allocation0 + $0x208] ss:$16 sm:$0x30] %vm1398_vm0, %v1492_v14   ;;  %v16251_v31 = vunpack.i.h.bf16 %v16249_v43  ;;  %v16250_v61 = vunpack.i.l.bf16 %v16249_v43 }
 0x208   : > { %1501 = vst.msk [vmem:[#allocation0 + $0x208] ss:$16 sm:$0xc0] %vm1398_vm0, %v1492_v14   ;;  %1517 = vst.msk [vmem:[#allocation0 + $0x288] ss:$16 sm:$0x3] %vm1398_vm0, %v1514_v15   ;;  %16528 = vrot.lane.b32.xlu1 %v16527_v7, %s16934_s16 }
 0x209   : > { %1519 = vst.msk [vmem:[#allocation0 + $0x288] ss:$16 sm:$0xc] %vm1398_vm0, %v1514_v15   ;;  %1521 = vst.msk [vmem:[#allocation0 + $0x288] ss:$16 sm:$0x30] %vm1398_vm0, %v1514_v15  }
 0x20a   : > { %1523 = vst.msk [vmem:[#allocation0 + $0x288] ss:$16 sm:$0xc0] %vm1398_vm0, %v1514_v15   ;;  %4344 = vst.msk [vmem:[#allocation0 + $0xe43] ss:$8 sm:$0xf] %vm1398_vm0, %v16226_v56   ;;  %v16259_v33 = vpop.permute.xlu1 %16258 }
 0x20b   : > { %4346 = vst.msk [vmem:[#allocation0 + $0xe43] ss:$8 sm:$0xf0] %vm1398_vm0, %v16226_v56   ;;  %4335 = vst.msk [vmem:[#allocation0 + $0xe03] ss:$8 sm:$0xf] %vm1398_vm0, %v16225_v53  }
 0x20c   : > { %4337 = vst.msk [vmem:[#allocation0 + $0xe03] ss:$8 sm:$0xf0] %vm1398_vm0, %v16225_v53   ;;  %v5444_v8 = vld.sshfl [vmem:[#allocation1 + $0x60] sm:$0xff pattern:$0xb3a29180]  }
 0x20d   : > { %v5453_v32 = vld.sshfl [vmem:[#allocation1 + $0x64] sm:$0xff pattern:$0xb3a29180]   ;;  %4362 = vst.msk [vmem:[#allocation0 + $0xec3] ss:$8 sm:$0xf] %vm1398_vm0, %v16231_v47  }
 0x20e   : > { %4364 = vst.msk [vmem:[#allocation0 + $0xec3] ss:$8 sm:$0xf0] %vm1398_vm0, %v16231_v47   ;;  %4353 = vst.msk [vmem:[#allocation0 + $0xe83] ss:$8 sm:$0xf] %vm1398_vm0, %v16230_v0   ;;  %v16532_v42 = vpack.i.bf16 %v5453_v32, %v5444_v8 }
 0x20f   : > { %4355 = vst.msk [vmem:[#allocation0 + $0xe83] ss:$8 sm:$0xf0] %vm1398_vm0, %v16230_v0   ;;  %v5462_v35 = vld.sshfl [vmem:[#allocation1 + $0x70] sm:$0xff pattern:$0xb3a29180]   ;;  %v16254_v0 = vpop.permute.xlu0 %16253 }
 0x210   : > { %v5471_v44 = vld.sshfl [vmem:[#allocation1 + $0x74] sm:$0xff pattern:$0xb3a29180]   ;;  %1539 = vst.msk [vmem:[#allocation0 + $0x308] ss:$16 sm:$0x3] %vm1398_vm0, %v1536_v36   ;;  %16533 = vrot.lane.b32.xlu0 %v16532_v42, %s16934_s16  ;;  %v16256_v8 = vunpack.i.h.bf16 %v16254_v0  ;;  %v16255_v32 = vunpack.i.l.bf16 %v16254_v0 }
 0x211   : > { %v1558_v37 = vld [vmem:[#allocation1 + $0x78] sm:$0xff]   ;;  %1541 = vst.msk [vmem:[#allocation0 + $0x308] ss:$16 sm:$0xc] %vm1398_vm0, %v1536_v36   ;;  %v16537_v19 = vpack.i.bf16 %v5471_v44, %v5462_v35  ;;  %v1580_v57 = vld [vmem:[#allocation1 + $0x88] sm:$0xff]   ;;  %v18349_v35 = vld [vmem:[#allocation1 + $0xb0] sm:$0xff]   ;;  %v16261_v44 = vunpack.i.h.bf16 %v16259_v33 }
 0x212   : > { %1543 = vst.msk [vmem:[#allocation0 + $0x308] ss:$16 sm:$0x30] %vm1398_vm0, %v1536_v36   ;;  %1545 = vst.msk [vmem:[#allocation0 + $0x308] ss:$16 sm:$0xc0] %vm1398_vm0, %v1536_v36  }
 0x213   : > { %1561 = vst.msk [vmem:[#allocation0 + $0x388] ss:$16 sm:$0x3] %vm1398_vm0, %v1558_v37   ;;  %1563 = vst.msk [vmem:[#allocation0 + $0x388] ss:$16 sm:$0xc] %vm1398_vm0, %v1558_v37   ;;  %16538 = vrot.lane.b32.xlu1 %v16537_v19, %s16934_s16 }
 0x214   : > { %1565 = vst.msk [vmem:[#allocation0 + $0x388] ss:$16 sm:$0x30] %vm1398_vm0, %v1558_v37   ;;  %1567 = vst.msk [vmem:[#allocation0 + $0x388] ss:$16 sm:$0xc0] %vm1398_vm0, %v1558_v37  }
 0x215   : > { %4380 = vst.msk [vmem:[#allocation0 + $0xf43] ss:$8 sm:$0xf] %vm1398_vm0, %v16236_v45   ;;  %4382 = vst.msk [vmem:[#allocation0 + $0xf43] ss:$8 sm:$0xf0] %vm1398_vm0, %v16236_v45   ;;  %v16260_v45 = vunpack.i.l.bf16 %v16259_v33 }
 0x216   : > { %4371 = vst.msk [vmem:[#allocation0 + $0xf03] ss:$8 sm:$0xf] %vm1398_vm0, %v16235_v18   ;;  %4373 = vst.msk [vmem:[#allocation0 + $0xf03] ss:$8 sm:$0xf0] %vm1398_vm0, %v16235_v18  }
 0x217   : > { %v5480_v13 = vld.sshfl [vmem:[#allocation1 + $0x80] sm:$0xff pattern:$0xb3a29180]   ;;  %v5489_v3 = vld.sshfl [vmem:[#allocation1 + $0x84] sm:$0xff pattern:$0xb3a29180]  }
 0x218   : > { %4398 = vst.msk [vmem:[#allocation0 + $0xfc3] ss:$8 sm:$0xf] %vm1398_vm0, %v16241_v38   ;;  %4400 = vst.msk [vmem:[#allocation0 + $0xfc3] ss:$8 sm:$0xf0] %vm1398_vm0, %v16241_v38   ;;  %v16542_v14 = vpack.i.bf16 %v5489_v3, %v5480_v13  ;;  %v16264_v13 = vpop.permute.xlu0 %16263 }
 0x219   : > { %4389 = vst.msk [vmem:[#allocation0 + $0xf83] ss:$8 sm:$0xf] %vm1398_vm0, %v16240_v39   ;;  %4391 = vst.msk [vmem:[#allocation0 + $0xf83] ss:$8 sm:$0xf0] %vm1398_vm0, %v16240_v39  }
 0x21a   : > { %v5498_v54 = vld.sshfl [vmem:[#allocation1 + $0x90] sm:$0xff pattern:$0xb3a29180]   ;;  %v5507_v29 = vld.sshfl [vmem:[#allocation1 + $0x94] sm:$0xff pattern:$0xb3a29180]   ;;  %16543 = vrot.lane.b32.xlu0 %v16542_v14, %s16934_s16 }
 0x21b   : > { %v18324_v15 = vld.sshfl [vmem:[#allocation1 + $0xa0] sm:$0xff pattern:$0xb3a29180]   ;;  %4416 = vst.msk [vmem:[#allocation0 + $0x1043] ss:$8 sm:$0xf] %vm1398_vm0, %v16246_v30   ;;  %v16547_v56 = vpack.i.bf16 %v5507_v29, %v5498_v54  ;;  %v16266_v29 = vunpack.i.h.bf16 %v16264_v13 }
 0x21c   : > { %4418 = vst.msk [vmem:[#allocation0 + $0x1043] ss:$8 sm:$0xf0] %vm1398_vm0, %v16246_v30   ;;  %4407 = vst.msk [vmem:[#allocation0 + $0x1003] ss:$8 sm:$0xf] %vm1398_vm0, %v16245_v40   ;;  %v16265_v30 = vunpack.i.l.bf16 %v16264_v13 }
 0x21d   : > { %4409 = vst.msk [vmem:[#allocation0 + $0x1003] ss:$8 sm:$0xf0] %vm1398_vm0, %v16245_v40   ;;  %v18331_v53 = vld.sshfl [vmem:[#allocation1 + $0xa4] sm:$0xff pattern:$0xb3a29180]   ;;  %16548 = vrot.lane.b32.xlu1 %v16547_v56, %s16934_s16  ;;  %v16269_v40 = vpop.permute.xlu1 %16268 }
 0x21e   : > { %v1602_v47 = vld [vmem:[#allocation1 + $0x98] sm:$0xff]   ;;  %4434 = vst.msk [vmem:[#allocation0 + $0x10c3] ss:$8 sm:$0xf] %vm1398_vm0, %v16251_v31   ;;  %v16552_v18 = vpack.i.bf16 %v18331_v53, %v18324_v15  ;;  %v18364_v36 = vld [vmem:[#allocation1 + $0xc0] sm:$0xff]   ;;  %v18366_v37 = vld [vmem:[#allocation1 + $0xd0] sm:$0xff]   ;;  %v16271_v43 = vunpack.i.h.bf16 %v16269_v40 }
 0x21f   : > { %4436 = vst.msk [vmem:[#allocation0 + $0x10c3] ss:$8 sm:$0xf0] %vm1398_vm0, %v16251_v31   ;;  %4425 = vst.msk [vmem:[#allocation0 + $0x1083] ss:$8 sm:$0xf] %vm1398_vm0, %v16250_v61   ;;  %v16847_v19 = vpack.i.bf16 %v18366_v37, %v18364_v36  ;;  %v16270_v31 = vunpack.i.l.bf16 %v16269_v40 }
 0x220   : > { %4427 = vst.msk [vmem:[#allocation0 + $0x1083] ss:$8 sm:$0xf0] %vm1398_vm0, %v16250_v61   ;;  %v18337_v63 = vld.sshfl [vmem:[#allocation1 + $0xb0] sm:$0xff pattern:$0xb3a29180]   ;;  %16553 = vrot.lane.b32.xlu0 %v16552_v18, %s16934_s16 }
 0x221   : > { %v18339_v7 = vld.sshfl [vmem:[#allocation1 + $0xb4] sm:$0xff pattern:$0xb3a29180]   ;;  %1583 = vst.msk [vmem:[#allocation0 + $0x408] ss:$16 sm:$0x3] %vm1398_vm0, %v1580_v57   ;;  %v16279_v33 = vpop.permute.xlu1 %16278 }
 0x222   : > { %1585 = vst.msk [vmem:[#allocation0 + $0x408] ss:$16 sm:$0xc] %vm1398_vm0, %v1580_v57   ;;  %1587 = vst.msk [vmem:[#allocation0 + $0x408] ss:$16 sm:$0x30] %vm1398_vm0, %v1580_v57   ;;  %v16557_v38 = vpack.i.bf16 %v18339_v7, %v18337_v63 }
 0x223   : > { %1589 = vst.msk [vmem:[#allocation0 + $0x408] ss:$16 sm:$0xc0] %vm1398_vm0, %v1580_v57   ;;  %1605 = vst.msk [vmem:[#allocation0 + $0x488] ss:$16 sm:$0x3] %vm1398_vm0, %v1602_v47  }
 0x224   : > { %1607 = vst.msk [vmem:[#allocation0 + $0x488] ss:$16 sm:$0xc] %vm1398_vm0, %v1602_v47   ;;  %1609 = vst.msk [vmem:[#allocation0 + $0x488] ss:$16 sm:$0x30] %vm1398_vm0, %v1602_v47   ;;  %16558 = vrot.lane.b32.xlu1 %v16557_v38, %s16934_s16  ;;  %v16281_v38 = vunpack.i.h.bf16 %v16279_v33 }
 0x225   : > { %1611 = vst.msk [vmem:[#allocation0 + $0x488] ss:$16 sm:$0xc0] %vm1398_vm0, %v1602_v47   ;;  %v18354_v20 = vld.sshfl [vmem:[#allocation1 + $0xc0] sm:$0xff pattern:$0xb3a29180]   ;;  %v16274_v47 = vpop.permute.xlu0 %16273 }
 0x226   : > { %1638 = vst.msk [vmem:[#allocation0 + $0x580] ss:$16 sm:$0x3] %vm1398_vm0, %v18349_v35   ;;  %1640 = vst.msk [vmem:[#allocation0 + $0x580] ss:$16 sm:$0xc] %vm1398_vm0, %v18349_v35  }
 0x227   : > { %1642 = vst.msk [vmem:[#allocation0 + $0x580] ss:$16 sm:$0x30] %vm1398_vm0, %v18349_v35   ;;  %1644 = vst.msk [vmem:[#allocation0 + $0x580] ss:$16 sm:$0xc0] %vm1398_vm0, %v18349_v35  }
 0x228   : > { %4452 = vst.msk [vmem:[#allocation0 + $0x1143] ss:$8 sm:$0xf] %vm1398_vm0, %v16256_v8   ;;  %4454 = vst.msk [vmem:[#allocation0 + $0x1143] ss:$8 sm:$0xf0] %vm1398_vm0, %v16256_v8   ;;  %v16276_v8 = vunpack.i.h.bf16 %v16274_v47 }
 0x229   : > { %4443 = vst.msk [vmem:[#allocation0 + $0x1103] ss:$8 sm:$0xf] %vm1398_vm0, %v16255_v32   ;;  %4445 = vst.msk [vmem:[#allocation0 + $0x1103] ss:$8 sm:$0xf0] %vm1398_vm0, %v16255_v32   ;;  %v16275_v32 = vunpack.i.l.bf16 %v16274_v47 }
 0x22a   : > { %v18375_v39 = vld.sshfl [vmem:[#allocation1 + $0xc4] sm:$0xff pattern:$0xb3a29180]   ;;  %v18377_v42 = vld.sshfl [vmem:[#allocation1 + $0xd0] sm:$0xff pattern:$0xb3a29180]  }
 0x22b   : > { %1660 = vst.msk [vmem:[#allocation0 + $0x600] ss:$16 sm:$0x3] %vm1398_vm0, %v18364_v36   ;;  %1662 = vst.msk [vmem:[#allocation0 + $0x600] ss:$16 sm:$0xc] %vm1398_vm0, %v18364_v36   ;;  %v16562_v61 = vpack.i.bf16 %v18375_v39, %v18354_v20  ;;  %v16280_v39 = vunpack.i.l.bf16 %v16279_v33 }
 0x22c   : > { %1664 = vst.msk [vmem:[#allocation0 + $0x600] ss:$16 sm:$0x30] %vm1398_vm0, %v18364_v36   ;;  %1666 = vst.msk [vmem:[#allocation0 + $0x600] ss:$16 sm:$0xc0] %vm1398_vm0, %v18364_v36  }
 0x22d   : > { %1682 = vst.msk [vmem:[#allocation0 + $0x680] ss:$16 sm:$0x3] %vm1398_vm0, %v18366_v37   ;;  %1684 = vst.msk [vmem:[#allocation0 + $0x680] ss:$16 sm:$0xc] %vm1398_vm0, %v18366_v37   ;;  %16563 = vrot.lane.b32.xlu0 %v16562_v61, %s16934_s16  ;;  %v16289_v61 = vpop.permute.xlu1 %16288 }
 0x22e   : > { %1686 = vst.msk [vmem:[#allocation0 + $0x680] ss:$16 sm:$0x30] %vm1398_vm0, %v18366_v37   ;;  %1688 = vst.msk [vmem:[#allocation0 + $0x680] ss:$16 sm:$0xc0] %vm1398_vm0, %v18366_v37  }
 0x22f   : > { %4470 = vst.msk [vmem:[#allocation0 + $0x11c3] ss:$8 sm:$0xf] %vm1398_vm0, %v16261_v44   ;;  %4472 = vst.msk [vmem:[#allocation0 + $0x11c3] ss:$8 sm:$0xf0] %vm1398_vm0, %v16261_v44  }
 0x230   : > { %4461 = vst.msk [vmem:[#allocation0 + $0x1183] ss:$8 sm:$0xf] %vm1398_vm0, %v16260_v45   ;;  %4463 = vst.msk [vmem:[#allocation0 + $0x1183] ss:$8 sm:$0xf0] %vm1398_vm0, %v16260_v45  }
 0x231   : > { %v18401_v3 = vld.sshfl [vmem:[#allocation1 + $0xd4] sm:$0xff pattern:$0xb3a29180]   ;;  %v1624_v49 = vld [vmem:[#allocation1 + $0xa8] sm:$0xff]   ;;  %v18433_v0 = vld [vmem:[#allocation1 + $0xe0] sm:$0xff]  }
 0x232   : > { %v1646_v54 = vld [vmem:[#allocation1 + $0xb8] sm:$0xff]   ;;  %1627 = vst.msk [vmem:[#allocation0 + $0x508] ss:$16 sm:$0x3] %vm1398_vm0, %v1624_v49   ;;  %v16567_v56 = vpack.i.bf16 %v18401_v3, %v18377_v42  ;;  %v18435_v63 = vld [vmem:[#allocation1 + $0xf0] sm:$0xff]   ;;  %v18437_v7 = vld [vmem:[#allocation1 + $0x100] sm:$0xff]  }
 0x233   : > { %1629 = vst.msk [vmem:[#allocation0 + $0x508] ss:$16 sm:$0xc] %vm1398_vm0, %v1624_v49   ;;  %1631 = vst.msk [vmem:[#allocation0 + $0x508] ss:$16 sm:$0x30] %vm1398_vm0, %v1624_v49   ;;  %v16852_v18 = vpack.i.bf16 %v18435_v63, %v18433_v0 }
 0x234   : > { %1633 = vst.msk [vmem:[#allocation0 + $0x508] ss:$16 sm:$0xc0] %vm1398_vm0, %v1624_v49   ;;  %1649 = vst.msk [vmem:[#allocation0 + $0x588] ss:$16 sm:$0x3] %vm1398_vm0, %v1646_v54   ;;  %16568 = vrot.lane.b32.xlu1 %v16567_v56, %s16934_s16 }
 0x235   : > { %1651 = vst.msk [vmem:[#allocation0 + $0x588] ss:$16 sm:$0xc] %vm1398_vm0, %v1646_v54   ;;  %1653 = vst.msk [vmem:[#allocation0 + $0x588] ss:$16 sm:$0x30] %vm1398_vm0, %v1646_v54  }
 0x236   : > { %1655 = vst.msk [vmem:[#allocation0 + $0x588] ss:$16 sm:$0xc0] %vm1398_vm0, %v1646_v54   ;;  %v18414_v14 = vld.sshfl [vmem:[#allocation1 + $0xe0] sm:$0xff pattern:$0xb3a29180]  }
 0x237   : > { %v18416_v15 = vld.sshfl [vmem:[#allocation1 + $0xe4] sm:$0xff pattern:$0xb3a29180]   ;;  %4488 = vst.msk [vmem:[#allocation0 + $0x1243] ss:$8 sm:$0xf] %vm1398_vm0, %v16266_v29  }
 0x238   : > { %4490 = vst.msk [vmem:[#allocation0 + $0x1243] ss:$8 sm:$0xf0] %vm1398_vm0, %v16266_v29   ;;  %4479 = vst.msk [vmem:[#allocation0 + $0x1203] ss:$8 sm:$0xf] %vm1398_vm0, %v16265_v30   ;;  %v16572_v42 = vpack.i.bf16 %v18416_v15, %v18414_v14  ;;  %v16284_v29 = vpop.permute.xlu0 %16283 }
 0x239   : > { %4481 = vst.msk [vmem:[#allocation0 + $0x1203] ss:$8 sm:$0xf0] %vm1398_vm0, %v16265_v30   ;;  %v18425_v53 = vld.sshfl [vmem:[#allocation1 + $0xf0] sm:$0xff pattern:$0xb3a29180]  }
 0x23a   : > { %v18427_v57 = vld.sshfl [vmem:[#allocation1 + $0xf4] sm:$0xff pattern:$0xb3a29180]   ;;  %4506 = vst.msk [vmem:[#allocation0 + $0x12c3] ss:$8 sm:$0xf] %vm1398_vm0, %v16271_v43   ;;  %16573 = vrot.lane.b32.xlu0 %v16572_v42, %s16934_s16 }
 0x23b   : > { %4508 = vst.msk [vmem:[#allocation0 + $0x12c3] ss:$8 sm:$0xf0] %vm1398_vm0, %v16271_v43   ;;  %4497 = vst.msk [vmem:[#allocation0 + $0x1283] ss:$8 sm:$0xf] %vm1398_vm0, %v16270_v31   ;;  %v16577_v3 = vpack.i.bf16 %v18427_v57, %v18425_v53  ;;  %v16286_v43 = vunpack.i.h.bf16 %v16284_v29  ;;  %v16291_v53 = vunpack.i.h.bf16 %v16289_v61  ;;  %v16290_v57 = vunpack.i.l.bf16 %v16289_v61 }
 0x23c   : > { %4499 = vst.msk [vmem:[#allocation0 + $0x1283] ss:$8 sm:$0xf0] %vm1398_vm0, %v16270_v31   ;;  %v1668_v44 = vld [vmem:[#allocation1 + $0xc8] sm:$0xff]   ;;  %v1690_v45 = vld [vmem:[#allocation1 + $0xd8] sm:$0xff]   ;;  %v18441_v20 = vld [vmem:[#allocation1 + $0x110] sm:$0xff]   ;;  %v16285_v31 = vunpack.i.l.bf16 %v16284_v29 }
 0x23d   : > { %1704 = vst.msk [vmem:[#allocation0 + $0x700] ss:$16 sm:$0x3] %vm1398_vm0, %v18433_v0   ;;  %1706 = vst.msk [vmem:[#allocation0 + $0x700] ss:$16 sm:$0xc] %vm1398_vm0, %v18433_v0   ;;  %v16857_v13 = vpack.i.bf16 %v18441_v20, %v18437_v7  ;;  %16578 = vrot.lane.b32.xlu1 %v16577_v3, %s16934_s16  ;;  %v16294_v3 = vpop.permute.xlu0 %16293 }
 0x23e   : > { %1708 = vst.msk [vmem:[#allocation0 + $0x700] ss:$16 sm:$0x30] %vm1398_vm0, %v18433_v0   ;;  %1710 = vst.msk [vmem:[#allocation0 + $0x700] ss:$16 sm:$0xc0] %vm1398_vm0, %v18433_v0   ;;  %v16296_v29 = vunpack.i.h.bf16 %v16294_v3 }
 0x23f   : > { %1726 = vst.msk [vmem:[#allocation0 + $0x780] ss:$16 sm:$0x3] %vm1398_vm0, %v18435_v63   ;;  %1728 = vst.msk [vmem:[#allocation0 + $0x780] ss:$16 sm:$0xc] %vm1398_vm0, %v18435_v63  }
 0x240   : > { %1730 = vst.msk [vmem:[#allocation0 + $0x780] ss:$16 sm:$0x30] %vm1398_vm0, %v18435_v63   ;;  %1732 = vst.msk [vmem:[#allocation0 + $0x780] ss:$16 sm:$0xc0] %vm1398_vm0, %v18435_v63  }
 0x241   : > { %1748 = vst.msk [vmem:[#allocation0 + $0x800] ss:$16 sm:$0x3] %vm1398_vm0, %v18437_v7   ;;  %1750 = vst.msk [vmem:[#allocation0 + $0x800] ss:$16 sm:$0xc] %vm1398_vm0, %v18437_v7  }
 0x242   : > { %1752 = vst.msk [vmem:[#allocation0 + $0x800] ss:$16 sm:$0x30] %vm1398_vm0, %v18437_v7   ;;  %1754 = vst.msk [vmem:[#allocation0 + $0x800] ss:$16 sm:$0xc0] %vm1398_vm0, %v18437_v7  }
 0x243   : > { %1671 = vst.msk [vmem:[#allocation0 + $0x608] ss:$16 sm:$0x3] %vm1398_vm0, %v1668_v44   ;;  %1673 = vst.msk [vmem:[#allocation0 + $0x608] ss:$16 sm:$0xc] %vm1398_vm0, %v1668_v44  }
 0x244   : > { %1675 = vst.msk [vmem:[#allocation0 + $0x608] ss:$16 sm:$0x30] %vm1398_vm0, %v1668_v44   ;;  %1677 = vst.msk [vmem:[#allocation0 + $0x608] ss:$16 sm:$0xc0] %vm1398_vm0, %v1668_v44  }
 0x245   : > { %1693 = vst.msk [vmem:[#allocation0 + $0x688] ss:$16 sm:$0x3] %vm1398_vm0, %v1690_v45   ;;  %1695 = vst.msk [vmem:[#allocation0 + $0x688] ss:$16 sm:$0xc] %vm1398_vm0, %v1690_v45  }
 0x246   : > { %1697 = vst.msk [vmem:[#allocation0 + $0x688] ss:$16 sm:$0x30] %vm1398_vm0, %v1690_v45   ;;  %1699 = vst.msk [vmem:[#allocation0 + $0x688] ss:$16 sm:$0xc0] %vm1398_vm0, %v1690_v45  }
 0x247   : > { %1770 = vst.msk [vmem:[#allocation0 + $0x880] ss:$16 sm:$0x3] %vm1398_vm0, %v18441_v20   ;;  %1772 = vst.msk [vmem:[#allocation0 + $0x880] ss:$16 sm:$0xc] %vm1398_vm0, %v18441_v20  }
 0x248   : > { %1774 = vst.msk [vmem:[#allocation0 + $0x880] ss:$16 sm:$0x30] %vm1398_vm0, %v18441_v20   ;;  %1776 = vst.msk [vmem:[#allocation0 + $0x880] ss:$16 sm:$0xc0] %vm1398_vm0, %v18441_v20  }
 0x249   : > { %4524 = vst.msk [vmem:[#allocation0 + $0x1343] ss:$8 sm:$0xf] %vm1398_vm0, %v16276_v8   ;;  %4526 = vst.msk [vmem:[#allocation0 + $0x1343] ss:$8 sm:$0xf0] %vm1398_vm0, %v16276_v8  }
 0x24a   : > { %4515 = vst.msk [vmem:[#allocation0 + $0x1303] ss:$8 sm:$0xf] %vm1398_vm0, %v16275_v32   ;;  %4517 = vst.msk [vmem:[#allocation0 + $0x1303] ss:$8 sm:$0xf0] %vm1398_vm0, %v16275_v32  }
 0x24b   : > { %v18495_v49 = vld.sshfl [vmem:[#allocation1 + $0x100] sm:$0xff pattern:$0xb3a29180]   ;;  %v18497_v54 = vld.sshfl [vmem:[#allocation1 + $0x104] sm:$0xff pattern:$0xb3a29180]  }
 0x24c   : > { %4542 = vst.msk [vmem:[#allocation0 + $0x13c3] ss:$8 sm:$0xf] %vm1398_vm0, %v16281_v38   ;;  %4544 = vst.msk [vmem:[#allocation0 + $0x13c3] ss:$8 sm:$0xf0] %vm1398_vm0, %v16281_v38   ;;  %v16582_v47 = vpack.i.bf16 %v18497_v54, %v18495_v49 }
 0x24d   : > { %4533 = vst.msk [vmem:[#allocation0 + $0x1383] ss:$8 sm:$0xf] %vm1398_vm0, %v16280_v39   ;;  %4535 = vst.msk [vmem:[#allocation0 + $0x1383] ss:$8 sm:$0xf0] %vm1398_vm0, %v16280_v39  }
 0x24e   : > { %v18503_v30 = vld.sshfl [vmem:[#allocation1 + $0x110] sm:$0xff pattern:$0xb3a29180]   ;;  %v18505_v40 = vld.sshfl [vmem:[#allocation1 + $0x114] sm:$0xff pattern:$0xb3a29180]   ;;  %16583 = vrot.lane.b32.xlu0 %v16582_v47, %s16934_s16 }
 0x24f   : > { %v18507_v14 = vld [vmem:[#allocation1 + $0x120] sm:$0xff]   ;;  %v18509_v15 = vld [vmem:[#allocation1 + $0x130] sm:$0xff]   ;;  %4560 = vst.msk [vmem:[#allocation0 + $0x1443] ss:$8 sm:$0xf] %vm1398_vm0, %v16286_v43   ;;  %v16587_v44 = vpack.i.bf16 %v18505_v40, %v18503_v30  ;;  %v1712_v38 = vld [vmem:[#allocation1 + $0xe8] sm:$0xff]   ;;  %v16295_v30 = vunpack.i.l.bf16 %v16294_v3  ;;  %v16299_v40 = vpop.permute.xlu1 %16298 }
 0x250   : > { %v18511_v56 = vld [vmem:[#allocation1 + $0x140] sm:$0xff]   ;;  %v16862_v32 = vpack.i.bf16 %v18509_v15, %v18507_v14  ;;  %v18520_v33 = vld [vmem:[#allocation1 + $0x150] sm:$0xff]   ;;  %1792 = vst.msk [vmem:[#allocation0 + $0x900] ss:$16 sm:$0x3] %vm1398_vm0, %v18507_v14   ;;  %v1734_v39 = vld [vmem:[#allocation1 + $0xf8] sm:$0xff]   ;;  %v16301_v61 = vunpack.i.h.bf16 %v16299_v40 }
 0x251   : > { %v18516_v8 = vld.sshfl [vmem:[#allocation1 + $0x120] sm:$0xff pattern:$0xb3a29180]   ;;  %1794 = vst.msk [vmem:[#allocation0 + $0x900] ss:$16 sm:$0xc] %vm1398_vm0, %v18507_v14   ;;  %16588 = vrot.lane.b32.xlu1 %v16587_v44, %s16934_s16 }
 0x252   : > { %1796 = vst.msk [vmem:[#allocation0 + $0x900] ss:$16 sm:$0x30] %vm1398_vm0, %v18507_v14   ;;  %1798 = vst.msk [vmem:[#allocation0 + $0x900] ss:$16 sm:$0xc0] %vm1398_vm0, %v18507_v14   ;;  %v21031_v14 = vpack.i.bf16 %v18520_v33, %v18511_v56 }
 0x253   : > { %1814 = vst.msk [vmem:[#allocation0 + $0x980] ss:$16 sm:$0x3] %vm1398_vm0, %v18509_v15   ;;  %1816 = vst.msk [vmem:[#allocation0 + $0x980] ss:$16 sm:$0xc] %vm1398_vm0, %v18509_v15  }
 0x254   : > { %1818 = vst.msk [vmem:[#allocation0 + $0x980] ss:$16 sm:$0x30] %vm1398_vm0, %v18509_v15   ;;  %1820 = vst.msk [vmem:[#allocation0 + $0x980] ss:$16 sm:$0xc0] %vm1398_vm0, %v18509_v15  }
 0x255   : > { %1836 = vst.msk [vmem:[#allocation0 + $0xa00] ss:$16 sm:$0x3] %vm1398_vm0, %v18511_v56   ;;  %1838 = vst.msk [vmem:[#allocation0 + $0xa00] ss:$16 sm:$0xc] %vm1398_vm0, %v18511_v56  }
 0x256   : > { %1840 = vst.msk [vmem:[#allocation0 + $0xa00] ss:$16 sm:$0x30] %vm1398_vm0, %v18511_v56   ;;  %1842 = vst.msk [vmem:[#allocation0 + $0xa00] ss:$16 sm:$0xc0] %vm1398_vm0, %v18511_v56  }
 0x257   : > { %4562 = vst.msk [vmem:[#allocation0 + $0x1443] ss:$8 sm:$0xf0] %vm1398_vm0, %v16286_v43   ;;  %4551 = vst.msk [vmem:[#allocation0 + $0x1403] ss:$8 sm:$0xf] %vm1398_vm0, %v16285_v31  }
 0x258   : > { %4553 = vst.msk [vmem:[#allocation0 + $0x1403] ss:$8 sm:$0xf0] %vm1398_vm0, %v16285_v31   ;;  %v18553_v45 = vld.sshfl [vmem:[#allocation1 + $0x124] sm:$0xff pattern:$0xb3a29180]  }
 0x259   : > { %1858 = vst.msk [vmem:[#allocation0 + $0xa80] ss:$16 sm:$0x3] %vm1398_vm0, %v18520_v33   ;;  %1860 = vst.msk [vmem:[#allocation0 + $0xa80] ss:$16 sm:$0xc] %vm1398_vm0, %v18520_v33  }
 0x25a   : > { %1862 = vst.msk [vmem:[#allocation0 + $0xa80] ss:$16 sm:$0x30] %vm1398_vm0, %v18520_v33   ;;  %1864 = vst.msk [vmem:[#allocation0 + $0xa80] ss:$16 sm:$0xc0] %vm1398_vm0, %v18520_v33  }
 0x25b   : > { %4578 = vst.msk [vmem:[#allocation0 + $0x14c3] ss:$8 sm:$0xf] %vm1398_vm0, %v16291_v53   ;;  %4580 = vst.msk [vmem:[#allocation0 + $0x14c3] ss:$8 sm:$0xf0] %vm1398_vm0, %v16291_v53   ;;  %v16300_v53 = vunpack.i.l.bf16 %v16299_v40 }
 0x25c   : > { %4569 = vst.msk [vmem:[#allocation0 + $0x1483] ss:$8 sm:$0xf] %vm1398_vm0, %v16290_v57   ;;  %4571 = vst.msk [vmem:[#allocation0 + $0x1483] ss:$8 sm:$0xf0] %vm1398_vm0, %v16290_v57   ;;  %v16592_v57 = vpack.i.bf16 %v18553_v45, %v18516_v8 }
 0x25d   : > { %v18569_v49 = vld.sshfl [vmem:[#allocation1 + $0x130] sm:$0xff pattern:$0xb3a29180]   ;;  %v18571_v54 = vld.sshfl [vmem:[#allocation1 + $0x134] sm:$0xff pattern:$0xb3a29180]  }
 0x25e   : > { %1715 = vst.msk [vmem:[#allocation0 + $0x708] ss:$16 sm:$0x3] %vm1398_vm0, %v1712_v38   ;;  %1717 = vst.msk [vmem:[#allocation0 + $0x708] ss:$16 sm:$0xc] %vm1398_vm0, %v1712_v38   ;;  %v16597_v44 = vpack.i.bf16 %v18571_v54, %v18569_v49  ;;  %v16304_v49 = vpop.permute.xlu0 %16303  ;;  %16593 = vrot.lane.b32.xlu0 %v16592_v57, %s16934_s16 }
 0x25f   : > { %1719 = vst.msk [vmem:[#allocation0 + $0x708] ss:$16 sm:$0x30] %vm1398_vm0, %v1712_v38   ;;  %1721 = vst.msk [vmem:[#allocation0 + $0x708] ss:$16 sm:$0xc0] %vm1398_vm0, %v1712_v38  }
 0x260   : > { %1737 = vst.msk [vmem:[#allocation0 + $0x788] ss:$16 sm:$0x3] %vm1398_vm0, %v1734_v39   ;;  %1739 = vst.msk [vmem:[#allocation0 + $0x788] ss:$16 sm:$0xc] %vm1398_vm0, %v1734_v39   ;;  %16598 = vrot.lane.b32.xlu1 %v16597_v44, %s16934_s16 }
 0x261   : > { %1741 = vst.msk [vmem:[#allocation0 + $0x788] ss:$16 sm:$0x30] %vm1398_vm0, %v1734_v39   ;;  %1743 = vst.msk [vmem:[#allocation0 + $0x788] ss:$16 sm:$0xc0] %vm1398_vm0, %v1734_v39  }
 0x262   : > { %v18581_v43 = vld.sshfl [vmem:[#allocation1 + $0x140] sm:$0xff pattern:$0xb3a29180]   ;;  %v18583_v31 = vld.sshfl [vmem:[#allocation1 + $0x144] sm:$0xff pattern:$0xb3a29180]  }
 0x263   : > { %v18588_v47 = vld [vmem:[#allocation1 + $0x160] sm:$0xff]   ;;  %v18590_v8 = vld [vmem:[#allocation1 + $0x170] sm:$0xff]   ;;  %4595 = vst.msk [vmem:[#allocation0 + $0x44] ss:$8 sm:$0xf] %vm1398_vm0, %v16296_v29   ;;  %v16602_v43 = vpack.i.bf16 %v18583_v31, %v18581_v43  ;;  %v1800_v40 = vld [vmem:[#allocation1 + $0x128] sm:$0xff]  }
 0x264   : > { %v18592_v45 = vld [vmem:[#allocation1 + $0x180] sm:$0xff]   ;;  %4597 = vst.msk [vmem:[#allocation0 + $0x44] ss:$8 sm:$0xf0] %vm1398_vm0, %v16296_v29   ;;  %v18605_v3 = vld [vmem:[#allocation1 + $0x190] sm:$0xff]   ;;  %v1756_v29 = vld [vmem:[#allocation1 + $0x108] sm:$0xff]  }
 0x265   : > { %4586 = vst.msk [vmem:[#allocation0 + $0x4] ss:$8 sm:$0xf] %vm1398_vm0, %v16295_v30   ;;  %4588 = vst.msk [vmem:[#allocation0 + $0x4] ss:$8 sm:$0xf0] %vm1398_vm0, %v16295_v30   ;;  %16603 = vrot.lane.b32.xlu0 %v16602_v43, %s16934_s16 }
 0x266   : > { %v18601_v38 = vld.sshfl [vmem:[#allocation1 + $0x150] sm:$0xff pattern:$0xb3a29180]   ;;  %1880 = vst.msk [vmem:[#allocation0 + $0xb00] ss:$16 sm:$0x3] %vm1398_vm0, %v18588_v47  }
 0x267   : > { %1882 = vst.msk [vmem:[#allocation0 + $0xb00] ss:$16 sm:$0xc] %vm1398_vm0, %v18588_v47   ;;  %1884 = vst.msk [vmem:[#allocation0 + $0xb00] ss:$16 sm:$0x30] %vm1398_vm0, %v18588_v47  }
 0x268   : > { %1886 = vst.msk [vmem:[#allocation0 + $0xb00] ss:$16 sm:$0xc0] %vm1398_vm0, %v18588_v47   ;;  %1902 = vst.msk [vmem:[#allocation0 + $0xb80] ss:$16 sm:$0x3] %vm1398_vm0, %v18590_v8   ;;  %v21032_v47 = vpack.i.bf16 %v18590_v8, %v18588_v47 }
 0x269   : > { %1904 = vst.msk [vmem:[#allocation0 + $0xb80] ss:$16 sm:$0xc] %vm1398_vm0, %v18590_v8   ;;  %1906 = vst.msk [vmem:[#allocation0 + $0xb80] ss:$16 sm:$0x30] %vm1398_vm0, %v18590_v8  }
 0x26a   : > { %1908 = vst.msk [vmem:[#allocation0 + $0xb80] ss:$16 sm:$0xc0] %vm1398_vm0, %v18590_v8   ;;  %1924 = vst.msk [vmem:[#allocation0 + $0xc00] ss:$16 sm:$0x3] %vm1398_vm0, %v18592_v45   ;;  %v21033_v8 = vpack.i.bf16 %v18605_v3, %v18592_v45 }
 0x26b   : > { %1926 = vst.msk [vmem:[#allocation0 + $0xc00] ss:$16 sm:$0xc] %vm1398_vm0, %v18592_v45   ;;  %1928 = vst.msk [vmem:[#allocation0 + $0xc00] ss:$16 sm:$0x30] %vm1398_vm0, %v18592_v45  }
 0x26c   : > { %1930 = vst.msk [vmem:[#allocation0 + $0xc00] ss:$16 sm:$0xc0] %vm1398_vm0, %v18592_v45   ;;  %4613 = vst.msk [vmem:[#allocation0 + $0xc4] ss:$8 sm:$0xf] %vm1398_vm0, %v16301_v61  }
 0x26d   : > { %4615 = vst.msk [vmem:[#allocation0 + $0xc4] ss:$8 sm:$0xf0] %vm1398_vm0, %v16301_v61   ;;  %4604 = vst.msk [vmem:[#allocation0 + $0x84] ss:$8 sm:$0xf] %vm1398_vm0, %v16300_v53   ;;  %v16306_v61 = vunpack.i.h.bf16 %v16304_v49 }
 0x26e   : > { %4606 = vst.msk [vmem:[#allocation0 + $0x84] ss:$8 sm:$0xf0] %vm1398_vm0, %v16300_v53   ;;  %v18635_v54 = vld.sshfl [vmem:[#allocation1 + $0x154] sm:$0xff pattern:$0xb3a29180]   ;;  %v16305_v53 = vunpack.i.l.bf16 %v16304_v49  ;;  %v16309_v49 = vpop.permute.xlu1 %16308 }
 0x26f   : > { %v1778_v30 = vld [vmem:[#allocation1 + $0x118] sm:$0xff]   ;;  %1946 = vst.msk [vmem:[#allocation0 + $0xc80] ss:$16 sm:$0x3] %vm1398_vm0, %v18605_v3   ;;  %v16607_v57 = vpack.i.bf16 %v18635_v54, %v18601_v38  ;;  %v16314_v54 = vpop.permute.xlu0 %16313  ;;  %v6675_v46 = vld [vmem:[#allocation1 + $0x30] sm:$0xff]   ;;  %v7000_v56 = vld [vmem:[#allocation1 + $0x1c0] sm:$0xff]  }
 0x270   : > { %1948 = vst.msk [vmem:[#allocation0 + $0xc80] ss:$16 sm:$0xc] %vm1398_vm0, %v18605_v3   ;;  %1950 = vst.msk [vmem:[#allocation0 + $0xc80] ss:$16 sm:$0x30] %vm1398_vm0, %v18605_v3   ;;  %v16822_v41 = vpack.i.bf16 %v6675_v46, %v6662_v60 }
 0x271   : > { %1952 = vst.msk [vmem:[#allocation0 + $0xc80] ss:$16 sm:$0xc0] %vm1398_vm0, %v18605_v3   ;;  %1759 = vst.msk [vmem:[#allocation0 + $0x808] ss:$16 sm:$0x3] %vm1398_vm0, %v1756_v29   ;;  %16608 = vrot.lane.b32.xlu1 %v16607_v57, %s16934_s16 }
 0x272   : > { %1761 = vst.msk [vmem:[#allocation0 + $0x808] ss:$16 sm:$0xc] %vm1398_vm0, %v1756_v29   ;;  %1763 = vst.msk [vmem:[#allocation0 + $0x808] ss:$16 sm:$0x30] %vm1398_vm0, %v1756_v29  }
 0x273   : > { %1765 = vst.msk [vmem:[#allocation0 + $0x808] ss:$16 sm:$0xc0] %vm1398_vm0, %v1756_v29   ;;  %1781 = vst.msk [vmem:[#allocation0 + $0x888] ss:$16 sm:$0x3] %vm1398_vm0, %v1778_v30   ;;  %v16311_v29 = vunpack.i.h.bf16 %v16309_v49 }
 0x274   : > { %1783 = vst.msk [vmem:[#allocation0 + $0x888] ss:$16 sm:$0xc] %vm1398_vm0, %v1778_v30   ;;  %1785 = vst.msk [vmem:[#allocation0 + $0x888] ss:$16 sm:$0x30] %vm1398_vm0, %v1778_v30  }
 0x275   : > { %1787 = vst.msk [vmem:[#allocation0 + $0x888] ss:$16 sm:$0xc0] %vm1398_vm0, %v1778_v30   ;;  %v16310_v30 = vunpack.i.l.bf16 %v16309_v49  ;;  %v18658_v31 = vld.sshfl [vmem:[#allocation1 + $0x160] sm:$0xff pattern:$0xb3a29180]  }
 0x276   : > { %4631 = vst.msk [vmem:[#allocation0 + $0x144] ss:$8 sm:$0xf] %vm1398_vm0, %v16306_v61   ;;  %4633 = vst.msk [vmem:[#allocation0 + $0x144] ss:$8 sm:$0xf0] %vm1398_vm0, %v16306_v61  }
 0x277   : > { %4622 = vst.msk [vmem:[#allocation0 + $0x104] ss:$8 sm:$0xf] %vm1398_vm0, %v16305_v53   ;;  %4624 = vst.msk [vmem:[#allocation0 + $0x104] ss:$8 sm:$0xf0] %vm1398_vm0, %v16305_v53  }
 0x278   : > { %v5741_v44 = vld.sshfl [vmem:[#allocation1 + $0x164] sm:$0xff pattern:$0xb3a29180]   ;;  %v5750_v38 = vld.sshfl [vmem:[#allocation1 + $0x170] sm:$0xff pattern:$0xb3a29180]  }
 0x279   : > { %4649 = vst.msk [vmem:[#allocation0 + $0x1c4] ss:$8 sm:$0xf] %vm1398_vm0, %v16311_v29   ;;  %4651 = vst.msk [vmem:[#allocation0 + $0x1c4] ss:$8 sm:$0xf0] %vm1398_vm0, %v16311_v29   ;;  %v16316_v29 = vunpack.i.h.bf16 %v16314_v54  ;;  %v16612_v43 = vpack.i.bf16 %v5741_v44, %v18658_v31 }
 0x27a   : > { %4640 = vst.msk [vmem:[#allocation0 + $0x184] ss:$8 sm:$0xf] %vm1398_vm0, %v16310_v30   ;;  %4642 = vst.msk [vmem:[#allocation0 + $0x184] ss:$8 sm:$0xf0] %vm1398_vm0, %v16310_v30   ;;  %v16315_v30 = vunpack.i.l.bf16 %v16314_v54  ;;  %v16319_v54 = vpop.permute.xlu1 %16318 }
 0x27b   : > { %v5759_v61 = vld.sshfl [vmem:[#allocation1 + $0x174] sm:$0xff pattern:$0xb3a29180]   ;;  %v18671_v53 = vld [vmem:[#allocation1 + $0x1a0] sm:$0xff]   ;;  %v16321_v42 = vunpack.i.h.bf16 %v16319_v54  ;;  %v16320_v54 = vunpack.i.l.bf16 %v16319_v54  ;;  %16613 = vrot.lane.b32.xlu0 %v16612_v43, %s16934_s16 }
 0x27c   : > { %v18673_v49 = vld [vmem:[#allocation1 + $0x1b0] sm:$0xff]   ;;  %v1822_v39 = vld [vmem:[#allocation1 + $0x138] sm:$0xff]   ;;  %1968 = vst.msk [vmem:[#allocation0 + $0xd00] ss:$16 sm:$0x3] %vm1398_vm0, %v18671_v53   ;;  %v7026_v3 = vld [vmem:[#allocation1 + $0x1e0] sm:$0xff]  }
 0x27d   : > { %1970 = vst.msk [vmem:[#allocation0 + $0xd00] ss:$16 sm:$0xc] %vm1398_vm0, %v18671_v53   ;;  %1972 = vst.msk [vmem:[#allocation0 + $0xd00] ss:$16 sm:$0x30] %vm1398_vm0, %v18671_v53  }
 0x27e   : > { %1974 = vst.msk [vmem:[#allocation0 + $0xd00] ss:$16 sm:$0xc0] %vm1398_vm0, %v18671_v53   ;;  %1990 = vst.msk [vmem:[#allocation0 + $0xd80] ss:$16 sm:$0x3] %vm1398_vm0, %v18673_v49   ;;  %v21034_v53 = vpack.i.bf16 %v18673_v49, %v18671_v53 }
 0x27f   : > { %1992 = vst.msk [vmem:[#allocation0 + $0xd80] ss:$16 sm:$0xc] %vm1398_vm0, %v18673_v49   ;;  %1994 = vst.msk [vmem:[#allocation0 + $0xd80] ss:$16 sm:$0x30] %vm1398_vm0, %v18673_v49  }
 0x280   : > { %1996 = vst.msk [vmem:[#allocation0 + $0xd80] ss:$16 sm:$0xc0] %vm1398_vm0, %v18673_v49   ;;  %1803 = vst.msk [vmem:[#allocation0 + $0x908] ss:$16 sm:$0x3] %vm1398_vm0, %v1800_v40  }
 0x281   : > { %1805 = vst.msk [vmem:[#allocation0 + $0x908] ss:$16 sm:$0xc] %vm1398_vm0, %v1800_v40   ;;  %1807 = vst.msk [vmem:[#allocation0 + $0x908] ss:$16 sm:$0x30] %vm1398_vm0, %v1800_v40  }
 0x282   : > { %1809 = vst.msk [vmem:[#allocation0 + $0x908] ss:$16 sm:$0xc0] %vm1398_vm0, %v1800_v40   ;;  %1825 = vst.msk [vmem:[#allocation0 + $0x988] ss:$16 sm:$0x3] %vm1398_vm0, %v1822_v39  }
 0x283   : > { %1827 = vst.msk [vmem:[#allocation0 + $0x988] ss:$16 sm:$0xc] %vm1398_vm0, %v1822_v39   ;;  %1829 = vst.msk [vmem:[#allocation0 + $0x988] ss:$16 sm:$0x30] %vm1398_vm0, %v1822_v39  }
 0x284   : > { %1831 = vst.msk [vmem:[#allocation0 + $0x988] ss:$16 sm:$0xc0] %vm1398_vm0, %v1822_v39   ;;  %4667 = vst.msk [vmem:[#allocation0 + $0x244] ss:$8 sm:$0xf] %vm1398_vm0, %v16316_v29   ;;  %v16617_v39 = vpack.i.bf16 %v5759_v61, %v5750_v38 }
 0x285   : > { %4669 = vst.msk [vmem:[#allocation0 + $0x244] ss:$8 sm:$0xf0] %vm1398_vm0, %v16316_v29   ;;  %4658 = vst.msk [vmem:[#allocation0 + $0x204] ss:$8 sm:$0xf] %vm1398_vm0, %v16315_v30   ;;  %v16329_v29 = vpop.permute.xlu1 %16328 }
 0x286   : > { %4660 = vst.msk [vmem:[#allocation0 + $0x204] ss:$8 sm:$0xf0] %vm1398_vm0, %v16315_v30   ;;  %v5768_v40 = vld.sshfl [vmem:[#allocation1 + $0x180] sm:$0xff pattern:$0xb3a29180]   ;;  %v16331_v30 = vunpack.i.h.bf16 %v16329_v29  ;;  %16618 = vrot.lane.b32.xlu1 %v16617_v39, %s16934_s16 }
 0x287   : > { %v5777_v31 = vld.sshfl [vmem:[#allocation1 + $0x184] sm:$0xff pattern:$0xb3a29180]   ;;  %4685 = vst.msk [vmem:[#allocation0 + $0x2c4] ss:$8 sm:$0xf] %vm1398_vm0, %v16321_v42  }
 0x288   : > { %4687 = vst.msk [vmem:[#allocation0 + $0x2c4] ss:$8 sm:$0xf0] %vm1398_vm0, %v16321_v42   ;;  %4676 = vst.msk [vmem:[#allocation0 + $0x284] ss:$8 sm:$0xf] %vm1398_vm0, %v16320_v54   ;;  %v16324_v42 = vpop.permute.xlu0 %16323  ;;  %v16622_v43 = vpack.i.bf16 %v5777_v31, %v5768_v40 }
 0x289   : > { %4678 = vst.msk [vmem:[#allocation0 + $0x284] ss:$8 sm:$0xf0] %vm1398_vm0, %v16320_v54   ;;  %v5786_v57 = vld.sshfl [vmem:[#allocation1 + $0x190] sm:$0xff pattern:$0xb3a29180]   ;;  %v16326_v38 = vunpack.i.h.bf16 %v16324_v42  ;;  %v16325_v61 = vunpack.i.l.bf16 %v16324_v42  ;;  %v16330_v54 = vunpack.i.l.bf16 %v16329_v29 }
 0x28a   : > { %v5795_v44 = vld.sshfl [vmem:[#allocation1 + $0x194] sm:$0xff pattern:$0xb3a29180]   ;;  %v5804_v40 = vld.sshfl [vmem:[#allocation1 + $0x1a0] sm:$0xff pattern:$0xb3a29180]   ;;  %16623 = vrot.lane.b32.xlu0 %v16622_v43, %s16934_s16 }
 0x28b   : > { %4703 = vst.msk [vmem:[#allocation0 + $0x344] ss:$8 sm:$0xf] %vm1398_vm0, %v16326_v38   ;;  %4705 = vst.msk [vmem:[#allocation0 + $0x344] ss:$8 sm:$0xf0] %vm1398_vm0, %v16326_v38   ;;  %v16627_v39 = vpack.i.bf16 %v5795_v44, %v5786_v57 }
 0x28c   : > { %4694 = vst.msk [vmem:[#allocation0 + $0x304] ss:$8 sm:$0xf] %vm1398_vm0, %v16325_v61   ;;  %4696 = vst.msk [vmem:[#allocation0 + $0x304] ss:$8 sm:$0xf0] %vm1398_vm0, %v16325_v61   ;;  %v16334_v44 = vpop.permute.xlu0 %16333 }
 0x28d   : > { %v5813_v31 = vld.sshfl [vmem:[#allocation1 + $0x1a4] sm:$0xff pattern:$0xb3a29180]   ;;  %v1866_v57 = vld [vmem:[#allocation1 + $0x158] sm:$0xff]   ;;  %v16336_v29 = vunpack.i.h.bf16 %v16334_v44  ;;  %16628 = vrot.lane.b32.xlu1 %v16627_v39, %s16934_s16  ;;  %v6727_v58 = vld [vmem:[#allocation1 + $0x70] sm:$0xff]  }
 0x28e   : > { %v1844_v42 = vld [vmem:[#allocation1 + $0x148] sm:$0xff]   ;;  %4721 = vst.msk [vmem:[#allocation0 + $0x3c4] ss:$8 sm:$0xf] %vm1398_vm0, %v16331_v30   ;;  %v16632_v43 = vpack.i.bf16 %v5813_v31, %v5804_v40 }
 0x28f   : > { %4723 = vst.msk [vmem:[#allocation0 + $0x3c4] ss:$8 sm:$0xf0] %vm1398_vm0, %v16331_v30   ;;  %4712 = vst.msk [vmem:[#allocation0 + $0x384] ss:$8 sm:$0xf] %vm1398_vm0, %v16330_v54   ;;  %v16335_v30 = vunpack.i.l.bf16 %v16334_v44 }
 0x290   : > { %4714 = vst.msk [vmem:[#allocation0 + $0x384] ss:$8 sm:$0xf0] %vm1398_vm0, %v16330_v54   ;;  %v5822_v38 = vld.sshfl [vmem:[#allocation1 + $0x1b0] sm:$0xff pattern:$0xb3a29180]   ;;  %v16339_v54 = vpop.permute.xlu1 %16338  ;;  %16633 = vrot.lane.b32.xlu0 %v16632_v43, %s16934_s16 }
 0x291   : > { %v5831_v61 = vld.sshfl [vmem:[#allocation1 + $0x1b4] sm:$0xff pattern:$0xb3a29180]   ;;  %1847 = vst.msk [vmem:[#allocation0 + $0xa08] ss:$16 sm:$0x3] %vm1398_vm0, %v1844_v42  }
 0x292   : > { %1849 = vst.msk [vmem:[#allocation0 + $0xa08] ss:$16 sm:$0xc] %vm1398_vm0, %v1844_v42   ;;  %1851 = vst.msk [vmem:[#allocation0 + $0xa08] ss:$16 sm:$0x30] %vm1398_vm0, %v1844_v42   ;;  %v16637_v39 = vpack.i.bf16 %v5831_v61, %v5822_v38  ;;  %v16344_v38 = vpop.permute.xlu0 %16343 }
 0x293   : > { %1853 = vst.msk [vmem:[#allocation0 + $0xa08] ss:$16 sm:$0xc0] %vm1398_vm0, %v1844_v42   ;;  %1869 = vst.msk [vmem:[#allocation0 + $0xa88] ss:$16 sm:$0x3] %vm1398_vm0, %v1866_v57   ;;  %v16341_v42 = vunpack.i.h.bf16 %v16339_v54 }
 0x294   : > { %1871 = vst.msk [vmem:[#allocation0 + $0xa88] ss:$16 sm:$0xc] %vm1398_vm0, %v1866_v57   ;;  %1873 = vst.msk [vmem:[#allocation0 + $0xa88] ss:$16 sm:$0x30] %vm1398_vm0, %v1866_v57   ;;  %16638 = vrot.lane.b32.xlu1 %v16637_v39, %s16934_s16 }
 0x295   : > { %1875 = vst.msk [vmem:[#allocation0 + $0xa88] ss:$16 sm:$0xc0] %vm1398_vm0, %v1866_v57   ;;  %v16340_v57 = vunpack.i.l.bf16 %v16339_v54  ;;  %v5840_v40 = vld.sshfl [vmem:[#allocation1 + $0x1c0] sm:$0xff pattern:$0xb3a29180]   ;;  %v16346_v54 = vunpack.i.h.bf16 %v16344_v38 }
 0x296   : > { %4739 = vst.msk [vmem:[#allocation0 + $0x444] ss:$8 sm:$0xf] %vm1398_vm0, %v16336_v29   ;;  %4741 = vst.msk [vmem:[#allocation0 + $0x444] ss:$8 sm:$0xf0] %vm1398_vm0, %v16336_v29  }
 0x297   : > { %4730 = vst.msk [vmem:[#allocation0 + $0x404] ss:$8 sm:$0xf] %vm1398_vm0, %v16335_v30   ;;  %4732 = vst.msk [vmem:[#allocation0 + $0x404] ss:$8 sm:$0xf0] %vm1398_vm0, %v16335_v30  }
 0x298   : > { %v5849_v31 = vld.sshfl [vmem:[#allocation1 + $0x1c4] sm:$0xff pattern:$0xb3a29180]   ;;  %v5858_v44 = vld.sshfl [vmem:[#allocation1 + $0x1d0] sm:$0xff pattern:$0xb3a29180]  }
 0x299   : > { %4757 = vst.msk [vmem:[#allocation0 + $0x4c4] ss:$8 sm:$0xf] %vm1398_vm0, %v16341_v42   ;;  %4759 = vst.msk [vmem:[#allocation0 + $0x4c4] ss:$8 sm:$0xf0] %vm1398_vm0, %v16341_v42   ;;  %v16345_v42 = vunpack.i.l.bf16 %v16344_v38  ;;  %v16642_v43 = vpack.i.bf16 %v5849_v31, %v5840_v40 }
 0x29a   : > { %4748 = vst.msk [vmem:[#allocation0 + $0x484] ss:$8 sm:$0xf] %vm1398_vm0, %v16340_v57   ;;  %4750 = vst.msk [vmem:[#allocation0 + $0x484] ss:$8 sm:$0xf0] %vm1398_vm0, %v16340_v57   ;;  %v16349_v57 = vpop.permute.xlu1 %16348 }
 0x29b   : > { %v5867_v61 = vld.sshfl [vmem:[#allocation1 + $0x1d4] sm:$0xff pattern:$0xb3a29180]   ;;  %v1888_v29 = vld [vmem:[#allocation1 + $0x168] sm:$0xff]   ;;  %v16351_v38 = vunpack.i.h.bf16 %v16349_v57  ;;  %16643 = vrot.lane.b32.xlu0 %v16642_v43, %s16934_s16 }
 0x29c   : > { %v1910_v30 = vld [vmem:[#allocation1 + $0x178] sm:$0xff]   ;;  %1891 = vst.msk [vmem:[#allocation0 + $0xb08] ss:$16 sm:$0x3] %vm1398_vm0, %v1888_v29   ;;  %v16647_v40 = vpack.i.bf16 %v5867_v61, %v5858_v44  ;;  %v16354_v44 = vpop.permute.xlu0 %16353 }
 0x29d   : > { %1893 = vst.msk [vmem:[#allocation0 + $0xb08] ss:$16 sm:$0xc] %vm1398_vm0, %v1888_v29   ;;  %1895 = vst.msk [vmem:[#allocation0 + $0xb08] ss:$16 sm:$0x30] %vm1398_vm0, %v1888_v29  }
 0x29e   : > { %1897 = vst.msk [vmem:[#allocation0 + $0xb08] ss:$16 sm:$0xc0] %vm1398_vm0, %v1888_v29   ;;  %1913 = vst.msk [vmem:[#allocation0 + $0xb88] ss:$16 sm:$0x3] %vm1398_vm0, %v1910_v30   ;;  %v16350_v29 = vunpack.i.l.bf16 %v16349_v57  ;;  %v16359_v57 = vpop.permute.xlu1 %16358  ;;  %16648 = vrot.lane.b32.xlu1 %v16647_v40, %s16934_s16 }
 0x29f   : > { %1915 = vst.msk [vmem:[#allocation0 + $0xb88] ss:$16 sm:$0xc] %vm1398_vm0, %v1910_v30   ;;  %1917 = vst.msk [vmem:[#allocation0 + $0xb88] ss:$16 sm:$0x30] %vm1398_vm0, %v1910_v30  }
 0x2a0   : > { %1919 = vst.msk [vmem:[#allocation0 + $0xb88] ss:$16 sm:$0xc0] %vm1398_vm0, %v1910_v30   ;;  %4775 = vst.msk [vmem:[#allocation0 + $0x544] ss:$8 sm:$0xf] %vm1398_vm0, %v16346_v54  }
 0x2a1   : > { %4777 = vst.msk [vmem:[#allocation0 + $0x544] ss:$8 sm:$0xf0] %vm1398_vm0, %v16346_v54   ;;  %4766 = vst.msk [vmem:[#allocation0 + $0x504] ss:$8 sm:$0xf] %vm1398_vm0, %v16345_v42   ;;  %v16356_v54 = vunpack.i.h.bf16 %v16354_v44 }
 0x2a2   : > { %4768 = vst.msk [vmem:[#allocation0 + $0x504] ss:$8 sm:$0xf0] %vm1398_vm0, %v16345_v42   ;;  %v5876_v39 = vld.sshfl [vmem:[#allocation1 + $0x1e0] sm:$0xff pattern:$0xb3a29180]   ;;  %v16355_v42 = vunpack.i.l.bf16 %v16354_v44  ;;  %v16361_v44 = vunpack.i.h.bf16 %v16359_v57  ;;  %v16360_v57 = vunpack.i.l.bf16 %v16359_v57 }
 0x2a3   : > { %v5885_v31 = vld.sshfl [vmem:[#allocation1 + $0x1e4] sm:$0xff pattern:$0xb3a29180]   ;;  %4793 = vst.msk [vmem:[#allocation0 + $0x5c4] ss:$8 sm:$0xf] %vm1398_vm0, %v16351_v38  }
 0x2a4   : > { %4795 = vst.msk [vmem:[#allocation0 + $0x5c4] ss:$8 sm:$0xf0] %vm1398_vm0, %v16351_v38   ;;  %4784 = vst.msk [vmem:[#allocation0 + $0x584] ss:$8 sm:$0xf] %vm1398_vm0, %v16350_v29   ;;  %v16652_v43 = vpack.i.bf16 %v5885_v31, %v5876_v39 }
 0x2a5   : > { %4786 = vst.msk [vmem:[#allocation0 + $0x584] ss:$8 sm:$0xf0] %vm1398_vm0, %v16350_v29   ;;  %v5894_v61 = vld.sshfl [vmem:[#allocation1 + $0x1f0] sm:$0xff pattern:$0xb3a29180]  }
 0x2a6   : > { %v5903_v30 = vld.sshfl [vmem:[#allocation1 + $0x1f4] sm:$0xff pattern:$0xb3a29180]   ;;  %v1932_v38 = vld [vmem:[#allocation1 + $0x188] sm:$0xff]   ;;  %16653 = vrot.lane.b32.xlu0 %v16652_v43, %s16934_s16 }
 0x2a7   : > { %v1954_v29 = vld [vmem:[#allocation1 + $0x198] sm:$0xff]   ;;  %1935 = vst.msk [vmem:[#allocation0 + $0xc08] ss:$16 sm:$0x3] %vm1398_vm0, %v1932_v38   ;;  %v16657_v40 = vpack.i.bf16 %v5903_v30, %v5894_v61  ;;  %v16364_v61 = vpop.permute.xlu0 %16363 }
 0x2a8   : > { %1937 = vst.msk [vmem:[#allocation0 + $0xc08] ss:$16 sm:$0xc] %vm1398_vm0, %v1932_v38   ;;  %1939 = vst.msk [vmem:[#allocation0 + $0xc08] ss:$16 sm:$0x30] %vm1398_vm0, %v1932_v38  }
 0x2a9   : > { %1941 = vst.msk [vmem:[#allocation0 + $0xc08] ss:$16 sm:$0xc0] %vm1398_vm0, %v1932_v38   ;;  %1957 = vst.msk [vmem:[#allocation0 + $0xc88] ss:$16 sm:$0x3] %vm1398_vm0, %v1954_v29   ;;  %v16365_v38 = vunpack.i.l.bf16 %v16364_v61  ;;  %16658 = vrot.lane.b32.xlu1 %v16657_v40, %s16934_s16 }
 0x2aa   : > { %1959 = vst.msk [vmem:[#allocation0 + $0xc88] ss:$16 sm:$0xc] %vm1398_vm0, %v1954_v29   ;;  %1961 = vst.msk [vmem:[#allocation0 + $0xc88] ss:$16 sm:$0x30] %vm1398_vm0, %v1954_v29  }
 0x2ab   : > { %1963 = vst.msk [vmem:[#allocation0 + $0xc88] ss:$16 sm:$0xc0] %vm1398_vm0, %v1954_v29   ;;  %4811 = vst.msk [vmem:[#allocation0 + $0x644] ss:$8 sm:$0xf] %vm1398_vm0, %v16356_v54   ;;  %v16369_v29 = vpop.permute.xlu1 %16368 }
 0x2ac   : > { %4813 = vst.msk [vmem:[#allocation0 + $0x644] ss:$8 sm:$0xf0] %vm1398_vm0, %v16356_v54   ;;  %4802 = vst.msk [vmem:[#allocation0 + $0x604] ss:$8 sm:$0xf] %vm1398_vm0, %v16355_v42  }
 0x2ad   : > { %4804 = vst.msk [vmem:[#allocation0 + $0x604] ss:$8 sm:$0xf0] %vm1398_vm0, %v16355_v42   ;;  %v5912_v39 = vld.sshfl [vmem:[#allocation1 + $0x200] sm:$0xff pattern:$0xb3a29180]   ;;  %v16366_v42 = vunpack.i.h.bf16 %v16364_v61 }
 0x2ae   : > { %v5921_v31 = vld.sshfl [vmem:[#allocation1 + $0x204] sm:$0xff pattern:$0xb3a29180]   ;;  %4829 = vst.msk [vmem:[#allocation0 + $0x6c4] ss:$8 sm:$0xf] %vm1398_vm0, %v16361_v44  }
 0x2af   : > { %4831 = vst.msk [vmem:[#allocation0 + $0x6c4] ss:$8 sm:$0xf0] %vm1398_vm0, %v16361_v44   ;;  %4820 = vst.msk [vmem:[#allocation0 + $0x684] ss:$8 sm:$0xf] %vm1398_vm0, %v16360_v57   ;;  %v16371_v44 = vunpack.i.h.bf16 %v16369_v29  ;;  %v16662_v43 = vpack.i.bf16 %v5921_v31, %v5912_v39 }
 0x2b0   : > { %4822 = vst.msk [vmem:[#allocation0 + $0x684] ss:$8 sm:$0xf0] %vm1398_vm0, %v16360_v57   ;;  %v5930_v30 = vld.sshfl [vmem:[#allocation1 + $0x210] sm:$0xff pattern:$0xb3a29180]   ;;  %v16370_v57 = vunpack.i.l.bf16 %v16369_v29 }
 0x2b1   : > { %v5939_v54 = vld.sshfl [vmem:[#allocation1 + $0x214] sm:$0xff pattern:$0xb3a29180]   ;;  %v5948_v39 = vld.sshfl [vmem:[#allocation1 + $0x220] sm:$0xff pattern:$0xb3a29180]   ;;  %16663 = vrot.lane.b32.xlu0 %v16662_v43, %s16934_s16 }
 0x2b2   : > { %4847 = vst.msk [vmem:[#allocation0 + $0x744] ss:$8 sm:$0xf] %vm1398_vm0, %v16366_v42   ;;  %4849 = vst.msk [vmem:[#allocation0 + $0x744] ss:$8 sm:$0xf0] %vm1398_vm0, %v16366_v42   ;;  %v16667_v40 = vpack.i.bf16 %v5939_v54, %v5930_v30  ;;  %v16374_v54 = vpop.permute.xlu0 %16373 }
 0x2b3   : > { %4838 = vst.msk [vmem:[#allocation0 + $0x704] ss:$8 sm:$0xf] %vm1398_vm0, %v16365_v38   ;;  %4840 = vst.msk [vmem:[#allocation0 + $0x704] ss:$8 sm:$0xf0] %vm1398_vm0, %v16365_v38   ;;  %v16376_v29 = vunpack.i.h.bf16 %v16374_v54 }
 0x2b4   : > { %v5957_v31 = vld.sshfl [vmem:[#allocation1 + $0x224] sm:$0xff pattern:$0xb3a29180]   ;;  %v1998_v30 = vld [vmem:[#allocation1 + $0x1b8] sm:$0xff]   ;;  %16668 = vrot.lane.b32.xlu1 %v16667_v40, %s16934_s16 }
 0x2b5   : > { %v1976_v61 = vld [vmem:[#allocation1 + $0x1a8] sm:$0xff]   ;;  %4865 = vst.msk [vmem:[#allocation0 + $0x7c4] ss:$8 sm:$0xf] %vm1398_vm0, %v16371_v44   ;;  %v16672_v43 = vpack.i.bf16 %v5957_v31, %v5948_v39 }
 0x2b6   : > { %4867 = vst.msk [vmem:[#allocation0 + $0x7c4] ss:$8 sm:$0xf0] %vm1398_vm0, %v16371_v44   ;;  %4856 = vst.msk [vmem:[#allocation0 + $0x784] ss:$8 sm:$0xf] %vm1398_vm0, %v16370_v57   ;;  %v16375_v44 = vunpack.i.l.bf16 %v16374_v54  ;;  %v16384_v54 = vpop.permute.xlu0 %16383 }
 0x2b7   : > { %4858 = vst.msk [vmem:[#allocation0 + $0x784] ss:$8 sm:$0xf0] %vm1398_vm0, %v16370_v57   ;;  %v5966_v42 = vld.sshfl [vmem:[#allocation1 + $0x230] sm:$0xff pattern:$0xb3a29180]   ;;  %v16379_v57 = vpop.permute.xlu1 %16378  ;;  %16673 = vrot.lane.b32.xlu0 %v16672_v43, %s16934_s16 }
 0x2b8   : > { %v5975_v38 = vld.sshfl [vmem:[#allocation1 + $0x234] sm:$0xff pattern:$0xb3a29180]   ;;  %1979 = vst.msk [vmem:[#allocation0 + $0xd08] ss:$16 sm:$0x3] %vm1398_vm0, %v1976_v61  }
 0x2b9   : > { %1981 = vst.msk [vmem:[#allocation0 + $0xd08] ss:$16 sm:$0xc] %vm1398_vm0, %v1976_v61   ;;  %1983 = vst.msk [vmem:[#allocation0 + $0xd08] ss:$16 sm:$0x30] %vm1398_vm0, %v1976_v61   ;;  %v16677_v39 = vpack.i.bf16 %v5975_v38, %v5966_v42 }
 0x2ba   : > { %1985 = vst.msk [vmem:[#allocation0 + $0xd08] ss:$16 sm:$0xc0] %vm1398_vm0, %v1976_v61   ;;  %2001 = vst.msk [vmem:[#allocation0 + $0xd88] ss:$16 sm:$0x3] %vm1398_vm0, %v1998_v30   ;;  %v16381_v61 = vunpack.i.h.bf16 %v16379_v57 }
 0x2bb   : > { %2003 = vst.msk [vmem:[#allocation0 + $0xd88] ss:$16 sm:$0xc] %vm1398_vm0, %v1998_v30   ;;  %2005 = vst.msk [vmem:[#allocation0 + $0xd88] ss:$16 sm:$0x30] %vm1398_vm0, %v1998_v30   ;;  %16678 = vrot.lane.b32.xlu1 %v16677_v39, %s16934_s16 }
 0x2bc   : > { %2007 = vst.msk [vmem:[#allocation0 + $0xd88] ss:$16 sm:$0xc0] %vm1398_vm0, %v1998_v30   ;;  %v16380_v30 = vunpack.i.l.bf16 %v16379_v57  ;;  %4883 = vst.msk [vmem:[#allocation0 + $0x844] ss:$8 sm:$0xf] %vm1398_vm0, %v16376_v29   ;;  %v16389_v57 = vpop.permute.xlu1 %16388 }
 0x2bd   : > { %4885 = vst.msk [vmem:[#allocation0 + $0x844] ss:$8 sm:$0xf0] %vm1398_vm0, %v16376_v29   ;;  %4874 = vst.msk [vmem:[#allocation0 + $0x804] ss:$8 sm:$0xf] %vm1398_vm0, %v16375_v44   ;;  %v16386_v29 = vunpack.i.h.bf16 %v16384_v54 }
 0x2be   : > { %4876 = vst.msk [vmem:[#allocation0 + $0x804] ss:$8 sm:$0xf0] %vm1398_vm0, %v16375_v44   ;;  %v5984_v40 = vld.sshfl [vmem:[#allocation1 + $0x240] sm:$0xff pattern:$0xb3a29180]   ;;  %v16385_v44 = vunpack.i.l.bf16 %v16384_v54  ;;  %v16394_v54 = vpop.permute.xlu0 %16393 }
 0x2bf   : > { %v5993_v31 = vld.sshfl [vmem:[#allocation1 + $0x244] sm:$0xff pattern:$0xb3a29180]   ;;  %4901 = vst.msk [vmem:[#allocation0 + $0x8c4] ss:$8 sm:$0xf] %vm1398_vm0, %v16381_v61  }
 0x2c0   : > { %4903 = vst.msk [vmem:[#allocation0 + $0x8c4] ss:$8 sm:$0xf0] %vm1398_vm0, %v16381_v61   ;;  %4892 = vst.msk [vmem:[#allocation0 + $0x884] ss:$8 sm:$0xf] %vm1398_vm0, %v16380_v30   ;;  %v16391_v61 = vunpack.i.h.bf16 %v16389_v57  ;;  %v16682_v43 = vpack.i.bf16 %v5993_v31, %v5984_v40 }
 0x2c1   : > { %4894 = vst.msk [vmem:[#allocation0 + $0x884] ss:$8 sm:$0xf0] %vm1398_vm0, %v16380_v30   ;;  %v6002_v42 = vld.sshfl [vmem:[#allocation1 + $0x250] sm:$0xff pattern:$0xb3a29180]   ;;  %v16390_v30 = vunpack.i.l.bf16 %v16389_v57  ;;  %v16399_v57 = vpop.permute.xlu1 %16398 }
 0x2c2   : > { %v6011_v38 = vld.sshfl [vmem:[#allocation1 + $0x254] sm:$0xff pattern:$0xb3a29180]   ;;  %4919 = vst.msk [vmem:[#allocation0 + $0x944] ss:$8 sm:$0xf] %vm1398_vm0, %v16386_v29   ;;  %16683 = vrot.lane.b32.xlu0 %v16682_v43, %s16934_s16 }
 0x2c3   : > { %4921 = vst.msk [vmem:[#allocation0 + $0x944] ss:$8 sm:$0xf0] %vm1398_vm0, %v16386_v29   ;;  %4910 = vst.msk [vmem:[#allocation0 + $0x904] ss:$8 sm:$0xf] %vm1398_vm0, %v16385_v44   ;;  %v16687_v39 = vpack.i.bf16 %v6011_v38, %v6002_v42  ;;  %v16396_v29 = vunpack.i.h.bf16 %v16394_v54 }
 0x2c4   : > { %4912 = vst.msk [vmem:[#allocation0 + $0x904] ss:$8 sm:$0xf0] %vm1398_vm0, %v16385_v44   ;;  %v6020_v40 = vld.sshfl [vmem:[#allocation1 + $0x260] sm:$0xff pattern:$0xb3a29180]   ;;  %v16395_v44 = vunpack.i.l.bf16 %v16394_v54  ;;  %v16404_v54 = vpop.permute.xlu0 %16403 }
 0x2c5   : > { %v6029_v31 = vld.sshfl [vmem:[#allocation1 + $0x264] sm:$0xff pattern:$0xb3a29180]   ;;  %4937 = vst.msk [vmem:[#allocation0 + $0x9c4] ss:$8 sm:$0xf] %vm1398_vm0, %v16391_v61   ;;  %16688 = vrot.lane.b32.xlu1 %v16687_v39, %s16934_s16 }
 0x2c6   : > { %4939 = vst.msk [vmem:[#allocation0 + $0x9c4] ss:$8 sm:$0xf0] %vm1398_vm0, %v16391_v61   ;;  %4928 = vst.msk [vmem:[#allocation0 + $0x984] ss:$8 sm:$0xf] %vm1398_vm0, %v16390_v30   ;;  %v16401_v61 = vunpack.i.h.bf16 %v16399_v57  ;;  %v16692_v43 = vpack.i.bf16 %v6029_v31, %v6020_v40 }
 0x2c7   : > { %4930 = vst.msk [vmem:[#allocation0 + $0x984] ss:$8 sm:$0xf0] %vm1398_vm0, %v16390_v30   ;;  %v6038_v42 = vld.sshfl [vmem:[#allocation1 + $0x270] sm:$0xff pattern:$0xb3a29180]   ;;  %v16400_v30 = vunpack.i.l.bf16 %v16399_v57  ;;  %v16409_v57 = vpop.permute.xlu1 %16408 }
 0x2c8   : > { %v6047_v38 = vld.sshfl [vmem:[#allocation1 + $0x274] sm:$0xff pattern:$0xb3a29180]   ;;  %4955 = vst.msk [vmem:[#allocation0 + $0xa44] ss:$8 sm:$0xf] %vm1398_vm0, %v16396_v29   ;;  %16693 = vrot.lane.b32.xlu0 %v16692_v43, %s16934_s16 }
 0x2c9   : > { %4957 = vst.msk [vmem:[#allocation0 + $0xa44] ss:$8 sm:$0xf0] %vm1398_vm0, %v16396_v29   ;;  %4946 = vst.msk [vmem:[#allocation0 + $0xa04] ss:$8 sm:$0xf] %vm1398_vm0, %v16395_v44   ;;  %v16697_v39 = vpack.i.bf16 %v6047_v38, %v6038_v42  ;;  %v16406_v29 = vunpack.i.h.bf16 %v16404_v54 }
 0x2ca   : > { %4948 = vst.msk [vmem:[#allocation0 + $0xa04] ss:$8 sm:$0xf0] %vm1398_vm0, %v16395_v44   ;;  %v6056_v40 = vld.sshfl [vmem:[#allocation1 + $0x280] sm:$0xff pattern:$0xb3a29180]   ;;  %v16405_v44 = vunpack.i.l.bf16 %v16404_v54 }
 0x2cb   : > { %v6065_v31 = vld.sshfl [vmem:[#allocation1 + $0x284] sm:$0xff pattern:$0xb3a29180]   ;;  %4973 = vst.msk [vmem:[#allocation0 + $0xac4] ss:$8 sm:$0xf] %vm1398_vm0, %v16401_v61   ;;  %16698 = vrot.lane.b32.xlu1 %v16697_v39, %s16934_s16 }
 0x2cc   : > { %4975 = vst.msk [vmem:[#allocation0 + $0xac4] ss:$8 sm:$0xf0] %vm1398_vm0, %v16401_v61   ;;  %4964 = vst.msk [vmem:[#allocation0 + $0xa84] ss:$8 sm:$0xf] %vm1398_vm0, %v16400_v30   ;;  %v16411_v61 = vunpack.i.h.bf16 %v16409_v57  ;;  %v16702_v43 = vpack.i.bf16 %v6065_v31, %v6056_v40  ;;  %v16414_v40 = vpop.permute.xlu0 %16413 }
 0x2cd   : > { %4966 = vst.msk [vmem:[#allocation0 + $0xa84] ss:$8 sm:$0xf0] %vm1398_vm0, %v16400_v30   ;;  %v6074_v42 = vld.sshfl [vmem:[#allocation1 + $0x290] sm:$0xff pattern:$0xb3a29180]   ;;  %v16410_v30 = vunpack.i.l.bf16 %v16409_v57  ;;  %v16416_v31 = vunpack.i.h.bf16 %v16414_v40  ;;  %v16415_v54 = vunpack.i.l.bf16 %v16414_v40 }
 0x2ce   : > { %v6083_v38 = vld.sshfl [vmem:[#allocation1 + $0x294] sm:$0xff pattern:$0xb3a29180]   ;;  %4991 = vst.msk [vmem:[#allocation0 + $0xb44] ss:$8 sm:$0xf] %vm1398_vm0, %v16406_v29   ;;  %16703 = vrot.lane.b32.xlu0 %v16702_v43, %s16934_s16 }
 0x2cf   : > { %4993 = vst.msk [vmem:[#allocation0 + $0xb44] ss:$8 sm:$0xf0] %vm1398_vm0, %v16406_v29   ;;  %4982 = vst.msk [vmem:[#allocation0 + $0xb04] ss:$8 sm:$0xf] %vm1398_vm0, %v16405_v44   ;;  %v16707_v39 = vpack.i.bf16 %v6083_v38, %v6074_v42  ;;  %v16419_v42 = vpop.permute.xlu1 %16418 }
 0x2d0   : > { %4984 = vst.msk [vmem:[#allocation0 + $0xb04] ss:$8 sm:$0xf0] %vm1398_vm0, %v16405_v44   ;;  %5009 = vst.msk [vmem:[#allocation0 + $0xbc4] ss:$8 sm:$0xf] %vm1398_vm0, %v16411_v61   ;;  %v16421_v38 = vunpack.i.h.bf16 %v16419_v42  ;;  %v16420_v29 = vunpack.i.l.bf16 %v16419_v42  ;;  %v16424_v44 = vpop.permute.xlu0 %16423 }
 0x2d1   : > { %5011 = vst.msk [vmem:[#allocation0 + $0xbc4] ss:$8 sm:$0xf0] %vm1398_vm0, %v16411_v61   ;;  %5000 = vst.msk [vmem:[#allocation0 + $0xb84] ss:$8 sm:$0xf] %vm1398_vm0, %v16410_v30   ;;  %16708 = vrot.lane.b32.xlu1 %v16707_v39, %s16934_s16  ;;  %v16426_v57 = vunpack.i.h.bf16 %v16424_v44  ;;  %v16425_v61 = vunpack.i.l.bf16 %v16424_v44 }
 0x2d2   : > { %5002 = vst.msk [vmem:[#allocation0 + $0xb84] ss:$8 sm:$0xf0] %vm1398_vm0, %v16410_v30   ;;  %5027 = vst.msk [vmem:[#allocation0 + $0xc44] ss:$8 sm:$0xf] %vm1398_vm0, %v16416_v31   ;;  %16713 = vrot.lane.b32.xlu0 %v17834_v4, %s16935_s17 }
 0x2d3   : > { %5029 = vst.msk [vmem:[#allocation0 + $0xc44] ss:$8 sm:$0xf0] %vm1398_vm0, %v16416_v31   ;;  %5018 = vst.msk [vmem:[#allocation0 + $0xc04] ss:$8 sm:$0xf] %vm1398_vm0, %v16415_v54   ;;  %v16429_v30 = vpop.permute.xlu1 %16428 }
 0x2d4   : > { %5020 = vst.msk [vmem:[#allocation0 + $0xc04] ss:$8 sm:$0xf0] %vm1398_vm0, %v16415_v54   ;;  %5045 = vst.msk [vmem:[#allocation0 + $0xcc4] ss:$8 sm:$0xf] %vm1398_vm0, %v16421_v38   ;;  %v16431_v43 = vunpack.i.h.bf16 %v16429_v30  ;;  %v16430_v39 = vunpack.i.l.bf16 %v16429_v30  ;;  %v16434_v59 = vpop.permute.xlu0 %16433 }
 0x2d5   : > { %5047 = vst.msk [vmem:[#allocation0 + $0xcc4] ss:$8 sm:$0xf0] %vm1398_vm0, %v16421_v38   ;;  %5036 = vst.msk [vmem:[#allocation0 + $0xc84] ss:$8 sm:$0xf] %vm1398_vm0, %v16420_v29   ;;  %16718 = vrot.lane.b32.xlu1 %v16717_v28, %s16935_s17  ;;  %v16436_v28 = vunpack.i.h.bf16 %v16434_v59  ;;  %v16435_v40 = vunpack.i.l.bf16 %v16434_v59 }
 0x2d6   : > { %5038 = vst.msk [vmem:[#allocation0 + $0xc84] ss:$8 sm:$0xf0] %vm1398_vm0, %v16420_v29   ;;  %5063 = vst.msk [vmem:[#allocation0 + $0xd44] ss:$8 sm:$0xf] %vm1398_vm0, %v16426_v57   ;;  %16723 = vrot.lane.b32.xlu0 %v17900_v25, %s16935_s17 }
 0x2d7   : > { %5065 = vst.msk [vmem:[#allocation0 + $0xd44] ss:$8 sm:$0xf0] %vm1398_vm0, %v16426_v57   ;;  %5054 = vst.msk [vmem:[#allocation0 + $0xd04] ss:$8 sm:$0xf] %vm1398_vm0, %v16425_v61   ;;  %v16439_v31 = vpop.permute.xlu1 %16438 }
 0x2d8   : > { %5056 = vst.msk [vmem:[#allocation0 + $0xd04] ss:$8 sm:$0xf0] %vm1398_vm0, %v16425_v61   ;;  %5081 = vst.msk [vmem:[#allocation0 + $0xdc4] ss:$8 sm:$0xf] %vm1398_vm0, %v16431_v43   ;;  %v16441_v54 = vunpack.i.h.bf16 %v16439_v31  ;;  %v16440_v42 = vunpack.i.l.bf16 %v16439_v31  ;;  %v16444_v34 = vpop.permute.xlu0 %16443 }
 0x2d9   : > { %5083 = vst.msk [vmem:[#allocation0 + $0xdc4] ss:$8 sm:$0xf0] %vm1398_vm0, %v16431_v43   ;;  %5072 = vst.msk [vmem:[#allocation0 + $0xd84] ss:$8 sm:$0xf] %vm1398_vm0, %v16430_v39   ;;  %16728 = vrot.lane.b32.xlu1 %v16727_v52, %s16935_s17  ;;  %v16446_v44 = vunpack.i.h.bf16 %v16444_v34  ;;  %v16445_v57 = vunpack.i.l.bf16 %v16444_v34 }
 0x2da   : > { %5074 = vst.msk [vmem:[#allocation0 + $0xd84] ss:$8 sm:$0xf0] %vm1398_vm0, %v16430_v39   ;;  %5099 = vst.msk [vmem:[#allocation0 + $0xe44] ss:$8 sm:$0xf] %vm1398_vm0, %v16436_v28   ;;  %16733 = vrot.lane.b32.xlu0 %v17970_v11, %s16935_s17 }
 0x2db   : > { %5101 = vst.msk [vmem:[#allocation0 + $0xe44] ss:$8 sm:$0xf0] %vm1398_vm0, %v16436_v28   ;;  %5090 = vst.msk [vmem:[#allocation0 + $0xe04] ss:$8 sm:$0xf] %vm1398_vm0, %v16435_v40   ;;  %v16449_v61 = vpop.permute.xlu1 %16448 }
 0x2dc   : > { %5092 = vst.msk [vmem:[#allocation0 + $0xe04] ss:$8 sm:$0xf0] %vm1398_vm0, %v16435_v40   ;;  %v6260_v52 = vld [vmem:[#allocation1 + $0xd0] sm:$0xff]   ;;  %v6273_v38 = vld [vmem:[#allocation1 + $0xe0] sm:$0xff]   ;;  %v16451_v30 = vunpack.i.h.bf16 %v16449_v61  ;;  %v16450_v43 = vunpack.i.l.bf16 %v16449_v61  ;;  %v16454_v40 = vpop.permute.xlu0 %16453 }
 0x2dd   : > { %5117 = vst.msk [vmem:[#allocation0 + $0xec4] ss:$8 sm:$0xf] %vm1398_vm0, %v16441_v54   ;;  %5119 = vst.msk [vmem:[#allocation0 + $0xec4] ss:$8 sm:$0xf0] %vm1398_vm0, %v16441_v54   ;;  %v16742_v39 = vpack.i.bf16 %v6260_v52, %v6247_v22  ;;  %16738 = vrot.lane.b32.xlu1 %v16737_v21, %s16935_s17  ;;  %v16455_v21 = vunpack.i.l.bf16 %v16454_v40 }
 0x2de   : > { %5108 = vst.msk [vmem:[#allocation0 + $0xe84] ss:$8 sm:$0xf] %vm1398_vm0, %v16440_v42   ;;  %5110 = vst.msk [vmem:[#allocation0 + $0xe84] ss:$8 sm:$0xf0] %vm1398_vm0, %v16440_v42   ;;  %v16456_v42 = vunpack.i.h.bf16 %v16454_v40 }
 0x2df   : > { %v6286_v29 = vld [vmem:[#allocation1 + $0xf0] sm:$0xff]   ;;  %5135 = vst.msk [vmem:[#allocation0 + $0xf44] ss:$8 sm:$0xf] %vm1398_vm0, %v16446_v44   ;;  %v6325_v31 = vld [vmem:[#allocation1 + $0x120] sm:$0xff]   ;;  %v16459_v22 = vpop.permute.xlu1 %16458  ;;  %16743 = vrot.lane.b32.xlu0 %v16742_v39, %s16935_s17 }
 0x2e0   : > { %5137 = vst.msk [vmem:[#allocation0 + $0xf44] ss:$8 sm:$0xf0] %vm1398_vm0, %v16446_v44   ;;  %5126 = vst.msk [vmem:[#allocation0 + $0xf04] ss:$8 sm:$0xf] %vm1398_vm0, %v16445_v57   ;;  %v16747_v59 = vpack.i.bf16 %v6286_v29, %v6273_v38  ;;  %v16461_v52 = vunpack.i.h.bf16 %v16459_v22  ;;  %v16460_v34 = vunpack.i.l.bf16 %v16459_v22  ;;  %v16464_v61 = vpop.permute.xlu0 %16463 }
 0x2e1   : > { %5128 = vst.msk [vmem:[#allocation0 + $0xf04] ss:$8 sm:$0xf0] %vm1398_vm0, %v16445_v57   ;;  %v6312_v28 = vld [vmem:[#allocation1 + $0x110] sm:$0xff]   ;;  %v6351_v44 = vld [vmem:[#allocation1 + $0x140] sm:$0xff]   ;;  %v16466_v39 = vunpack.i.h.bf16 %v16464_v61 }
 0x2e2   : > { %5153 = vst.msk [vmem:[#allocation0 + $0xfc4] ss:$8 sm:$0xf] %vm1398_vm0, %v16451_v30   ;;  %5155 = vst.msk [vmem:[#allocation0 + $0xfc4] ss:$8 sm:$0xf0] %vm1398_vm0, %v16451_v30   ;;  %v16752_v38 = vpack.i.bf16 %v6312_v28, %v6299_v48  ;;  %16748 = vrot.lane.b32.xlu1 %v16747_v59, %s16935_s17  ;;  %v16465_v59 = vunpack.i.l.bf16 %v16464_v61 }
 0x2e3   : > { %5144 = vst.msk [vmem:[#allocation0 + $0xf84] ss:$8 sm:$0xf] %vm1398_vm0, %v16450_v43   ;;  %5146 = vst.msk [vmem:[#allocation0 + $0xf84] ss:$8 sm:$0xf0] %vm1398_vm0, %v16450_v43   ;;  %v16469_v48 = vpop.permute.xlu1 %16468 }
 0x2e4   : > { %v6338_v54 = vld [vmem:[#allocation1 + $0x130] sm:$0xff]   ;;  %5171 = vst.msk [vmem:[#allocation0 + $0x1044] ss:$8 sm:$0xf] %vm1398_vm0, %v16456_v42   ;;  %v6377_v30 = vld [vmem:[#allocation1 + $0x160] sm:$0xff]   ;;  %v16471_v28 = vunpack.i.h.bf16 %v16469_v48  ;;  %v16470_v40 = vunpack.i.l.bf16 %v16469_v48  ;;  %16753 = vrot.lane.b32.xlu0 %v16752_v38, %s16935_s17  ;;  %v16474_v22 = vpop.permute.xlu0 %16473 }
 0x2e5   : > { %5173 = vst.msk [vmem:[#allocation0 + $0x1044] ss:$8 sm:$0xf0] %vm1398_vm0, %v16456_v42   ;;  %5162 = vst.msk [vmem:[#allocation0 + $0x1004] ss:$8 sm:$0xf] %vm1398_vm0, %v16455_v21   ;;  %v16757_v29 = vpack.i.bf16 %v6338_v54, %v6325_v31  ;;  %v16476_v38 = vunpack.i.h.bf16 %v16474_v22 }
 0x2e6   : > { %5164 = vst.msk [vmem:[#allocation0 + $0x1004] ss:$8 sm:$0xf0] %vm1398_vm0, %v16455_v21   ;;  %v6364_v57 = vld [vmem:[#allocation1 + $0x150] sm:$0xff]   ;;  %v6403_v42 = vld [vmem:[#allocation1 + $0x180] sm:$0xff]  }
 0x2e7   : > { %5189 = vst.msk [vmem:[#allocation0 + $0x10c4] ss:$8 sm:$0xf] %vm1398_vm0, %v16461_v52   ;;  %5191 = vst.msk [vmem:[#allocation0 + $0x10c4] ss:$8 sm:$0xf0] %vm1398_vm0, %v16461_v52   ;;  %v16762_v31 = vpack.i.bf16 %v6364_v57, %v6351_v44  ;;  %16758 = vrot.lane.b32.xlu1 %v16757_v29, %s16935_s17  ;;  %v16475_v29 = vunpack.i.l.bf16 %v16474_v22  ;;  %v16479_v44 = vpop.permute.xlu1 %16478 }
 0x2e8   : > { %5180 = vst.msk [vmem:[#allocation0 + $0x1084] ss:$8 sm:$0xf] %vm1398_vm0, %v16460_v34   ;;  %5182 = vst.msk [vmem:[#allocation0 + $0x1084] ss:$8 sm:$0xf0] %vm1398_vm0, %v16460_v34   ;;  %v16481_v57 = vunpack.i.h.bf16 %v16479_v44  ;;  %v16480_v61 = vunpack.i.l.bf16 %v16479_v44 }
 0x2e9   : > { %v6390_v43 = vld [vmem:[#allocation1 + $0x170] sm:$0xff]   ;;  %5207 = vst.msk [vmem:[#allocation0 + $0x1144] ss:$8 sm:$0xf] %vm1398_vm0, %v16466_v39   ;;  %v6429_v52 = vld [vmem:[#allocation1 + $0x1a0] sm:$0xff]   ;;  %16763 = vrot.lane.b32.xlu0 %v16762_v31, %s16935_s17 }
 0x2ea   : > { %5209 = vst.msk [vmem:[#allocation0 + $0x1144] ss:$8 sm:$0xf0] %vm1398_vm0, %v16466_v39   ;;  %5198 = vst.msk [vmem:[#allocation0 + $0x1104] ss:$8 sm:$0xf] %vm1398_vm0, %v16465_v59   ;;  %v16767_v54 = vpack.i.bf16 %v6390_v43, %v6377_v30  ;;  %v16484_v39 = vpop.permute.xlu0 %16483 }
 0x2eb   : > { %5200 = vst.msk [vmem:[#allocation0 + $0x1104] ss:$8 sm:$0xf0] %vm1398_vm0, %v16465_v59   ;;  %v6416_v21 = vld [vmem:[#allocation1 + $0x190] sm:$0xff]   ;;  %v16486_v59 = vunpack.i.h.bf16 %v16484_v39  ;;  %v16485_v48 = vunpack.i.l.bf16 %v16484_v39 }
 0x2ec   : > { %5225 = vst.msk [vmem:[#allocation0 + $0x11c4] ss:$8 sm:$0xf] %vm1398_vm0, %v16471_v28   ;;  %5227 = vst.msk [vmem:[#allocation0 + $0x11c4] ss:$8 sm:$0xf0] %vm1398_vm0, %v16471_v28   ;;  %v16772_v30 = vpack.i.bf16 %v6416_v21, %v6403_v42  ;;  %16768 = vrot.lane.b32.xlu1 %v16767_v54, %s16935_s17  ;;  %v16489_v28 = vpop.permute.xlu1 %16488 }
 0x2ed   : > { %5216 = vst.msk [vmem:[#allocation0 + $0x1184] ss:$8 sm:$0xf] %vm1398_vm0, %v16470_v40   ;;  %5218 = vst.msk [vmem:[#allocation0 + $0x1184] ss:$8 sm:$0xf0] %vm1398_vm0, %v16470_v40   ;;  %v16491_v40 = vunpack.i.h.bf16 %v16489_v28  ;;  %v16490_v31 = vunpack.i.l.bf16 %v16489_v28 }
 0x2ee   : > { %v6442_v34 = vld [vmem:[#allocation1 + $0x1b0] sm:$0xff]   ;;  %5243 = vst.msk [vmem:[#allocation0 + $0x1244] ss:$8 sm:$0xf] %vm1398_vm0, %v16476_v38   ;;  %16773 = vrot.lane.b32.xlu0 %v16772_v30, %s16935_s17  ;;  %v16494_v54 = vpop.permute.xlu0 %16493 }
 0x2ef   : > { %5245 = vst.msk [vmem:[#allocation0 + $0x1244] ss:$8 sm:$0xf0] %vm1398_vm0, %v16476_v38   ;;  %5234 = vst.msk [vmem:[#allocation0 + $0x1204] ss:$8 sm:$0xf] %vm1398_vm0, %v16475_v29   ;;  %v16777_v43 = vpack.i.bf16 %v6442_v34, %v6429_v52  ;;  %v16496_v42 = vunpack.i.h.bf16 %v16494_v54  ;;  %v16495_v21 = vunpack.i.l.bf16 %v16494_v54 }
 0x2f0   : > { %5236 = vst.msk [vmem:[#allocation0 + $0x1204] ss:$8 sm:$0xf0] %vm1398_vm0, %v16475_v29   ;;  %5261 = vst.msk [vmem:[#allocation0 + $0x12c4] ss:$8 sm:$0xf] %vm1398_vm0, %v16481_v57   ;;  %v16499_v22 = vpop.permute.xlu1 %16498 }
 0x2f1   : > { %5263 = vst.msk [vmem:[#allocation0 + $0x12c4] ss:$8 sm:$0xf0] %vm1398_vm0, %v16481_v57   ;;  %5252 = vst.msk [vmem:[#allocation0 + $0x1284] ss:$8 sm:$0xf] %vm1398_vm0, %v16480_v61   ;;  %16778 = vrot.lane.b32.xlu1 %v16777_v43, %s16935_s17  ;;  %v16501_v52 = vunpack.i.h.bf16 %v16499_v22  ;;  %v16500_v34 = vunpack.i.l.bf16 %v16499_v22 }
 0x2f2   : > { %5254 = vst.msk [vmem:[#allocation0 + $0x1284] ss:$8 sm:$0xf0] %vm1398_vm0, %v16480_v61   ;;  %5279 = vst.msk [vmem:[#allocation0 + $0x1344] ss:$8 sm:$0xf] %vm1398_vm0, %v16486_v59   ;;  %16783 = vrot.lane.b32.xlu0 %v16782_v50, %s16935_s17  ;;  %v16504_v55 = vpop.permute.xlu0 %16503 }
 0x2f3   : > { %5281 = vst.msk [vmem:[#allocation0 + $0x1344] ss:$8 sm:$0xf0] %vm1398_vm0, %v16486_v59   ;;  %5270 = vst.msk [vmem:[#allocation0 + $0x1304] ss:$8 sm:$0xf] %vm1398_vm0, %v16485_v48   ;;  %v16506_v27 = vunpack.i.h.bf16 %v16504_v55  ;;  %v16505_v1 = vunpack.i.l.bf16 %v16504_v55 }
 0x2f4   : > { %5272 = vst.msk [vmem:[#allocation0 + $0x1304] ss:$8 sm:$0xf0] %vm1398_vm0, %v16485_v48   ;;  %5297 = vst.msk [vmem:[#allocation0 + $0x13c4] ss:$8 sm:$0xf] %vm1398_vm0, %v16491_v40   ;;  %v16509_v12 = vpop.permute.xlu1 %16508 }
 0x2f5   : > { %5299 = vst.msk [vmem:[#allocation0 + $0x13c4] ss:$8 sm:$0xf0] %vm1398_vm0, %v16491_v40   ;;  %5288 = vst.msk [vmem:[#allocation0 + $0x1384] ss:$8 sm:$0xf] %vm1398_vm0, %v16490_v31   ;;  %16788 = vrot.lane.b32.xlu1 %v16787_v51, %s16935_s17  ;;  %v16511_v50 = vunpack.i.h.bf16 %v16509_v12  ;;  %v16510_v51 = vunpack.i.l.bf16 %v16509_v12 }
 0x2f6   : > { %5290 = vst.msk [vmem:[#allocation0 + $0x1384] ss:$8 sm:$0xf0] %vm1398_vm0, %v16490_v31   ;;  %5315 = vst.msk [vmem:[#allocation0 + $0x1444] ss:$8 sm:$0xf] %vm1398_vm0, %v16496_v42   ;;  %16793 = vrot.lane.b32.xlu0 %v16792_v23, %s16935_s17  ;;  %v16514_v26 = vpop.permute.xlu0 %16513 }
 0x2f7   : > { %5317 = vst.msk [vmem:[#allocation0 + $0x1444] ss:$8 sm:$0xf0] %vm1398_vm0, %v16496_v42   ;;  %5306 = vst.msk [vmem:[#allocation0 + $0x1404] ss:$8 sm:$0xf] %vm1398_vm0, %v16495_v21   ;;  %v16516_v16 = vunpack.i.h.bf16 %v16514_v26  ;;  %v16515_v6 = vunpack.i.l.bf16 %v16514_v26 }
 0x2f8   : > { %5308 = vst.msk [vmem:[#allocation0 + $0x1404] ss:$8 sm:$0xf0] %vm1398_vm0, %v16495_v21   ;;  %5333 = vst.msk [vmem:[#allocation0 + $0x14c4] ss:$8 sm:$0xf] %vm1398_vm0, %v16501_v52   ;;  %v16519_v9 = vpop.permute.xlu1 %16518 }
 0x2f9   : > { %5335 = vst.msk [vmem:[#allocation0 + $0x14c4] ss:$8 sm:$0xf0] %vm1398_vm0, %v16501_v52   ;;  %5324 = vst.msk [vmem:[#allocation0 + $0x1484] ss:$8 sm:$0xf] %vm1398_vm0, %v16500_v34   ;;  %16798 = vrot.lane.b32.xlu1 %v16797_v24, %s16935_s17  ;;  %v16521_v23 = vunpack.i.h.bf16 %v16519_v9  ;;  %v16520_v24 = vunpack.i.l.bf16 %v16519_v9 }
 0x2fa   : > { %5326 = vst.msk [vmem:[#allocation0 + $0x1484] ss:$8 sm:$0xf0] %vm1398_vm0, %v16500_v34   ;;  %5350 = vst.msk [vmem:[#allocation0 + $0x45] ss:$8 sm:$0xf] %vm1398_vm0, %v16506_v27   ;;  %16803 = vrot.lane.b32.xlu0 %v16802_v5, %s16935_s17  ;;  %v16524_v62 = vpop.permute.xlu0 %16523 }
 0x2fb   : > { %5352 = vst.msk [vmem:[#allocation0 + $0x45] ss:$8 sm:$0xf0] %vm1398_vm0, %v16506_v27   ;;  %5341 = vst.msk [vmem:[#allocation0 + $0x5] ss:$8 sm:$0xf] %vm1398_vm0, %v16505_v1   ;;  %v16526_v2 = vunpack.i.h.bf16 %v16524_v62  ;;  %v16525_v5 = vunpack.i.l.bf16 %v16524_v62 }
 0x2fc   : > { %5343 = vst.msk [vmem:[#allocation0 + $0x5] ss:$8 sm:$0xf0] %vm1398_vm0, %v16505_v1   ;;  %5368 = vst.msk [vmem:[#allocation0 + $0xc5] ss:$8 sm:$0xf] %vm1398_vm0, %v16511_v50  }
 0x2fd   : > { %5370 = vst.msk [vmem:[#allocation0 + $0xc5] ss:$8 sm:$0xf0] %vm1398_vm0, %v16511_v50   ;;  %5359 = vst.msk [vmem:[#allocation0 + $0x85] ss:$8 sm:$0xf] %vm1398_vm0, %v16510_v51   ;;  %16808 = vrot.lane.b32.xlu1 %v16807_v17, %s16935_s17  ;;  %v16529_v17 = vpop.permute.xlu1 %16528 }
 0x2fe   : > { %5361 = vst.msk [vmem:[#allocation0 + $0x85] ss:$8 sm:$0xf0] %vm1398_vm0, %v16510_v51   ;;  %5386 = vst.msk [vmem:[#allocation0 + $0x145] ss:$8 sm:$0xf] %vm1398_vm0, %v16516_v16   ;;  %v16531_v38 = vunpack.i.h.bf16 %v16529_v17  ;;  %v16530_v29 = vunpack.i.l.bf16 %v16529_v17  ;;  %16813 = vrot.lane.b32.xlu0 %v16812_v10, %s16935_s17  ;;  %v16534_v10 = vpop.permute.xlu0 %16533 }
 0x2ff   : > { %5388 = vst.msk [vmem:[#allocation0 + $0x145] ss:$8 sm:$0xf0] %vm1398_vm0, %v16516_v16   ;;  %5377 = vst.msk [vmem:[#allocation0 + $0x105] ss:$8 sm:$0xf] %vm1398_vm0, %v16515_v6   ;;  %v16536_v44 = vunpack.i.h.bf16 %v16534_v10  ;;  %v16535_v57 = vunpack.i.l.bf16 %v16534_v10 }
 0x300   : > { %5379 = vst.msk [vmem:[#allocation0 + $0x105] ss:$8 sm:$0xf0] %vm1398_vm0, %v16515_v6   ;;  %5404 = vst.msk [vmem:[#allocation0 + $0x1c5] ss:$8 sm:$0xf] %vm1398_vm0, %v16521_v23  }
 0x301   : > { %5406 = vst.msk [vmem:[#allocation0 + $0x1c5] ss:$8 sm:$0xf0] %vm1398_vm0, %v16521_v23   ;;  %5395 = vst.msk [vmem:[#allocation0 + $0x185] ss:$8 sm:$0xf] %vm1398_vm0, %v16520_v24   ;;  %16818 = vrot.lane.b32.xlu1 %v17834_v4, %s16936_s18  ;;  %v16539_v61 = vpop.permute.xlu1 %16538 }
 0x302   : > { %5397 = vst.msk [vmem:[#allocation0 + $0x185] ss:$8 sm:$0xf0] %vm1398_vm0, %v16520_v24   ;;  %5422 = vst.msk [vmem:[#allocation0 + $0x245] ss:$8 sm:$0xf] %vm1398_vm0, %v16526_v2   ;;  %v16541_v30 = vunpack.i.h.bf16 %v16539_v61  ;;  %v16540_v43 = vunpack.i.l.bf16 %v16539_v61  ;;  %16823 = vrot.lane.b32.xlu0 %v16822_v41, %s16936_s18  ;;  %v16544_v59 = vpop.permute.xlu0 %16543 }
 0x303   : > { %5424 = vst.msk [vmem:[#allocation0 + $0x245] ss:$8 sm:$0xf0] %vm1398_vm0, %v16526_v2   ;;  %5413 = vst.msk [vmem:[#allocation0 + $0x205] ss:$8 sm:$0xf] %vm1398_vm0, %v16525_v5   ;;  %v16546_v48 = vunpack.i.h.bf16 %v16544_v59  ;;  %v16545_v28 = vunpack.i.l.bf16 %v16544_v59 }
 0x304   : > { %5415 = vst.msk [vmem:[#allocation0 + $0x205] ss:$8 sm:$0xf0] %vm1398_vm0, %v16525_v5   ;;  %v6714_v4 = vld [vmem:[#allocation1 + $0x60] sm:$0xff]   ;;  %v7039_v16 = vld [vmem:[#allocation1 + $0x1f0] sm:$0xff]  }
 0x305   : > { %5440 = vst.msk [vmem:[#allocation0 + $0x2c5] ss:$8 sm:$0xf] %vm1398_vm0, %v16531_v38   ;;  %5442 = vst.msk [vmem:[#allocation0 + $0x2c5] ss:$8 sm:$0xf0] %vm1398_vm0, %v16531_v38   ;;  %v16832_v39 = vpack.i.bf16 %v6727_v58, %v6714_v4  ;;  %16828 = vrot.lane.b32.xlu1 %v17900_v25, %s16936_s18  ;;  %v16549_v40 = vpop.permute.xlu1 %16548  ;;  %v16892_v49 = vpack.i.bf16 %v7039_v16, %v7026_v3 }
 0x306   : > { %5431 = vst.msk [vmem:[#allocation0 + $0x285] ss:$8 sm:$0xf] %vm1398_vm0, %v16530_v29   ;;  %5433 = vst.msk [vmem:[#allocation0 + $0x285] ss:$8 sm:$0xf0] %vm1398_vm0, %v16530_v29   ;;  %v16551_v31 = vunpack.i.h.bf16 %v16549_v40  ;;  %v16550_v54 = vunpack.i.l.bf16 %v16549_v40 }
 0x307   : > { %5458 = vst.msk [vmem:[#allocation0 + $0x345] ss:$8 sm:$0xf] %vm1398_vm0, %v16536_v44   ;;  %5460 = vst.msk [vmem:[#allocation0 + $0x345] ss:$8 sm:$0xf0] %vm1398_vm0, %v16536_v44   ;;  %16833 = vrot.lane.b32.xlu0 %v16832_v39, %s16936_s18 }
 0x308   : > { %5449 = vst.msk [vmem:[#allocation0 + $0x305] ss:$8 sm:$0xf] %vm1398_vm0, %v16535_v57   ;;  %5451 = vst.msk [vmem:[#allocation0 + $0x305] ss:$8 sm:$0xf0] %vm1398_vm0, %v16535_v57  }
 0x309   : > { %v6766_v25 = vld [vmem:[#allocation1 + $0xa0] sm:$0xff]   ;;  %5476 = vst.msk [vmem:[#allocation0 + $0x3c5] ss:$8 sm:$0xf] %vm1398_vm0, %v16541_v30   ;;  %16838 = vrot.lane.b32.xlu1 %v17970_v11, %s16936_s18  ;;  %v16554_v11 = vpop.permute.xlu0 %16553  ;;  %v16559_v22 = vpop.permute.xlu1 %16558  ;;  %v7065_v23 = vld [vmem:[#allocation1 + $0x210] sm:$0xff]  }
 0x30a   : > { %5478 = vst.msk [vmem:[#allocation0 + $0x3c5] ss:$8 sm:$0xf0] %vm1398_vm0, %v16541_v30   ;;  %5467 = vst.msk [vmem:[#allocation0 + $0x385] ss:$8 sm:$0xf] %vm1398_vm0, %v16540_v43   ;;  %v16842_v35 = vpack.i.bf16 %v18349_v35, %v6766_v25  ;;  %v16556_v42 = vunpack.i.h.bf16 %v16554_v11  ;;  %v16555_v21 = vunpack.i.l.bf16 %v16554_v11  ;;  %v16561_v52 = vunpack.i.h.bf16 %v16559_v22 }
 0x30b   : > { %5469 = vst.msk [vmem:[#allocation0 + $0x385] ss:$8 sm:$0xf0] %vm1398_vm0, %v16540_v43   ;;  %5494 = vst.msk [vmem:[#allocation0 + $0x445] ss:$8 sm:$0xf] %vm1398_vm0, %v16546_v48   ;;  %v16560_v34 = vunpack.i.l.bf16 %v16559_v22 }
 0x30c   : > { %5496 = vst.msk [vmem:[#allocation0 + $0x445] ss:$8 sm:$0xf0] %vm1398_vm0, %v16546_v48   ;;  %5485 = vst.msk [vmem:[#allocation0 + $0x405] ss:$8 sm:$0xf] %vm1398_vm0, %v16545_v28   ;;  %16843 = vrot.lane.b32.xlu0 %v16842_v35, %s16936_s18 }
 0x30d   : > { %5487 = vst.msk [vmem:[#allocation0 + $0x405] ss:$8 sm:$0xf0] %vm1398_vm0, %v16545_v28   ;;  %5512 = vst.msk [vmem:[#allocation0 + $0x4c5] ss:$8 sm:$0xf] %vm1398_vm0, %v16551_v31   ;;  %16848 = vrot.lane.b32.xlu1 %v16847_v19, %s16936_s18  ;;  %v16564_v36 = vpop.permute.xlu0 %16563  ;;  %v16569_v55 = vpop.permute.xlu1 %16568 }
 0x30e   : > { %5514 = vst.msk [vmem:[#allocation0 + $0x4c5] ss:$8 sm:$0xf0] %vm1398_vm0, %v16551_v31   ;;  %5503 = vst.msk [vmem:[#allocation0 + $0x485] ss:$8 sm:$0xf] %vm1398_vm0, %v16550_v54   ;;  %v16566_v37 = vunpack.i.h.bf16 %v16564_v36  ;;  %v16565_v19 = vunpack.i.l.bf16 %v16564_v36  ;;  %v16571_v27 = vunpack.i.h.bf16 %v16569_v55  ;;  %v16570_v1 = vunpack.i.l.bf16 %v16569_v55 }
 0x30f   : > { %5505 = vst.msk [vmem:[#allocation0 + $0x485] ss:$8 sm:$0xf0] %vm1398_vm0, %v16550_v54   ;;  %5530 = vst.msk [vmem:[#allocation0 + $0x545] ss:$8 sm:$0xf] %vm1398_vm0, %v16556_v42  }
 0x310   : > { %5532 = vst.msk [vmem:[#allocation0 + $0x545] ss:$8 sm:$0xf0] %vm1398_vm0, %v16556_v42   ;;  %5521 = vst.msk [vmem:[#allocation0 + $0x505] ss:$8 sm:$0xf] %vm1398_vm0, %v16555_v21   ;;  %16853 = vrot.lane.b32.xlu0 %v16852_v18, %s16936_s18 }
 0x311   : > { %5523 = vst.msk [vmem:[#allocation0 + $0x505] ss:$8 sm:$0xf0] %vm1398_vm0, %v16555_v21   ;;  %5548 = vst.msk [vmem:[#allocation0 + $0x5c5] ss:$8 sm:$0xf] %vm1398_vm0, %v16561_v52   ;;  %16858 = vrot.lane.b32.xlu1 %v16857_v13, %s16936_s18  ;;  %v16574_v0 = vpop.permute.xlu0 %16573  ;;  %v16579_v18 = vpop.permute.xlu1 %16578 }
 0x312   : > { %5550 = vst.msk [vmem:[#allocation0 + $0x5c5] ss:$8 sm:$0xf0] %vm1398_vm0, %v16561_v52   ;;  %5539 = vst.msk [vmem:[#allocation0 + $0x585] ss:$8 sm:$0xf] %vm1398_vm0, %v16560_v34   ;;  %v16576_v63 = vunpack.i.h.bf16 %v16574_v0  ;;  %v16575_v7 = vunpack.i.l.bf16 %v16574_v0  ;;  %v16581_v20 = vunpack.i.h.bf16 %v16579_v18  ;;  %v16580_v13 = vunpack.i.l.bf16 %v16579_v18 }
 0x313   : > { %5541 = vst.msk [vmem:[#allocation0 + $0x585] ss:$8 sm:$0xf0] %vm1398_vm0, %v16560_v34   ;;  %5566 = vst.msk [vmem:[#allocation0 + $0x645] ss:$8 sm:$0xf] %vm1398_vm0, %v16566_v37  }
 0x314   : > { %5568 = vst.msk [vmem:[#allocation0 + $0x645] ss:$8 sm:$0xf0] %vm1398_vm0, %v16566_v37   ;;  %5557 = vst.msk [vmem:[#allocation0 + $0x605] ss:$8 sm:$0xf] %vm1398_vm0, %v16565_v19   ;;  %16863 = vrot.lane.b32.xlu0 %v16862_v32, %s16936_s18 }
 0x315   : > { %5559 = vst.msk [vmem:[#allocation0 + $0x605] ss:$8 sm:$0xf0] %vm1398_vm0, %v16565_v19   ;;  %5584 = vst.msk [vmem:[#allocation0 + $0x6c5] ss:$8 sm:$0xf] %vm1398_vm0, %v16571_v27   ;;  %16868 = vrot.lane.b32.xlu1 %v21031_v14, %s16936_s18  ;;  %v16584_v15 = vpop.permute.xlu0 %16583  ;;  %v16589_v50 = vpop.permute.xlu1 %16588 }
 0x316   : > { %5586 = vst.msk [vmem:[#allocation0 + $0x6c5] ss:$8 sm:$0xf0] %vm1398_vm0, %v16571_v27   ;;  %5575 = vst.msk [vmem:[#allocation0 + $0x685] ss:$8 sm:$0xf] %vm1398_vm0, %v16570_v1   ;;  %v16586_v33 = vunpack.i.h.bf16 %v16584_v15  ;;  %v16585_v12 = vunpack.i.l.bf16 %v16584_v15  ;;  %v16591_v51 = vunpack.i.h.bf16 %v16589_v50  ;;  %v16590_v26 = vunpack.i.l.bf16 %v16589_v50 }
 0x317   : > { %5577 = vst.msk [vmem:[#allocation0 + $0x685] ss:$8 sm:$0xf0] %vm1398_vm0, %v16570_v1   ;;  %5602 = vst.msk [vmem:[#allocation0 + $0x745] ss:$8 sm:$0xf] %vm1398_vm0, %v16576_v63  }
 0x318   : > { %5604 = vst.msk [vmem:[#allocation0 + $0x745] ss:$8 sm:$0xf0] %vm1398_vm0, %v16576_v63   ;;  %5593 = vst.msk [vmem:[#allocation0 + $0x705] ss:$8 sm:$0xf] %vm1398_vm0, %v16575_v7   ;;  %16873 = vrot.lane.b32.xlu0 %v21032_v47, %s16936_s18 }
 0x319   : > { %5595 = vst.msk [vmem:[#allocation0 + $0x705] ss:$8 sm:$0xf0] %vm1398_vm0, %v16575_v7   ;;  %5620 = vst.msk [vmem:[#allocation0 + $0x7c5] ss:$8 sm:$0xf] %vm1398_vm0, %v16581_v20   ;;  %16878 = vrot.lane.b32.xlu1 %v21033_v8, %s16936_s18  ;;  %v16594_v6 = vpop.permute.xlu0 %16593  ;;  %v16599_v46 = vpop.permute.xlu1 %16598 }
 0x31a   : > { %5622 = vst.msk [vmem:[#allocation0 + $0x7c5] ss:$8 sm:$0xf0] %vm1398_vm0, %v16581_v20   ;;  %5611 = vst.msk [vmem:[#allocation0 + $0x785] ss:$8 sm:$0xf] %vm1398_vm0, %v16580_v13   ;;  %v16596_v24 = vunpack.i.h.bf16 %v16594_v6  ;;  %v16595_v60 = vunpack.i.l.bf16 %v16594_v6  ;;  %v16601_v62 = vunpack.i.h.bf16 %v16599_v46  ;;  %v16600_v2 = vunpack.i.l.bf16 %v16599_v46 }
 0x31b   : > { %5613 = vst.msk [vmem:[#allocation0 + $0x785] ss:$8 sm:$0xf0] %vm1398_vm0, %v16580_v13   ;;  %v7013_v32 = vld [vmem:[#allocation1 + $0x1d0] sm:$0xff]   ;;  %v7052_v9 = vld [vmem:[#allocation1 + $0x200] sm:$0xff]  }
 0x31c   : > { %5638 = vst.msk [vmem:[#allocation0 + $0x845] ss:$8 sm:$0xf] %vm1398_vm0, %v16586_v33   ;;  %5640 = vst.msk [vmem:[#allocation0 + $0x845] ss:$8 sm:$0xf0] %vm1398_vm0, %v16586_v33   ;;  %v16887_v45 = vpack.i.bf16 %v7013_v32, %v7000_v56  ;;  %16883 = vrot.lane.b32.xlu0 %v21034_v53, %s16936_s18  ;;  %v16897_v5 = vpack.i.bf16 %v7065_v23, %v7052_v9 }
 0x31d   : > { %5629 = vst.msk [vmem:[#allocation0 + $0x805] ss:$8 sm:$0xf] %vm1398_vm0, %v16585_v12   ;;  %5631 = vst.msk [vmem:[#allocation0 + $0x805] ss:$8 sm:$0xf0] %vm1398_vm0, %v16585_v12   ;;  %v16604_v29 = vpop.permute.xlu0 %16603  ;;  %v16609_v44 = vpop.permute.xlu1 %16608 }
 0x31e   : > { %5656 = vst.msk [vmem:[#allocation0 + $0x8c5] ss:$8 sm:$0xf] %vm1398_vm0, %v16591_v51   ;;  %5658 = vst.msk [vmem:[#allocation0 + $0x8c5] ss:$8 sm:$0xf0] %vm1398_vm0, %v16591_v51   ;;  %16888 = vrot.lane.b32.xlu1 %v16887_v45, %s16936_s18  ;;  %v16606_v58 = vunpack.i.h.bf16 %v16604_v29  ;;  %v16605_v10 = vunpack.i.l.bf16 %v16604_v29  ;;  %v16611_v57 = vunpack.i.h.bf16 %v16609_v44  ;;  %v16610_v61 = vunpack.i.l.bf16 %v16609_v44 }
 0x31f   : > { %5647 = vst.msk [vmem:[#allocation0 + $0x885] ss:$8 sm:$0xf] %vm1398_vm0, %v16590_v26   ;;  %5649 = vst.msk [vmem:[#allocation0 + $0x885] ss:$8 sm:$0xf0] %vm1398_vm0, %v16590_v26  }
 0x320   : > { %5674 = vst.msk [vmem:[#allocation0 + $0x945] ss:$8 sm:$0xf] %vm1398_vm0, %v16596_v24   ;;  %5676 = vst.msk [vmem:[#allocation0 + $0x945] ss:$8 sm:$0xf0] %vm1398_vm0, %v16596_v24   ;;  %16893 = vrot.lane.b32.xlu0 %v16892_v49, %s16936_s18 }
 0x321   : > { %5665 = vst.msk [vmem:[#allocation0 + $0x905] ss:$8 sm:$0xf] %vm1398_vm0, %v16595_v60   ;;  %5667 = vst.msk [vmem:[#allocation0 + $0x905] ss:$8 sm:$0xf0] %vm1398_vm0, %v16595_v60   ;;  %v16614_v59 = vpop.permute.xlu0 %16613  ;;  %v16619_v54 = vpop.permute.xlu1 %16618 }
 0x322   : > { %v7078_v17 = vld [vmem:[#allocation1 + $0x220] sm:$0xff]   ;;  %v7091_v38 = vld [vmem:[#allocation1 + $0x230] sm:$0xff]   ;;  %5692 = vst.msk [vmem:[#allocation0 + $0x9c5] ss:$8 sm:$0xf] %vm1398_vm0, %v16601_v62   ;;  %16898 = vrot.lane.b32.xlu1 %v16897_v5, %s16936_s18  ;;  %v16616_v40 = vunpack.i.h.bf16 %v16614_v59  ;;  %v16615_v31 = vunpack.i.l.bf16 %v16614_v59  ;;  %v16621_v35 = vunpack.i.h.bf16 %v16619_v54  ;;  %v16620_v11 = vunpack.i.l.bf16 %v16619_v54 }
 0x323   : > { %5694 = vst.msk [vmem:[#allocation0 + $0x9c5] ss:$8 sm:$0xf0] %vm1398_vm0, %v16601_v62   ;;  %5683 = vst.msk [vmem:[#allocation0 + $0x985] ss:$8 sm:$0xf] %vm1398_vm0, %v16600_v2   ;;  %v16902_v30 = vpack.i.bf16 %v7091_v38, %v7078_v17 }
 0x324   : > { %5685 = vst.msk [vmem:[#allocation0 + $0x985] ss:$8 sm:$0xf0] %vm1398_vm0, %v16600_v2   ;;  %v7104_v41 = vld [vmem:[#allocation1 + $0x240] sm:$0xff]   ;;  %v7117_v4 = vld [vmem:[#allocation1 + $0x250] sm:$0xff]  }
 0x325   : > { %5710 = vst.msk [vmem:[#allocation0 + $0xa45] ss:$8 sm:$0xf] %vm1398_vm0, %v16606_v58   ;;  %5712 = vst.msk [vmem:[#allocation0 + $0xa45] ss:$8 sm:$0xf0] %vm1398_vm0, %v16606_v58   ;;  %v16907_v43 = vpack.i.bf16 %v7117_v4, %v7104_v41  ;;  %16903 = vrot.lane.b32.xlu0 %v16902_v30, %s16936_s18  ;;  %v16624_v22 = vpop.permute.xlu0 %16623  ;;  %v16629_v36 = vpop.permute.xlu1 %16628 }
 0x326   : > { %5701 = vst.msk [vmem:[#allocation0 + $0xa05] ss:$8 sm:$0xf] %vm1398_vm0, %v16605_v10   ;;  %5703 = vst.msk [vmem:[#allocation0 + $0xa05] ss:$8 sm:$0xf0] %vm1398_vm0, %v16605_v10   ;;  %v16626_v52 = vunpack.i.h.bf16 %v16624_v22  ;;  %v16625_v34 = vunpack.i.l.bf16 %v16624_v22  ;;  %v16631_v37 = vunpack.i.h.bf16 %v16629_v36  ;;  %v16630_v19 = vunpack.i.l.bf16 %v16629_v36 }
 0x327   : > { %v7130_v39 = vld [vmem:[#allocation1 + $0x260] sm:$0xff]   ;;  %v7143_v25 = vld [vmem:[#allocation1 + $0x270] sm:$0xff]   ;;  %5728 = vst.msk [vmem:[#allocation0 + $0xac5] ss:$8 sm:$0xf] %vm1398_vm0, %v16611_v57   ;;  %16908 = vrot.lane.b32.xlu1 %v16907_v43, %s16936_s18 }
 0x328   : > { %5730 = vst.msk [vmem:[#allocation0 + $0xac5] ss:$8 sm:$0xf0] %vm1398_vm0, %v16611_v57   ;;  %5719 = vst.msk [vmem:[#allocation0 + $0xa85] ss:$8 sm:$0xf] %vm1398_vm0, %v16610_v61   ;;  %v16912_v42 = vpack.i.bf16 %v7143_v25, %v7130_v39 }
 0x329   : > { %5721 = vst.msk [vmem:[#allocation0 + $0xa85] ss:$8 sm:$0xf0] %vm1398_vm0, %v16610_v61   ;;  %v7156_v48 = vld [vmem:[#allocation1 + $0x280] sm:$0xff]   ;;  %v7169_v28 = vld [vmem:[#allocation1 + $0x290] sm:$0xff]   ;;  %v16634_v55 = vpop.permute.xlu0 %16633  ;;  %v16639_v0 = vpop.permute.xlu1 %16638 }
 0x32a   : > { %5746 = vst.msk [vmem:[#allocation0 + $0xb45] ss:$8 sm:$0xf] %vm1398_vm0, %v16616_v40   ;;  %5748 = vst.msk [vmem:[#allocation0 + $0xb45] ss:$8 sm:$0xf0] %vm1398_vm0, %v16616_v40   ;;  %v16917_v21 = vpack.i.bf16 %v7169_v28, %v7156_v48  ;;  %16913 = vrot.lane.b32.xlu0 %v16912_v42, %s16936_s18  ;;  %v16636_v27 = vunpack.i.h.bf16 %v16634_v55  ;;  %v16635_v1 = vunpack.i.l.bf16 %v16634_v55  ;;  %v16641_v63 = vunpack.i.h.bf16 %v16639_v0 }
 0x32b   : > { %5737 = vst.msk [vmem:[#allocation0 + $0xb05] ss:$8 sm:$0xf] %vm1398_vm0, %v16615_v31   ;;  %5739 = vst.msk [vmem:[#allocation0 + $0xb05] ss:$8 sm:$0xf0] %vm1398_vm0, %v16615_v31   ;;  %v16640_v7 = vunpack.i.l.bf16 %v16639_v0 }
 0x32c   : > { %5764 = vst.msk [vmem:[#allocation0 + $0xbc5] ss:$8 sm:$0xf] %vm1398_vm0, %v16621_v35   ;;  %5766 = vst.msk [vmem:[#allocation0 + $0xbc5] ss:$8 sm:$0xf0] %vm1398_vm0, %v16621_v35   ;;  %16918 = vrot.lane.b32.xlu1 %v16917_v21, %s16936_s18 }
 0x32d   : > { %5755 = vst.msk [vmem:[#allocation0 + $0xb85] ss:$8 sm:$0xf] %vm1398_vm0, %v16620_v11   ;;  %5757 = vst.msk [vmem:[#allocation0 + $0xb85] ss:$8 sm:$0xf0] %vm1398_vm0, %v16620_v11   ;;  %v16644_v18 = vpop.permute.xlu0 %16643  ;;  %v16649_v14 = vpop.permute.xlu1 %16648 }
 0x32e   : > { %5782 = vst.msk [vmem:[#allocation0 + $0xc45] ss:$8 sm:$0xf] %vm1398_vm0, %v16626_v52   ;;  %5784 = vst.msk [vmem:[#allocation0 + $0xc45] ss:$8 sm:$0xf0] %vm1398_vm0, %v16626_v52   ;;  %v16646_v20 = vunpack.i.h.bf16 %v16644_v18  ;;  %v16645_v13 = vunpack.i.l.bf16 %v16644_v18  ;;  %v16651_v15 = vunpack.i.h.bf16 %v16649_v14  ;;  %v16650_v56 = vunpack.i.l.bf16 %v16649_v14 }
 0x32f   : > { %5773 = vst.msk [vmem:[#allocation0 + $0xc05] ss:$8 sm:$0xf] %vm1398_vm0, %v16625_v34   ;;  %5775 = vst.msk [vmem:[#allocation0 + $0xc05] ss:$8 sm:$0xf0] %vm1398_vm0, %v16625_v34  }
 0x330   : > { %5800 = vst.msk [vmem:[#allocation0 + $0xcc5] ss:$8 sm:$0xf] %vm1398_vm0, %v16631_v37   ;;  %5802 = vst.msk [vmem:[#allocation0 + $0xcc5] ss:$8 sm:$0xf0] %vm1398_vm0, %v16631_v37  }
 0x331   : > { %5791 = vst.msk [vmem:[#allocation0 + $0xc85] ss:$8 sm:$0xf] %vm1398_vm0, %v16630_v19   ;;  %5793 = vst.msk [vmem:[#allocation0 + $0xc85] ss:$8 sm:$0xf0] %vm1398_vm0, %v16630_v19   ;;  %v16654_v32 = vpop.permute.xlu0 %16653  ;;  %v16659_v50 = vpop.permute.xlu1 %16658 }
 0x332   : > { %5818 = vst.msk [vmem:[#allocation0 + $0xd45] ss:$8 sm:$0xf] %vm1398_vm0, %v16636_v27   ;;  %5820 = vst.msk [vmem:[#allocation0 + $0xd45] ss:$8 sm:$0xf0] %vm1398_vm0, %v16636_v27   ;;  %v16656_v33 = vunpack.i.h.bf16 %v16654_v32  ;;  %v16655_v12 = vunpack.i.l.bf16 %v16654_v32  ;;  %v16661_v51 = vunpack.i.h.bf16 %v16659_v50  ;;  %v16660_v26 = vunpack.i.l.bf16 %v16659_v50 }
 0x333   : > { %5809 = vst.msk [vmem:[#allocation0 + $0xd05] ss:$8 sm:$0xf] %vm1398_vm0, %v16635_v1   ;;  %5811 = vst.msk [vmem:[#allocation0 + $0xd05] ss:$8 sm:$0xf0] %vm1398_vm0, %v16635_v1  }
 0x334   : > { %5836 = vst.msk [vmem:[#allocation0 + $0xdc5] ss:$8 sm:$0xf] %vm1398_vm0, %v16641_v63   ;;  %5838 = vst.msk [vmem:[#allocation0 + $0xdc5] ss:$8 sm:$0xf0] %vm1398_vm0, %v16641_v63  }
 0x335   : > { %5827 = vst.msk [vmem:[#allocation0 + $0xd85] ss:$8 sm:$0xf] %vm1398_vm0, %v16640_v7   ;;  %5829 = vst.msk [vmem:[#allocation0 + $0xd85] ss:$8 sm:$0xf0] %vm1398_vm0, %v16640_v7   ;;  %v16664_v47 = vpop.permute.xlu0 %16663  ;;  %v16669_v3 = vpop.permute.xlu1 %16668 }
 0x336   : > { %5854 = vst.msk [vmem:[#allocation0 + $0xe45] ss:$8 sm:$0xf] %vm1398_vm0, %v16646_v20   ;;  %5856 = vst.msk [vmem:[#allocation0 + $0xe45] ss:$8 sm:$0xf0] %vm1398_vm0, %v16646_v20   ;;  %v16666_v8 = vunpack.i.h.bf16 %v16664_v47  ;;  %v16665_v45 = vunpack.i.l.bf16 %v16664_v47  ;;  %v16671_v16 = vunpack.i.h.bf16 %v16669_v3  ;;  %v16670_v6 = vunpack.i.l.bf16 %v16669_v3 }
 0x337   : > { %5845 = vst.msk [vmem:[#allocation0 + $0xe05] ss:$8 sm:$0xf] %vm1398_vm0, %v16645_v13   ;;  %5847 = vst.msk [vmem:[#allocation0 + $0xe05] ss:$8 sm:$0xf0] %vm1398_vm0, %v16645_v13  }
 0x338   : > { %5872 = vst.msk [vmem:[#allocation0 + $0xec5] ss:$8 sm:$0xf] %vm1398_vm0, %v16651_v15   ;;  %5874 = vst.msk [vmem:[#allocation0 + $0xec5] ss:$8 sm:$0xf0] %vm1398_vm0, %v16651_v15  }
 0x339   : > { %5863 = vst.msk [vmem:[#allocation0 + $0xe85] ss:$8 sm:$0xf] %vm1398_vm0, %v16650_v56   ;;  %5865 = vst.msk [vmem:[#allocation0 + $0xe85] ss:$8 sm:$0xf0] %vm1398_vm0, %v16650_v56   ;;  %v16674_v9 = vpop.permute.xlu0 %16673  ;;  %v16679_v60 = vpop.permute.xlu1 %16678 }
 0x33a   : > { %5890 = vst.msk [vmem:[#allocation0 + $0xf45] ss:$8 sm:$0xf] %vm1398_vm0, %v16656_v33   ;;  %5892 = vst.msk [vmem:[#allocation0 + $0xf45] ss:$8 sm:$0xf0] %vm1398_vm0, %v16656_v33   ;;  %v16676_v23 = vunpack.i.h.bf16 %v16674_v9  ;;  %v16675_v24 = vunpack.i.l.bf16 %v16674_v9  ;;  %v16681_v46 = vunpack.i.h.bf16 %v16679_v60  ;;  %v16680_v62 = vunpack.i.l.bf16 %v16679_v60 }
 0x33b   : > { %5881 = vst.msk [vmem:[#allocation0 + $0xf05] ss:$8 sm:$0xf] %vm1398_vm0, %v16655_v12   ;;  %5883 = vst.msk [vmem:[#allocation0 + $0xf05] ss:$8 sm:$0xf0] %vm1398_vm0, %v16655_v12  }
 0x33c   : > { %5908 = vst.msk [vmem:[#allocation0 + $0xfc5] ss:$8 sm:$0xf] %vm1398_vm0, %v16661_v51   ;;  %5910 = vst.msk [vmem:[#allocation0 + $0xfc5] ss:$8 sm:$0xf0] %vm1398_vm0, %v16661_v51  }
 0x33d   : > { %5899 = vst.msk [vmem:[#allocation0 + $0xf85] ss:$8 sm:$0xf] %vm1398_vm0, %v16660_v26   ;;  %5901 = vst.msk [vmem:[#allocation0 + $0xf85] ss:$8 sm:$0xf0] %vm1398_vm0, %v16660_v26   ;;  %v16684_v2 = vpop.permute.xlu0 %16683  ;;  %v16689_v5 = vpop.permute.xlu1 %16688 }
 0x33e   : > { %5926 = vst.msk [vmem:[#allocation0 + $0x1045] ss:$8 sm:$0xf] %vm1398_vm0, %v16666_v8   ;;  %5928 = vst.msk [vmem:[#allocation0 + $0x1045] ss:$8 sm:$0xf0] %vm1398_vm0, %v16666_v8   ;;  %v16686_v53 = vunpack.i.h.bf16 %v16684_v2  ;;  %v16685_v49 = vunpack.i.l.bf16 %v16684_v2  ;;  %v16691_v17 = vunpack.i.h.bf16 %v16689_v5  ;;  %v16690_v38 = vunpack.i.l.bf16 %v16689_v5 }
 0x33f   : > { %5917 = vst.msk [vmem:[#allocation0 + $0x1005] ss:$8 sm:$0xf] %vm1398_vm0, %v16665_v45   ;;  %5919 = vst.msk [vmem:[#allocation0 + $0x1005] ss:$8 sm:$0xf0] %vm1398_vm0, %v16665_v45  }
 0x340   : > { %5944 = vst.msk [vmem:[#allocation0 + $0x10c5] ss:$8 sm:$0xf] %vm1398_vm0, %v16671_v16   ;;  %5946 = vst.msk [vmem:[#allocation0 + $0x10c5] ss:$8 sm:$0xf0] %vm1398_vm0, %v16671_v16  }
 0x341   : > { %5935 = vst.msk [vmem:[#allocation0 + $0x1085] ss:$8 sm:$0xf] %vm1398_vm0, %v16670_v6   ;;  %5937 = vst.msk [vmem:[#allocation0 + $0x1085] ss:$8 sm:$0xf0] %vm1398_vm0, %v16670_v6   ;;  %v16694_v29 = vpop.permute.xlu0 %16693  ;;  %v16699_v58 = vpop.permute.xlu1 %16698 }
 0x342   : > { %5962 = vst.msk [vmem:[#allocation0 + $0x1145] ss:$8 sm:$0xf] %vm1398_vm0, %v16676_v23   ;;  %5964 = vst.msk [vmem:[#allocation0 + $0x1145] ss:$8 sm:$0xf0] %vm1398_vm0, %v16676_v23   ;;  %v16696_v41 = vunpack.i.h.bf16 %v16694_v29  ;;  %v16695_v4 = vunpack.i.l.bf16 %v16694_v29  ;;  %v16701_v10 = vunpack.i.h.bf16 %v16699_v58  ;;  %v16700_v44 = vunpack.i.l.bf16 %v16699_v58 }
 0x343   : > { %5953 = vst.msk [vmem:[#allocation0 + $0x1105] ss:$8 sm:$0xf] %vm1398_vm0, %v16675_v24   ;;  %5955 = vst.msk [vmem:[#allocation0 + $0x1105] ss:$8 sm:$0xf0] %vm1398_vm0, %v16675_v24  }
 0x344   : > { %5980 = vst.msk [vmem:[#allocation0 + $0x11c5] ss:$8 sm:$0xf] %vm1398_vm0, %v16681_v46   ;;  %5982 = vst.msk [vmem:[#allocation0 + $0x11c5] ss:$8 sm:$0xf0] %vm1398_vm0, %v16681_v46  }
 0x345   : > { %5971 = vst.msk [vmem:[#allocation0 + $0x1185] ss:$8 sm:$0xf] %vm1398_vm0, %v16680_v62   ;;  %5973 = vst.msk [vmem:[#allocation0 + $0x1185] ss:$8 sm:$0xf0] %vm1398_vm0, %v16680_v62   ;;  %v16704_v57 = vpop.permute.xlu0 %16703  ;;  %v16709_v43 = vpop.permute.xlu1 %16708 }
 0x346   : > { %5998 = vst.msk [vmem:[#allocation0 + $0x1245] ss:$8 sm:$0xf] %vm1398_vm0, %v16686_v53   ;;  %6000 = vst.msk [vmem:[#allocation0 + $0x1245] ss:$8 sm:$0xf0] %vm1398_vm0, %v16686_v53   ;;  %v16706_v61 = vunpack.i.h.bf16 %v16704_v57  ;;  %v16705_v30 = vunpack.i.l.bf16 %v16704_v57  ;;  %v16711_v39 = vunpack.i.h.bf16 %v16709_v43  ;;  %v16710_v25 = vunpack.i.l.bf16 %v16709_v43 }
 0x347   : > { %5989 = vst.msk [vmem:[#allocation0 + $0x1205] ss:$8 sm:$0xf] %vm1398_vm0, %v16685_v49   ;;  %5991 = vst.msk [vmem:[#allocation0 + $0x1205] ss:$8 sm:$0xf0] %vm1398_vm0, %v16685_v49  }
 0x348   : > { %6016 = vst.msk [vmem:[#allocation0 + $0x12c5] ss:$8 sm:$0xf] %vm1398_vm0, %v16691_v17   ;;  %6018 = vst.msk [vmem:[#allocation0 + $0x12c5] ss:$8 sm:$0xf0] %vm1398_vm0, %v16691_v17  }
 0x349   : > { %6007 = vst.msk [vmem:[#allocation0 + $0x1285] ss:$8 sm:$0xf] %vm1398_vm0, %v16690_v38   ;;  %6009 = vst.msk [vmem:[#allocation0 + $0x1285] ss:$8 sm:$0xf0] %vm1398_vm0, %v16690_v38   ;;  %v16714_v59 = vpop.permute.xlu0 %16713  ;;  %v16719_v40 = vpop.permute.xlu1 %16718 }
 0x34a   : > { %6034 = vst.msk [vmem:[#allocation0 + $0x1345] ss:$8 sm:$0xf] %vm1398_vm0, %v16696_v41   ;;  %6036 = vst.msk [vmem:[#allocation0 + $0x1345] ss:$8 sm:$0xf0] %vm1398_vm0, %v16696_v41   ;;  %v16716_v48 = vunpack.i.h.bf16 %v16714_v59  ;;  %v16715_v28 = vunpack.i.l.bf16 %v16714_v59  ;;  %v16721_v31 = vunpack.i.h.bf16 %v16719_v40  ;;  %v16720_v54 = vunpack.i.l.bf16 %v16719_v40 }
 0x34b   : > { %6025 = vst.msk [vmem:[#allocation0 + $0x1305] ss:$8 sm:$0xf] %vm1398_vm0, %v16695_v4   ;;  %6027 = vst.msk [vmem:[#allocation0 + $0x1305] ss:$8 sm:$0xf0] %vm1398_vm0, %v16695_v4  }
 0x34c   : > { %6052 = vst.msk [vmem:[#allocation0 + $0x13c5] ss:$8 sm:$0xf] %vm1398_vm0, %v16701_v10   ;;  %6054 = vst.msk [vmem:[#allocation0 + $0x13c5] ss:$8 sm:$0xf0] %vm1398_vm0, %v16701_v10  }
 0x34d   : > { %6043 = vst.msk [vmem:[#allocation0 + $0x1385] ss:$8 sm:$0xf] %vm1398_vm0, %v16700_v44   ;;  %6045 = vst.msk [vmem:[#allocation0 + $0x1385] ss:$8 sm:$0xf0] %vm1398_vm0, %v16700_v44   ;;  %v16724_v35 = vpop.permute.xlu0 %16723  ;;  %v16729_v21 = vpop.permute.xlu1 %16728 }
 0x34e   : > { %6070 = vst.msk [vmem:[#allocation0 + $0x1445] ss:$8 sm:$0xf] %vm1398_vm0, %v16706_v61   ;;  %6072 = vst.msk [vmem:[#allocation0 + $0x1445] ss:$8 sm:$0xf0] %vm1398_vm0, %v16706_v61   ;;  %v16726_v11 = vunpack.i.h.bf16 %v16724_v35  ;;  %v16725_v42 = vunpack.i.l.bf16 %v16724_v35  ;;  %v16731_v22 = vunpack.i.h.bf16 %v16729_v21  ;;  %v16730_v52 = vunpack.i.l.bf16 %v16729_v21 }
 0x34f   : > { %6061 = vst.msk [vmem:[#allocation0 + $0x1405] ss:$8 sm:$0xf] %vm1398_vm0, %v16705_v30   ;;  %6063 = vst.msk [vmem:[#allocation0 + $0x1405] ss:$8 sm:$0xf0] %vm1398_vm0, %v16705_v30  }
 0x350   : > { %6088 = vst.msk [vmem:[#allocation0 + $0x14c5] ss:$8 sm:$0xf] %vm1398_vm0, %v16711_v39   ;;  %6090 = vst.msk [vmem:[#allocation0 + $0x14c5] ss:$8 sm:$0xf0] %vm1398_vm0, %v16711_v39  }
 0x351   : > { %6079 = vst.msk [vmem:[#allocation0 + $0x1485] ss:$8 sm:$0xf] %vm1398_vm0, %v16710_v25   ;;  %6081 = vst.msk [vmem:[#allocation0 + $0x1485] ss:$8 sm:$0xf0] %vm1398_vm0, %v16710_v25   ;;  %v16734_v34 = vpop.permute.xlu0 %16733  ;;  %v16739_v19 = vpop.permute.xlu1 %16738 }
 0x352   : > { %6109 = vst.msk [vmem:[#allocation0 + $0x86] ss:$16 sm:$0x3] %vm1398_vm0, %v16716_v48   ;;  %6111 = vst.msk [vmem:[#allocation0 + $0x86] ss:$16 sm:$0xc] %vm1398_vm0, %v16716_v48   ;;  %v16736_v36 = vunpack.i.h.bf16 %v16734_v34  ;;  %v16735_v37 = vunpack.i.l.bf16 %v16734_v34  ;;  %v16741_v55 = vunpack.i.h.bf16 %v16739_v19  ;;  %v16740_v27 = vunpack.i.l.bf16 %v16739_v19 }
 0x353   : > { %6113 = vst.msk [vmem:[#allocation0 + $0x86] ss:$16 sm:$0x30] %vm1398_vm0, %v16716_v48   ;;  %6115 = vst.msk [vmem:[#allocation0 + $0x86] ss:$16 sm:$0xc0] %vm1398_vm0, %v16716_v48  }
 0x354   : > { %6096 = vst.msk [vmem:[#allocation0 + $0x6] ss:$16 sm:$0x3] %vm1398_vm0, %v16715_v28   ;;  %6098 = vst.msk [vmem:[#allocation0 + $0x6] ss:$16 sm:$0xc] %vm1398_vm0, %v16715_v28  }
 0x355   : > { %6100 = vst.msk [vmem:[#allocation0 + $0x6] ss:$16 sm:$0x30] %vm1398_vm0, %v16715_v28   ;;  %6102 = vst.msk [vmem:[#allocation0 + $0x6] ss:$16 sm:$0xc0] %vm1398_vm0, %v16715_v28   ;;  %v16744_v1 = vpop.permute.xlu0 %16743  ;;  %v16749_v7 = vpop.permute.xlu1 %16748 }
 0x356   : > { %6135 = vst.msk [vmem:[#allocation0 + $0x186] ss:$16 sm:$0x3] %vm1398_vm0, %v16721_v31   ;;  %6137 = vst.msk [vmem:[#allocation0 + $0x186] ss:$16 sm:$0xc] %vm1398_vm0, %v16721_v31   ;;  %v16746_v0 = vunpack.i.h.bf16 %v16744_v1  ;;  %v16745_v63 = vunpack.i.l.bf16 %v16744_v1  ;;  %v16751_v18 = vunpack.i.h.bf16 %v16749_v7  ;;  %v16750_v20 = vunpack.i.l.bf16 %v16749_v7 }
 0x357   : > { %6139 = vst.msk [vmem:[#allocation0 + $0x186] ss:$16 sm:$0x30] %vm1398_vm0, %v16721_v31   ;;  %6141 = vst.msk [vmem:[#allocation0 + $0x186] ss:$16 sm:$0xc0] %vm1398_vm0, %v16721_v31  }
 0x358   : > { %6122 = vst.msk [vmem:[#allocation0 + $0x106] ss:$16 sm:$0x3] %vm1398_vm0, %v16720_v54   ;;  %6124 = vst.msk [vmem:[#allocation0 + $0x106] ss:$16 sm:$0xc] %vm1398_vm0, %v16720_v54  }
 0x359   : > { %6126 = vst.msk [vmem:[#allocation0 + $0x106] ss:$16 sm:$0x30] %vm1398_vm0, %v16720_v54   ;;  %6128 = vst.msk [vmem:[#allocation0 + $0x106] ss:$16 sm:$0xc0] %vm1398_vm0, %v16720_v54   ;;  %v16754_v13 = vpop.permute.xlu0 %16753  ;;  %v16759_v56 = vpop.permute.xlu1 %16758 }
 0x35a   : > { %6161 = vst.msk [vmem:[#allocation0 + $0x286] ss:$16 sm:$0x3] %vm1398_vm0, %v16726_v11   ;;  %6163 = vst.msk [vmem:[#allocation0 + $0x286] ss:$16 sm:$0xc] %vm1398_vm0, %v16726_v11   ;;  %v16756_v14 = vunpack.i.h.bf16 %v16754_v13  ;;  %v16755_v15 = vunpack.i.l.bf16 %v16754_v13  ;;  %v16761_v32 = vunpack.i.h.bf16 %v16759_v56  ;;  %v16760_v33 = vunpack.i.l.bf16 %v16759_v56 }
 0x35b   : > { %6165 = vst.msk [vmem:[#allocation0 + $0x286] ss:$16 sm:$0x30] %vm1398_vm0, %v16726_v11   ;;  %6167 = vst.msk [vmem:[#allocation0 + $0x286] ss:$16 sm:$0xc0] %vm1398_vm0, %v16726_v11  }
 0x35c   : > { %6148 = vst.msk [vmem:[#allocation0 + $0x206] ss:$16 sm:$0x3] %vm1398_vm0, %v16725_v42   ;;  %6150 = vst.msk [vmem:[#allocation0 + $0x206] ss:$16 sm:$0xc] %vm1398_vm0, %v16725_v42  }
 0x35d   : > { %6152 = vst.msk [vmem:[#allocation0 + $0x206] ss:$16 sm:$0x30] %vm1398_vm0, %v16725_v42   ;;  %6154 = vst.msk [vmem:[#allocation0 + $0x206] ss:$16 sm:$0xc0] %vm1398_vm0, %v16725_v42   ;;  %v16764_v12 = vpop.permute.xlu0 %16763 }
 0x35e   : > { %6187 = vst.msk [vmem:[#allocation0 + $0x386] ss:$16 sm:$0x3] %vm1398_vm0, %v16731_v22   ;;  %6189 = vst.msk [vmem:[#allocation0 + $0x386] ss:$16 sm:$0xc] %vm1398_vm0, %v16731_v22   ;;  %v16766_v50 = vunpack.i.h.bf16 %v16764_v12  ;;  %v16765_v51 = vunpack.i.l.bf16 %v16764_v12  ;;  %v16769_v26 = vpop.permute.xlu1 %16768 }
 0x35f   : > { %6191 = vst.msk [vmem:[#allocation0 + $0x386] ss:$16 sm:$0x30] %vm1398_vm0, %v16731_v22   ;;  %6193 = vst.msk [vmem:[#allocation0 + $0x386] ss:$16 sm:$0xc0] %vm1398_vm0, %v16731_v22   ;;  %v16771_v47 = vunpack.i.h.bf16 %v16769_v26  ;;  %v16770_v8 = vunpack.i.l.bf16 %v16769_v26 }
 0x360   : > { %6174 = vst.msk [vmem:[#allocation0 + $0x306] ss:$16 sm:$0x3] %vm1398_vm0, %v16730_v52   ;;  %6176 = vst.msk [vmem:[#allocation0 + $0x306] ss:$16 sm:$0xc] %vm1398_vm0, %v16730_v52  }
 0x361   : > { %6178 = vst.msk [vmem:[#allocation0 + $0x306] ss:$16 sm:$0x30] %vm1398_vm0, %v16730_v52   ;;  %6180 = vst.msk [vmem:[#allocation0 + $0x306] ss:$16 sm:$0xc0] %vm1398_vm0, %v16730_v52   ;;  %v16774_v45 = vpop.permute.xlu0 %16773 }
 0x362   : > { %6213 = vst.msk [vmem:[#allocation0 + $0x486] ss:$16 sm:$0x3] %vm1398_vm0, %v16736_v36   ;;  %6215 = vst.msk [vmem:[#allocation0 + $0x486] ss:$16 sm:$0xc] %vm1398_vm0, %v16736_v36   ;;  %v16776_v3 = vunpack.i.h.bf16 %v16774_v45  ;;  %v16775_v16 = vunpack.i.l.bf16 %v16774_v45 }
 0x363   : > { %6217 = vst.msk [vmem:[#allocation0 + $0x486] ss:$16 sm:$0x30] %vm1398_vm0, %v16736_v36   ;;  %6219 = vst.msk [vmem:[#allocation0 + $0x486] ss:$16 sm:$0xc0] %vm1398_vm0, %v16736_v36   ;;  %v16779_v6 = vpop.permute.xlu1 %16778 }
 0x364   : > { %6200 = vst.msk [vmem:[#allocation0 + $0x406] ss:$16 sm:$0x3] %vm1398_vm0, %v16735_v37   ;;  %6202 = vst.msk [vmem:[#allocation0 + $0x406] ss:$16 sm:$0xc] %vm1398_vm0, %v16735_v37   ;;  %v16781_v9 = vunpack.i.h.bf16 %v16779_v6  ;;  %v16780_v23 = vunpack.i.l.bf16 %v16779_v6 }
 0x365   : > { %6204 = vst.msk [vmem:[#allocation0 + $0x406] ss:$16 sm:$0x30] %vm1398_vm0, %v16735_v37   ;;  %6206 = vst.msk [vmem:[#allocation0 + $0x406] ss:$16 sm:$0xc0] %vm1398_vm0, %v16735_v37   ;;  %v16784_v24 = vpop.permute.xlu0 %16783 }
 0x366   : > { %6239 = vst.msk [vmem:[#allocation0 + $0x586] ss:$16 sm:$0x3] %vm1398_vm0, %v16741_v55   ;;  %6241 = vst.msk [vmem:[#allocation0 + $0x586] ss:$16 sm:$0xc] %vm1398_vm0, %v16741_v55   ;;  %v16786_v60 = vunpack.i.h.bf16 %v16784_v24  ;;  %v16785_v46 = vunpack.i.l.bf16 %v16784_v24 }
 0x367   : > { %6243 = vst.msk [vmem:[#allocation0 + $0x586] ss:$16 sm:$0x30] %vm1398_vm0, %v16741_v55   ;;  %6245 = vst.msk [vmem:[#allocation0 + $0x586] ss:$16 sm:$0xc0] %vm1398_vm0, %v16741_v55   ;;  %v16789_v62 = vpop.permute.xlu1 %16788 }
 0x368   : > { %6226 = vst.msk [vmem:[#allocation0 + $0x506] ss:$16 sm:$0x3] %vm1398_vm0, %v16740_v27   ;;  %6228 = vst.msk [vmem:[#allocation0 + $0x506] ss:$16 sm:$0xc] %vm1398_vm0, %v16740_v27   ;;  %v16791_v2 = vunpack.i.h.bf16 %v16789_v62  ;;  %v16790_v53 = vunpack.i.l.bf16 %v16789_v62 }
 0x369   : > { %6230 = vst.msk [vmem:[#allocation0 + $0x506] ss:$16 sm:$0x30] %vm1398_vm0, %v16740_v27   ;;  %6232 = vst.msk [vmem:[#allocation0 + $0x506] ss:$16 sm:$0xc0] %vm1398_vm0, %v16740_v27   ;;  %v16794_v49 = vpop.permute.xlu0 %16793 }
 0x36a   : > { %6265 = vst.msk [vmem:[#allocation0 + $0x686] ss:$16 sm:$0x3] %vm1398_vm0, %v16746_v0   ;;  %6267 = vst.msk [vmem:[#allocation0 + $0x686] ss:$16 sm:$0xc] %vm1398_vm0, %v16746_v0   ;;  %v16796_v5 = vunpack.i.h.bf16 %v16794_v49  ;;  %v16795_v17 = vunpack.i.l.bf16 %v16794_v49 }
 0x36b   : > { %6269 = vst.msk [vmem:[#allocation0 + $0x686] ss:$16 sm:$0x30] %vm1398_vm0, %v16746_v0   ;;  %6271 = vst.msk [vmem:[#allocation0 + $0x686] ss:$16 sm:$0xc0] %vm1398_vm0, %v16746_v0   ;;  %v16799_v38 = vpop.permute.xlu1 %16798 }
 0x36c   : > { %6252 = vst.msk [vmem:[#allocation0 + $0x606] ss:$16 sm:$0x3] %vm1398_vm0, %v16745_v63   ;;  %6254 = vst.msk [vmem:[#allocation0 + $0x606] ss:$16 sm:$0xc] %vm1398_vm0, %v16745_v63   ;;  %v16801_v29 = vunpack.i.h.bf16 %v16799_v38  ;;  %v16800_v41 = vunpack.i.l.bf16 %v16799_v38 }
 0x36d   : > { %6256 = vst.msk [vmem:[#allocation0 + $0x606] ss:$16 sm:$0x30] %vm1398_vm0, %v16745_v63   ;;  %6258 = vst.msk [vmem:[#allocation0 + $0x606] ss:$16 sm:$0xc0] %vm1398_vm0, %v16745_v63   ;;  %v16804_v4 = vpop.permute.xlu0 %16803 }
 0x36e   : > { %6291 = vst.msk [vmem:[#allocation0 + $0x786] ss:$16 sm:$0x3] %vm1398_vm0, %v16751_v18   ;;  %6293 = vst.msk [vmem:[#allocation0 + $0x786] ss:$16 sm:$0xc] %vm1398_vm0, %v16751_v18   ;;  %v16806_v58 = vunpack.i.h.bf16 %v16804_v4  ;;  %v16805_v10 = vunpack.i.l.bf16 %v16804_v4 }
 0x36f   : > { %6295 = vst.msk [vmem:[#allocation0 + $0x786] ss:$16 sm:$0x30] %vm1398_vm0, %v16751_v18   ;;  %6297 = vst.msk [vmem:[#allocation0 + $0x786] ss:$16 sm:$0xc0] %vm1398_vm0, %v16751_v18   ;;  %v16809_v44 = vpop.permute.xlu1 %16808 }
 0x370   : > { %6278 = vst.msk [vmem:[#allocation0 + $0x706] ss:$16 sm:$0x3] %vm1398_vm0, %v16750_v20   ;;  %6280 = vst.msk [vmem:[#allocation0 + $0x706] ss:$16 sm:$0xc] %vm1398_vm0, %v16750_v20   ;;  %v16811_v57 = vunpack.i.h.bf16 %v16809_v44  ;;  %v16810_v61 = vunpack.i.l.bf16 %v16809_v44 }
 0x371   : > { %6282 = vst.msk [vmem:[#allocation0 + $0x706] ss:$16 sm:$0x30] %vm1398_vm0, %v16750_v20   ;;  %6284 = vst.msk [vmem:[#allocation0 + $0x706] ss:$16 sm:$0xc0] %vm1398_vm0, %v16750_v20   ;;  %v16814_v30 = vpop.permute.xlu0 %16813 }
 0x372   : > { %6317 = vst.msk [vmem:[#allocation0 + $0x886] ss:$16 sm:$0x3] %vm1398_vm0, %v16756_v14   ;;  %6319 = vst.msk [vmem:[#allocation0 + $0x886] ss:$16 sm:$0xc] %vm1398_vm0, %v16756_v14   ;;  %v16816_v43 = vunpack.i.h.bf16 %v16814_v30  ;;  %v16815_v39 = vunpack.i.l.bf16 %v16814_v30 }
 0x373   : > { %6321 = vst.msk [vmem:[#allocation0 + $0x886] ss:$16 sm:$0x30] %vm1398_vm0, %v16756_v14   ;;  %6323 = vst.msk [vmem:[#allocation0 + $0x886] ss:$16 sm:$0xc0] %vm1398_vm0, %v16756_v14   ;;  %v16819_v25 = vpop.permute.xlu1 %16818 }
 0x374   : > { %6304 = vst.msk [vmem:[#allocation0 + $0x806] ss:$16 sm:$0x3] %vm1398_vm0, %v16755_v15   ;;  %6306 = vst.msk [vmem:[#allocation0 + $0x806] ss:$16 sm:$0xc] %vm1398_vm0, %v16755_v15   ;;  %v16821_v59 = vunpack.i.h.bf16 %v16819_v25  ;;  %v16820_v48 = vunpack.i.l.bf16 %v16819_v25 }
 0x375   : > { %6308 = vst.msk [vmem:[#allocation0 + $0x806] ss:$16 sm:$0x30] %vm1398_vm0, %v16755_v15   ;;  %6310 = vst.msk [vmem:[#allocation0 + $0x806] ss:$16 sm:$0xc0] %vm1398_vm0, %v16755_v15   ;;  %v16824_v28 = vpop.permute.xlu0 %16823 }
 0x376   : > { %6343 = vst.msk [vmem:[#allocation0 + $0x986] ss:$16 sm:$0x3] %vm1398_vm0, %v16761_v32   ;;  %6345 = vst.msk [vmem:[#allocation0 + $0x986] ss:$16 sm:$0xc] %vm1398_vm0, %v16761_v32   ;;  %v16826_v40 = vunpack.i.h.bf16 %v16824_v28  ;;  %v16825_v31 = vunpack.i.l.bf16 %v16824_v28 }
 0x377   : > { %6347 = vst.msk [vmem:[#allocation0 + $0x986] ss:$16 sm:$0x30] %vm1398_vm0, %v16761_v32   ;;  %6349 = vst.msk [vmem:[#allocation0 + $0x986] ss:$16 sm:$0xc0] %vm1398_vm0, %v16761_v32   ;;  %v16829_v54 = vpop.permute.xlu1 %16828 }
 0x378   : > { %6330 = vst.msk [vmem:[#allocation0 + $0x906] ss:$16 sm:$0x3] %vm1398_vm0, %v16760_v33   ;;  %6332 = vst.msk [vmem:[#allocation0 + $0x906] ss:$16 sm:$0xc] %vm1398_vm0, %v16760_v33   ;;  %v16831_v35 = vunpack.i.h.bf16 %v16829_v54  ;;  %v16830_v11 = vunpack.i.l.bf16 %v16829_v54 }
 0x379   : > { %6334 = vst.msk [vmem:[#allocation0 + $0x906] ss:$16 sm:$0x30] %vm1398_vm0, %v16760_v33   ;;  %6336 = vst.msk [vmem:[#allocation0 + $0x906] ss:$16 sm:$0xc0] %vm1398_vm0, %v16760_v33   ;;  %v16834_v42 = vpop.permute.xlu0 %16833 }
 0x37a   : > { %6369 = vst.msk [vmem:[#allocation0 + $0xa86] ss:$16 sm:$0x3] %vm1398_vm0, %v16766_v50   ;;  %6371 = vst.msk [vmem:[#allocation0 + $0xa86] ss:$16 sm:$0xc] %vm1398_vm0, %v16766_v50   ;;  %v16836_v34 = vunpack.i.h.bf16 %v16834_v42  ;;  %v16835_v36 = vunpack.i.l.bf16 %v16834_v42 }
 0x37b   : > { %6373 = vst.msk [vmem:[#allocation0 + $0xa86] ss:$16 sm:$0x30] %vm1398_vm0, %v16766_v50   ;;  %6375 = vst.msk [vmem:[#allocation0 + $0xa86] ss:$16 sm:$0xc0] %vm1398_vm0, %v16766_v50   ;;  %v16839_v37 = vpop.permute.xlu1 %16838 }
 0x37c   : > { %6356 = vst.msk [vmem:[#allocation0 + $0xa06] ss:$16 sm:$0x3] %vm1398_vm0, %v16765_v51   ;;  %6358 = vst.msk [vmem:[#allocation0 + $0xa06] ss:$16 sm:$0xc] %vm1398_vm0, %v16765_v51   ;;  %v16841_v1 = vunpack.i.h.bf16 %v16839_v37  ;;  %v16840_v0 = vunpack.i.l.bf16 %v16839_v37 }
 0x37d   : > { %6360 = vst.msk [vmem:[#allocation0 + $0xa06] ss:$16 sm:$0x30] %vm1398_vm0, %v16765_v51   ;;  %6362 = vst.msk [vmem:[#allocation0 + $0xa06] ss:$16 sm:$0xc0] %vm1398_vm0, %v16765_v51  }
 0x37e   : > { %6395 = vst.msk [vmem:[#allocation0 + $0xb86] ss:$16 sm:$0x3] %vm1398_vm0, %v16771_v47   ;;  %6397 = vst.msk [vmem:[#allocation0 + $0xb86] ss:$16 sm:$0xc] %vm1398_vm0, %v16771_v47  }
 0x37f   : > { %6399 = vst.msk [vmem:[#allocation0 + $0xb86] ss:$16 sm:$0x30] %vm1398_vm0, %v16771_v47   ;;  %6401 = vst.msk [vmem:[#allocation0 + $0xb86] ss:$16 sm:$0xc0] %vm1398_vm0, %v16771_v47  }
 0x380   : > { %6382 = vst.msk [vmem:[#allocation0 + $0xb06] ss:$16 sm:$0x3] %vm1398_vm0, %v16770_v8   ;;  %6384 = vst.msk [vmem:[#allocation0 + $0xb06] ss:$16 sm:$0xc] %vm1398_vm0, %v16770_v8  }
 0x381   : > { %6386 = vst.msk [vmem:[#allocation0 + $0xb06] ss:$16 sm:$0x30] %vm1398_vm0, %v16770_v8   ;;  %6388 = vst.msk [vmem:[#allocation0 + $0xb06] ss:$16 sm:$0xc0] %vm1398_vm0, %v16770_v8   ;;  %v16844_v8 = vpop.permute.xlu0 %16843 }
 0x382   : > { %6421 = vst.msk [vmem:[#allocation0 + $0xc86] ss:$16 sm:$0x3] %vm1398_vm0, %v16776_v3   ;;  %6423 = vst.msk [vmem:[#allocation0 + $0xc86] ss:$16 sm:$0xc] %vm1398_vm0, %v16776_v3   ;;  %v16846_v62 = vunpack.i.h.bf16 %v16844_v8 }
 0x383   : > { %6425 = vst.msk [vmem:[#allocation0 + $0xc86] ss:$16 sm:$0x30] %vm1398_vm0, %v16776_v3   ;;  %6427 = vst.msk [vmem:[#allocation0 + $0xc86] ss:$16 sm:$0xc0] %vm1398_vm0, %v16776_v3  }
 0x384   : > { %6408 = vst.msk [vmem:[#allocation0 + $0xc06] ss:$16 sm:$0x3] %vm1398_vm0, %v16775_v16   ;;  %6410 = vst.msk [vmem:[#allocation0 + $0xc06] ss:$16 sm:$0xc] %vm1398_vm0, %v16775_v16  }
 0x385   : > { %6412 = vst.msk [vmem:[#allocation0 + $0xc06] ss:$16 sm:$0x30] %vm1398_vm0, %v16775_v16   ;;  %6414 = vst.msk [vmem:[#allocation0 + $0xc06] ss:$16 sm:$0xc0] %vm1398_vm0, %v16775_v16  }
 0x386   : > { %6447 = vst.msk [vmem:[#allocation0 + $0xd86] ss:$16 sm:$0x3] %vm1398_vm0, %v16781_v9   ;;  %6449 = vst.msk [vmem:[#allocation0 + $0xd86] ss:$16 sm:$0xc] %vm1398_vm0, %v16781_v9  }
 0x387   : > { %6451 = vst.msk [vmem:[#allocation0 + $0xd86] ss:$16 sm:$0x30] %vm1398_vm0, %v16781_v9   ;;  %6453 = vst.msk [vmem:[#allocation0 + $0xd86] ss:$16 sm:$0xc0] %vm1398_vm0, %v16781_v9  }
 0x388   : > { %6434 = vst.msk [vmem:[#allocation0 + $0xd06] ss:$16 sm:$0x3] %vm1398_vm0, %v16780_v23   ;;  %6436 = vst.msk [vmem:[#allocation0 + $0xd06] ss:$16 sm:$0xc] %vm1398_vm0, %v16780_v23  }
 0x389   : > { %6438 = vst.msk [vmem:[#allocation0 + $0xd06] ss:$16 sm:$0x30] %vm1398_vm0, %v16780_v23   ;;  %6440 = vst.msk [vmem:[#allocation0 + $0xd06] ss:$16 sm:$0xc0] %vm1398_vm0, %v16780_v23  }
 0x38a   : > { %6473 = vst.msk [vmem:[#allocation0 + $0xe86] ss:$16 sm:$0x3] %vm1398_vm0, %v16786_v60   ;;  %6475 = vst.msk [vmem:[#allocation0 + $0xe86] ss:$16 sm:$0xc] %vm1398_vm0, %v16786_v60  }
 0x38b   : > { %6477 = vst.msk [vmem:[#allocation0 + $0xe86] ss:$16 sm:$0x30] %vm1398_vm0, %v16786_v60   ;;  %6479 = vst.msk [vmem:[#allocation0 + $0xe86] ss:$16 sm:$0xc0] %vm1398_vm0, %v16786_v60  }
 0x38c   : > { %6460 = vst.msk [vmem:[#allocation0 + $0xe06] ss:$16 sm:$0x3] %vm1398_vm0, %v16785_v46   ;;  %6462 = vst.msk [vmem:[#allocation0 + $0xe06] ss:$16 sm:$0xc] %vm1398_vm0, %v16785_v46  }
 0x38d   : > { %6464 = vst.msk [vmem:[#allocation0 + $0xe06] ss:$16 sm:$0x30] %vm1398_vm0, %v16785_v46   ;;  %6466 = vst.msk [vmem:[#allocation0 + $0xe06] ss:$16 sm:$0xc0] %vm1398_vm0, %v16785_v46  }
 0x38e   : > { %6499 = vst.msk [vmem:[#allocation0 + $0xf86] ss:$16 sm:$0x3] %vm1398_vm0, %v16791_v2   ;;  %6501 = vst.msk [vmem:[#allocation0 + $0xf86] ss:$16 sm:$0xc] %vm1398_vm0, %v16791_v2  }
 0x38f   : > { %6503 = vst.msk [vmem:[#allocation0 + $0xf86] ss:$16 sm:$0x30] %vm1398_vm0, %v16791_v2   ;;  %6505 = vst.msk [vmem:[#allocation0 + $0xf86] ss:$16 sm:$0xc0] %vm1398_vm0, %v16791_v2   ;;  %v16849_v2 = vpop.permute.xlu1 %16848 }
 0x390   : > { %6486 = vst.msk [vmem:[#allocation0 + $0xf06] ss:$16 sm:$0x3] %vm1398_vm0, %v16790_v53   ;;  %6488 = vst.msk [vmem:[#allocation0 + $0xf06] ss:$16 sm:$0xc] %vm1398_vm0, %v16790_v53   ;;  %v16851_v28 = vunpack.i.h.bf16 %v16849_v2 }
 0x391   : > { %6490 = vst.msk [vmem:[#allocation0 + $0xf06] ss:$16 sm:$0x30] %vm1398_vm0, %v16790_v53   ;;  %6492 = vst.msk [vmem:[#allocation0 + $0xf06] ss:$16 sm:$0xc0] %vm1398_vm0, %v16790_v53  }
 0x392   : > { %6525 = vst.msk [vmem:[#allocation0 + $0x1086] ss:$16 sm:$0x3] %vm1398_vm0, %v16796_v5   ;;  %6527 = vst.msk [vmem:[#allocation0 + $0x1086] ss:$16 sm:$0xc] %vm1398_vm0, %v16796_v5  }
 0x393   : > { %6529 = vst.msk [vmem:[#allocation0 + $0x1086] ss:$16 sm:$0x30] %vm1398_vm0, %v16796_v5   ;;  %6531 = vst.msk [vmem:[#allocation0 + $0x1086] ss:$16 sm:$0xc0] %vm1398_vm0, %v16796_v5  }
 0x394   : > { %6512 = vst.msk [vmem:[#allocation0 + $0x1006] ss:$16 sm:$0x3] %vm1398_vm0, %v16795_v17   ;;  %6514 = vst.msk [vmem:[#allocation0 + $0x1006] ss:$16 sm:$0xc] %vm1398_vm0, %v16795_v17  }
 0x395   : > { %6516 = vst.msk [vmem:[#allocation0 + $0x1006] ss:$16 sm:$0x30] %vm1398_vm0, %v16795_v17   ;;  %6518 = vst.msk [vmem:[#allocation0 + $0x1006] ss:$16 sm:$0xc0] %vm1398_vm0, %v16795_v17  }
 0x396   : > { %6551 = vst.msk [vmem:[#allocation0 + $0x1186] ss:$16 sm:$0x3] %vm1398_vm0, %v16801_v29   ;;  %6553 = vst.msk [vmem:[#allocation0 + $0x1186] ss:$16 sm:$0xc] %vm1398_vm0, %v16801_v29  }
 0x397   : > { %6555 = vst.msk [vmem:[#allocation0 + $0x1186] ss:$16 sm:$0x30] %vm1398_vm0, %v16801_v29   ;;  %6557 = vst.msk [vmem:[#allocation0 + $0x1186] ss:$16 sm:$0xc0] %vm1398_vm0, %v16801_v29  }
 0x398   : > { %6538 = vst.msk [vmem:[#allocation0 + $0x1106] ss:$16 sm:$0x3] %vm1398_vm0, %v16800_v41   ;;  %6540 = vst.msk [vmem:[#allocation0 + $0x1106] ss:$16 sm:$0xc] %vm1398_vm0, %v16800_v41  }
 0x399   : > { %6542 = vst.msk [vmem:[#allocation0 + $0x1106] ss:$16 sm:$0x30] %vm1398_vm0, %v16800_v41   ;;  %6544 = vst.msk [vmem:[#allocation0 + $0x1106] ss:$16 sm:$0xc0] %vm1398_vm0, %v16800_v41  }
 0x39a   : > { %6577 = vst.msk [vmem:[#allocation0 + $0x1286] ss:$16 sm:$0x3] %vm1398_vm0, %v16806_v58   ;;  %6579 = vst.msk [vmem:[#allocation0 + $0x1286] ss:$16 sm:$0xc] %vm1398_vm0, %v16806_v58  }
 0x39b   : > { %6581 = vst.msk [vmem:[#allocation0 + $0x1286] ss:$16 sm:$0x30] %vm1398_vm0, %v16806_v58   ;;  %6583 = vst.msk [vmem:[#allocation0 + $0x1286] ss:$16 sm:$0xc0] %vm1398_vm0, %v16806_v58  }
 0x39c   : > { %6564 = vst.msk [vmem:[#allocation0 + $0x1206] ss:$16 sm:$0x3] %vm1398_vm0, %v16805_v10   ;;  %6566 = vst.msk [vmem:[#allocation0 + $0x1206] ss:$16 sm:$0xc] %vm1398_vm0, %v16805_v10  }
 0x39d   : > { %6568 = vst.msk [vmem:[#allocation0 + $0x1206] ss:$16 sm:$0x30] %vm1398_vm0, %v16805_v10   ;;  %6570 = vst.msk [vmem:[#allocation0 + $0x1206] ss:$16 sm:$0xc0] %vm1398_vm0, %v16805_v10   ;;  %v16845_v10 = vunpack.i.l.bf16 %v16844_v8 }
 0x39e   : > { %6603 = vst.msk [vmem:[#allocation0 + $0x1386] ss:$16 sm:$0x3] %vm1398_vm0, %v16811_v57   ;;  %6605 = vst.msk [vmem:[#allocation0 + $0x1386] ss:$16 sm:$0xc] %vm1398_vm0, %v16811_v57  }
 0x39f   : > { %6607 = vst.msk [vmem:[#allocation0 + $0x1386] ss:$16 sm:$0x30] %vm1398_vm0, %v16811_v57   ;;  %6609 = vst.msk [vmem:[#allocation0 + $0x1386] ss:$16 sm:$0xc0] %vm1398_vm0, %v16811_v57  }
 0x3a0   : > { %6590 = vst.msk [vmem:[#allocation0 + $0x1306] ss:$16 sm:$0x3] %vm1398_vm0, %v16810_v61   ;;  %6592 = vst.msk [vmem:[#allocation0 + $0x1306] ss:$16 sm:$0xc] %vm1398_vm0, %v16810_v61  }
 0x3a1   : > { %6594 = vst.msk [vmem:[#allocation0 + $0x1306] ss:$16 sm:$0x30] %vm1398_vm0, %v16810_v61   ;;  %6596 = vst.msk [vmem:[#allocation0 + $0x1306] ss:$16 sm:$0xc0] %vm1398_vm0, %v16810_v61  }
 0x3a2   : > { %6629 = vst.msk [vmem:[#allocation0 + $0x1486] ss:$16 sm:$0x3] %vm1398_vm0, %v16816_v43   ;;  %6631 = vst.msk [vmem:[#allocation0 + $0x1486] ss:$16 sm:$0xc] %vm1398_vm0, %v16816_v43  }
 0x3a3   : > { %6633 = vst.msk [vmem:[#allocation0 + $0x1486] ss:$16 sm:$0x30] %vm1398_vm0, %v16816_v43   ;;  %6635 = vst.msk [vmem:[#allocation0 + $0x1486] ss:$16 sm:$0xc0] %vm1398_vm0, %v16816_v43  }
 0x3a4   : > { %6616 = vst.msk [vmem:[#allocation0 + $0x1406] ss:$16 sm:$0x3] %vm1398_vm0, %v16815_v39   ;;  %6618 = vst.msk [vmem:[#allocation0 + $0x1406] ss:$16 sm:$0xc] %vm1398_vm0, %v16815_v39  }
 0x3a5   : > { %6620 = vst.msk [vmem:[#allocation0 + $0x1406] ss:$16 sm:$0x30] %vm1398_vm0, %v16815_v39   ;;  %6622 = vst.msk [vmem:[#allocation0 + $0x1406] ss:$16 sm:$0xc0] %vm1398_vm0, %v16815_v39  }
 0x3a6   : > { %6654 = vst.msk [vmem:[#allocation0 + $0x87] ss:$16 sm:$0x3] %vm1398_vm0, %v16821_v59   ;;  %6656 = vst.msk [vmem:[#allocation0 + $0x87] ss:$16 sm:$0xc] %vm1398_vm0, %v16821_v59  }
 0x3a7   : > { %6658 = vst.msk [vmem:[#allocation0 + $0x87] ss:$16 sm:$0x30] %vm1398_vm0, %v16821_v59   ;;  %6660 = vst.msk [vmem:[#allocation0 + $0x87] ss:$16 sm:$0xc0] %vm1398_vm0, %v16821_v59  }
 0x3a8   : > { %6641 = vst.msk [vmem:[#allocation0 + $0x7] ss:$16 sm:$0x3] %vm1398_vm0, %v16820_v48   ;;  %6643 = vst.msk [vmem:[#allocation0 + $0x7] ss:$16 sm:$0xc] %vm1398_vm0, %v16820_v48  }
 0x3a9   : > { %6645 = vst.msk [vmem:[#allocation0 + $0x7] ss:$16 sm:$0x30] %vm1398_vm0, %v16820_v48   ;;  %6647 = vst.msk [vmem:[#allocation0 + $0x7] ss:$16 sm:$0xc0] %vm1398_vm0, %v16820_v48  }
 0x3aa   : > { %6680 = vst.msk [vmem:[#allocation0 + $0x187] ss:$16 sm:$0x3] %vm1398_vm0, %v16826_v40   ;;  %6682 = vst.msk [vmem:[#allocation0 + $0x187] ss:$16 sm:$0xc] %vm1398_vm0, %v16826_v40  }
 0x3ab   : > { %6684 = vst.msk [vmem:[#allocation0 + $0x187] ss:$16 sm:$0x30] %vm1398_vm0, %v16826_v40   ;;  %6686 = vst.msk [vmem:[#allocation0 + $0x187] ss:$16 sm:$0xc0] %vm1398_vm0, %v16826_v40  }
 0x3ac   : > { %6667 = vst.msk [vmem:[#allocation0 + $0x107] ss:$16 sm:$0x3] %vm1398_vm0, %v16825_v31   ;;  %6669 = vst.msk [vmem:[#allocation0 + $0x107] ss:$16 sm:$0xc] %vm1398_vm0, %v16825_v31  }
 0x3ad   : > { %6671 = vst.msk [vmem:[#allocation0 + $0x107] ss:$16 sm:$0x30] %vm1398_vm0, %v16825_v31   ;;  %6673 = vst.msk [vmem:[#allocation0 + $0x107] ss:$16 sm:$0xc0] %vm1398_vm0, %v16825_v31  }
 0x3ae   : > { %6706 = vst.msk [vmem:[#allocation0 + $0x287] ss:$16 sm:$0x3] %vm1398_vm0, %v16831_v35   ;;  %6708 = vst.msk [vmem:[#allocation0 + $0x287] ss:$16 sm:$0xc] %vm1398_vm0, %v16831_v35  }
 0x3af   : > { %6710 = vst.msk [vmem:[#allocation0 + $0x287] ss:$16 sm:$0x30] %vm1398_vm0, %v16831_v35   ;;  %6712 = vst.msk [vmem:[#allocation0 + $0x287] ss:$16 sm:$0xc0] %vm1398_vm0, %v16831_v35  }
 0x3b0   : > { %6693 = vst.msk [vmem:[#allocation0 + $0x207] ss:$16 sm:$0x3] %vm1398_vm0, %v16830_v11   ;;  %6695 = vst.msk [vmem:[#allocation0 + $0x207] ss:$16 sm:$0xc] %vm1398_vm0, %v16830_v11  }
 0x3b1   : > { %6697 = vst.msk [vmem:[#allocation0 + $0x207] ss:$16 sm:$0x30] %vm1398_vm0, %v16830_v11   ;;  %6699 = vst.msk [vmem:[#allocation0 + $0x207] ss:$16 sm:$0xc0] %vm1398_vm0, %v16830_v11  }
 0x3b2   : > { %v19379_v21 = vld [vmem:[#allocation0 + $0x8] sm:$0xff]  ;;  %v19381_v22 = vld [vmem:[#allocation0 + $0x18] sm:$0xff]  ;;  %v7185_v20 = vld [vmem:[#allocation0] sm:$0xff]  ;;  %6732 = vst.msk [vmem:[#allocation0 + $0x387] ss:$16 sm:$0x3] %vm1398_vm0, %v16836_v34  }
 0x3b3   : > { %v19383_v52 = vld [vmem:[#allocation0 + $0x28] sm:$0xff]  ;;  %v19385_v19 = vld [vmem:[#allocation0 + $0x38] sm:$0xff]  ;;  %v7196_v13 = vld [vmem:[#allocation0 + $0x10] sm:$0xff]  ;;  %6734 = vst.msk [vmem:[#allocation0 + $0x387] ss:$16 sm:$0xc] %vm1398_vm0, %v16836_v34   ;;  %v13594_v51 = vpack.c.bf16 %v19379_v21, %v7185_v20 }
 0x3b4   : > { %v19387_v55 = vld [vmem:[#allocation0 + $0x48] sm:$0xff]  ;;  %v19389_v27 = vld [vmem:[#allocation0 + $0x58] sm:$0xff]  ;;  %v7210_v14 = vld [vmem:[#allocation0 + $0x20] sm:$0xff]  ;;  %6736 = vst.msk [vmem:[#allocation0 + $0x387] ss:$16 sm:$0x30] %vm1398_vm0, %v16836_v34   ;;  %v13599_v26 = vpack.c.bf16 %v19381_v22, %v7196_v13  ;;  %v16859_v13 = vpop.permute.xlu1 %16858 }
 0x3b5   : > { %v19391_v63 = vld [vmem:[#allocation0 + $0x68] sm:$0xff]  ;;  %v19393_v7 = vld [vmem:[#allocation0 + $0x78] sm:$0xff]  ;;  %6738 = vst.msk [vmem:[#allocation0 + $0x387] ss:$16 sm:$0xc0] %vm1398_vm0, %v16836_v34   ;;  %v7224_v33 = vld [vmem:[#allocation0 + $0x30] sm:$0xff]  ;;  %v13604_v47 = vpack.c.bf16 %v19383_v52, %v7210_v14  ;;  %v16850_v34 = vunpack.i.l.bf16 %v16849_v2 }
 0x3b6   : > { %v19395_v18 = vld [vmem:[#allocation0 + $0x88] sm:$0xff]  ;;  %6719 = vst.msk [vmem:[#allocation0 + $0x307] ss:$16 sm:$0x3] %vm1398_vm0, %v16835_v36   ;;  %v19411_v15 = vld [vmem:[#allocation0 + $0x98] sm:$0xff]  ;;  %v7238_v12 = vld [vmem:[#allocation0 + $0x40] sm:$0xff]  ;;  %v13609_v24 = vpack.c.bf16 %v19385_v19, %v7224_v33 }
 0x3b7   : > { %6721 = vst.msk [vmem:[#allocation0 + $0x307] ss:$16 sm:$0xc] %vm1398_vm0, %v16835_v36   ;;  %6723 = vst.msk [vmem:[#allocation0 + $0x307] ss:$16 sm:$0x30] %vm1398_vm0, %v16835_v36   ;;  %v13614_v60 = vpack.c.bf16 %v19387_v55, %v7238_v12 }
 0x3b8   : > { %6725 = vst.msk [vmem:[#allocation0 + $0x307] ss:$16 sm:$0xc0] %vm1398_vm0, %v16835_v36   ;;  %v19413_v56 = vld [vmem:[#allocation0 + $0xa8] sm:$0xff]  ;;  %v19415_v32 = vld [vmem:[#allocation0 + $0xb8] sm:$0xff]  ;;  %v7252_v50 = vld [vmem:[#allocation0 + $0x50] sm:$0xff]  ;;  %v16854_v36 = vpop.permute.xlu0 %16853 }
 0x3b9   : > { %6758 = vst.msk [vmem:[#allocation0 + $0x487] ss:$16 sm:$0x3] %vm1398_vm0, %v16841_v1   ;;  %6760 = vst.msk [vmem:[#allocation0 + $0x487] ss:$16 sm:$0xc] %vm1398_vm0, %v16841_v1   ;;  %v13619_v46 = vpack.c.bf16 %v19389_v27, %v7252_v50  ;;  %v16856_v20 = vunpack.i.h.bf16 %v16854_v36 }
 0x3ba   : > { %6762 = vst.msk [vmem:[#allocation0 + $0x487] ss:$16 sm:$0x30] %vm1398_vm0, %v16841_v1   ;;  %6764 = vst.msk [vmem:[#allocation0 + $0x487] ss:$16 sm:$0xc0] %vm1398_vm0, %v16841_v1  }
 0x3bb   : > { %6745 = vst.msk [vmem:[#allocation0 + $0x407] ss:$16 sm:$0x3] %vm1398_vm0, %v16840_v0   ;;  %6747 = vst.msk [vmem:[#allocation0 + $0x407] ss:$16 sm:$0xc] %vm1398_vm0, %v16840_v0  }
 0x3bc   : > { %6749 = vst.msk [vmem:[#allocation0 + $0x407] ss:$16 sm:$0x30] %vm1398_vm0, %v16840_v0   ;;  %6751 = vst.msk [vmem:[#allocation0 + $0x407] ss:$16 sm:$0xc0] %vm1398_vm0, %v16840_v0  }
 0x3bd   : > { %v19428_v45 = vld [vmem:[#allocation0 + $0xc8] sm:$0xff]  ;;  %v19430_v3 = vld [vmem:[#allocation0 + $0xd8] sm:$0xff]  ;;  %v7266_v6 = vld [vmem:[#allocation0 + $0x60] sm:$0xff]  ;;  %13595 = vst [vmem:[%s19409_s22] sm:$0xff] %v13594_v51  }
 0x3be   : > { %v19432_v16 = vld [vmem:[#allocation0 + $0xe8] sm:$0xff]  ;;  %v7280_v9 = vld [vmem:[#allocation0 + $0x70] sm:$0xff]  ;;  %v7294_v23 = vld [vmem:[#allocation0 + $0x80] sm:$0xff]  ;;  %v13624_v41 = vpack.c.bf16 %v19391_v63, %v7266_v6  ;;  %15312 = vst [vmem:[%s19409_s22 + $0x8] sm:$0xff] %v13599_v26  }
 0x3bf   : > { %v19437_v53 = vld [vmem:[#allocation0 + $0xf8] sm:$0xff]  ;;  %v19439_v49 = vld [vmem:[#allocation0 + $0x108] sm:$0xff]  ;;  %v7308_v17 = vld [vmem:[#allocation0 + $0x90] sm:$0xff]  ;;  %v13629_v4 = vpack.c.bf16 %v19393_v7, %v7280_v9  ;;  %v13634_v58 = vpack.c.bf16 %v19395_v18, %v7294_v23  ;;  %15313 = vst [vmem:[%s19409_s22 + $0x10] sm:$0xff] %v13604_v47   ;;  %v16855_v47 = vunpack.i.l.bf16 %v16854_v36 }
 0x3c0   : > { %v19441_v5 = vld [vmem:[#allocation0 + $0x118] sm:$0xff]  ;;  %v7322_v38 = vld [vmem:[#allocation0 + $0xa0] sm:$0xff]  ;;  %v7336_v29 = vld [vmem:[#allocation0 + $0xb0] sm:$0xff]  ;;  %v13639_v25 = vpack.c.bf16 %v19411_v15, %v7308_v17  ;;  %6784 = vst.msk [vmem:[#allocation0 + $0x587] ss:$16 sm:$0x3] %vm1398_vm0, %v16846_v62  }
 0x3c1   : > { %v19449_v44 = vld [vmem:[#allocation0 + $0x128] sm:$0xff]  ;;  %v19451_v57 = vld [vmem:[#allocation0 + $0x138] sm:$0xff]  ;;  %v19455_v30 = vld [vmem:[#allocation0 + $0xc0] sm:$0xff]  ;;  %v13644_v59 = vpack.c.bf16 %v19413_v56, %v7322_v38  ;;  %v13649_v48 = vpack.c.bf16 %v19415_v32, %v7336_v29  ;;  %6786 = vst.msk [vmem:[#allocation0 + $0x587] ss:$16 sm:$0xc] %vm1398_vm0, %v16846_v62  }
 0x3c2   : > { %v19453_v61 = vld [vmem:[#allocation0 + $0x148] sm:$0xff]  ;;  %v19457_v43 = vld [vmem:[#allocation0 + $0xd0] sm:$0xff]  ;;  %v19459_v39 = vld [vmem:[#allocation0 + $0xe0] sm:$0xff]  ;;  %6788 = vst.msk [vmem:[#allocation0 + $0x587] ss:$16 sm:$0x30] %vm1398_vm0, %v16846_v62   ;;  %v13654_v11 = vpack.c.bf16 %v19428_v45, %v19455_v30 }
 0x3c3   : > { %6790 = vst.msk [vmem:[#allocation0 + $0x587] ss:$16 sm:$0xc0] %vm1398_vm0, %v16846_v62   ;;  %15314 = vst [vmem:[%s19409_s22 + $0x18] sm:$0xff] %v13609_v24   ;;  %v19471_v40 = vld [vmem:[#allocation0 + $0x158] sm:$0xff]  ;;  %v19473_v31 = vld [vmem:[#allocation0 + $0x168] sm:$0xff]  ;;  %v13659_v42 = vpack.c.bf16 %v19430_v3, %v19457_v43  ;;  %v13664_v21 = vpack.c.bf16 %v19432_v16, %v19459_v39 }
 0x3c4   : > { %15315 = vst [vmem:[%s19409_s22 + $0x20] sm:$0xff] %v13614_v60   ;;  %15316 = vst [vmem:[%s19409_s22 + $0x28] sm:$0xff] %v13619_v46   ;;  %v19475_v54 = vld [vmem:[#allocation0 + $0x178] sm:$0xff]  ;;  %v19477_v35 = vld [vmem:[#allocation0 + $0xf0] sm:$0xff]  ;;  %v16861_v46 = vunpack.i.h.bf16 %v16859_v13 }
 0x3c5   : > { %v7406_v22 = vld [vmem:[#allocation0 + $0x100] sm:$0xff]  ;;  %v7420_v52 = vld [vmem:[#allocation0 + $0x110] sm:$0xff]  ;;  %6771 = vst.msk [vmem:[#allocation0 + $0x507] ss:$16 sm:$0x3] %vm1398_vm0, %v16845_v10   ;;  %15317 = vst [vmem:[%s19409_s22 + $0x30] sm:$0xff] %v13624_v41   ;;  %v13669_v27 = vpack.c.bf16 %v19437_v53, %v19477_v35 }
 0x3c6   : > { %6773 = vst.msk [vmem:[#allocation0 + $0x507] ss:$16 sm:$0xc] %vm1398_vm0, %v16845_v10   ;;  %6775 = vst.msk [vmem:[#allocation0 + $0x507] ss:$16 sm:$0x30] %vm1398_vm0, %v16845_v10   ;;  %v13674_v7 = vpack.c.bf16 %v19439_v49, %v7406_v22  ;;  %v13679_v18 = vpack.c.bf16 %v19441_v5, %v7420_v52 }
 0x3c7   : > { %6777 = vst.msk [vmem:[#allocation0 + $0x507] ss:$16 sm:$0xc0] %vm1398_vm0, %v16845_v10   ;;  %15318 = vst [vmem:[%s19409_s22 + $0x38] sm:$0xff] %v13629_v4   ;;  %v19492_v37 = vld [vmem:[#allocation0 + $0x188] sm:$0xff]  ;;  %v19494_v19 = vld [vmem:[#allocation0 + $0x198] sm:$0xff]  ;;  %v16860_v4 = vunpack.i.l.bf16 %v16859_v13 }
 0x3c8   : > { %15319 = vst [vmem:[%s19409_s22 + $0x40] sm:$0xff] %v13634_v58   ;;  %v19496_v55 = vld [vmem:[#allocation0 + $0x1a8] sm:$0xff]  ;;  %v19500_v1 = vld [vmem:[#allocation0 + $0x120] sm:$0xff]  ;;  %v19502_v0 = vld [vmem:[#allocation0 + $0x130] sm:$0xff]  ;;  %v16864_v58 = vpop.permute.xlu0 %16863 }
 0x3c9   : > { %v19504_v63 = vld [vmem:[#allocation0 + $0x140] sm:$0xff]  ;;  %6810 = vst.msk [vmem:[#allocation0 + $0x687] ss:$16 sm:$0x3] %vm1398_vm0, %v16851_v28   ;;  %15320 = vst [vmem:[%s19409_s22 + $0x48] sm:$0xff] %v13639_v25   ;;  %v19515_v14 = vld [vmem:[#allocation0 + $0x1b8] sm:$0xff]  ;;  %v13684_v50 = vpack.c.bf16 %v19449_v44, %v19500_v1  ;;  %v13689_v51 = vpack.c.bf16 %v19451_v57, %v19502_v0 }
 0x3ca   : > { %6812 = vst.msk [vmem:[#allocation0 + $0x687] ss:$16 sm:$0xc] %vm1398_vm0, %v16851_v28   ;;  %6814 = vst.msk [vmem:[#allocation0 + $0x687] ss:$16 sm:$0x30] %vm1398_vm0, %v16851_v28   ;;  %v13694_v26 = vpack.c.bf16 %v19453_v61, %v19504_v63 }
 0x3cb   : > { %6816 = vst.msk [vmem:[#allocation0 + $0x687] ss:$16 sm:$0xc0] %vm1398_vm0, %v16851_v28   ;;  %15321 = vst [vmem:[%s19409_s22 + $0x50] sm:$0xff] %v13644_v59   ;;  %v19517_v15 = vld [vmem:[#allocation0 + $0x1c8] sm:$0xff]  ;;  %v19519_v56 = vld [vmem:[#allocation0 + $0x1d8] sm:$0xff]  ;;  %v16869_v28 = vpop.permute.xlu1 %16868 }
 0x3cc   : > { %15322 = vst [vmem:[%s19409_s22 + $0x58] sm:$0xff] %v13649_v48   ;;  %v19521_v32 = vld [vmem:[#allocation0 + $0x150] sm:$0xff]  ;;  %v19523_v33 = vld [vmem:[#allocation0 + $0x160] sm:$0xff]  ;;  %6797 = vst.msk [vmem:[#allocation0 + $0x607] ss:$16 sm:$0x3] %vm1398_vm0, %v16850_v34   ;;  %v16866_v48 = vunpack.i.h.bf16 %v16864_v58 }
 0x3cd   : > { %v19525_v12 = vld [vmem:[#allocation0 + $0x170] sm:$0xff]  ;;  %6799 = vst.msk [vmem:[#allocation0 + $0x607] ss:$16 sm:$0xc] %vm1398_vm0, %v16850_v34   ;;  %15323 = vst [vmem:[%s19409_s22 + $0x60] sm:$0xff] %v13654_v11   ;;  %v19540_v8 = vld [vmem:[#allocation0 + $0x1e8] sm:$0xff]  ;;  %v13699_v23 = vpack.c.bf16 %v19471_v40, %v19521_v32  ;;  %v13704_v24 = vpack.c.bf16 %v19473_v31, %v19523_v33 }
 0x3ce   : > { %6801 = vst.msk [vmem:[#allocation0 + $0x607] ss:$16 sm:$0x30] %vm1398_vm0, %v16850_v34   ;;  %6803 = vst.msk [vmem:[#allocation0 + $0x607] ss:$16 sm:$0xc0] %vm1398_vm0, %v16850_v34   ;;  %v13709_v60 = vpack.c.bf16 %v19475_v54, %v19525_v12  ;;  %v16865_v34 = vunpack.i.l.bf16 %v16864_v58 }
 0x3cf   : > { %15324 = vst [vmem:[%s19409_s22 + $0x68] sm:$0xff] %v13659_v42   ;;  %15325 = vst [vmem:[%s19409_s22 + $0x70] sm:$0xff] %v13664_v21   ;;  %v19542_v45 = vld [vmem:[#allocation0 + $0x1f8] sm:$0xff]  ;;  %v19544_v3 = vld [vmem:[#allocation0 + $0x208] sm:$0xff] }
 0x3d0   : > { %v19546_v16 = vld [vmem:[#allocation0 + $0x180] sm:$0xff]  ;;  %v19548_v6 = vld [vmem:[#allocation0 + $0x190] sm:$0xff]  ;;  %6836 = vst.msk [vmem:[#allocation0 + $0x787] ss:$16 sm:$0x3] %vm1398_vm0, %v16856_v20   ;;  %15326 = vst [vmem:[%s19409_s22 + $0x78] sm:$0xff] %v13669_v27  }
 0x3d1   : > { %v19550_v9 = vld [vmem:[#allocation0 + $0x1a0] sm:$0xff]  ;;  %6838 = vst.msk [vmem:[#allocation0 + $0x787] ss:$16 sm:$0xc] %vm1398_vm0, %v16856_v20   ;;  %15327 = vst [vmem:[%s19409_s22 + $0x80] sm:$0xff] %v13674_v7   ;;  %v19565_v62 = vld [vmem:[#allocation0 + $0x218] sm:$0xff]  ;;  %v13714_v38 = vpack.c.bf16 %v19492_v37, %v19546_v16  ;;  %v13719_v29 = vpack.c.bf16 %v19494_v19, %v19548_v6 }
 0x3d2   : > { %6840 = vst.msk [vmem:[#allocation0 + $0x787] ss:$16 sm:$0x30] %vm1398_vm0, %v16856_v20   ;;  %6842 = vst.msk [vmem:[#allocation0 + $0x787] ss:$16 sm:$0xc0] %vm1398_vm0, %v16856_v20   ;;  %v13724_v41 = vpack.c.bf16 %v19496_v55, %v19550_v9 }
 0x3d3   : > { %15328 = vst [vmem:[%s19409_s22 + $0x88] sm:$0xff] %v13679_v18   ;;  %v19567_v2 = vld [vmem:[#allocation0 + $0x228] sm:$0xff]  ;;  %v19569_v53 = vld [vmem:[#allocation0 + $0x238] sm:$0xff]  ;;  %v19571_v49 = vld [vmem:[#allocation0 + $0x1b0] sm:$0xff]  ;;  %v16871_v18 = vunpack.i.h.bf16 %v16869_v28 }
 0x3d4   : > { %v19573_v5 = vld [vmem:[#allocation0 + $0x1c0] sm:$0xff]  ;;  %v19575_v17 = vld [vmem:[#allocation0 + $0x1d0] sm:$0xff]  ;;  %6823 = vst.msk [vmem:[#allocation0 + $0x707] ss:$16 sm:$0x3] %vm1398_vm0, %v16855_v47   ;;  %15329 = vst [vmem:[%s19409_s22 + $0x90] sm:$0xff] %v13684_v50   ;;  %v13729_v43 = vpack.c.bf16 %v19515_v14, %v19571_v49 }
 0x3d5   : > { %6825 = vst.msk [vmem:[#allocation0 + $0x707] ss:$16 sm:$0xc] %vm1398_vm0, %v16855_v47   ;;  %6827 = vst.msk [vmem:[#allocation0 + $0x707] ss:$16 sm:$0x30] %vm1398_vm0, %v16855_v47   ;;  %v13734_v39 = vpack.c.bf16 %v19517_v15, %v19573_v5  ;;  %v13739_v25 = vpack.c.bf16 %v19519_v56, %v19575_v17 }
 0x3d6   : > { %6829 = vst.msk [vmem:[#allocation0 + $0x707] ss:$16 sm:$0xc0] %vm1398_vm0, %v16855_v47   ;;  %15330 = vst [vmem:[%s19409_s22 + $0x98] sm:$0xff] %v13689_v51   ;;  %v19590_v10 = vld [vmem:[#allocation0 + $0x248] sm:$0xff]  ;;  %v19592_v44 = vld [vmem:[#allocation0 + $0x258] sm:$0xff]  ;;  %v16870_v51 = vunpack.i.l.bf16 %v16869_v28 }
 0x3d7   : > { %15331 = vst [vmem:[%s19409_s22 + $0xa0] sm:$0xff] %v13694_v26   ;;  %v19594_v57 = vld [vmem:[#allocation0 + $0x268] sm:$0xff]  ;;  %v19596_v61 = vld [vmem:[#allocation0 + $0x1e0] sm:$0xff]  ;;  %v19598_v30 = vld [vmem:[#allocation0 + $0x1f0] sm:$0xff]  ;;  %v16874_v26 = vpop.permute.xlu0 %16873 }
 0x3d8   : > { %v7630_v59 = vld [vmem:[#allocation0 + $0x200] sm:$0xff]  ;;  %6862 = vst.msk [vmem:[#allocation0 + $0x887] ss:$16 sm:$0x3] %vm1398_vm0, %v16861_v46   ;;  %15332 = vst [vmem:[%s19409_s22 + $0xa8] sm:$0xff] %v13699_v23   ;;  %v19613_v40 = vld [vmem:[#allocation0 + $0x278] sm:$0xff]  ;;  %v13744_v35 = vpack.c.bf16 %v19540_v8, %v19596_v61  ;;  %v13749_v11 = vpack.c.bf16 %v19542_v45, %v19598_v30 }
 0x3d9   : > { %6864 = vst.msk [vmem:[#allocation0 + $0x887] ss:$16 sm:$0xc] %vm1398_vm0, %v16861_v46   ;;  %6866 = vst.msk [vmem:[#allocation0 + $0x887] ss:$16 sm:$0x30] %vm1398_vm0, %v16861_v46   ;;  %v13754_v52 = vpack.c.bf16 %v19544_v3, %v7630_v59 }
 0x3da   : > { %6868 = vst.msk [vmem:[#allocation0 + $0x887] ss:$16 sm:$0xc0] %vm1398_vm0, %v16861_v46   ;;  %15333 = vst [vmem:[%s19409_s22 + $0xb0] sm:$0xff] %v13704_v24   ;;  %v19615_v31 = vld [vmem:[#allocation0 + $0x288] sm:$0xff]  ;;  %v19617_v54 = vld [vmem:[#allocation0 + $0x298] sm:$0xff]  ;;  %v16879_v46 = vpop.permute.xlu1 %16878 }
 0x3db   : > { %15334 = vst [vmem:[%s19409_s22 + $0xb8] sm:$0xff] %v13709_v60   ;;  %v7644_v42 = vld [vmem:[#allocation0 + $0x210] sm:$0xff]  ;;  %v7658_v21 = vld [vmem:[#allocation0 + $0x220] sm:$0xff]  ;;  %6849 = vst.msk [vmem:[#allocation0 + $0x807] ss:$16 sm:$0x3] %vm1398_vm0, %v16860_v4   ;;  %v16876_v60 = vunpack.i.h.bf16 %v16874_v26  ;;  %v16881_v59 = vunpack.i.h.bf16 %v16879_v46 }
 0x3dc   : > { %v7672_v22 = vld [vmem:[#allocation0 + $0x230] sm:$0xff]  ;;  %6851 = vst.msk [vmem:[#allocation0 + $0x807] ss:$16 sm:$0xc] %vm1398_vm0, %v16860_v4   ;;  %15335 = vst [vmem:[%s19409_s22 + $0xc0] sm:$0xff] %v13714_v38   ;;  %v19631_v36 = vld [vmem:[#allocation0 + $0x2a8] sm:$0xff]  ;;  %v13759_v0 = vpack.c.bf16 %v19565_v62, %v7644_v42  ;;  %v13764_v63 = vpack.c.bf16 %v19567_v2, %v7658_v21 }
 0x3dd   : > { %6853 = vst.msk [vmem:[#allocation0 + $0x807] ss:$16 sm:$0x30] %vm1398_vm0, %v16860_v4   ;;  %6855 = vst.msk [vmem:[#allocation0 + $0x807] ss:$16 sm:$0xc0] %vm1398_vm0, %v16860_v4   ;;  %v13769_v7 = vpack.c.bf16 %v19569_v53, %v7672_v22  ;;  %v16875_v4 = vunpack.i.l.bf16 %v16874_v26  ;;  %v16880_v22 = vunpack.i.l.bf16 %v16879_v46 }
 0x3de   : > { %15336 = vst [vmem:[%s19409_s22 + $0xc8] sm:$0xff] %v13719_v29   ;;  %15337 = vst [vmem:[%s19409_s22 + $0xd0] sm:$0xff] %v13724_v41   ;;  %v19633_v37 = vld [vmem:[#allocation0 + $0x2b8] sm:$0xff]  ;;  %v19635_v19 = vld [vmem:[#allocation0 + $0x2c8] sm:$0xff] }
 0x3df   : > { %v19637_v55 = vld [vmem:[#allocation0 + $0x240] sm:$0xff]  ;;  %v19639_v27 = vld [vmem:[#allocation0 + $0x250] sm:$0xff]  ;;  %6888 = vst.msk [vmem:[#allocation0 + $0x987] ss:$16 sm:$0x3] %vm1398_vm0, %v16866_v48   ;;  %15338 = vst [vmem:[%s19409_s22 + $0xd8] sm:$0xff] %v13729_v43  }
 0x3e0   : > { %v19641_v1 = vld [vmem:[#allocation0 + $0x260] sm:$0xff]  ;;  %6890 = vst.msk [vmem:[#allocation0 + $0x987] ss:$16 sm:$0xc] %vm1398_vm0, %v16866_v48   ;;  %15339 = vst [vmem:[%s19409_s22 + $0xe0] sm:$0xff] %v13734_v39   ;;  %v19653_v20 = vld [vmem:[#allocation0 + $0x2d8] sm:$0xff]  ;;  %v13774_v33 = vpack.c.bf16 %v19590_v10, %v19637_v55  ;;  %v13779_v12 = vpack.c.bf16 %v19592_v44, %v19639_v27 }
 0x3e1   : > { %6892 = vst.msk [vmem:[#allocation0 + $0x987] ss:$16 sm:$0x30] %vm1398_vm0, %v16866_v48   ;;  %6894 = vst.msk [vmem:[#allocation0 + $0x987] ss:$16 sm:$0xc0] %vm1398_vm0, %v16866_v48   ;;  %v13784_v50 = vpack.c.bf16 %v19594_v57, %v19641_v1 }
 0x3e2   : > { %15340 = vst [vmem:[%s19409_s22 + $0xe8] sm:$0xff] %v13739_v25   ;;  %v19655_v13 = vld [vmem:[#allocation0 + $0x2e8] sm:$0xff]  ;;  %v19657_v14 = vld [vmem:[#allocation0 + $0x2f8] sm:$0xff]  ;;  %v19659_v15 = vld [vmem:[#allocation0 + $0x270] sm:$0xff] }
 0x3e3   : > { %v19661_v56 = vld [vmem:[#allocation0 + $0x280] sm:$0xff]  ;;  %v19663_v32 = vld [vmem:[#allocation0 + $0x290] sm:$0xff]  ;;  %6875 = vst.msk [vmem:[#allocation0 + $0x907] ss:$16 sm:$0x3] %vm1398_vm0, %v16865_v34   ;;  %15341 = vst [vmem:[%s19409_s22 + $0xf0] sm:$0xff] %v13744_v35   ;;  %v13789_v9 = vpack.c.bf16 %v19613_v40, %v19659_v15 }
 0x3e4   : > { %6877 = vst.msk [vmem:[#allocation0 + $0x907] ss:$16 sm:$0xc] %vm1398_vm0, %v16865_v34   ;;  %6879 = vst.msk [vmem:[#allocation0 + $0x907] ss:$16 sm:$0x30] %vm1398_vm0, %v16865_v34   ;;  %v13794_v23 = vpack.c.bf16 %v19615_v31, %v19661_v56  ;;  %v13799_v24 = vpack.c.bf16 %v19617_v54, %v19663_v32 }
 0x3e5   : > { %6881 = vst.msk [vmem:[#allocation0 + $0x907] ss:$16 sm:$0xc0] %vm1398_vm0, %v16865_v34   ;;  %15342 = vst [vmem:[%s19409_s22 + $0xf8] sm:$0xff] %v13749_v11   ;;  %v19678_v47 = vld [vmem:[#allocation0 + $0x308] sm:$0xff]  ;;  %v19680_v8 = vld [vmem:[#allocation0 + $0x318] sm:$0xff] }
 0x3e6   : > { %15343 = vst [vmem:[%s19409_s22 + $0x100] sm:$0xff] %v13754_v52   ;;  %v19682_v45 = vld [vmem:[#allocation0 + $0x328] sm:$0xff]  ;;  %v19684_v3 = vld [vmem:[#allocation0 + $0x2a0] sm:$0xff]  ;;  %v19686_v16 = vld [vmem:[#allocation0 + $0x2b0] sm:$0xff]  ;;  %v16884_v52 = vpop.permute.xlu0 %16883 }
 0x3e7   : > { %v19688_v6 = vld [vmem:[#allocation0 + $0x2c0] sm:$0xff]  ;;  %6914 = vst.msk [vmem:[#allocation0 + $0xa87] ss:$16 sm:$0x3] %vm1398_vm0, %v16871_v18   ;;  %15344 = vst [vmem:[%s19409_s22 + $0x108] sm:$0xff] %v13759_v0   ;;  %v19703_v62 = vld [vmem:[#allocation0 + $0x338] sm:$0xff]  ;;  %v13804_v38 = vpack.c.bf16 %v19631_v36, %v19684_v3  ;;  %v13809_v29 = vpack.c.bf16 %v19633_v37, %v19686_v16 }
 0x3e8   : > { %6916 = vst.msk [vmem:[#allocation0 + $0xa87] ss:$16 sm:$0xc] %vm1398_vm0, %v16871_v18   ;;  %6918 = vst.msk [vmem:[#allocation0 + $0xa87] ss:$16 sm:$0x30] %vm1398_vm0, %v16871_v18   ;;  %v13814_v41 = vpack.c.bf16 %v19635_v19, %v19688_v6 }
 0x3e9   : > { %6920 = vst.msk [vmem:[#allocation0 + $0xa87] ss:$16 sm:$0xc0] %vm1398_vm0, %v16871_v18   ;;  %15345 = vst [vmem:[%s19409_s22 + $0x110] sm:$0xff] %v13764_v63   ;;  %v19705_v2 = vld [vmem:[#allocation0 + $0x348] sm:$0xff]  ;;  %v19707_v53 = vld [vmem:[#allocation0 + $0x358] sm:$0xff]  ;;  %v16889_v18 = vpop.permute.xlu1 %16888 }
 0x3ea   : > { %15346 = vst [vmem:[%s19409_s22 + $0x118] sm:$0xff] %v13769_v7   ;;  %v19709_v49 = vld [vmem:[#allocation0 + $0x2d0] sm:$0xff]  ;;  %v19711_v5 = vld [vmem:[#allocation0 + $0x2e0] sm:$0xff]  ;;  %6901 = vst.msk [vmem:[#allocation0 + $0xa07] ss:$16 sm:$0x3] %vm1398_vm0, %v16870_v51   ;;  %v16886_v7 = vunpack.i.h.bf16 %v16884_v52 }
 0x3eb   : > { %v19713_v17 = vld [vmem:[#allocation0 + $0x2f0] sm:$0xff]  ;;  %6903 = vst.msk [vmem:[#allocation0 + $0xa07] ss:$16 sm:$0xc] %vm1398_vm0, %v16870_v51   ;;  %15347 = vst [vmem:[%s19409_s22 + $0x120] sm:$0xff] %v13774_v33   ;;  %v19728_v58 = vld [vmem:[#allocation0 + $0x368] sm:$0xff]  ;;  %v13819_v57 = vpack.c.bf16 %v19653_v20, %v19709_v49  ;;  %v13824_v61 = vpack.c.bf16 %v19655_v13, %v19711_v5 }
 0x3ec   : > { %6905 = vst.msk [vmem:[#allocation0 + $0xa07] ss:$16 sm:$0x30] %vm1398_vm0, %v16870_v51   ;;  %6907 = vst.msk [vmem:[#allocation0 + $0xa07] ss:$16 sm:$0xc0] %vm1398_vm0, %v16870_v51   ;;  %v13829_v30 = vpack.c.bf16 %v19657_v14, %v19713_v17  ;;  %v16885_v51 = vunpack.i.l.bf16 %v16884_v52 }
 0x3ed   : > { %15348 = vst [vmem:[%s19409_s22 + $0x128] sm:$0xff] %v13779_v12   ;;  %15349 = vst [vmem:[%s19409_s22 + $0x130] sm:$0xff] %v13784_v50   ;;  %v19730_v10 = vld [vmem:[#allocation0 + $0x378] sm:$0xff]  ;;  %v19732_v44 = vld [vmem:[#allocation0 + $0x388] sm:$0xff] }
 0x3ee   : > { %v7854_v43 = vld [vmem:[#allocation0 + $0x300] sm:$0xff]  ;;  %v7868_v39 = vld [vmem:[#allocation0 + $0x310] sm:$0xff]  ;;  %6940 = vst.msk [vmem:[#allocation0 + $0xb87] ss:$16 sm:$0x3] %vm1398_vm0, %v16876_v60   ;;  %15350 = vst [vmem:[%s19409_s22 + $0x138] sm:$0xff] %v13789_v9  }
 0x3ef   : > { %v7882_v25 = vld [vmem:[#allocation0 + $0x320] sm:$0xff]  ;;  %6942 = vst.msk [vmem:[#allocation0 + $0xb87] ss:$16 sm:$0xc] %vm1398_vm0, %v16876_v60   ;;  %15351 = vst [vmem:[%s19409_s22 + $0x140] sm:$0xff] %v13794_v23   ;;  %v19747_v48 = vld [vmem:[#allocation0 + $0x398] sm:$0xff]  ;;  %v13834_v11 = vpack.c.bf16 %v19678_v47, %v7854_v43  ;;  %v13839_v42 = vpack.c.bf16 %v19680_v8, %v7868_v39 }
 0x3f0   : > { %6944 = vst.msk [vmem:[#allocation0 + $0xb87] ss:$16 sm:$0x30] %vm1398_vm0, %v16876_v60   ;;  %6946 = vst.msk [vmem:[#allocation0 + $0xb87] ss:$16 sm:$0xc0] %vm1398_vm0, %v16876_v60   ;;  %v13844_v21 = vpack.c.bf16 %v19682_v45, %v7882_v25 }
 0x3f1   : > { %15352 = vst [vmem:[%s19409_s22 + $0x148] sm:$0xff] %v13799_v24   ;;  %v19749_v28 = vld [vmem:[#allocation0 + $0x3a8] sm:$0xff]  ;;  %v19751_v40 = vld [vmem:[#allocation0 + $0x3b8] sm:$0xff]  ;;  %v19753_v31 = vld [vmem:[#allocation0 + $0x330] sm:$0xff]  ;;  %v16891_v24 = vunpack.i.h.bf16 %v16889_v18 }
 0x3f2   : > { %v19755_v54 = vld [vmem:[#allocation0 + $0x340] sm:$0xff]  ;;  %v19757_v35 = vld [vmem:[#allocation0 + $0x350] sm:$0xff]  ;;  %6927 = vst.msk [vmem:[#allocation0 + $0xb07] ss:$16 sm:$0x3] %vm1398_vm0, %v16875_v4   ;;  %15353 = vst [vmem:[%s19409_s22 + $0x150] sm:$0xff] %v13804_v38   ;;  %v13849_v1 = vpack.c.bf16 %v19703_v62, %v19753_v31 }
 0x3f3   : > { %6929 = vst.msk [vmem:[#allocation0 + $0xb07] ss:$16 sm:$0xc] %vm1398_vm0, %v16875_v4   ;;  %6931 = vst.msk [vmem:[#allocation0 + $0xb07] ss:$16 sm:$0x30] %vm1398_vm0, %v16875_v4   ;;  %v13854_v0 = vpack.c.bf16 %v19705_v2, %v19755_v54  ;;  %v13859_v63 = vpack.c.bf16 %v19707_v53, %v19757_v35 }
 0x3f4   : > { %6933 = vst.msk [vmem:[#allocation0 + $0xb07] ss:$16 sm:$0xc0] %vm1398_vm0, %v16875_v4   ;;  %15354 = vst [vmem:[%s19409_s22 + $0x158] sm:$0xff] %v13809_v29   ;;  %v19769_v34 = vld [vmem:[#allocation0 + $0x3c8] sm:$0xff]  ;;  %v19771_v36 = vld [vmem:[#allocation0 + $0x3d8] sm:$0xff]  ;;  %v16890_v29 = vunpack.i.l.bf16 %v16889_v18 }
 0x3f5   : > { %15355 = vst [vmem:[%s19409_s22 + $0x160] sm:$0xff] %v13814_v41   ;;  %v19773_v37 = vld [vmem:[#allocation0 + $0x3e8] sm:$0xff]  ;;  %v19775_v19 = vld [vmem:[#allocation0 + $0x360] sm:$0xff]  ;;  %v19777_v55 = vld [vmem:[#allocation0 + $0x370] sm:$0xff]  ;;  %v16894_v41 = vpop.permute.xlu0 %16893 }
 0x3f6   : > { %v19779_v27 = vld [vmem:[#allocation0 + $0x380] sm:$0xff]  ;;  %6966 = vst.msk [vmem:[#allocation0 + $0xc87] ss:$16 sm:$0x3] %vm1398_vm0, %v16881_v59   ;;  %15356 = vst [vmem:[%s19409_s22 + $0x168] sm:$0xff] %v13819_v57   ;;  %v19794_v20 = vld [vmem:[#allocation0 + $0x3f8] sm:$0xff]  ;;  %v13864_v33 = vpack.c.bf16 %v19728_v58, %v19775_v19  ;;  %v13869_v12 = vpack.c.bf16 %v19730_v10, %v19777_v55  ;;  %v16896_v25 = vunpack.i.h.bf16 %v16894_v41 }
 0x3f7   : > { %6968 = vst.msk [vmem:[#allocation0 + $0xc87] ss:$16 sm:$0xc] %vm1398_vm0, %v16881_v59   ;;  %6970 = vst.msk [vmem:[#allocation0 + $0xc87] ss:$16 sm:$0x30] %vm1398_vm0, %v16881_v59   ;;  %v13874_v50 = vpack.c.bf16 %v19732_v44, %v19779_v27 }
 0x3f8   : > { %6972 = vst.msk [vmem:[#allocation0 + $0xc87] ss:$16 sm:$0xc0] %vm1398_vm0, %v16881_v59   ;;  %15357 = vst [vmem:[%s19409_s22 + $0x170] sm:$0xff] %v13824_v61   ;;  %v19796_v13 = vld [vmem:[#allocation0 + $0x408] sm:$0xff]  ;;  %v19798_v14 = vld [vmem:[#allocation0 + $0x418] sm:$0xff]  ;;  %v16899_v59 = vpop.permute.xlu1 %16898 }
 0x3f9   : > { %15358 = vst [vmem:[%s19409_s22 + $0x178] sm:$0xff] %v13829_v30   ;;  %v19800_v15 = vld [vmem:[#allocation0 + $0x390] sm:$0xff]  ;;  %v19802_v56 = vld [vmem:[#allocation0 + $0x3a0] sm:$0xff]  ;;  %6953 = vst.msk [vmem:[#allocation0 + $0xc07] ss:$16 sm:$0x3] %vm1398_vm0, %v16880_v22  }
 0x3fa   : > { %v19804_v32 = vld [vmem:[#allocation0 + $0x3b0] sm:$0xff]  ;;  %6955 = vst.msk [vmem:[#allocation0 + $0xc07] ss:$16 sm:$0xc] %vm1398_vm0, %v16880_v22   ;;  %15359 = vst [vmem:[%s19409_s22 + $0x180] sm:$0xff] %v13834_v11   ;;  %v19819_v26 = vld [vmem:[#allocation0 + $0x428] sm:$0xff]  ;;  %v13879_v6 = vpack.c.bf16 %v19747_v48, %v19800_v15  ;;  %v13884_v9 = vpack.c.bf16 %v19749_v28, %v19802_v56 }
 0x3fb   : > { %6957 = vst.msk [vmem:[#allocation0 + $0xc07] ss:$16 sm:$0x30] %vm1398_vm0, %v16880_v22   ;;  %6959 = vst.msk [vmem:[#allocation0 + $0xc07] ss:$16 sm:$0xc0] %vm1398_vm0, %v16880_v22   ;;  %v13889_v23 = vpack.c.bf16 %v19751_v40, %v19804_v32  ;;  %v16895_v22 = vunpack.i.l.bf16 %v16894_v41 }
 0x3fc   : > { %15360 = vst [vmem:[%s19409_s22 + $0x188] sm:$0xff] %v13839_v42   ;;  %15361 = vst [vmem:[%s19409_s22 + $0x190] sm:$0xff] %v13844_v21   ;;  %v19821_v47 = vld [vmem:[#allocation0 + $0x438] sm:$0xff]  ;;  %v19823_v8 = vld [vmem:[#allocation0 + $0x448] sm:$0xff] }
 0x3fd   : > { %v19825_v45 = vld [vmem:[#allocation0 + $0x3c0] sm:$0xff]  ;;  %v19827_v3 = vld [vmem:[#allocation0 + $0x3d0] sm:$0xff]  ;;  %6992 = vst.msk [vmem:[#allocation0 + $0xd87] ss:$16 sm:$0x3] %vm1398_vm0, %v16886_v7   ;;  %15362 = vst [vmem:[%s19409_s22 + $0x198] sm:$0xff] %v13849_v1  }
 0x3fe   : > { %v19829_v16 = vld [vmem:[#allocation0 + $0x3e0] sm:$0xff]  ;;  %6994 = vst.msk [vmem:[#allocation0 + $0xd87] ss:$16 sm:$0xc] %vm1398_vm0, %v16886_v7   ;;  %15363 = vst [vmem:[%s19409_s22 + $0x1a0] sm:$0xff] %v13854_v0   ;;  %v19844_v60 = vld [vmem:[#allocation0 + $0x458] sm:$0xff]  ;;  %v13894_v53 = vpack.c.bf16 %v19769_v34, %v19825_v45  ;;  %v13899_v49 = vpack.c.bf16 %v19771_v36, %v19827_v3 }
 0x3ff   : > { %6996 = vst.msk [vmem:[#allocation0 + $0xd87] ss:$16 sm:$0x30] %vm1398_vm0, %v16886_v7   ;;  %6998 = vst.msk [vmem:[#allocation0 + $0xd87] ss:$16 sm:$0xc0] %vm1398_vm0, %v16886_v7   ;;  %v13904_v5 = vpack.c.bf16 %v19773_v37, %v19829_v16 }
 0x400   : > { %15364 = vst [vmem:[%s19409_s22 + $0x1a8] sm:$0xff] %v13859_v63   ;;  %v19846_v46 = vld [vmem:[#allocation0 + $0x468] sm:$0xff]  ;;  %v19848_v62 = vld [vmem:[#allocation0 + $0x478] sm:$0xff]  ;;  %v19850_v2 = vld [vmem:[#allocation0 + $0x3f0] sm:$0xff]  ;;  %v16901_v63 = vunpack.i.h.bf16 %v16899_v59 }
 0x401   : > { %v8078_v17 = vld [vmem:[#allocation0 + $0x400] sm:$0xff]  ;;  %v8092_v38 = vld [vmem:[#allocation0 + $0x410] sm:$0xff]  ;;  %6979 = vst.msk [vmem:[#allocation0 + $0xd07] ss:$16 sm:$0x3] %vm1398_vm0, %v16885_v51   ;;  %15365 = vst [vmem:[%s19409_s22 + $0x1b0] sm:$0xff] %v13864_v33   ;;  %v13909_v44 = vpack.c.bf16 %v19794_v20, %v19850_v2 }
 0x402   : > { %6981 = vst.msk [vmem:[#allocation0 + $0xd07] ss:$16 sm:$0xc] %vm1398_vm0, %v16885_v51   ;;  %6983 = vst.msk [vmem:[#allocation0 + $0xd07] ss:$16 sm:$0x30] %vm1398_vm0, %v16885_v51   ;;  %v13914_v43 = vpack.c.bf16 %v19796_v13, %v8078_v17  ;;  %v13919_v39 = vpack.c.bf16 %v19798_v14, %v8092_v38 }
 0x403   : > { %6985 = vst.msk [vmem:[#allocation0 + $0xd07] ss:$16 sm:$0xc0] %vm1398_vm0, %v16885_v51   ;;  %15366 = vst [vmem:[%s19409_s22 + $0x1b8] sm:$0xff] %v13869_v12   ;;  %v19865_v4 = vld [vmem:[#allocation0 + $0x488] sm:$0xff]  ;;  %v19867_v58 = vld [vmem:[#allocation0 + $0x498] sm:$0xff]  ;;  %v16900_v12 = vunpack.i.l.bf16 %v16899_v59 }
 0x404   : > { %15367 = vst [vmem:[%s19409_s22 + $0x1c0] sm:$0xff] %v13874_v50   ;;  %v19869_v10 = vld [vmem:[#allocation0 + $0x4a8] sm:$0xff]  ;;  %v19873_v57 = vld [vmem:[#allocation0 + $0x420] sm:$0xff]  ;;  %v19875_v61 = vld [vmem:[#allocation0 + $0x430] sm:$0xff]  ;;  %v16904_v50 = vpop.permute.xlu0 %16903 }
 0x405   : > { %v19877_v30 = vld [vmem:[#allocation0 + $0x440] sm:$0xff]  ;;  %7018 = vst.msk [vmem:[#allocation0 + $0xe87] ss:$16 sm:$0x3] %vm1398_vm0, %v16891_v24   ;;  %15368 = vst [vmem:[%s19409_s22 + $0x1c8] sm:$0xff] %v13879_v6   ;;  %v19888_v48 = vld [vmem:[#allocation0 + $0x4b8] sm:$0xff]  ;;  %v13924_v11 = vpack.c.bf16 %v19819_v26, %v19873_v57  ;;  %v13929_v42 = vpack.c.bf16 %v19821_v47, %v19875_v61 }
 0x406   : > { %7020 = vst.msk [vmem:[#allocation0 + $0xe87] ss:$16 sm:$0xc] %vm1398_vm0, %v16891_v24   ;;  %7022 = vst.msk [vmem:[#allocation0 + $0xe87] ss:$16 sm:$0x30] %vm1398_vm0, %v16891_v24   ;;  %v13934_v21 = vpack.c.bf16 %v19823_v8, %v19877_v30 }
 0x407   : > { %7024 = vst.msk [vmem:[#allocation0 + $0xe87] ss:$16 sm:$0xc0] %vm1398_vm0, %v16891_v24   ;;  %15369 = vst [vmem:[%s19409_s22 + $0x1d0] sm:$0xff] %v13884_v9   ;;  %v19890_v28 = vld [vmem:[#allocation0 + $0x4c8] sm:$0xff]  ;;  %v19892_v40 = vld [vmem:[#allocation0 + $0x4d8] sm:$0xff]  ;;  %v16909_v24 = vpop.permute.xlu1 %16908 }
 0x408   : > { %15370 = vst [vmem:[%s19409_s22 + $0x1d8] sm:$0xff] %v13889_v23   ;;  %v19894_v31 = vld [vmem:[#allocation0 + $0x450] sm:$0xff]  ;;  %v19896_v54 = vld [vmem:[#allocation0 + $0x460] sm:$0xff]  ;;  %7005 = vst.msk [vmem:[#allocation0 + $0xe07] ss:$16 sm:$0x3] %vm1398_vm0, %v16890_v29   ;;  %v16906_v23 = vunpack.i.h.bf16 %v16904_v50 }
 0x409   : > { %v19898_v35 = vld [vmem:[#allocation0 + $0x470] sm:$0xff]  ;;  %7007 = vst.msk [vmem:[#allocation0 + $0xe07] ss:$16 sm:$0xc] %vm1398_vm0, %v16890_v29   ;;  %15371 = vst [vmem:[%s19409_s22 + $0x1e0] sm:$0xff] %v13894_v53   ;;  %v19913_v52 = vld [vmem:[#allocation0 + $0x4e8] sm:$0xff]  ;;  %v13939_v27 = vpack.c.bf16 %v19844_v60, %v19894_v31  ;;  %v13944_v1 = vpack.c.bf16 %v19846_v46, %v19896_v54 }
 0x40a   : > { %7009 = vst.msk [vmem:[#allocation0 + $0xe07] ss:$16 sm:$0x30] %vm1398_vm0, %v16890_v29   ;;  %7011 = vst.msk [vmem:[#allocation0 + $0xe07] ss:$16 sm:$0xc0] %vm1398_vm0, %v16890_v29   ;;  %v13949_v0 = vpack.c.bf16 %v19848_v62, %v19898_v35  ;;  %v16905_v29 = vunpack.i.l.bf16 %v16904_v50 }
 0x40b   : > { %15372 = vst [vmem:[%s19409_s22 + $0x1e8] sm:$0xff] %v13899_v49   ;;  %15373 = vst [vmem:[%s19409_s22 + $0x1f0] sm:$0xff] %v13904_v5   ;;  %v19915_v34 = vld [vmem:[#allocation0 + $0x4f8] sm:$0xff]  ;;  %v19917_v36 = vld [vmem:[#allocation0 + $0x508] sm:$0xff] }
 0x40c   : > { %v19919_v37 = vld [vmem:[#allocation0 + $0x480] sm:$0xff]  ;;  %v19921_v19 = vld [vmem:[#allocation0 + $0x490] sm:$0xff]  ;;  %7044 = vst.msk [vmem:[#allocation0 + $0xf87] ss:$16 sm:$0x3] %vm1398_vm0, %v16896_v25   ;;  %15374 = vst [vmem:[%s19409_s22 + $0x1f8] sm:$0xff] %v13909_v44  }
 0x40d   : > { %v19923_v55 = vld [vmem:[#allocation0 + $0x4a0] sm:$0xff]  ;;  %7046 = vst.msk [vmem:[#allocation0 + $0xf87] ss:$16 sm:$0xc] %vm1398_vm0, %v16896_v25   ;;  %15375 = vst [vmem:[%s19409_s22 + $0x200] sm:$0xff] %v13914_v43   ;;  %v19938_v7 = vld [vmem:[#allocation0 + $0x518] sm:$0xff]  ;;  %v13954_v56 = vpack.c.bf16 %v19865_v4, %v19919_v37  ;;  %v13959_v32 = vpack.c.bf16 %v19867_v58, %v19921_v19 }
 0x40e   : > { %7048 = vst.msk [vmem:[#allocation0 + $0xf87] ss:$16 sm:$0x30] %vm1398_vm0, %v16896_v25   ;;  %7050 = vst.msk [vmem:[#allocation0 + $0xf87] ss:$16 sm:$0xc0] %vm1398_vm0, %v16896_v25   ;;  %v13964_v33 = vpack.c.bf16 %v19869_v10, %v19923_v55 }
 0x40f   : > { %15376 = vst [vmem:[%s19409_s22 + $0x208] sm:$0xff] %v13919_v39   ;;  %v19940_v18 = vld [vmem:[#allocation0 + $0x528] sm:$0xff]  ;;  %v19942_v20 = vld [vmem:[#allocation0 + $0x538] sm:$0xff]  ;;  %v19944_v13 = vld [vmem:[#allocation0 + $0x4b0] sm:$0xff]  ;;  %v16911_v39 = vunpack.i.h.bf16 %v16909_v24 }
 0x410   : > { %v19946_v14 = vld [vmem:[#allocation0 + $0x4c0] sm:$0xff]  ;;  %v19948_v15 = vld [vmem:[#allocation0 + $0x4d0] sm:$0xff]  ;;  %7031 = vst.msk [vmem:[#allocation0 + $0xf07] ss:$16 sm:$0x3] %vm1398_vm0, %v16895_v22   ;;  %15377 = vst [vmem:[%s19409_s22 + $0x210] sm:$0xff] %v13924_v11   ;;  %v13969_v3 = vpack.c.bf16 %v19888_v48, %v19944_v13 }
 0x411   : > { %7033 = vst.msk [vmem:[#allocation0 + $0xf07] ss:$16 sm:$0xc] %vm1398_vm0, %v16895_v22   ;;  %7035 = vst.msk [vmem:[#allocation0 + $0xf07] ss:$16 sm:$0x30] %vm1398_vm0, %v16895_v22   ;;  %v13974_v16 = vpack.c.bf16 %v19890_v28, %v19946_v14  ;;  %v13979_v6 = vpack.c.bf16 %v19892_v40, %v19948_v15 }
 0x412   : > { %7037 = vst.msk [vmem:[#allocation0 + $0xf07] ss:$16 sm:$0xc0] %vm1398_vm0, %v16895_v22   ;;  %15378 = vst [vmem:[%s19409_s22 + $0x218] sm:$0xff] %v13929_v42   ;;  %v19963_v51 = vld [vmem:[#allocation0 + $0x548] sm:$0xff]  ;;  %v19965_v26 = vld [vmem:[#allocation0 + $0x558] sm:$0xff]  ;;  %v16910_v42 = vunpack.i.l.bf16 %v16909_v24 }
 0x413   : > { %15379 = vst [vmem:[%s19409_s22 + $0x220] sm:$0xff] %v13934_v21   ;;  %v19967_v47 = vld [vmem:[#allocation0 + $0x568] sm:$0xff]  ;;  %v19969_v8 = vld [vmem:[#allocation0 + $0x4e0] sm:$0xff]  ;;  %v19971_v45 = vld [vmem:[#allocation0 + $0x4f0] sm:$0xff]  ;;  %v16914_v21 = vpop.permute.xlu0 %16913 }
 0x414   : > { %v8302_v9 = vld [vmem:[#allocation0 + $0x500] sm:$0xff]  ;;  %7070 = vst.msk [vmem:[#allocation0 + $0x1087] ss:$16 sm:$0x3] %vm1398_vm0, %v16901_v63   ;;  %15380 = vst [vmem:[%s19409_s22 + $0x228] sm:$0xff] %v13939_v27   ;;  %v19986_v60 = vld [vmem:[#allocation0 + $0x578] sm:$0xff]  ;;  %v13984_v2 = vpack.c.bf16 %v19913_v52, %v19969_v8  ;;  %v13989_v53 = vpack.c.bf16 %v19915_v34, %v19971_v45 }
 0x415   : > { %7072 = vst.msk [vmem:[#allocation0 + $0x1087] ss:$16 sm:$0xc] %vm1398_vm0, %v16901_v63   ;;  %7074 = vst.msk [vmem:[#allocation0 + $0x1087] ss:$16 sm:$0x30] %vm1398_vm0, %v16901_v63   ;;  %v13994_v38 = vpack.c.bf16 %v19917_v36, %v8302_v9 }
 0x416   : > { %7076 = vst.msk [vmem:[#allocation0 + $0x1087] ss:$16 sm:$0xc0] %vm1398_vm0, %v16901_v63   ;;  %15381 = vst [vmem:[%s19409_s22 + $0x230] sm:$0xff] %v13944_v1   ;;  %v19988_v46 = vld [vmem:[#allocation0 + $0x588] sm:$0xff]  ;;  %v19990_v62 = vld [vmem:[#allocation0 + $0x598] sm:$0xff]  ;;  %v16919_v63 = vpop.permute.xlu1 %16918 }
 0x417   : > { %15382 = vst [vmem:[%s19409_s22 + $0x238] sm:$0xff] %v13949_v0   ;;  %v8316_v49 = vld [vmem:[#allocation0 + $0x510] sm:$0xff]  ;;  %v8330_v5 = vld [vmem:[#allocation0 + $0x520] sm:$0xff]  ;;  %7057 = vst.msk [vmem:[#allocation0 + $0x1007] ss:$16 sm:$0x3] %vm1398_vm0, %v16900_v12   ;;  %v16916_v0 = vunpack.i.h.bf16 %v16914_v21  ;;  %v16921_v9 = vunpack.i.h.bf16 %v16919_v63 }
 0x418   : > { %v8344_v17 = vld [vmem:[#allocation0 + $0x530] sm:$0xff]  ;;  %7059 = vst.msk [vmem:[#allocation0 + $0x1007] ss:$16 sm:$0xc] %vm1398_vm0, %v16900_v12   ;;  %15383 = vst [vmem:[%s19409_s22 + $0x240] sm:$0xff] %v13954_v56   ;;  %v20004_v41 = vld [vmem:[#allocation0 + $0x5a8] sm:$0xff]  ;;  %v13999_v61 = vpack.c.bf16 %v19938_v7, %v8316_v49  ;;  %v14004_v30 = vpack.c.bf16 %v19940_v18, %v8330_v5 }
 0x419   : > { %7061 = vst.msk [vmem:[#allocation0 + $0x1007] ss:$16 sm:$0x30] %vm1398_vm0, %v16900_v12   ;;  %7063 = vst.msk [vmem:[#allocation0 + $0x1007] ss:$16 sm:$0xc0] %vm1398_vm0, %v16900_v12   ;;  %v14009_v43 = vpack.c.bf16 %v19942_v20, %v8344_v17  ;;  %v16915_v12 = vunpack.i.l.bf16 %v16914_v21  ;;  %v16920_v17 = vunpack.i.l.bf16 %v16919_v63 }
 0x41a   : > { %15384 = vst [vmem:[%s19409_s22 + $0x248] sm:$0xff] %v13959_v32   ;;  %15385 = vst [vmem:[%s19409_s22 + $0x250] sm:$0xff] %v13964_v33   ;;  %v20006_v4 = vld [vmem:[#allocation0 + $0x5b8] sm:$0xff]  ;;  %v20008_v58 = vld [vmem:[#allocation0 + $0x5c8] sm:$0xff] }
 0x41b   : > { %v20010_v10 = vld [vmem:[#allocation0 + $0x540] sm:$0xff]  ;;  %v20012_v44 = vld [vmem:[#allocation0 + $0x550] sm:$0xff]  ;;  %7096 = vst.msk [vmem:[#allocation0 + $0x1187] ss:$16 sm:$0x3] %vm1398_vm0, %v16906_v23   ;;  %15386 = vst [vmem:[%s19409_s22 + $0x258] sm:$0xff] %v13969_v3  }
 0x41c   : > { %v20014_v57 = vld [vmem:[#allocation0 + $0x560] sm:$0xff]  ;;  %7098 = vst.msk [vmem:[#allocation0 + $0x1187] ss:$16 sm:$0xc] %vm1398_vm0, %v16906_v23   ;;  %15387 = vst [vmem:[%s19409_s22 + $0x260] sm:$0xff] %v13974_v16   ;;  %v20026_v25 = vld [vmem:[#allocation0 + $0x5d8] sm:$0xff]  ;;  %v14014_v54 = vpack.c.bf16 %v19963_v51, %v20010_v10  ;;  %v14019_v35 = vpack.c.bf16 %v19965_v26, %v20012_v44 }
 0x41d   : > { %7100 = vst.msk [vmem:[#allocation0 + $0x1187] ss:$16 sm:$0x30] %vm1398_vm0, %v16906_v23   ;;  %7102 = vst.msk [vmem:[#allocation0 + $0x1187] ss:$16 sm:$0xc0] %vm1398_vm0, %v16906_v23   ;;  %v14024_v11 = vpack.c.bf16 %v19967_v47, %v20014_v57 }
 0x41e   : > { %15388 = vst [vmem:[%s19409_s22 + $0x268] sm:$0xff] %v13979_v6   ;;  %v20028_v59 = vld [vmem:[#allocation0 + $0x5e8] sm:$0xff]  ;;  %v20030_v48 = vld [vmem:[#allocation0 + $0x5f8] sm:$0xff]  ;;  %v20032_v28 = vld [vmem:[#allocation0 + $0x570] sm:$0xff] }
 0x41f   : > { %v20034_v40 = vld [vmem:[#allocation0 + $0x580] sm:$0xff]  ;;  %v20036_v31 = vld [vmem:[#allocation0 + $0x590] sm:$0xff]  ;;  %7083 = vst.msk [vmem:[#allocation0 + $0x1107] ss:$16 sm:$0x3] %vm1398_vm0, %v16905_v29   ;;  %15389 = vst [vmem:[%s19409_s22 + $0x270] sm:$0xff] %v13984_v2   ;;  %v14029_v55 = vpack.c.bf16 %v19986_v60, %v20032_v28 }
 0x420   : > { %7085 = vst.msk [vmem:[#allocation0 + $0x1107] ss:$16 sm:$0xc] %vm1398_vm0, %v16905_v29   ;;  %7087 = vst.msk [vmem:[#allocation0 + $0x1107] ss:$16 sm:$0x30] %vm1398_vm0, %v16905_v29   ;;  %v14034_v27 = vpack.c.bf16 %v19988_v46, %v20034_v40  ;;  %v14039_v1 = vpack.c.bf16 %v19990_v62, %v20036_v31 }
 0x421   : > { %7089 = vst.msk [vmem:[#allocation0 + $0x1107] ss:$16 sm:$0xc0] %vm1398_vm0, %v16905_v29   ;;  %15390 = vst [vmem:[%s19409_s22 + $0x278] sm:$0xff] %v13989_v53   ;;  %v20051_v22 = vld [vmem:[#allocation0 + $0x608] sm:$0xff]  ;;  %v20053_v52 = vld [vmem:[#allocation0 + $0x618] sm:$0xff] }
 0x422   : > { %15391 = vst [vmem:[%s19409_s22 + $0x280] sm:$0xff] %v13994_v38   ;;  %v20055_v34 = vld [vmem:[#allocation0 + $0x628] sm:$0xff]  ;;  %v20057_v36 = vld [vmem:[#allocation0 + $0x5a0] sm:$0xff]  ;;  %v20059_v37 = vld [vmem:[#allocation0 + $0x5b0] sm:$0xff] }
 0x423   : > { %v20061_v19 = vld [vmem:[#allocation0 + $0x5c0] sm:$0xff]  ;;  %7122 = vst.msk [vmem:[#allocation0 + $0x1287] ss:$16 sm:$0x3] %vm1398_vm0, %v16911_v39   ;;  %15392 = vst [vmem:[%s19409_s22 + $0x288] sm:$0xff] %v13999_v61   ;;  %v20076_v7 = vld [vmem:[#allocation0 + $0x638] sm:$0xff]  ;;  %v14044_v56 = vpack.c.bf16 %v20004_v41, %v20057_v36  ;;  %v14049_v32 = vpack.c.bf16 %v20006_v4, %v20059_v37 }
 0x424   : > { %7124 = vst.msk [vmem:[#allocation0 + $0x1287] ss:$16 sm:$0xc] %vm1398_vm0, %v16911_v39   ;;  %7126 = vst.msk [vmem:[#allocation0 + $0x1287] ss:$16 sm:$0x30] %vm1398_vm0, %v16911_v39   ;;  %v14054_v33 = vpack.c.bf16 %v20008_v58, %v20061_v19 }
 0x425   : > { %7128 = vst.msk [vmem:[#allocation0 + $0x1287] ss:$16 sm:$0xc0] %vm1398_vm0, %v16911_v39   ;;  %15393 = vst [vmem:[%s19409_s22 + $0x290] sm:$0xff] %v14004_v30   ;;  %v20078_v18 = vld [vmem:[#allocation0 + $0x648] sm:$0xff]  ;;  %v20080_v20 = vld [vmem:[#allocation0 + $0x658] sm:$0xff] }
 0x426   : > { %15394 = vst [vmem:[%s19409_s22 + $0x298] sm:$0xff] %v14009_v43   ;;  %v8484_v13 = vld [vmem:[#allocation0 + $0x5d0] sm:$0xff]  ;;  %v8498_v14 = vld [vmem:[#allocation0 + $0x5e0] sm:$0xff]  ;;  %7109 = vst.msk [vmem:[#allocation0 + $0x1207] ss:$16 sm:$0x3] %vm1398_vm0, %v16910_v42  }
 0x427   : > { %v8512_v15 = vld [vmem:[#allocation0 + $0x5f0] sm:$0xff]  ;;  %7111 = vst.msk [vmem:[#allocation0 + $0x1207] ss:$16 sm:$0xc] %vm1398_vm0, %v16910_v42   ;;  %15395 = vst [vmem:[%s19409_s22 + $0x2a0] sm:$0xff] %v14014_v54   ;;  %v20095_v50 = vld [vmem:[#allocation0 + $0x668] sm:$0xff]  ;;  %v14059_v47 = vpack.c.bf16 %v20026_v25, %v8484_v13  ;;  %v14064_v8 = vpack.c.bf16 %v20028_v59, %v8498_v14 }
 0x428   : > { %7113 = vst.msk [vmem:[#allocation0 + $0x1207] ss:$16 sm:$0x30] %vm1398_vm0, %v16910_v42   ;;  %7115 = vst.msk [vmem:[#allocation0 + $0x1207] ss:$16 sm:$0xc0] %vm1398_vm0, %v16910_v42   ;;  %v14069_v45 = vpack.c.bf16 %v20030_v48, %v8512_v15 }
 0x429   : > { %15396 = vst [vmem:[%s19409_s22 + $0x2a8] sm:$0xff] %v14019_v35   ;;  %15397 = vst [vmem:[%s19409_s22 + $0x2b0] sm:$0xff] %v14024_v11   ;;  %v20097_v51 = vld [vmem:[#allocation0 + $0x678] sm:$0xff]  ;;  %v20099_v26 = vld [vmem:[#allocation0 + $0x688] sm:$0xff] }
 0x42a   : > { %v8526_v3 = vld [vmem:[#allocation0 + $0x600] sm:$0xff]  ;;  %v8540_v16 = vld [vmem:[#allocation0 + $0x610] sm:$0xff]  ;;  %7148 = vst.msk [vmem:[#allocation0 + $0x1387] ss:$16 sm:$0x3] %vm1398_vm0, %v16916_v0   ;;  %15398 = vst [vmem:[%s19409_s22 + $0x2b8] sm:$0xff] %v14029_v55  }
 0x42b   : > { %v8554_v6 = vld [vmem:[#allocation0 + $0x620] sm:$0xff]  ;;  %7150 = vst.msk [vmem:[#allocation0 + $0x1387] ss:$16 sm:$0xc] %vm1398_vm0, %v16916_v0   ;;  %15399 = vst [vmem:[%s19409_s22 + $0x2c0] sm:$0xff] %v14034_v27   ;;  %v20111_v23 = vld [vmem:[#allocation0 + $0x698] sm:$0xff]  ;;  %v14074_v53 = vpack.c.bf16 %v20051_v22, %v8526_v3  ;;  %v14079_v49 = vpack.c.bf16 %v20053_v52, %v8540_v16 }
 0x42c   : > { %7152 = vst.msk [vmem:[#allocation0 + $0x1387] ss:$16 sm:$0x30] %vm1398_vm0, %v16916_v0   ;;  %7154 = vst.msk [vmem:[#allocation0 + $0x1387] ss:$16 sm:$0xc0] %vm1398_vm0, %v16916_v0   ;;  %v14084_v5 = vpack.c.bf16 %v20055_v34, %v8554_v6 }
 0x42d   : > { %15400 = vst [vmem:[%s19409_s22 + $0x2c8] sm:$0xff] %v14039_v1   ;;  %v20113_v24 = vld [vmem:[#allocation0 + $0x6a8] sm:$0xff]  ;;  %v20115_v60 = vld [vmem:[#allocation0 + $0x6b8] sm:$0xff]  ;;  %v8568_v46 = vld [vmem:[#allocation0 + $0x630] sm:$0xff] }
 0x42e   : > { %v8582_v62 = vld [vmem:[#allocation0 + $0x640] sm:$0xff]  ;;  %v8596_v2 = vld [vmem:[#allocation0 + $0x650] sm:$0xff]  ;;  %7135 = vst.msk [vmem:[#allocation0 + $0x1307] ss:$16 sm:$0x3] %vm1398_vm0, %v16915_v12   ;;  %15401 = vst [vmem:[%s19409_s22 + $0x2d0] sm:$0xff] %v14044_v56   ;;  %v14089_v44 = vpack.c.bf16 %v20076_v7, %v8568_v46 }
 0x42f   : > { %7137 = vst.msk [vmem:[#allocation0 + $0x1307] ss:$16 sm:$0xc] %vm1398_vm0, %v16915_v12   ;;  %7139 = vst.msk [vmem:[#allocation0 + $0x1307] ss:$16 sm:$0x30] %vm1398_vm0, %v16915_v12   ;;  %v14094_v57 = vpack.c.bf16 %v20078_v18, %v8582_v62  ;;  %v14099_v61 = vpack.c.bf16 %v20080_v20, %v8596_v2 }
 0x430   : > { %7141 = vst.msk [vmem:[#allocation0 + $0x1307] ss:$16 sm:$0xc0] %vm1398_vm0, %v16915_v12   ;;  %15402 = vst [vmem:[%s19409_s22 + $0x2d8] sm:$0xff] %v14049_v32   ;;  %v20127_v38 = vld [vmem:[#allocation0 + $0x6c8] sm:$0xff]  ;;  %v20129_v29 = vld [vmem:[#allocation0 + $0x6d8] sm:$0xff] }
 0x431   : > { %15403 = vst [vmem:[%s19409_s22 + $0x2e0] sm:$0xff] %v14054_v33   ;;  %v20131_v41 = vld [vmem:[#allocation0 + $0x6e8] sm:$0xff]  ;;  %v8610_v4 = vld [vmem:[#allocation0 + $0x660] sm:$0xff]  ;;  %v8624_v58 = vld [vmem:[#allocation0 + $0x670] sm:$0xff] }
 0x432   : > { %v8638_v10 = vld [vmem:[#allocation0 + $0x680] sm:$0xff]  ;;  %7174 = vst.msk [vmem:[#allocation0 + $0x1487] ss:$16 sm:$0x3] %vm1398_vm0, %v16921_v9   ;;  %15404 = vst [vmem:[%s19409_s22 + $0x2e8] sm:$0xff] %v14059_v47   ;;  %v20143_v30 = vld [vmem:[#allocation0 + $0x6f8] sm:$0xff]  ;;  %v14104_v28 = vpack.c.bf16 %v20095_v50, %v8610_v4  ;;  %v14109_v40 = vpack.c.bf16 %v20097_v51, %v8624_v58 }
 0x433   : > { %7176 = vst.msk [vmem:[#allocation0 + $0x1487] ss:$16 sm:$0xc] %vm1398_vm0, %v16921_v9   ;;  %7178 = vst.msk [vmem:[#allocation0 + $0x1487] ss:$16 sm:$0x30] %vm1398_vm0, %v16921_v9   ;;  %v14114_v31 = vpack.c.bf16 %v20099_v26, %v8638_v10 }
 0x434   : > { %7180 = vst.msk [vmem:[#allocation0 + $0x1487] ss:$16 sm:$0xc0] %vm1398_vm0, %v16921_v9   ;;  %15405 = vst [vmem:[%s19409_s22 + $0x2f0] sm:$0xff] %v14064_v8   ;;  %v20145_v43 = vld [vmem:[#allocation0 + $0x708] sm:$0xff]  ;;  %v20147_v39 = vld [vmem:[#allocation0 + $0x718] sm:$0xff] }
 0x435   : > { %15406 = vst [vmem:[%s19409_s22 + $0x2f8] sm:$0xff] %v14069_v45   ;;  %v8652_v25 = vld [vmem:[#allocation0 + $0x690] sm:$0xff]  ;;  %v8666_v59 = vld [vmem:[#allocation0 + $0x6a0] sm:$0xff]  ;;  %7161 = vst.msk [vmem:[#allocation0 + $0x1407] ss:$16 sm:$0x3] %vm1398_vm0, %v16920_v17  }
 0x436   : > { %v8680_v48 = vld [vmem:[#allocation0 + $0x6b0] sm:$0xff]  ;;  %7163 = vst.msk [vmem:[#allocation0 + $0x1407] ss:$16 sm:$0xc] %vm1398_vm0, %v16920_v17   ;;  %15407 = vst [vmem:[%s19409_s22 + $0x300] sm:$0xff] %v14074_v53   ;;  %v20159_v54 = vld [vmem:[#allocation0 + $0x728] sm:$0xff]  ;;  %v14119_v52 = vpack.c.bf16 %v20111_v23, %v8652_v25  ;;  %v14124_v34 = vpack.c.bf16 %v20113_v24, %v8666_v59 }
 0x437   : > { %7165 = vst.msk [vmem:[#allocation0 + $0x1407] ss:$16 sm:$0x30] %vm1398_vm0, %v16920_v17   ;;  %7167 = vst.msk [vmem:[#allocation0 + $0x1407] ss:$16 sm:$0xc0] %vm1398_vm0, %v16920_v17   ;;  %v14129_v36 = vpack.c.bf16 %v20115_v60, %v8680_v48 }
 0x438   : > { %15408 = vst [vmem:[%s19409_s22 + $0x308] sm:$0xff] %v14079_v49   ;;  %15409 = vst [vmem:[%s19409_s22 + $0x310] sm:$0xff] %v14084_v5   ;;  %v20161_v35 = vld [vmem:[#allocation0 + $0x738] sm:$0xff]  ;;  %v20163_v11 = vld [vmem:[#allocation0 + $0x748] sm:$0xff] }
 0x439   : > { %v8694_v42 = vld [vmem:[#allocation0 + $0x6c0] sm:$0xff]  ;;  %v8708_v21 = vld [vmem:[#allocation0 + $0x6d0] sm:$0xff]  ;;  %15410 = vst [vmem:[%s19409_s22 + $0x318] sm:$0xff] %v14089_v44   ;;  %15411 = vst [vmem:[%s19409_s22 + $0x320] sm:$0xff] %v14094_v57  }
 0x43a   : > { %v8722_v22 = vld [vmem:[#allocation0 + $0x6e0] sm:$0xff]  ;;  %15412 = vst [vmem:[%s19409_s22 + $0x328] sm:$0xff] %v14099_v61   ;;  %v20171_v37 = vld [vmem:[#allocation0 + $0x758] sm:$0xff]  ;;  %v20173_v19 = vld [vmem:[#allocation0 + $0x768] sm:$0xff]  ;;  %v14134_v1 = vpack.c.bf16 %v20127_v38, %v8694_v42  ;;  %v14139_v0 = vpack.c.bf16 %v20129_v29, %v8708_v21 }
 0x43b   : > { %v20175_v55 = vld [vmem:[#allocation0 + $0x778] sm:$0xff]  ;;  %v8736_v27 = vld [vmem:[#allocation0 + $0x6f0] sm:$0xff]  ;;  %v14144_v63 = vpack.c.bf16 %v20131_v41, %v8722_v22  ;;  %v8750_v7 = vld [vmem:[#allocation0 + $0x700] sm:$0xff]  ;;  %15413 = vst [vmem:[%s19409_s22 + $0x330] sm:$0xff] %v14104_v28  }
 0x43c   : > { %v8764_v18 = vld [vmem:[#allocation0 + $0x710] sm:$0xff]  ;;  %15414 = vst [vmem:[%s19409_s22 + $0x338] sm:$0xff] %v14109_v40   ;;  %15415 = vst [vmem:[%s19409_s22 + $0x340] sm:$0xff] %v14114_v31   ;;  %v20183_v20 = vld [vmem:[#allocation0 + $0x788] sm:$0xff]  ;;  %v14149_v15 = vpack.c.bf16 %v20143_v30, %v8736_v27  ;;  %v14154_v12 = vpack.c.bf16 %v20145_v43, %v8750_v7 }
 0x43d   : > { %v20185_v13 = vld [vmem:[#allocation0 + $0x798] sm:$0xff]  ;;  %v20187_v14 = vld [vmem:[#allocation0 + $0x7a8] sm:$0xff]  ;;  %v8778_v56 = vld [vmem:[#allocation0 + $0x720] sm:$0xff]  ;;  %v14159_v50 = vpack.c.bf16 %v20147_v39, %v8764_v18  ;;  %15416 = vst [vmem:[%s19409_s22 + $0x348] sm:$0xff] %v14119_v52  }
 0x43e   : > { %v8792_v32 = vld [vmem:[#allocation0 + $0x730] sm:$0xff]  ;;  %v8806_v33 = vld [vmem:[#allocation0 + $0x740] sm:$0xff]  ;;  %15417 = vst [vmem:[%s19409_s22 + $0x350] sm:$0xff] %v14124_v34   ;;  %15418 = vst [vmem:[%s19409_s22 + $0x358] sm:$0xff] %v14129_v36   ;;  %v14164_v16 = vpack.c.bf16 %v20159_v54, %v8778_v56 }
 0x43f   : > { %v20195_v51 = vld [vmem:[#allocation0 + $0x7b8] sm:$0xff]  ;;  %v20197_v26 = vld [vmem:[#allocation0 + $0x7c8] sm:$0xff]  ;;  %v8820_v8 = vld [vmem:[#allocation0 + $0x750] sm:$0xff]  ;;  %v14169_v6 = vpack.c.bf16 %v20161_v35, %v8792_v32  ;;  %v14174_v9 = vpack.c.bf16 %v20163_v11, %v8806_v33  ;;  %15419 = vst [vmem:[%s19409_s22 + $0x360] sm:$0xff] %v14134_v1  }
 0x440   : > { %v20199_v47 = vld [vmem:[#allocation0 + $0x7d8] sm:$0xff]  ;;  %v8834_v45 = vld [vmem:[#allocation0 + $0x760] sm:$0xff]  ;;  %v8848_v3 = vld [vmem:[#allocation0 + $0x770] sm:$0xff]  ;;  %15420 = vst [vmem:[%s19409_s22 + $0x368] sm:$0xff] %v14139_v0   ;;  %v14179_v53 = vpack.c.bf16 %v20171_v37, %v8820_v8 }
 0x441   : > { %15421 = vst [vmem:[%s19409_s22 + $0x370] sm:$0xff] %v14144_v63   ;;  %v20207_v23 = vld [vmem:[#allocation0 + $0x7e8] sm:$0xff]  ;;  %v20209_v24 = vld [vmem:[#allocation0 + $0x7f8] sm:$0xff]  ;;  %v8862_v46 = vld [vmem:[#allocation0 + $0x780] sm:$0xff]  ;;  %v14184_v49 = vpack.c.bf16 %v20173_v19, %v8834_v45  ;;  %v14189_v5 = vpack.c.bf16 %v20175_v55, %v8848_v3 }
 0x442   : > { %v20211_v60 = vld [vmem:[#allocation0 + $0x808] sm:$0xff]  ;;  %v8876_v62 = vld [vmem:[#allocation0 + $0x790] sm:$0xff]  ;;  %v8890_v2 = vld [vmem:[#allocation0 + $0x7a0] sm:$0xff]  ;;  %15422 = vst [vmem:[%s19409_s22 + $0x378] sm:$0xff] %v14149_v15   ;;  %v14194_v10 = vpack.c.bf16 %v20183_v20, %v8862_v46 }
 0x443   : > { %15423 = vst [vmem:[%s19409_s22 + $0x380] sm:$0xff] %v14154_v12   ;;  %15424 = vst [vmem:[%s19409_s22 + $0x388] sm:$0xff] %v14159_v50   ;;  %v20219_v17 = vld [vmem:[#allocation0 + $0x818] sm:$0xff]  ;;  %v20221_v38 = vld [vmem:[#allocation0 + $0x828] sm:$0xff]  ;;  %v14199_v44 = vpack.c.bf16 %v20185_v13, %v8876_v62  ;;  %v14204_v57 = vpack.c.bf16 %v20187_v14, %v8890_v2 }
 0x444   : > { %v20223_v29 = vld [vmem:[#allocation0 + $0x838] sm:$0xff]  ;;  %v8904_v41 = vld [vmem:[#allocation0 + $0x7b0] sm:$0xff]  ;;  %v8918_v4 = vld [vmem:[#allocation0 + $0x7c0] sm:$0xff]  ;;  %15425 = vst [vmem:[%s19409_s22 + $0x390] sm:$0xff] %v14164_v16  }
 0x445   : > { %v8932_v58 = vld [vmem:[#allocation0 + $0x7d0] sm:$0xff]  ;;  %15426 = vst [vmem:[%s19409_s22 + $0x398] sm:$0xff] %v14169_v6   ;;  %15427 = vst [vmem:[%s19409_s22 + $0x3a0] sm:$0xff] %v14174_v9   ;;  %v20231_v61 = vld [vmem:[#allocation0 + $0x848] sm:$0xff]  ;;  %v14209_v59 = vpack.c.bf16 %v20195_v51, %v8904_v41  ;;  %v14214_v48 = vpack.c.bf16 %v20197_v26, %v8918_v4 }
 0x446   : > { %v20233_v30 = vld [vmem:[#allocation0 + $0x858] sm:$0xff]  ;;  %v20235_v43 = vld [vmem:[#allocation0 + $0x868] sm:$0xff]  ;;  %v8946_v39 = vld [vmem:[#allocation0 + $0x7e0] sm:$0xff]  ;;  %v14219_v28 = vpack.c.bf16 %v20199_v47, %v8932_v58  ;;  %15428 = vst [vmem:[%s19409_s22 + $0x3a8] sm:$0xff] %v14179_v53  }
 0x447   : > { %v8960_v25 = vld [vmem:[#allocation0 + $0x7f0] sm:$0xff]  ;;  %v8974_v40 = vld [vmem:[#allocation0 + $0x800] sm:$0xff]  ;;  %15429 = vst [vmem:[%s19409_s22 + $0x3b0] sm:$0xff] %v14184_v49   ;;  %15430 = vst [vmem:[%s19409_s22 + $0x3b8] sm:$0xff] %v14189_v5   ;;  %v14224_v11 = vpack.c.bf16 %v20207_v23, %v8946_v39 }
 0x448   : > { %v20243_v31 = vld [vmem:[#allocation0 + $0x878] sm:$0xff]  ;;  %v20245_v54 = vld [vmem:[#allocation0 + $0x888] sm:$0xff]  ;;  %v14229_v42 = vpack.c.bf16 %v20209_v24, %v8960_v25  ;;  %v8988_v21 = vld [vmem:[#allocation0 + $0x810] sm:$0xff]  ;;  %v14234_v34 = vpack.c.bf16 %v20211_v60, %v8974_v40  ;;  %15431 = vst [vmem:[%s19409_s22 + $0x3c0] sm:$0xff] %v14194_v10  }
 0x449   : > { %v20247_v35 = vld [vmem:[#allocation0 + $0x898] sm:$0xff]  ;;  %v9002_v22 = vld [vmem:[#allocation0 + $0x820] sm:$0xff]  ;;  %v9016_v52 = vld [vmem:[#allocation0 + $0x830] sm:$0xff]  ;;  %15432 = vst [vmem:[%s19409_s22 + $0x3c8] sm:$0xff] %v14199_v44   ;;  %v14239_v0 = vpack.c.bf16 %v20219_v17, %v8988_v21 }
 0x44a   : > { %15433 = vst [vmem:[%s19409_s22 + $0x3d0] sm:$0xff] %v14204_v57   ;;  %v20255_v36 = vld [vmem:[#allocation0 + $0x8a8] sm:$0xff]  ;;  %v20257_v37 = vld [vmem:[#allocation0 + $0x8b8] sm:$0xff]  ;;  %v9030_v55 = vld [vmem:[#allocation0 + $0x840] sm:$0xff]  ;;  %v14244_v63 = vpack.c.bf16 %v20221_v38, %v9002_v22  ;;  %v14249_v7 = vpack.c.bf16 %v20223_v29, %v9016_v52 }
 0x44b   : > { %v20259_v19 = vld [vmem:[#allocation0 + $0x8c8] sm:$0xff]  ;;  %v9044_v27 = vld [vmem:[#allocation0 + $0x850] sm:$0xff]  ;;  %v9058_v1 = vld [vmem:[#allocation0 + $0x860] sm:$0xff]  ;;  %15434 = vst [vmem:[%s19409_s22 + $0x3d8] sm:$0xff] %v14209_v59   ;;  %v14254_v32 = vpack.c.bf16 %v20231_v61, %v9030_v55 }
 0x44c   : > { %15435 = vst [vmem:[%s19409_s22 + $0x3e0] sm:$0xff] %v14214_v48   ;;  %15436 = vst [vmem:[%s19409_s22 + $0x3e8] sm:$0xff] %v14219_v28   ;;  %v20267_v18 = vld [vmem:[#allocation0 + $0x8d8] sm:$0xff]  ;;  %v20269_v20 = vld [vmem:[#allocation0 + $0x8e8] sm:$0xff]  ;;  %v14259_v33 = vpack.c.bf16 %v20233_v30, %v9044_v27  ;;  %v14264_v12 = vpack.c.bf16 %v20235_v43, %v9058_v1 }
 0x44d   : > { %v20271_v13 = vld [vmem:[#allocation0 + $0x8f8] sm:$0xff]  ;;  %v9072_v14 = vld [vmem:[#allocation0 + $0x870] sm:$0xff]  ;;  %v9086_v15 = vld [vmem:[#allocation0 + $0x880] sm:$0xff]  ;;  %15437 = vst [vmem:[%s19409_s22 + $0x3f0] sm:$0xff] %v14224_v11  }
 0x44e   : > { %v9100_v56 = vld [vmem:[#allocation0 + $0x890] sm:$0xff]  ;;  %15438 = vst [vmem:[%s19409_s22 + $0x3f8] sm:$0xff] %v14229_v42   ;;  %15439 = vst [vmem:[%s19409_s22 + $0x400] sm:$0xff] %v14234_v34   ;;  %v20279_v50 = vld [vmem:[#allocation0 + $0x908] sm:$0xff]  ;;  %v14269_v3 = vpack.c.bf16 %v20243_v31, %v9072_v14  ;;  %v14274_v16 = vpack.c.bf16 %v20245_v54, %v9086_v15 }
 0x44f   : > { %v20281_v51 = vld [vmem:[#allocation0 + $0x918] sm:$0xff]  ;;  %v20283_v26 = vld [vmem:[#allocation0 + $0x928] sm:$0xff]  ;;  %v9114_v47 = vld [vmem:[#allocation0 + $0x8a0] sm:$0xff]  ;;  %v14279_v6 = vpack.c.bf16 %v20247_v35, %v9100_v56  ;;  %15440 = vst [vmem:[%s19409_s22 + $0x408] sm:$0xff] %v14239_v0  }
 0x450   : > { %v9128_v8 = vld [vmem:[#allocation0 + $0x8b0] sm:$0xff]  ;;  %v9142_v45 = vld [vmem:[#allocation0 + $0x8c0] sm:$0xff]  ;;  %15441 = vst [vmem:[%s19409_s22 + $0x410] sm:$0xff] %v14244_v63   ;;  %15442 = vst [vmem:[%s19409_s22 + $0x418] sm:$0xff] %v14249_v7   ;;  %v14284_v2 = vpack.c.bf16 %v20255_v36, %v9114_v47 }
 0x451   : > { %v20291_v9 = vld [vmem:[#allocation0 + $0x938] sm:$0xff]  ;;  %v20293_v23 = vld [vmem:[#allocation0 + $0x948] sm:$0xff]  ;;  %v9156_v60 = vld [vmem:[#allocation0 + $0x8d0] sm:$0xff]  ;;  %v14289_v53 = vpack.c.bf16 %v20257_v37, %v9128_v8  ;;  %v14294_v49 = vpack.c.bf16 %v20259_v19, %v9142_v45  ;;  %15443 = vst [vmem:[%s19409_s22 + $0x420] sm:$0xff] %v14254_v32  }
 0x452   : > { %v20295_v24 = vld [vmem:[#allocation0 + $0x958] sm:$0xff]  ;;  %v9170_v46 = vld [vmem:[#allocation0 + $0x8e0] sm:$0xff]  ;;  %v9184_v62 = vld [vmem:[#allocation0 + $0x8f0] sm:$0xff]  ;;  %15444 = vst [vmem:[%s19409_s22 + $0x428] sm:$0xff] %v14259_v33   ;;  %v14299_v29 = vpack.c.bf16 %v20267_v18, %v9156_v60 }
 0x453   : > { %15445 = vst [vmem:[%s19409_s22 + $0x430] sm:$0xff] %v14264_v12   ;;  %v20303_v5 = vld [vmem:[#allocation0 + $0x968] sm:$0xff]  ;;  %v20305_v17 = vld [vmem:[#allocation0 + $0x978] sm:$0xff]  ;;  %v14304_v41 = vpack.c.bf16 %v20269_v20, %v9170_v46  ;;  %v14309_v4 = vpack.c.bf16 %v20271_v13, %v9184_v62  ;;  %v9198_v58 = vld [vmem:[#allocation0 + $0x900] sm:$0xff] }
 0x454   : > { %v20307_v38 = vld [vmem:[#allocation0 + $0x988] sm:$0xff]  ;;  %v9212_v10 = vld [vmem:[#allocation0 + $0x910] sm:$0xff]  ;;  %v9226_v44 = vld [vmem:[#allocation0 + $0x920] sm:$0xff]  ;;  %15446 = vst [vmem:[%s19409_s22 + $0x438] sm:$0xff] %v14269_v3   ;;  %v14314_v59 = vpack.c.bf16 %v20279_v50, %v9198_v58 }
 0x455   : > { %15447 = vst [vmem:[%s19409_s22 + $0x440] sm:$0xff] %v14274_v16   ;;  %15448 = vst [vmem:[%s19409_s22 + $0x448] sm:$0xff] %v14279_v6   ;;  %v20315_v57 = vld [vmem:[#allocation0 + $0x998] sm:$0xff]  ;;  %v20317_v61 = vld [vmem:[#allocation0 + $0x9a8] sm:$0xff]  ;;  %v14319_v48 = vpack.c.bf16 %v20281_v51, %v9212_v10  ;;  %v14324_v28 = vpack.c.bf16 %v20283_v26, %v9226_v44 }
 0x456   : > { %v20319_v30 = vld [vmem:[#allocation0 + $0x9b8] sm:$0xff]  ;;  %v9240_v43 = vld [vmem:[#allocation0 + $0x930] sm:$0xff]  ;;  %v9254_v39 = vld [vmem:[#allocation0 + $0x940] sm:$0xff]  ;;  %15449 = vst [vmem:[%s19409_s22 + $0x450] sm:$0xff] %v14284_v2  }
 0x457   : > { %v9268_v25 = vld [vmem:[#allocation0 + $0x950] sm:$0xff]  ;;  %15450 = vst [vmem:[%s19409_s22 + $0x458] sm:$0xff] %v14289_v53   ;;  %15451 = vst [vmem:[%s19409_s22 + $0x460] sm:$0xff] %v14294_v49   ;;  %v20327_v40 = vld [vmem:[#allocation0 + $0x9c8] sm:$0xff]  ;;  %v14329_v21 = vpack.c.bf16 %v20291_v9, %v9240_v43  ;;  %v14334_v22 = vpack.c.bf16 %v20293_v23, %v9254_v39 }
 0x458   : > { %v20329_v31 = vld [vmem:[#allocation0 + $0x9d8] sm:$0xff]  ;;  %v20331_v54 = vld [vmem:[#allocation0 + $0x9e8] sm:$0xff]  ;;  %v9282_v35 = vld [vmem:[#allocation0 + $0x960] sm:$0xff]  ;;  %v14339_v52 = vpack.c.bf16 %v20295_v24, %v9268_v25  ;;  %15452 = vst [vmem:[%s19409_s22 + $0x468] sm:$0xff] %v14299_v29  }
 0x459   : > { %v9296_v11 = vld [vmem:[#allocation0 + $0x970] sm:$0xff]  ;;  %v9310_v42 = vld [vmem:[#allocation0 + $0x980] sm:$0xff]  ;;  %15453 = vst [vmem:[%s19409_s22 + $0x470] sm:$0xff] %v14304_v41   ;;  %15454 = vst [vmem:[%s19409_s22 + $0x478] sm:$0xff] %v14309_v4   ;;  %v14344_v1 = vpack.c.bf16 %v20303_v5, %v9282_v35 }
 0x45a   : > { %v20339_v34 = vld [vmem:[#allocation0 + $0x9f8] sm:$0xff]  ;;  %v20341_v36 = vld [vmem:[#allocation0 + $0xa08] sm:$0xff]  ;;  %v9324_v19 = vld [vmem:[#allocation0 + $0x990] sm:$0xff]  ;;  %v14349_v0 = vpack.c.bf16 %v20305_v17, %v9296_v11  ;;  %v14354_v63 = vpack.c.bf16 %v20307_v38, %v9310_v42  ;;  %15455 = vst [vmem:[%s19409_s22 + $0x480] sm:$0xff] %v14314_v59  }
 0x45b   : > { %v20343_v37 = vld [vmem:[#allocation0 + $0xa18] sm:$0xff]  ;;  %v9338_v55 = vld [vmem:[#allocation0 + $0x9a0] sm:$0xff]  ;;  %v9352_v27 = vld [vmem:[#allocation0 + $0x9b0] sm:$0xff]  ;;  %15456 = vst [vmem:[%s19409_s22 + $0x488] sm:$0xff] %v14319_v48   ;;  %v14359_v56 = vpack.c.bf16 %v20315_v57, %v9324_v19 }
 0x45c   : > { %15457 = vst [vmem:[%s19409_s22 + $0x490] sm:$0xff] %v14324_v28   ;;  %v20351_v7 = vld [vmem:[#allocation0 + $0xa28] sm:$0xff]  ;;  %v20353_v18 = vld [vmem:[#allocation0 + $0xa38] sm:$0xff]  ;;  %v9366_v13 = vld [vmem:[#allocation0 + $0x9c0] sm:$0xff]  ;;  %v14364_v32 = vpack.c.bf16 %v20317_v61, %v9338_v55  ;;  %v14369_v33 = vpack.c.bf16 %v20319_v30, %v9352_v27 }
 0x45d   : > { %v20355_v20 = vld [vmem:[#allocation0 + $0xa48] sm:$0xff]  ;;  %v9380_v14 = vld [vmem:[#allocation0 + $0x9d0] sm:$0xff]  ;;  %v9394_v15 = vld [vmem:[#allocation0 + $0x9e0] sm:$0xff]  ;;  %15458 = vst [vmem:[%s19409_s22 + $0x498] sm:$0xff] %v14329_v21   ;;  %v14374_v47 = vpack.c.bf16 %v20327_v40, %v9366_v13 }
 0x45e   : > { %15459 = vst [vmem:[%s19409_s22 + $0x4a0] sm:$0xff] %v14334_v22   ;;  %15460 = vst [vmem:[%s19409_s22 + $0x4a8] sm:$0xff] %v14339_v52   ;;  %v20363_v12 = vld [vmem:[#allocation0 + $0xa58] sm:$0xff]  ;;  %v20365_v50 = vld [vmem:[#allocation0 + $0xa68] sm:$0xff]  ;;  %v14379_v8 = vpack.c.bf16 %v20329_v31, %v9380_v14  ;;  %v14384_v45 = vpack.c.bf16 %v20331_v54, %v9394_v15 }
 0x45f   : > { %v20367_v51 = vld [vmem:[#allocation0 + $0xa78] sm:$0xff]  ;;  %v9408_v26 = vld [vmem:[#allocation0 + $0x9f0] sm:$0xff]  ;;  %v9422_v3 = vld [vmem:[#allocation0 + $0xa00] sm:$0xff]  ;;  %15461 = vst [vmem:[%s19409_s22 + $0x4b0] sm:$0xff] %v14344_v1  }
 0x460   : > { %v9436_v16 = vld [vmem:[#allocation0 + $0xa10] sm:$0xff]  ;;  %15462 = vst [vmem:[%s19409_s22 + $0x4b8] sm:$0xff] %v14349_v0   ;;  %15463 = vst [vmem:[%s19409_s22 + $0x4c0] sm:$0xff] %v14354_v63   ;;  %v20375_v6 = vld [vmem:[#allocation0 + $0xa88] sm:$0xff]  ;;  %v14389_v24 = vpack.c.bf16 %v20339_v34, %v9408_v26  ;;  %v14394_v2 = vpack.c.bf16 %v20341_v36, %v9422_v3 }
 0x461   : > { %v20377_v9 = vld [vmem:[#allocation0 + $0xa98] sm:$0xff]  ;;  %v20379_v23 = vld [vmem:[#allocation0 + $0xaa8] sm:$0xff]  ;;  %v9450_v60 = vld [vmem:[#allocation0 + $0xa20] sm:$0xff]  ;;  %v14399_v53 = vpack.c.bf16 %v20343_v37, %v9436_v16  ;;  %15464 = vst [vmem:[%s19409_s22 + $0x4c8] sm:$0xff] %v14359_v56  }
 0x462   : > { %v9464_v46 = vld [vmem:[#allocation0 + $0xa30] sm:$0xff]  ;;  %v9478_v62 = vld [vmem:[#allocation0 + $0xa40] sm:$0xff]  ;;  %15465 = vst [vmem:[%s19409_s22 + $0x4d0] sm:$0xff] %v14364_v32   ;;  %15466 = vst [vmem:[%s19409_s22 + $0x4d8] sm:$0xff] %v14369_v33   ;;  %v14404_v4 = vpack.c.bf16 %v20351_v7, %v9450_v60 }
 0x463   : > { %v20387_v49 = vld [vmem:[#allocation0 + $0xab8] sm:$0xff]  ;;  %v20389_v5 = vld [vmem:[#allocation0 + $0xac8] sm:$0xff]  ;;  %v9492_v38 = vld [vmem:[#allocation0 + $0xa50] sm:$0xff]  ;;  %v14409_v58 = vpack.c.bf16 %v20353_v18, %v9464_v46  ;;  %v14414_v10 = vpack.c.bf16 %v20355_v20, %v9478_v62  ;;  %15467 = vst [vmem:[%s19409_s22 + $0x4e0] sm:$0xff] %v14374_v47  }
 0x464   : > { %v20391_v17 = vld [vmem:[#allocation0 + $0xad8] sm:$0xff]  ;;  %v9506_v29 = vld [vmem:[#allocation0 + $0xa60] sm:$0xff]  ;;  %v9520_v41 = vld [vmem:[#allocation0 + $0xa70] sm:$0xff]  ;;  %15468 = vst [vmem:[%s19409_s22 + $0x4e8] sm:$0xff] %v14379_v8   ;;  %v14419_v25 = vpack.c.bf16 %v20363_v12, %v9492_v38 }
 0x465   : > { %15469 = vst [vmem:[%s19409_s22 + $0x4f0] sm:$0xff] %v14384_v45   ;;  %v20399_v44 = vld [vmem:[#allocation0 + $0xae8] sm:$0xff]  ;;  %v20401_v57 = vld [vmem:[#allocation0 + $0xaf8] sm:$0xff]  ;;  %v9534_v30 = vld [vmem:[#allocation0 + $0xa80] sm:$0xff]  ;;  %v14424_v59 = vpack.c.bf16 %v20365_v50, %v9506_v29  ;;  %v14429_v48 = vpack.c.bf16 %v20367_v51, %v9520_v41 }
 0x466   : > { %v20403_v61 = vld [vmem:[#allocation0 + $0xb08] sm:$0xff]  ;;  %v9548_v43 = vld [vmem:[#allocation0 + $0xa90] sm:$0xff]  ;;  %v9562_v39 = vld [vmem:[#allocation0 + $0xaa0] sm:$0xff]  ;;  %15470 = vst [vmem:[%s19409_s22 + $0x4f8] sm:$0xff] %v14389_v24   ;;  %v14434_v42 = vpack.c.bf16 %v20375_v6, %v9534_v30 }
 0x467   : > { %15471 = vst [vmem:[%s19409_s22 + $0x500] sm:$0xff] %v14394_v2   ;;  %15472 = vst [vmem:[%s19409_s22 + $0x508] sm:$0xff] %v14399_v53   ;;  %v20411_v28 = vld [vmem:[#allocation0 + $0xb18] sm:$0xff]  ;;  %v20413_v40 = vld [vmem:[#allocation0 + $0xb28] sm:$0xff]  ;;  %v14439_v21 = vpack.c.bf16 %v20377_v9, %v9548_v43  ;;  %v14444_v22 = vpack.c.bf16 %v20379_v23, %v9562_v39 }
 0x468   : > { %v20415_v31 = vld [vmem:[#allocation0 + $0xb38] sm:$0xff]  ;;  %v9576_v54 = vld [vmem:[#allocation0 + $0xab0] sm:$0xff]  ;;  %v9590_v35 = vld [vmem:[#allocation0 + $0xac0] sm:$0xff]  ;;  %15473 = vst [vmem:[%s19409_s22 + $0x510] sm:$0xff] %v14404_v4  }
 0x469   : > { %v9604_v11 = vld [vmem:[#allocation0 + $0xad0] sm:$0xff]  ;;  %15474 = vst [vmem:[%s19409_s22 + $0x518] sm:$0xff] %v14409_v58   ;;  %15475 = vst [vmem:[%s19409_s22 + $0x520] sm:$0xff] %v14414_v10   ;;  %v20423_v52 = vld [vmem:[#allocation0 + $0xb48] sm:$0xff]  ;;  %v14449_v55 = vpack.c.bf16 %v20387_v49, %v9576_v54  ;;  %v14454_v27 = vpack.c.bf16 %v20389_v5, %v9590_v35 }
 0x46a   : > { %v20425_v34 = vld [vmem:[#allocation0 + $0xb58] sm:$0xff]  ;;  %v20427_v36 = vld [vmem:[#allocation0 + $0xb68] sm:$0xff]  ;;  %v9618_v37 = vld [vmem:[#allocation0 + $0xae0] sm:$0xff]  ;;  %v14459_v1 = vpack.c.bf16 %v20391_v17, %v9604_v11  ;;  %15476 = vst [vmem:[%s19409_s22 + $0x528] sm:$0xff] %v14419_v25  }
 0x46b   : > { %v9632_v19 = vld [vmem:[#allocation0 + $0xaf0] sm:$0xff]  ;;  %v9646_v0 = vld [vmem:[#allocation0 + $0xb00] sm:$0xff]  ;;  %15477 = vst [vmem:[%s19409_s22 + $0x530] sm:$0xff] %v14424_v59   ;;  %15478 = vst [vmem:[%s19409_s22 + $0x538] sm:$0xff] %v14429_v48   ;;  %v14464_v20 = vpack.c.bf16 %v20399_v44, %v9618_v37 }
 0x46c   : > { %v20435_v63 = vld [vmem:[#allocation0 + $0xb78] sm:$0xff]  ;;  %v20437_v7 = vld [vmem:[#allocation0 + $0xb88] sm:$0xff]  ;;  %v14469_v13 = vpack.c.bf16 %v20401_v57, %v9632_v19  ;;  %v9660_v14 = vld [vmem:[#allocation0 + $0xb10] sm:$0xff]  ;;  %v14474_v32 = vpack.c.bf16 %v20403_v61, %v9646_v0  ;;  %15479 = vst [vmem:[%s19409_s22 + $0x540] sm:$0xff] %v14434_v42  }
 0x46d   : > { %v20439_v18 = vld [vmem:[#allocation0 + $0xb98] sm:$0xff]  ;;  %v9674_v15 = vld [vmem:[#allocation0 + $0xb20] sm:$0xff]  ;;  %v9688_v56 = vld [vmem:[#allocation0 + $0xb30] sm:$0xff]  ;;  %15480 = vst [vmem:[%s19409_s22 + $0x548] sm:$0xff] %v14439_v21   ;;  %v14479_v8 = vpack.c.bf16 %v20411_v28, %v9660_v14 }
 0x46e   : > { %15481 = vst [vmem:[%s19409_s22 + $0x550] sm:$0xff] %v14444_v22   ;;  %v20447_v33 = vld [vmem:[#allocation0 + $0xba8] sm:$0xff]  ;;  %v20449_v12 = vld [vmem:[#allocation0 + $0xbb8] sm:$0xff]  ;;  %v9702_v51 = vld [vmem:[#allocation0 + $0xb40] sm:$0xff]  ;;  %v14484_v45 = vpack.c.bf16 %v20413_v40, %v9674_v15  ;;  %v14489_v3 = vpack.c.bf16 %v20415_v31, %v9688_v56 }
 0x46f   : > { %v20451_v50 = vld [vmem:[#allocation0 + $0xbc8] sm:$0xff]  ;;  %v9716_v26 = vld [vmem:[#allocation0 + $0xb50] sm:$0xff]  ;;  %v9730_v47 = vld [vmem:[#allocation0 + $0xb60] sm:$0xff]  ;;  %15482 = vst [vmem:[%s19409_s22 + $0x558] sm:$0xff] %v14449_v55   ;;  %v14494_v46 = vpack.c.bf16 %v20423_v52, %v9702_v51 }
 0x470   : > { %15483 = vst [vmem:[%s19409_s22 + $0x560] sm:$0xff] %v14454_v27   ;;  %15484 = vst [vmem:[%s19409_s22 + $0x568] sm:$0xff] %v14459_v1   ;;  %v20459_v16 = vld [vmem:[#allocation0 + $0xbd8] sm:$0xff]  ;;  %v20461_v6 = vld [vmem:[#allocation0 + $0xbe8] sm:$0xff]  ;;  %v14499_v62 = vpack.c.bf16 %v20425_v34, %v9716_v26  ;;  %v14504_v2 = vpack.c.bf16 %v20427_v36, %v9730_v47 }
 0x471   : > { %v20463_v9 = vld [vmem:[#allocation0 + $0xbf8] sm:$0xff]  ;;  %v9744_v23 = vld [vmem:[#allocation0 + $0xb70] sm:$0xff]  ;;  %v9758_v24 = vld [vmem:[#allocation0 + $0xb80] sm:$0xff]  ;;  %15485 = vst [vmem:[%s19409_s22 + $0x570] sm:$0xff] %v14464_v20  }
 0x472   : > { %v9772_v60 = vld [vmem:[#allocation0 + $0xb90] sm:$0xff]  ;;  %15486 = vst [vmem:[%s19409_s22 + $0x578] sm:$0xff] %v14469_v13   ;;  %15487 = vst [vmem:[%s19409_s22 + $0x580] sm:$0xff] %v14474_v32   ;;  %v20471_v53 = vld [vmem:[#allocation0 + $0xc08] sm:$0xff]  ;;  %v14509_v41 = vpack.c.bf16 %v20435_v63, %v9744_v23  ;;  %v14514_v4 = vpack.c.bf16 %v20437_v7, %v9758_v24 }
 0x473   : > { %v20473_v49 = vld [vmem:[#allocation0 + $0xc18] sm:$0xff]  ;;  %v20475_v5 = vld [vmem:[#allocation0 + $0xc28] sm:$0xff]  ;;  %v9786_v17 = vld [vmem:[#allocation0 + $0xba0] sm:$0xff]  ;;  %v14519_v58 = vpack.c.bf16 %v20439_v18, %v9772_v60  ;;  %15488 = vst [vmem:[%s19409_s22 + $0x588] sm:$0xff] %v14479_v8  }
 0x474   : > { %v9800_v38 = vld [vmem:[#allocation0 + $0xbb0] sm:$0xff]  ;;  %v9814_v29 = vld [vmem:[#allocation0 + $0xbc0] sm:$0xff]  ;;  %15489 = vst [vmem:[%s19409_s22 + $0x590] sm:$0xff] %v14484_v45   ;;  %15490 = vst [vmem:[%s19409_s22 + $0x598] sm:$0xff] %v14489_v3   ;;  %v14524_v39 = vpack.c.bf16 %v20447_v33, %v9786_v17 }
 0x475   : > { %v20483_v10 = vld [vmem:[#allocation0 + $0xc38] sm:$0xff]  ;;  %v20485_v44 = vld [vmem:[#allocation0 + $0xc48] sm:$0xff]  ;;  %v9828_v61 = vld [vmem:[#allocation0 + $0xbd0] sm:$0xff]  ;;  %v14529_v25 = vpack.c.bf16 %v20449_v12, %v9800_v38  ;;  %v14534_v59 = vpack.c.bf16 %v20451_v50, %v9814_v29  ;;  %15491 = vst [vmem:[%s19409_s22 + $0x5a0] sm:$0xff] %v14494_v46  }
 0x476   : > { %v20487_v57 = vld [vmem:[#allocation0 + $0xc58] sm:$0xff]  ;;  %v9842_v30 = vld [vmem:[#allocation0 + $0xbe0] sm:$0xff]  ;;  %v9856_v43 = vld [vmem:[#allocation0 + $0xbf0] sm:$0xff]  ;;  %15492 = vst [vmem:[%s19409_s22 + $0x5a8] sm:$0xff] %v14499_v62   ;;  %v14539_v31 = vpack.c.bf16 %v20459_v16, %v9828_v61 }
 0x477   : > { %15493 = vst [vmem:[%s19409_s22 + $0x5b0] sm:$0xff] %v14504_v2   ;;  %v20495_v48 = vld [vmem:[#allocation0 + $0xc68] sm:$0xff]  ;;  %v20497_v28 = vld [vmem:[#allocation0 + $0xc78] sm:$0xff]  ;;  %v14544_v54 = vpack.c.bf16 %v20461_v6, %v9842_v30  ;;  %v14549_v35 = vpack.c.bf16 %v20463_v9, %v9856_v43  ;;  %v9870_v11 = vld [vmem:[#allocation0 + $0xc00] sm:$0xff] }
 0x478   : > { %v20499_v40 = vld [vmem:[#allocation0 + $0xc88] sm:$0xff]  ;;  %v9884_v42 = vld [vmem:[#allocation0 + $0xc10] sm:$0xff]  ;;  %v9898_v21 = vld [vmem:[#allocation0 + $0xc20] sm:$0xff]  ;;  %15494 = vst [vmem:[%s19409_s22 + $0x5b8] sm:$0xff] %v14509_v41   ;;  %v14554_v55 = vpack.c.bf16 %v20471_v53, %v9870_v11 }
 0x479   : > { %15495 = vst [vmem:[%s19409_s22 + $0x5c0] sm:$0xff] %v14514_v4   ;;  %15496 = vst [vmem:[%s19409_s22 + $0x5c8] sm:$0xff] %v14519_v58   ;;  %v20507_v22 = vld [vmem:[#allocation0 + $0xc98] sm:$0xff]  ;;  %v20509_v52 = vld [vmem:[#allocation0 + $0xca8] sm:$0xff]  ;;  %v14559_v27 = vpack.c.bf16 %v20473_v49, %v9884_v42  ;;  %v14564_v1 = vpack.c.bf16 %v20475_v5, %v9898_v21 }
 0x47a   : > { %v20511_v34 = vld [vmem:[#allocation0 + $0xcb8] sm:$0xff]  ;;  %v9912_v36 = vld [vmem:[#allocation0 + $0xc30] sm:$0xff]  ;;  %v9926_v37 = vld [vmem:[#allocation0 + $0xc40] sm:$0xff]  ;;  %15497 = vst [vmem:[%s19409_s22 + $0x5d0] sm:$0xff] %v14524_v39  }
 0x47b   : > { %v9940_v19 = vld [vmem:[#allocation0 + $0xc50] sm:$0xff]  ;;  %15498 = vst [vmem:[%s19409_s22 + $0x5d8] sm:$0xff] %v14529_v25   ;;  %15499 = vst [vmem:[%s19409_s22 + $0x5e0] sm:$0xff] %v14534_v59   ;;  %v20519_v0 = vld [vmem:[#allocation0 + $0xcc8] sm:$0xff]  ;;  %v14569_v14 = vpack.c.bf16 %v20483_v10, %v9912_v36  ;;  %v14574_v15 = vpack.c.bf16 %v20485_v44, %v9926_v37 }
 0x47c   : > { %v20521_v63 = vld [vmem:[#allocation0 + $0xcd8] sm:$0xff]  ;;  %v20523_v7 = vld [vmem:[#allocation0 + $0xce8] sm:$0xff]  ;;  %v9954_v18 = vld [vmem:[#allocation0 + $0xc60] sm:$0xff]  ;;  %v14579_v56 = vpack.c.bf16 %v20487_v57, %v9940_v19  ;;  %15500 = vst [vmem:[%s19409_s22 + $0x5e8] sm:$0xff] %v14539_v31  }
 0x47d   : > { %v9968_v20 = vld [vmem:[#allocation0 + $0xc70] sm:$0xff]  ;;  %v9982_v13 = vld [vmem:[#allocation0 + $0xc80] sm:$0xff]  ;;  %15501 = vst [vmem:[%s19409_s22 + $0x5f0] sm:$0xff] %v14544_v54   ;;  %15502 = vst [vmem:[%s19409_s22 + $0x5f8] sm:$0xff] %v14549_v35   ;;  %v14584_v47 = vpack.c.bf16 %v20495_v48, %v9954_v18 }
 0x47e   : > { %v20531_v32 = vld [vmem:[#allocation0 + $0xcf8] sm:$0xff]  ;;  %v20533_v33 = vld [vmem:[#allocation0 + $0xd08] sm:$0xff]  ;;  %v9996_v50 = vld [vmem:[#allocation0 + $0xc90] sm:$0xff]  ;;  %v14589_v8 = vpack.c.bf16 %v20497_v28, %v9968_v20  ;;  %v14594_v45 = vpack.c.bf16 %v20499_v40, %v9982_v13  ;;  %15503 = vst [vmem:[%s19409_s22 + $0x600] sm:$0xff] %v14554_v55  }
 0x47f   : > { %v20535_v12 = vld [vmem:[#allocation0 + $0xd18] sm:$0xff]  ;;  %v10010_v51 = vld [vmem:[#allocation0 + $0xca0] sm:$0xff]  ;;  %v10024_v26 = vld [vmem:[#allocation0 + $0xcb0] sm:$0xff]  ;;  %15504 = vst [vmem:[%s19409_s22 + $0x608] sm:$0xff] %v14559_v27   ;;  %v14599_v60 = vpack.c.bf16 %v20507_v22, %v9996_v50 }
 0x480   : > { %15505 = vst [vmem:[%s19409_s22 + $0x610] sm:$0xff] %v14564_v1   ;;  %v20543_v3 = vld [vmem:[#allocation0 + $0xd28] sm:$0xff]  ;;  %v20545_v16 = vld [vmem:[#allocation0 + $0xd38] sm:$0xff]  ;;  %v10038_v9 = vld [vmem:[#allocation0 + $0xcc0] sm:$0xff]  ;;  %v14604_v46 = vpack.c.bf16 %v20509_v52, %v10010_v51  ;;  %v14609_v62 = vpack.c.bf16 %v20511_v34, %v10024_v26 }
 0x481   : > { %v20547_v6 = vld [vmem:[#allocation0 + $0xd48] sm:$0xff]  ;;  %v10052_v23 = vld [vmem:[#allocation0 + $0xcd0] sm:$0xff]  ;;  %v10066_v24 = vld [vmem:[#allocation0 + $0xce0] sm:$0xff]  ;;  %15506 = vst [vmem:[%s19409_s22 + $0x618] sm:$0xff] %v14569_v14   ;;  %v14614_v17 = vpack.c.bf16 %v20519_v0, %v10038_v9 }
 0x482   : > { %15507 = vst [vmem:[%s19409_s22 + $0x620] sm:$0xff] %v14574_v15   ;;  %15508 = vst [vmem:[%s19409_s22 + $0x628] sm:$0xff] %v14579_v56   ;;  %v20555_v2 = vld [vmem:[#allocation0 + $0xd58] sm:$0xff]  ;;  %v20557_v53 = vld [vmem:[#allocation0 + $0xd68] sm:$0xff]  ;;  %v14619_v38 = vpack.c.bf16 %v20521_v63, %v10052_v23  ;;  %v14624_v29 = vpack.c.bf16 %v20523_v7, %v10066_v24 }
 0x483   : > { %v20559_v49 = vld [vmem:[#allocation0 + $0xd78] sm:$0xff]  ;;  %v10080_v5 = vld [vmem:[#allocation0 + $0xcf0] sm:$0xff]  ;;  %v10094_v41 = vld [vmem:[#allocation0 + $0xd00] sm:$0xff]  ;;  %15509 = vst [vmem:[%s19409_s22 + $0x630] sm:$0xff] %v14584_v47  }
 0x484   : > { %v10108_v4 = vld [vmem:[#allocation0 + $0xd10] sm:$0xff]  ;;  %15510 = vst [vmem:[%s19409_s22 + $0x638] sm:$0xff] %v14589_v8   ;;  %15511 = vst [vmem:[%s19409_s22 + $0x640] sm:$0xff] %v14594_v45   ;;  %v20567_v58 = vld [vmem:[#allocation0 + $0xd88] sm:$0xff]  ;;  %v14629_v57 = vpack.c.bf16 %v20531_v32, %v10080_v5  ;;  %v14634_v39 = vpack.c.bf16 %v20533_v33, %v10094_v41 }
 0x485   : > { %v20569_v10 = vld [vmem:[#allocation0 + $0xd98] sm:$0xff]  ;;  %v20571_v44 = vld [vmem:[#allocation0 + $0xda8] sm:$0xff]  ;;  %v10122_v61 = vld [vmem:[#allocation0 + $0xd20] sm:$0xff]  ;;  %v14639_v25 = vpack.c.bf16 %v20535_v12, %v10108_v4  ;;  %15512 = vst [vmem:[%s19409_s22 + $0x648] sm:$0xff] %v14599_v60  }
 0x486   : > { %v10136_v30 = vld [vmem:[#allocation0 + $0xd30] sm:$0xff]  ;;  %v10150_v43 = vld [vmem:[#allocation0 + $0xd40] sm:$0xff]  ;;  %15513 = vst [vmem:[%s19409_s22 + $0x650] sm:$0xff] %v14604_v46   ;;  %15514 = vst [vmem:[%s19409_s22 + $0x658] sm:$0xff] %v14609_v62   ;;  %v14644_v35 = vpack.c.bf16 %v20543_v3, %v10122_v61 }
 0x487   : > { %v20579_v59 = vld [vmem:[#allocation0 + $0xdb8] sm:$0xff]  ;;  %v20581_v48 = vld [vmem:[#allocation0 + $0xdc8] sm:$0xff]  ;;  %v10164_v40 = vld [vmem:[#allocation0 + $0xd50] sm:$0xff]  ;;  %v14649_v11 = vpack.c.bf16 %v20545_v16, %v10136_v30  ;;  %v14654_v42 = vpack.c.bf16 %v20547_v6, %v10150_v43  ;;  %15515 = vst [vmem:[%s19409_s22 + $0x660] sm:$0xff] %v14614_v17  }
 0x488   : > { %v20583_v28 = vld [vmem:[#allocation0 + $0xdd8] sm:$0xff]  ;;  %v10178_v31 = vld [vmem:[#allocation0 + $0xd60] sm:$0xff]  ;;  %v10192_v54 = vld [vmem:[#allocation0 + $0xd70] sm:$0xff]  ;;  %15516 = vst [vmem:[%s19409_s22 + $0x668] sm:$0xff] %v14619_v38   ;;  %v14659_v19 = vpack.c.bf16 %v20555_v2, %v10164_v40 }
 0x489   : > { %15517 = vst [vmem:[%s19409_s22 + $0x670] sm:$0xff] %v14624_v29   ;;  %v20591_v21 = vld [vmem:[#allocation0 + $0xde8] sm:$0xff]  ;;  %v20593_v22 = vld [vmem:[#allocation0 + $0xdf8] sm:$0xff]  ;;  %v10206_v34 = vld [vmem:[#allocation0 + $0xd80] sm:$0xff]  ;;  %v14664_v55 = vpack.c.bf16 %v20557_v53, %v10178_v31  ;;  %v14669_v27 = vpack.c.bf16 %v20559_v49, %v10192_v54 }
 0x48a   : > { %v20595_v52 = vld [vmem:[#allocation0 + $0xe08] sm:$0xff]  ;;  %v10220_v36 = vld [vmem:[#allocation0 + $0xd90] sm:$0xff]  ;;  %v10234_v37 = vld [vmem:[#allocation0 + $0xda0] sm:$0xff]  ;;  %15518 = vst [vmem:[%s19409_s22 + $0x678] sm:$0xff] %v14629_v57   ;;  %v14674_v13 = vpack.c.bf16 %v20567_v58, %v10206_v34 }
 0x48b   : > { %15519 = vst [vmem:[%s19409_s22 + $0x680] sm:$0xff] %v14634_v39   ;;  %15520 = vst [vmem:[%s19409_s22 + $0x688] sm:$0xff] %v14639_v25   ;;  %v20603_v1 = vld [vmem:[#allocation0 + $0xe18] sm:$0xff]  ;;  %v20605_v0 = vld [vmem:[#allocation0 + $0xe28] sm:$0xff]  ;;  %v14679_v14 = vpack.c.bf16 %v20569_v10, %v10220_v36  ;;  %v14684_v15 = vpack.c.bf16 %v20571_v44, %v10234_v37 }
 0x48c   : > { %v20607_v63 = vld [vmem:[#allocation0 + $0xe38] sm:$0xff]  ;;  %v10248_v7 = vld [vmem:[#allocation0 + $0xdb0] sm:$0xff]  ;;  %v10262_v18 = vld [vmem:[#allocation0 + $0xdc0] sm:$0xff]  ;;  %15521 = vst [vmem:[%s19409_s22 + $0x690] sm:$0xff] %v14644_v35  }
 0x48d   : > { %v10276_v20 = vld [vmem:[#allocation0 + $0xdd0] sm:$0xff]  ;;  %15522 = vst [vmem:[%s19409_s22 + $0x698] sm:$0xff] %v14649_v11   ;;  %15523 = vst [vmem:[%s19409_s22 + $0x6a0] sm:$0xff] %v14654_v42   ;;  %v20615_v56 = vld [vmem:[#allocation0 + $0xe48] sm:$0xff]  ;;  %v14689_v51 = vpack.c.bf16 %v20579_v59, %v10248_v7  ;;  %v14694_v26 = vpack.c.bf16 %v20581_v48, %v10262_v18 }
 0x48e   : > { %v20617_v32 = vld [vmem:[#allocation0 + $0xe58] sm:$0xff]  ;;  %v20619_v33 = vld [vmem:[#allocation0 + $0xe68] sm:$0xff]  ;;  %v10290_v12 = vld [vmem:[#allocation0 + $0xde0] sm:$0xff]  ;;  %v14699_v47 = vpack.c.bf16 %v20583_v28, %v10276_v20  ;;  %15524 = vst [vmem:[%s19409_s22 + $0x6a8] sm:$0xff] %v14659_v19  }
 0x48f   : > { %v10304_v50 = vld [vmem:[#allocation0 + $0xdf0] sm:$0xff]  ;;  %v10318_v8 = vld [vmem:[#allocation0 + $0xe00] sm:$0xff]  ;;  %15525 = vst [vmem:[%s19409_s22 + $0x6b0] sm:$0xff] %v14664_v55   ;;  %15526 = vst [vmem:[%s19409_s22 + $0x6b8] sm:$0xff] %v14669_v27   ;;  %v14704_v6 = vpack.c.bf16 %v20591_v21, %v10290_v12 }
 0x490   : > { %v20627_v45 = vld [vmem:[#allocation0 + $0xe78] sm:$0xff]  ;;  %v20629_v3 = vld [vmem:[#allocation0 + $0xe88] sm:$0xff]  ;;  %v14709_v9 = vpack.c.bf16 %v20593_v22, %v10304_v50  ;;  %v10332_v23 = vld [vmem:[#allocation0 + $0xe10] sm:$0xff]  ;;  %v14714_v46 = vpack.c.bf16 %v20595_v52, %v10318_v8  ;;  %15527 = vst [vmem:[%s19409_s22 + $0x6c0] sm:$0xff] %v14674_v13  }
 0x491   : > { %v20631_v16 = vld [vmem:[#allocation0 + $0xe98] sm:$0xff]  ;;  %v10346_v24 = vld [vmem:[#allocation0 + $0xe20] sm:$0xff]  ;;  %v10360_v60 = vld [vmem:[#allocation0 + $0xe30] sm:$0xff]  ;;  %15528 = vst [vmem:[%s19409_s22 + $0x6c8] sm:$0xff] %v14679_v14   ;;  %v14719_v38 = vpack.c.bf16 %v20603_v1, %v10332_v23 }
 0x492   : > { %15529 = vst [vmem:[%s19409_s22 + $0x6d0] sm:$0xff] %v14684_v15   ;;  %v20639_v62 = vld [vmem:[#allocation0 + $0xea8] sm:$0xff]  ;;  %v20641_v2 = vld [vmem:[#allocation0 + $0xeb8] sm:$0xff]  ;;  %v10374_v49 = vld [vmem:[#allocation0 + $0xe40] sm:$0xff]  ;;  %v14724_v29 = vpack.c.bf16 %v20605_v0, %v10346_v24  ;;  %v14729_v41 = vpack.c.bf16 %v20607_v63, %v10360_v60 }
 0x493   : > { %v20643_v53 = vld [vmem:[#allocation0 + $0xec8] sm:$0xff]  ;;  %v10388_v5 = vld [vmem:[#allocation0 + $0xe50] sm:$0xff]  ;;  %v10402_v17 = vld [vmem:[#allocation0 + $0xe60] sm:$0xff]  ;;  %15530 = vst [vmem:[%s19409_s22 + $0x6d8] sm:$0xff] %v14689_v51   ;;  %v14734_v30 = vpack.c.bf16 %v20615_v56, %v10374_v49 }
 0x494   : > { %15531 = vst [vmem:[%s19409_s22 + $0x6e0] sm:$0xff] %v14694_v26   ;;  %15532 = vst [vmem:[%s19409_s22 + $0x6e8] sm:$0xff] %v14699_v47   ;;  %v20651_v4 = vld [vmem:[#allocation0 + $0xed8] sm:$0xff]  ;;  %v20653_v58 = vld [vmem:[#allocation0 + $0xee8] sm:$0xff]  ;;  %v14739_v43 = vpack.c.bf16 %v20617_v32, %v10388_v5  ;;  %v14744_v39 = vpack.c.bf16 %v20619_v33, %v10402_v17 }
 0x495   : > { %v20655_v10 = vld [vmem:[#allocation0 + $0xef8] sm:$0xff]  ;;  %v10416_v44 = vld [vmem:[#allocation0 + $0xe70] sm:$0xff]  ;;  %v10430_v57 = vld [vmem:[#allocation0 + $0xe80] sm:$0xff]  ;;  %15533 = vst [vmem:[%s19409_s22 + $0x6f0] sm:$0xff] %v14704_v6  }
 0x496   : > { %v10444_v61 = vld [vmem:[#allocation0 + $0xe90] sm:$0xff]  ;;  %15534 = vst [vmem:[%s19409_s22 + $0x6f8] sm:$0xff] %v14709_v9   ;;  %15535 = vst [vmem:[%s19409_s22 + $0x700] sm:$0xff] %v14714_v46   ;;  %v20663_v25 = vld [vmem:[#allocation0 + $0xf28] sm:$0xff]  ;;  %v14749_v54 = vpack.c.bf16 %v20627_v45, %v10416_v44  ;;  %v14754_v35 = vpack.c.bf16 %v20629_v3, %v10430_v57 }
 0x497   : > { %v20665_v59 = vld [vmem:[#allocation0 + $0xf08] sm:$0xff]  ;;  %v20667_v48 = vld [vmem:[#allocation0 + $0xf18] sm:$0xff]  ;;  %v10458_v28 = vld [vmem:[#allocation0 + $0xea0] sm:$0xff]  ;;  %v14759_v11 = vpack.c.bf16 %v20631_v16, %v10444_v61  ;;  %15536 = vst [vmem:[%s19409_s22 + $0x708] sm:$0xff] %v14719_v38  }
 0x498   : > { %v10472_v40 = vld [vmem:[#allocation0 + $0xeb0] sm:$0xff]  ;;  %v10486_v31 = vld [vmem:[#allocation0 + $0xec0] sm:$0xff]  ;;  %15537 = vst [vmem:[%s19409_s22 + $0x710] sm:$0xff] %v14724_v29   ;;  %15538 = vst [vmem:[%s19409_s22 + $0x718] sm:$0xff] %v14729_v41   ;;  %v14764_v37 = vpack.c.bf16 %v20639_v62, %v10458_v28 }
 0x499   : > { %v20675_v42 = vld [vmem:[#allocation0 + $0xf38] sm:$0xff]  ;;  %v20677_v21 = vld [vmem:[#allocation0 + $0xf48] sm:$0xff]  ;;  %v10500_v52 = vld [vmem:[#allocation0 + $0xed0] sm:$0xff]  ;;  %v14769_v19 = vpack.c.bf16 %v20641_v2, %v10472_v40  ;;  %v14774_v55 = vpack.c.bf16 %v20643_v53, %v10486_v31  ;;  %15539 = vst [vmem:[%s19409_s22 + $0x720] sm:$0xff] %v14734_v30  }
 0x49a   : > { %v20679_v22 = vld [vmem:[#allocation0 + $0xf58] sm:$0xff]  ;;  %v10514_v34 = vld [vmem:[#allocation0 + $0xee0] sm:$0xff]  ;;  %v10528_v36 = vld [vmem:[#allocation0 + $0xef0] sm:$0xff]  ;;  %15540 = vst [vmem:[%s19409_s22 + $0x728] sm:$0xff] %v14739_v43   ;;  %v14779_v63 = vpack.c.bf16 %v20651_v4, %v10500_v52 }
 0x49b   : > { %15541 = vst [vmem:[%s19409_s22 + $0x730] sm:$0xff] %v14744_v39   ;;  %v20687_v27 = vld [vmem:[#allocation0 + $0xf68] sm:$0xff]  ;;  %v20689_v1 = vld [vmem:[#allocation0 + $0xf78] sm:$0xff]  ;;  %v14784_v7 = vpack.c.bf16 %v20653_v58, %v10514_v34  ;;  %v14789_v18 = vpack.c.bf16 %v20655_v10, %v10528_v36  ;;  %v10542_v20 = vld [vmem:[#allocation0 + $0xf00] sm:$0xff] }
 0x49c   : > { %v20691_v0 = vld [vmem:[#allocation0 + $0xf88] sm:$0xff]  ;;  %v10556_v13 = vld [vmem:[#allocation0 + $0xf10] sm:$0xff]  ;;  %v10570_v14 = vld [vmem:[#allocation0 + $0xf20] sm:$0xff]  ;;  %15542 = vst [vmem:[%s19409_s22 + $0x738] sm:$0xff] %v14749_v54   ;;  %v14794_v51 = vpack.c.bf16 %v20665_v59, %v10542_v20 }
 0x49d   : > { %15543 = vst [vmem:[%s19409_s22 + $0x740] sm:$0xff] %v14754_v35   ;;  %15544 = vst [vmem:[%s19409_s22 + $0x748] sm:$0xff] %v14759_v11   ;;  %v20699_v15 = vld [vmem:[#allocation0 + $0xf98] sm:$0xff]  ;;  %v20701_v56 = vld [vmem:[#allocation0 + $0xfa8] sm:$0xff]  ;;  %v14799_v26 = vpack.c.bf16 %v20667_v48, %v10556_v13  ;;  %v14804_v47 = vpack.c.bf16 %v20663_v25, %v10570_v14 }
 0x49e   : > { %v20703_v32 = vld [vmem:[#allocation0 + $0xfb8] sm:$0xff]  ;;  %v10584_v33 = vld [vmem:[#allocation0 + $0xf30] sm:$0xff]  ;;  %v10598_v12 = vld [vmem:[#allocation0 + $0xf40] sm:$0xff]  ;;  %15545 = vst [vmem:[%s19409_s22 + $0x750] sm:$0xff] %v14764_v37  }
 0x49f   : > { %v10612_v50 = vld [vmem:[#allocation0 + $0xf50] sm:$0xff]  ;;  %15546 = vst [vmem:[%s19409_s22 + $0x758] sm:$0xff] %v14769_v19   ;;  %15547 = vst [vmem:[%s19409_s22 + $0x760] sm:$0xff] %v14774_v55   ;;  %v20711_v8 = vld [vmem:[#allocation0 + $0xfc8] sm:$0xff]  ;;  %v14809_v23 = vpack.c.bf16 %v20675_v42, %v10584_v33  ;;  %v14814_v24 = vpack.c.bf16 %v20677_v21, %v10598_v12 }
 0x4a0   : > { %v20713_v45 = vld [vmem:[#allocation0 + $0xfd8] sm:$0xff]  ;;  %v20715_v3 = vld [vmem:[#allocation0 + $0xfe8] sm:$0xff]  ;;  %v10626_v16 = vld [vmem:[#allocation0 + $0xf60] sm:$0xff]  ;;  %v14819_v60 = vpack.c.bf16 %v20679_v22, %v10612_v50  ;;  %15548 = vst [vmem:[%s19409_s22 + $0x768] sm:$0xff] %v14779_v63  }
 0x4a1   : > { %v10640_v6 = vld [vmem:[#allocation0 + $0xf70] sm:$0xff]  ;;  %v10654_v9 = vld [vmem:[#allocation0 + $0xf80] sm:$0xff]  ;;  %15549 = vst [vmem:[%s19409_s22 + $0x770] sm:$0xff] %v14784_v7   ;;  %15550 = vst [vmem:[%s19409_s22 + $0x778] sm:$0xff] %v14789_v18   ;;  %v14824_v17 = vpack.c.bf16 %v20687_v27, %v10626_v16 }
 0x4a2   : > { %v20723_v46 = vld [vmem:[#allocation0 + $0xff8] sm:$0xff]  ;;  %v20725_v62 = vld [vmem:[#allocation0 + $0x1008] sm:$0xff]  ;;  %v10668_v53 = vld [vmem:[#allocation0 + $0xf90] sm:$0xff]  ;;  %v14829_v38 = vpack.c.bf16 %v20689_v1, %v10640_v6  ;;  %v14834_v29 = vpack.c.bf16 %v20691_v0, %v10654_v9  ;;  %15551 = vst [vmem:[%s19409_s22 + $0x780] sm:$0xff] %v14794_v51  }
 0x4a3   : > { %v20727_v2 = vld [vmem:[#allocation0 + $0x1018] sm:$0xff]  ;;  %v10682_v49 = vld [vmem:[#allocation0 + $0xfa0] sm:$0xff]  ;;  %v10696_v5 = vld [vmem:[#allocation0 + $0xfb0] sm:$0xff]  ;;  %15552 = vst [vmem:[%s19409_s22 + $0x788] sm:$0xff] %v14799_v26   ;;  %v14839_v61 = vpack.c.bf16 %v20699_v15, %v10668_v53 }
 0x4a4   : > { %15553 = vst [vmem:[%s19409_s22 + $0x790] sm:$0xff] %v14804_v47   ;;  %v20735_v41 = vld [vmem:[#allocation0 + $0x1048] sm:$0xff]  ;;  %v20739_v58 = vld [vmem:[#allocation0 + $0x1038] sm:$0xff]  ;;  %v10710_v10 = vld [vmem:[#allocation0 + $0xfc0] sm:$0xff]  ;;  %v14844_v30 = vpack.c.bf16 %v20701_v56, %v10682_v49  ;;  %v14849_v43 = vpack.c.bf16 %v20703_v32, %v10696_v5 }
 0x4a5   : > { %v20737_v4 = vld [vmem:[#allocation0 + $0x1028] sm:$0xff]  ;;  %v10724_v44 = vld [vmem:[#allocation0 + $0xfd0] sm:$0xff]  ;;  %v10738_v57 = vld [vmem:[#allocation0 + $0xfe0] sm:$0xff]  ;;  %15554 = vst [vmem:[%s19409_s22 + $0x798] sm:$0xff] %v14809_v23   ;;  %v14854_v28 = vpack.c.bf16 %v20711_v8, %v10710_v10 }
 0x4a6   : > { %15555 = vst [vmem:[%s19409_s22 + $0x7a0] sm:$0xff] %v14814_v24   ;;  %15556 = vst [vmem:[%s19409_s22 + $0x7a8] sm:$0xff] %v14819_v60   ;;  %v20747_v39 = vld [vmem:[#allocation0 + $0x1058] sm:$0xff]  ;;  %v20749_v25 = vld [vmem:[#allocation0 + $0x1068] sm:$0xff]  ;;  %v14859_v40 = vpack.c.bf16 %v20713_v45, %v10724_v44  ;;  %v14864_v31 = vpack.c.bf16 %v20715_v3, %v10738_v57 }
 0x4a7   : > { %v20751_v59 = vld [vmem:[#allocation0 + $0x1078] sm:$0xff]  ;;  %v10752_v48 = vld [vmem:[#allocation0 + $0xff0] sm:$0xff]  ;;  %v10766_v54 = vld [vmem:[#allocation0 + $0x1000] sm:$0xff]  ;;  %15557 = vst [vmem:[%s19409_s22 + $0x7b0] sm:$0xff] %v14824_v17  }
 0x4a8   : > { %v10780_v35 = vld [vmem:[#allocation0 + $0x1010] sm:$0xff]  ;;  %15558 = vst [vmem:[%s19409_s22 + $0x7b8] sm:$0xff] %v14829_v38   ;;  %15559 = vst [vmem:[%s19409_s22 + $0x7c0] sm:$0xff] %v14834_v29   ;;  %v20759_v11 = vld [vmem:[#allocation0 + $0x1088] sm:$0xff]  ;;  %v14869_v22 = vpack.c.bf16 %v20723_v46, %v10752_v48  ;;  %v14874_v37 = vpack.c.bf16 %v20725_v62, %v10766_v54 }
 0x4a9   : > { %v20761_v42 = vld [vmem:[#allocation0 + $0x1098] sm:$0xff]  ;;  %v20763_v21 = vld [vmem:[#allocation0 + $0x10a8] sm:$0xff]  ;;  %v10794_v52 = vld [vmem:[#allocation0 + $0x1020] sm:$0xff]  ;;  %v14879_v19 = vpack.c.bf16 %v20727_v2, %v10780_v35  ;;  %15560 = vst [vmem:[%s19409_s22 + $0x7c8] sm:$0xff] %v14839_v61  }
 0x4aa   : > { %v10808_v34 = vld [vmem:[#allocation0 + $0x1030] sm:$0xff]  ;;  %v10822_v36 = vld [vmem:[#allocation0 + $0x1040] sm:$0xff]  ;;  %15561 = vst [vmem:[%s19409_s22 + $0x7d0] sm:$0xff] %v14844_v30   ;;  %15562 = vst [vmem:[%s19409_s22 + $0x7d8] sm:$0xff] %v14849_v43   ;;  %v14884_v18 = vpack.c.bf16 %v20737_v4, %v10794_v52 }
 0x4ab   : > { %v20771_v55 = vld [vmem:[#allocation0 + $0x10b8] sm:$0xff]  ;;  %v20773_v27 = vld [vmem:[#allocation0 + $0x10c8] sm:$0xff]  ;;  %v10836_v0 = vld [vmem:[#allocation0 + $0x1050] sm:$0xff]  ;;  %v14889_v20 = vpack.c.bf16 %v20739_v58, %v10808_v34  ;;  %v14894_v13 = vpack.c.bf16 %v20735_v41, %v10822_v36  ;;  %15563 = vst [vmem:[%s19409_s22 + $0x7e0] sm:$0xff] %v14854_v28  }
 0x4ac   : > { %v20775_v1 = vld [vmem:[#allocation0 + $0x10d8] sm:$0xff]  ;;  %v10850_v63 = vld [vmem:[#allocation0 + $0x1060] sm:$0xff]  ;;  %v10864_v7 = vld [vmem:[#allocation0 + $0x1070] sm:$0xff]  ;;  %15564 = vst [vmem:[%s19409_s22 + $0x7e8] sm:$0xff] %v14859_v40   ;;  %v14899_v50 = vpack.c.bf16 %v20747_v39, %v10836_v0 }
 0x4ad   : > { %15565 = vst [vmem:[%s19409_s22 + $0x7f0] sm:$0xff] %v14864_v31   ;;  %v20783_v14 = vld [vmem:[#allocation0 + $0x10e8] sm:$0xff]  ;;  %v20785_v15 = vld [vmem:[#allocation0 + $0x10f8] sm:$0xff]  ;;  %v10878_v32 = vld [vmem:[#allocation0 + $0x1080] sm:$0xff]  ;;  %v14904_v51 = vpack.c.bf16 %v20749_v25, %v10850_v63  ;;  %v14909_v26 = vpack.c.bf16 %v20751_v59, %v10864_v7 }
 0x4ae   : > { %v20787_v56 = vld [vmem:[#allocation0 + $0x1108] sm:$0xff]  ;;  %v10892_v33 = vld [vmem:[#allocation0 + $0x1090] sm:$0xff]  ;;  %v10906_v12 = vld [vmem:[#allocation0 + $0x10a0] sm:$0xff]  ;;  %15566 = vst [vmem:[%s19409_s22 + $0x7f8] sm:$0xff] %v14869_v22   ;;  %v14914_v9 = vpack.c.bf16 %v20759_v11, %v10878_v32 }
 0x4af   : > { %15567 = vst [vmem:[%s19409_s22 + $0x800] sm:$0xff] %v14874_v37   ;;  %15568 = vst [vmem:[%s19409_s22 + $0x808] sm:$0xff] %v14879_v19   ;;  %v20795_v47 = vld [vmem:[#allocation0 + $0x1118] sm:$0xff]  ;;  %v20797_v8 = vld [vmem:[#allocation0 + $0x1128] sm:$0xff]  ;;  %v14919_v23 = vpack.c.bf16 %v20761_v42, %v10892_v33  ;;  %v14924_v24 = vpack.c.bf16 %v20763_v21, %v10906_v12 }
 0x4b0   : > { %v20799_v45 = vld [vmem:[#allocation0 + $0x1138] sm:$0xff]  ;;  %v10920_v3 = vld [vmem:[#allocation0 + $0x10b0] sm:$0xff]  ;;  %v10934_v16 = vld [vmem:[#allocation0 + $0x10c0] sm:$0xff]  ;;  %15569 = vst [vmem:[%s19409_s22 + $0x810] sm:$0xff] %v14884_v18  }
 0x4b1   : > { %v10948_v6 = vld [vmem:[#allocation0 + $0x10d0] sm:$0xff]  ;;  %15570 = vst [vmem:[%s19409_s22 + $0x818] sm:$0xff] %v14889_v20   ;;  %15571 = vst [vmem:[%s19409_s22 + $0x820] sm:$0xff] %v14894_v13   ;;  %v20807_v60 = vld [vmem:[#allocation0 + $0x1168] sm:$0xff]  ;;  %v14929_v49 = vpack.c.bf16 %v20771_v55, %v10920_v3  ;;  %v14934_v5 = vpack.c.bf16 %v20773_v27, %v10934_v16 }
 0x4b2   : > { %v20809_v46 = vld [vmem:[#allocation0 + $0x1148] sm:$0xff]  ;;  %v20811_v62 = vld [vmem:[#allocation0 + $0x1158] sm:$0xff]  ;;  %v10962_v2 = vld [vmem:[#allocation0 + $0x10e0] sm:$0xff]  ;;  %v14939_v17 = vpack.c.bf16 %v20775_v1, %v10948_v6  ;;  %15572 = vst [vmem:[%s19409_s22 + $0x828] sm:$0xff] %v14899_v50  }
 0x4b3   : > { %v10976_v53 = vld [vmem:[#allocation0 + $0x10f0] sm:$0xff]  ;;  %v10990_v38 = vld [vmem:[#allocation0 + $0x1100] sm:$0xff]  ;;  %15573 = vst [vmem:[%s19409_s22 + $0x830] sm:$0xff] %v14904_v51   ;;  %15574 = vst [vmem:[%s19409_s22 + $0x838] sm:$0xff] %v14909_v26   ;;  %v14944_v58 = vpack.c.bf16 %v20783_v14, %v10962_v2 }
 0x4b4   : > { %v20819_v29 = vld [vmem:[#allocation0 + $0x1178] sm:$0xff]  ;;  %v20821_v41 = vld [vmem:[#allocation0 + $0x1188] sm:$0xff]  ;;  %v14949_v10 = vpack.c.bf16 %v20785_v15, %v10976_v53  ;;  %v11004_v44 = vld [vmem:[#allocation0 + $0x1110] sm:$0xff]  ;;  %v14954_v30 = vpack.c.bf16 %v20787_v56, %v10990_v38  ;;  %15575 = vst [vmem:[%s19409_s22 + $0x840] sm:$0xff] %v14914_v9  }
 0x4b5   : > { %v20823_v4 = vld [vmem:[#allocation0 + $0x1198] sm:$0xff]  ;;  %v11018_v57 = vld [vmem:[#allocation0 + $0x1120] sm:$0xff]  ;;  %v11032_v61 = vld [vmem:[#allocation0 + $0x1130] sm:$0xff]  ;;  %15576 = vst [vmem:[%s19409_s22 + $0x848] sm:$0xff] %v14919_v23   ;;  %v14959_v40 = vpack.c.bf16 %v20795_v47, %v11004_v44 }
 0x4b6   : > { %15577 = vst [vmem:[%s19409_s22 + $0x850] sm:$0xff] %v14924_v24   ;;  %v20831_v43 = vld [vmem:[#allocation0 + $0x11a8] sm:$0xff]  ;;  %v20833_v39 = vld [vmem:[#allocation0 + $0x11b8] sm:$0xff]  ;;  %v11046_v59 = vld [vmem:[#allocation0 + $0x1140] sm:$0xff]  ;;  %v14964_v31 = vpack.c.bf16 %v20797_v8, %v11018_v57  ;;  %v14969_v54 = vpack.c.bf16 %v20799_v45, %v11032_v61 }
 0x4b7   : > { %v20835_v25 = vld [vmem:[#allocation0 + $0x11c8] sm:$0xff]  ;;  %v11060_v48 = vld [vmem:[#allocation0 + $0x1150] sm:$0xff]  ;;  %v11074_v28 = vld [vmem:[#allocation0 + $0x1160] sm:$0xff]  ;;  %15578 = vst [vmem:[%s19409_s22 + $0x858] sm:$0xff] %v14929_v49   ;;  %v14974_v34 = vpack.c.bf16 %v20809_v46, %v11046_v59 }
 0x4b8   : > { %15579 = vst [vmem:[%s19409_s22 + $0x860] sm:$0xff] %v14934_v5   ;;  %15580 = vst [vmem:[%s19409_s22 + $0x868] sm:$0xff] %v14939_v17   ;;  %v20843_v35 = vld [vmem:[#allocation0 + $0x11d8] sm:$0xff]  ;;  %v20845_v11 = vld [vmem:[#allocation0 + $0x11e8] sm:$0xff]  ;;  %v14979_v36 = vpack.c.bf16 %v20811_v62, %v11060_v48  ;;  %v14984_v37 = vpack.c.bf16 %v20807_v60, %v11074_v28 }
 0x4b9   : > { %v20847_v42 = vld [vmem:[#allocation0 + $0x11f8] sm:$0xff]  ;;  %v11088_v21 = vld [vmem:[#allocation0 + $0x1170] sm:$0xff]  ;;  %v11102_v22 = vld [vmem:[#allocation0 + $0x1180] sm:$0xff]  ;;  %15581 = vst [vmem:[%s19409_s22 + $0x870] sm:$0xff] %v14944_v58  }
 0x4ba   : > { %v11116_v52 = vld [vmem:[#allocation0 + $0x1190] sm:$0xff]  ;;  %15582 = vst [vmem:[%s19409_s22 + $0x878] sm:$0xff] %v14949_v10   ;;  %15583 = vst [vmem:[%s19409_s22 + $0x880] sm:$0xff] %v14954_v30   ;;  %v20855_v19 = vld [vmem:[#allocation0 + $0x1228] sm:$0xff]  ;;  %v14989_v7 = vpack.c.bf16 %v20819_v29, %v11088_v21  ;;  %v14994_v18 = vpack.c.bf16 %v20821_v41, %v11102_v22 }
 0x4bb   : > { %v20857_v55 = vld [vmem:[#allocation0 + $0x1208] sm:$0xff]  ;;  %v20859_v27 = vld [vmem:[#allocation0 + $0x1218] sm:$0xff]  ;;  %v11130_v1 = vld [vmem:[#allocation0 + $0x11a0] sm:$0xff]  ;;  %v14999_v20 = vpack.c.bf16 %v20823_v4, %v11116_v52  ;;  %15584 = vst [vmem:[%s19409_s22 + $0x888] sm:$0xff] %v14959_v40  }
 0x4bc   : > { %v11144_v0 = vld [vmem:[#allocation0 + $0x11b0] sm:$0xff]  ;;  %v11158_v63 = vld [vmem:[#allocation0 + $0x11c0] sm:$0xff]  ;;  %15585 = vst [vmem:[%s19409_s22 + $0x890] sm:$0xff] %v14964_v31   ;;  %15586 = vst [vmem:[%s19409_s22 + $0x898] sm:$0xff] %v14969_v54   ;;  %v15004_v12 = vpack.c.bf16 %v20831_v43, %v11130_v1 }
 0x4bd   : > { %v20867_v13 = vld [vmem:[#allocation0 + $0x1238] sm:$0xff]  ;;  %v20869_v14 = vld [vmem:[#allocation0 + $0x1248] sm:$0xff]  ;;  %v11172_v56 = vld [vmem:[#allocation0 + $0x11d0] sm:$0xff]  ;;  %v15009_v50 = vpack.c.bf16 %v20833_v39, %v11144_v0  ;;  %v15014_v51 = vpack.c.bf16 %v20835_v25, %v11158_v63  ;;  %15587 = vst [vmem:[%s19409_s22 + $0x8a0] sm:$0xff] %v14974_v34  }
 0x4be   : > { %v20871_v15 = vld [vmem:[#allocation0 + $0x1258] sm:$0xff]  ;;  %v11186_v32 = vld [vmem:[#allocation0 + $0x11e0] sm:$0xff]  ;;  %v11200_v33 = vld [vmem:[#allocation0 + $0x11f0] sm:$0xff]  ;;  %15588 = vst [vmem:[%s19409_s22 + $0x8a8] sm:$0xff] %v14979_v36   ;;  %v15019_v45 = vpack.c.bf16 %v20843_v35, %v11172_v56 }
 0x4bf   : > { %15589 = vst [vmem:[%s19409_s22 + $0x8b0] sm:$0xff] %v14984_v37   ;;  %v20879_v26 = vld [vmem:[#allocation0 + $0x1268] sm:$0xff]  ;;  %v20881_v47 = vld [vmem:[#allocation0 + $0x1278] sm:$0xff]  ;;  %v15024_v3 = vpack.c.bf16 %v20845_v11, %v11186_v32  ;;  %v15029_v16 = vpack.c.bf16 %v20847_v42, %v11200_v33  ;;  %v11214_v6 = vld [vmem:[#allocation0 + $0x1200] sm:$0xff] }
 0x4c0   : > { %v20883_v8 = vld [vmem:[#allocation0 + $0x1288] sm:$0xff]  ;;  %v11228_v9 = vld [vmem:[#allocation0 + $0x1210] sm:$0xff]  ;;  %v11242_v23 = vld [vmem:[#allocation0 + $0x1220] sm:$0xff]  ;;  %15590 = vst [vmem:[%s19409_s22 + $0x8b8] sm:$0xff] %v14989_v7   ;;  %v15034_v49 = vpack.c.bf16 %v20857_v55, %v11214_v6 }
 0x4c1   : > { %15591 = vst [vmem:[%s19409_s22 + $0x8c0] sm:$0xff] %v14994_v18   ;;  %15592 = vst [vmem:[%s19409_s22 + $0x8c8] sm:$0xff] %v14999_v20   ;;  %v20891_v24 = vld [vmem:[#allocation0 + $0x12a8] sm:$0xff]  ;;  %v20893_v60 = vld [vmem:[#allocation0 + $0x12b8] sm:$0xff]  ;;  %v15039_v5 = vpack.c.bf16 %v20859_v27, %v11228_v9  ;;  %v15044_v17 = vpack.c.bf16 %v20855_v19, %v11242_v23 }
 0x4c2   : > { %v20895_v46 = vld [vmem:[#allocation0 + $0x1298] sm:$0xff]  ;;  %v11256_v62 = vld [vmem:[#allocation0 + $0x1230] sm:$0xff]  ;;  %v11270_v2 = vld [vmem:[#allocation0 + $0x1240] sm:$0xff]  ;;  %15593 = vst [vmem:[%s19409_s22 + $0x8d0] sm:$0xff] %v15004_v12  }
 0x4c3   : > { %v11284_v53 = vld [vmem:[#allocation0 + $0x1250] sm:$0xff]  ;;  %15594 = vst [vmem:[%s19409_s22 + $0x8d8] sm:$0xff] %v15009_v50   ;;  %15595 = vst [vmem:[%s19409_s22 + $0x8e0] sm:$0xff] %v15014_v51   ;;  %v20903_v38 = vld [vmem:[#allocation0 + $0x12c8] sm:$0xff]  ;;  %v15049_v44 = vpack.c.bf16 %v20867_v13, %v11256_v62  ;;  %v15054_v57 = vpack.c.bf16 %v20869_v14, %v11270_v2 }
 0x4c4   : > { %v20905_v29 = vld [vmem:[#allocation0 + $0x12d8] sm:$0xff]  ;;  %v20907_v41 = vld [vmem:[#allocation0 + $0x12e8] sm:$0xff]  ;;  %v11298_v4 = vld [vmem:[#allocation0 + $0x1260] sm:$0xff]  ;;  %v15059_v61 = vpack.c.bf16 %v20871_v15, %v11284_v53  ;;  %15596 = vst [vmem:[%s19409_s22 + $0x8e8] sm:$0xff] %v15019_v45  }
 0x4c5   : > { %v11312_v58 = vld [vmem:[#allocation0 + $0x1270] sm:$0xff]  ;;  %v11326_v10 = vld [vmem:[#allocation0 + $0x1280] sm:$0xff]  ;;  %15597 = vst [vmem:[%s19409_s22 + $0x8f0] sm:$0xff] %v15024_v3   ;;  %15598 = vst [vmem:[%s19409_s22 + $0x8f8] sm:$0xff] %v15029_v16   ;;  %v15064_v28 = vpack.c.bf16 %v20879_v26, %v11298_v4 }
 0x4c6   : > { %v20915_v30 = vld [vmem:[#allocation0 + $0x12f8] sm:$0xff]  ;;  %v20917_v43 = vld [vmem:[#allocation0 + $0x1308] sm:$0xff]  ;;  %v11340_v25 = vld [vmem:[#allocation0 + $0x1290] sm:$0xff]  ;;  %v15069_v40 = vpack.c.bf16 %v20881_v47, %v11312_v58  ;;  %v15074_v31 = vpack.c.bf16 %v20883_v8, %v11326_v10  ;;  %15599 = vst [vmem:[%s19409_s22 + $0x900] sm:$0xff] %v15034_v49  }
 0x4c7   : > { %v20919_v39 = vld [vmem:[#allocation0 + $0x1318] sm:$0xff]  ;;  %v11354_v59 = vld [vmem:[#allocation0 + $0x12a0] sm:$0xff]  ;;  %v11368_v48 = vld [vmem:[#allocation0 + $0x12b0] sm:$0xff]  ;;  %15600 = vst [vmem:[%s19409_s22 + $0x908] sm:$0xff] %v15039_v5   ;;  %v15079_v52 = vpack.c.bf16 %v20895_v46, %v11340_v25 }
 0x4c8   : > { %15601 = vst [vmem:[%s19409_s22 + $0x910] sm:$0xff] %v15044_v17   ;;  %v20927_v54 = vld [vmem:[#allocation0 + $0x1348] sm:$0xff]  ;;  %v20931_v11 = vld [vmem:[#allocation0 + $0x1338] sm:$0xff]  ;;  %v11382_v42 = vld [vmem:[#allocation0 + $0x12c0] sm:$0xff]  ;;  %v15084_v34 = vpack.c.bf16 %v20891_v24, %v11354_v59  ;;  %v15089_v36 = vpack.c.bf16 %v20893_v60, %v11368_v48 }
 0x4c9   : > { %v20929_v35 = vld [vmem:[#allocation0 + $0x1328] sm:$0xff]  ;;  %v11396_v21 = vld [vmem:[#allocation0 + $0x12d0] sm:$0xff]  ;;  %v11410_v22 = vld [vmem:[#allocation0 + $0x12e0] sm:$0xff]  ;;  %15602 = vst [vmem:[%s19409_s22 + $0x918] sm:$0xff] %v15049_v44   ;;  %v15094_v1 = vpack.c.bf16 %v20903_v38, %v11382_v42 }
 0x4ca   : > { %15603 = vst [vmem:[%s19409_s22 + $0x920] sm:$0xff] %v15054_v57   ;;  %15604 = vst [vmem:[%s19409_s22 + $0x928] sm:$0xff] %v15059_v61   ;;  %v20939_v37 = vld [vmem:[#allocation0 + $0x1358] sm:$0xff]  ;;  %v20941_v19 = vld [vmem:[#allocation0 + $0x1368] sm:$0xff]  ;;  %v15099_v0 = vpack.c.bf16 %v20905_v29, %v11396_v21  ;;  %v15104_v63 = vpack.c.bf16 %v20907_v41, %v11410_v22 }
 0x4cb   : > { %v20943_v55 = vld [vmem:[#allocation0 + $0x1378] sm:$0xff]  ;;  %v11424_v27 = vld [vmem:[#allocation0 + $0x12f0] sm:$0xff]  ;;  %v11438_v7 = vld [vmem:[#allocation0 + $0x1300] sm:$0xff]  ;;  %15605 = vst [vmem:[%s19409_s22 + $0x930] sm:$0xff] %v15064_v28  }
 0x4cc   : > { %v11452_v18 = vld [vmem:[#allocation0 + $0x1310] sm:$0xff]  ;;  %15606 = vst [vmem:[%s19409_s22 + $0x938] sm:$0xff] %v15069_v40   ;;  %15607 = vst [vmem:[%s19409_s22 + $0x940] sm:$0xff] %v15074_v31   ;;  %v20951_v20 = vld [vmem:[#allocation0 + $0x1388] sm:$0xff]  ;;  %v15109_v15 = vpack.c.bf16 %v20915_v30, %v11424_v27  ;;  %v15114_v12 = vpack.c.bf16 %v20917_v43, %v11438_v7 }
 0x4cd   : > { %v20953_v13 = vld [vmem:[#allocation0 + $0x1398] sm:$0xff]  ;;  %v20955_v14 = vld [vmem:[#allocation0 + $0x13a8] sm:$0xff]  ;;  %v11466_v56 = vld [vmem:[#allocation0 + $0x1320] sm:$0xff]  ;;  %15608 = vst [vmem:[%s19409_s22 + $0x948] sm:$0xff] %v15079_v52   ;;  %v15119_v50 = vpack.c.bf16 %v20919_v39, %v11452_v18 }
 0x4ce   : > { %v11480_v32 = vld [vmem:[#allocation0 + $0x1330] sm:$0xff]  ;;  %v11494_v33 = vld [vmem:[#allocation0 + $0x1340] sm:$0xff]  ;;  %15609 = vst [vmem:[%s19409_s22 + $0x950] sm:$0xff] %v15084_v34   ;;  %15610 = vst [vmem:[%s19409_s22 + $0x958] sm:$0xff] %v15089_v36   ;;  %v15124_v16 = vpack.c.bf16 %v20929_v35, %v11466_v56 }
 0x4cf   : > { %v20963_v51 = vld [vmem:[#allocation0 + $0x13b8] sm:$0xff]  ;;  %v20965_v26 = vld [vmem:[#allocation0 + $0x13c8] sm:$0xff]  ;;  %v11508_v8 = vld [vmem:[#allocation0 + $0x1350] sm:$0xff]  ;;  %15611 = vst [vmem:[%s19409_s22 + $0x960] sm:$0xff] %v15094_v1   ;;  %v15129_v6 = vpack.c.bf16 %v20931_v11, %v11480_v32  ;;  %v15134_v9 = vpack.c.bf16 %v20927_v54, %v11494_v33 }
 0x4d0   : > { %v20967_v47 = vld [vmem:[#allocation0 + $0x13d8] sm:$0xff]  ;;  %v11522_v45 = vld [vmem:[#allocation0 + $0x1360] sm:$0xff]  ;;  %v11536_v3 = vld [vmem:[#allocation0 + $0x1370] sm:$0xff]  ;;  %15612 = vst [vmem:[%s19409_s22 + $0x968] sm:$0xff] %v15099_v0   ;;  %v15139_v53 = vpack.c.bf16 %v20939_v37, %v11508_v8 }
 0x4d1   : > { %15613 = vst [vmem:[%s19409_s22 + $0x970] sm:$0xff] %v15104_v63   ;;  %v20975_v23 = vld [vmem:[#allocation0 + $0x13e8] sm:$0xff]  ;;  %v20977_v24 = vld [vmem:[#allocation0 + $0x13f8] sm:$0xff]  ;;  %v11550_v46 = vld [vmem:[#allocation0 + $0x1380] sm:$0xff]  ;;  %v15144_v49 = vpack.c.bf16 %v20941_v19, %v11522_v45  ;;  %v15149_v5 = vpack.c.bf16 %v20943_v55, %v11536_v3 }
 0x4d2   : > { %v20979_v60 = vld [vmem:[#allocation0 + $0x1408] sm:$0xff]  ;;  %v11564_v62 = vld [vmem:[#allocation0 + $0x1390] sm:$0xff]  ;;  %v11578_v2 = vld [vmem:[#allocation0 + $0x13a0] sm:$0xff]  ;;  %15614 = vst [vmem:[%s19409_s22 + $0x978] sm:$0xff] %v15109_v15   ;;  %v15154_v10 = vpack.c.bf16 %v20951_v20, %v11550_v46 }
 0x4d3   : > { %15615 = vst [vmem:[%s19409_s22 + $0x980] sm:$0xff] %v15114_v12   ;;  %15616 = vst [vmem:[%s19409_s22 + $0x988] sm:$0xff] %v15119_v50   ;;  %v11683_v17 = vld [vmem:[#allocation0 + $0x1418] sm:$0xff]  ;;  %v11697_v38 = vld [vmem:[#allocation0 + $0x1428] sm:$0xff]  ;;  %v15159_v44 = vpack.c.bf16 %v20953_v13, %v11564_v62  ;;  %v15164_v57 = vpack.c.bf16 %v20955_v14, %v11578_v2 }
 0x4d4   : > { %v11711_v29 = vld [vmem:[#allocation0 + $0x1438] sm:$0xff]  ;;  %v11592_v41 = vld [vmem:[#allocation0 + $0x13b0] sm:$0xff]  ;;  %v11606_v4 = vld [vmem:[#allocation0 + $0x13c0] sm:$0xff]  ;;  %15617 = vst [vmem:[%s19409_s22 + $0x990] sm:$0xff] %v15124_v16  }
 0x4d5   : > { %v11620_v58 = vld [vmem:[#allocation0 + $0x13d0] sm:$0xff]  ;;  %15618 = vst [vmem:[%s19409_s22 + $0x998] sm:$0xff] %v15129_v6   ;;  %15619 = vst [vmem:[%s19409_s22 + $0x9a0] sm:$0xff] %v15134_v9   ;;  %v11725_v61 = vld [vmem:[#allocation0 + $0x1448] sm:$0xff]  ;;  %v15169_v59 = vpack.c.bf16 %v20963_v51, %v11592_v41  ;;  %v15174_v48 = vpack.c.bf16 %v20965_v26, %v11606_v4 }
 0x4d6   : > { %v11739_v30 = vld [vmem:[#allocation0 + $0x1458] sm:$0xff]  ;;  %v11753_v43 = vld [vmem:[#allocation0 + $0x1468] sm:$0xff]  ;;  %v11634_v39 = vld [vmem:[#allocation0 + $0x13e0] sm:$0xff]  ;;  %15620 = vst [vmem:[%s19409_s22 + $0x9a8] sm:$0xff] %v15139_v53   ;;  %v15179_v28 = vpack.c.bf16 %v20967_v47, %v11620_v58 }
 0x4d7   : > { %v11648_v25 = vld [vmem:[#allocation0 + $0x13f0] sm:$0xff]  ;;  %15621 = vst [vmem:[%s19409_s22 + $0x9b0] sm:$0xff] %v15144_v49   ;;  %15622 = vst [vmem:[%s19409_s22 + $0x9b8] sm:$0xff] %v15149_v5   ;;  %v11662_v40 = vld [vmem:[#allocation0 + $0x1400] sm:$0xff]  ;;  %v15184_v11 = vpack.c.bf16 %v20975_v23, %v11634_v39 }
 0x4d8   : > { %v11767_v31 = vld [vmem:[#allocation0 + $0x1478] sm:$0xff]  ;;  %v11781_v54 = vld [vmem:[#allocation0 + $0x1488] sm:$0xff]  ;;  %15623 = vst [vmem:[%s19409_s22 + $0x9c0] sm:$0xff] %v15154_v10   ;;  %15624 = vst [vmem:[%s19409_s22 + $0x9c8] sm:$0xff] %v15159_v44   ;;  %v15189_v42 = vpack.c.bf16 %v20977_v24, %v11648_v25  ;;  %v15194_v21 = vpack.c.bf16 %v20979_v60, %v11662_v40 }
 0x4d9   : > { %v11795_v35 = vld [vmem:[#allocation0 + $0x1498] sm:$0xff]  ;;  %15625 = vst [vmem:[%s19409_s22 + $0x9d0] sm:$0xff] %v15164_v57   ;;  %v11676_v22 = vld [vmem:[#allocation0 + $0x1410] sm:$0xff]  ;;  %v11690_v52 = vld [vmem:[#allocation0 + $0x1420] sm:$0xff] }
 0x4da   : > { %v11704_v34 = vld [vmem:[#allocation0 + $0x1430] sm:$0xff]  ;;  %v11837_v36 = vld [vmem:[#allocation0 + $0x14c8] sm:$0xff]  ;;  %v11823_v19 = vld [vmem:[#allocation0 + $0x14b8] sm:$0xff]  ;;  %15626 = vst [vmem:[%s19409_s22 + $0x9d8] sm:$0xff] %v15169_v59   ;;  %v15199_v55 = vpack.c.bf16 %v11683_v17, %v11676_v22  ;;  %v15204_v27 = vpack.c.bf16 %v11697_v38, %v11690_v52 }
 0x4db   : > { %v11809_v37 = vld [vmem:[#allocation0 + $0x14a8] sm:$0xff]  ;;  %15627 = vst [vmem:[%s19409_s22 + $0x9e0] sm:$0xff] %v15174_v48   ;;  %15628 = vst [vmem:[%s19409_s22 + $0x9e8] sm:$0xff] %v15179_v28   ;;  %v15209_v1 = vpack.c.bf16 %v11711_v29, %v11704_v34  ;;  %v11718_v0 = vld [vmem:[#allocation0 + $0x1440] sm:$0xff] }
 0x4dc   : > { %v11732_v63 = vld [vmem:[#allocation0 + $0x1450] sm:$0xff]  ;;  %v11746_v7 = vld [vmem:[#allocation0 + $0x1460] sm:$0xff]  ;;  %v11851_v18 = vld [vmem:[#allocation0 + $0x14d8] sm:$0xff]  ;;  %15629 = vst [vmem:[%s19409_s22 + $0x9f0] sm:$0xff] %v15184_v11   ;;  %v15214_v14 = vpack.c.bf16 %v11725_v61, %v11718_v0 }
 0x4dd   : > { %v11865_v20 = vld [vmem:[#allocation0 + $0x14e8] sm:$0xff]  ;;  %v11879_v13 = vld [vmem:[#allocation0 + $0x14f8] sm:$0xff]  ;;  %15630 = vst [vmem:[%s19409_s22 + $0x9f8] sm:$0xff] %v15189_v42   ;;  %15631 = vst [vmem:[%s19409_s22 + $0xa00] sm:$0xff] %v15194_v21   ;;  %v15219_v15 = vpack.c.bf16 %v11739_v30, %v11732_v63  ;;  %v15224_v56 = vpack.c.bf16 %v11753_v43, %v11746_v7 }
 0x4de   : > { %v11760_v32 = vld [vmem:[#allocation0 + $0x1470] sm:$0xff]  ;;  %v11774_v33 = vld [vmem:[#allocation0 + $0x1480] sm:$0xff]  ;;  %15632 = vst [vmem:[%s19409_s22 + $0xa08] sm:$0xff] %v15199_v55   ;;  %15633 = vst [vmem:[%s19409_s22 + $0xa10] sm:$0xff] %v15204_v27  }
 0x4df   : > { %v11788_v12 = vld [vmem:[#allocation0 + $0x1490] sm:$0xff]  ;;  %15634 = vst [vmem:[%s19409_s22 + $0xa18] sm:$0xff] %v15209_v1   ;;  %v15229_v50 = vpack.c.bf16 %v11767_v31, %v11760_v32  ;;  %v15234_v51 = vpack.c.bf16 %v11781_v54, %v11774_v33  ;;  %v11802_v47 = vld [vmem:[#allocation0 + $0x14a0] sm:$0xff]  ;;  %15635 = vst [vmem:[%s19409_s22 + $0xa20] sm:$0xff] %v15214_v14  }
 0x4e0   : > { %v15239_v26 = vpack.c.bf16 %v11795_v35, %v11788_v12  ;;  %v11816_v8 = vld [vmem:[#allocation0 + $0x14b0] sm:$0xff]  ;;  %v11830_v45 = vld [vmem:[#allocation0 + $0x14c0] sm:$0xff]  ;;  %15636 = vst [vmem:[%s19409_s22 + $0xa28] sm:$0xff] %v15219_v15   ;;  %15637 = vst [vmem:[%s19409_s22 + $0xa30] sm:$0xff] %v15224_v56   ;;  %v15244_v3 = vpack.c.bf16 %v11809_v37, %v11802_v47 }
 0x4e1   : > { %v15249_v16 = vpack.c.bf16 %v11823_v19, %v11816_v8  ;;  %v15254_v6 = vpack.c.bf16 %v11837_v36, %v11830_v45  ;;  %v11844_v9 = vld [vmem:[#allocation0 + $0x14d0] sm:$0xff]  ;;  %v11858_v23 = vld [vmem:[#allocation0 + $0x14e0] sm:$0xff]  ;;  %15638 = vst [vmem:[%s19409_s22 + $0xa38] sm:$0xff] %v15229_v50   ;;  %15639 = vst [vmem:[%s19409_s22 + $0xa40] sm:$0xff] %v15234_v51  }
 0x4e2   : > { %v11872_v24 = vld [vmem:[#allocation0 + $0x14f0] sm:$0xff]  ;;  %15640 = vst [vmem:[%s19409_s22 + $0xa48] sm:$0xff] %v15239_v26   ;;  %v15259_v60 = vpack.c.bf16 %v11851_v18, %v11844_v9  ;;  %v15264_v46 = vpack.c.bf16 %v11865_v20, %v11858_v23  ;;  %15641 = vst [vmem:[%s19409_s22 + $0xa50] sm:$0xff] %v15244_v3  }
 0x4e3   : > { %v15269_v62 = vpack.c.bf16 %v11879_v13, %v11872_v24  ;;  %15642 = vst [vmem:[%s19409_s22 + $0xa58] sm:$0xff] %v15249_v16   ;;  %15643 = vst [vmem:[%s19409_s22 + $0xa60] sm:$0xff] %v15254_v6  }
 0x4e4   : > { %15644 = vst [vmem:[%s19409_s22 + $0xa68] sm:$0xff] %v15259_v60   ;;  %15645 = vst [vmem:[%s19409_s22 + $0xa70] sm:$0xff] %v15264_v46  }
 0x4e5   : > { %15646 = vst [vmem:[%s19409_s22 + $0xa78] sm:$0xff] %v15269_v62  }
 0x4e6 PF: > { %s7_s6 = sadd.s32 1, %s16928_s6  }
 0x4e7   : > { %p4_p5 = scmp.ge.s32.totalorder %s7_s6, 6  }
 0x4e9   :  { %6 = sbr.rel (!%p4_p5) target bundleno = 1 (0x1), region = 3637 }

</bundles_post_ra>
